<compile_context>
chip_gen: v5e
topology: v5e:2x2
jax: 0.10.0
libtpu: 0.0.40
codegen_flags: <defaults>
</compile_context>

<pallas_src>
import jax
import jax.numpy as jnp
from jax import lax
from jax.experimental import pallas as pl
from jax.experimental.pallas import tpu as pltpu


BN_EPS = 0.001
C_OUT_TILE = 480  # 960 / 480 = 2 grid steps; multiple of 8 (sublane-aligned)


def fused_kernel(x_ref, w1_ref, g1_ref, b1_ref, w2_ref, g2_ref, b2_ref, o_ref):
    # ---- Stage 1: conv2d53 + batchnorm2d39 (training-mode batch stats). ----
    # Tiny (~48 MFLOP in bf16); recomputed on every grid step so the steps are
    # fully independent and the grid axis can run "parallel" (v7x megacore).
    y = jnp.dot(w1_ref[...], x_ref[...],
                preferred_element_type=jnp.float32)               # (C_mid, P) f32
    m1 = jnp.mean(y, axis=1, keepdims=True)                       # (C_mid, 1)
    v1 = jnp.maximum(jnp.mean(y * y, axis=1, keepdims=True) - m1 * m1, 0.0)
    a1 = g1_ref[...] * lax.rsqrt(v1 + BN_EPS)                     # folded BN scale
    c1 = b1_ref[...] - m1 * a1                                    # folded BN shift
    yb = (y * a1 + c1).astype(jnp.bfloat16)                       # (C_mid, P)

    # ---- Stage 2: conv2d54 + batchnorm2d40 for this tile of out channels. --
    # BN2 stats are per output channel over P, so tiles are independent.
    z = jnp.dot(w2_ref[...], yb,
                preferred_element_type=jnp.float32)               # (TILE, P) f32
    m2 = jnp.mean(z, axis=1, keepdims=True)
    v2 = jnp.maximum(jnp.mean(z * z, axis=1, keepdims=True) - m2 * m2, 0.0)
    a2 = g2_ref[...] * lax.rsqrt(v2 + BN_EPS)
    c2 = b2_ref[...] - m2 * a2
    o_ref[...] = z * a2 + c2


def fused_forward(x165, x170, w1, g1, b1, w2, g2, b2):
    """x165: (1, C_in, H, W) NCHW; x170: (1, C_in, 1, 1).
    w1: (C_mid, C_in), w2: (C_out, C_mid)  (PyTorch (Cout, Cin, 1, 1) squeezed).
    g*/b*: (C,) BatchNorm affine params.  Returns NCHW (1, C_out, H, W) f32."""
    N, C_in, H, W = x165.shape
    # The transpose-free (C, P) layout relies on N == 1 (as in the module).
    # TODO(synk): for N > 1, fall back to an NHWC (N*H*W, C) layout with a
    # per-sample broadcast of x170 (the (1, C_in) fold below is N==1 only).
    assert N == 1, "fused_forward assumes batch size 1 (as in the spec)"
    C_mid = w1.shape[0]
    C_out = w2.shape[0]
    P = N * H * W

    tile = C_OUT_TILE if C_out % C_OUT_TILE == 0 else C_out

    # NCHW with N == 1 is already channel-major: pure reshape, no transpose.
    # bf16 matmul operands (kernel accumulates and does all BN math in f32).
    x2d = x165.reshape(C_in, P).astype(jnp.bfloat16)
    # Fold x171 = x170 * x165 into the conv53 weight: (s*x)@W.T == x@(W*s).T.
    w1s = (w1 * x170.reshape(1, C_in)).astype(jnp.bfloat16)
    w2b = w2.astype(jnp.bfloat16)
    g1c = g1.reshape(C_mid, 1).astype(jnp.float32)
    b1c = b1.reshape(C_mid, 1).astype(jnp.float32)
    g2c = g2.reshape(C_out, 1).astype(jnp.float32)
    b2c = b2.reshape(C_out, 1).astype(jnp.float32)

    out2d = pl.pallas_call(
        fused_kernel,
        out_shape=jax.ShapeDtypeStruct((C_out, P), jnp.float32),
        grid_spec=pltpu.PrefetchScalarGridSpec(
            num_scalar_prefetch=0,
            grid=(C_out // tile,),
            in_specs=[
                pl.BlockSpec((C_in, P), lambda i: (0, 0)),        # x (C_in, P) bf16
                pl.BlockSpec((C_mid, C_in), lambda i: (0, 0)),    # scaled w1 bf16
                pl.BlockSpec((C_mid, 1), lambda i: (0, 0)),       # bn39 gamma
                pl.BlockSpec((C_mid, 1), lambda i: (0, 0)),       # bn39 beta
                pl.BlockSpec((tile, C_mid), lambda i: (i, 0)),    # w2 tile bf16
                pl.BlockSpec((tile, 1), lambda i: (i, 0)),        # bn40 gamma
                pl.BlockSpec((tile, 1), lambda i: (i, 0)),        # bn40 beta
            ],
            out_specs=pl.BlockSpec((tile, P), lambda i: (i, 0)),
        ),
        # No cross-step state (stage 1 is recomputed per step), so the grid
        # axis is safe to shard across TensorCores on v7x.
        compiler_params=pltpu.CompilerParams(
            dimension_semantics=("parallel",)),
    )(x2d, w1s, g1c, b1c, w2b, g2c, b2c)

    # (C_out, P) -> NCHW: pure reshape again (no transpose).
    return out2d.reshape(N, C_out, H, W)


def reference_forward(x165, x170, w1, g1, b1, w2, g2, b2):
    """Pure-JAX f32 reference mirroring the PyTorch forward (training-mode BN)."""
    # TODO(synk): BatchNorm running_mean/var buffer updates (a training-mode
    # side effect of the module) are not materialized; only x175 is produced.
    eps = BN_EPS
    N, C_in, H, W = x165.shape
    x = x170 * x165                                               # x171
    x2d = jnp.transpose(x, (0, 2, 3, 1)).reshape(-1, C_in)        # (P, C_in)
    y = x2d @ w1.T                                                # conv2d53
    m1 = y.mean(0, keepdims=True)
    v1 = ((y - m1) ** 2).mean(0, keepdims=True)
    y = (y - m1) / jnp.sqrt(v1 + eps) * g1 + b1                   # bn39
    z = y @ w2.T                                                  # conv2d54
    m2 = z.mean(0, keepdims=True)
    v2 = ((z - m2) ** 2).mean(0, keepdims=True)
    z = (z - m2) / jnp.sqrt(v2 + eps) * g2 + b2                   # bn40
    C_out = w2.shape[0]
    return jnp.transpose(z.reshape(N, H, W, C_out), (0, 3, 1, 2))


if __name__ == "__main__":
    # Shapes implied by the module: 768 -> (1x1 conv) -> 160 -> (1x1 conv) -> 960,
    # spatial 14x14, batch 1.
    N, C_in, H, W = 1, 768, 14, 14
    C_mid, C_out = 160, 960

    key = jax.random.PRNGKey(0)
    k = jax.random.split(key, 8)
    x165 = jax.random.normal(k[0], (N, C_in, H, W), jnp.float32)
    x170 = jax.random.normal(k[1], (N, C_in, 1, 1), jnp.float32)

    # Conv weights in PyTorch (Cout, Cin) layout; BN params as 1-D vectors.
    w1 = jax.random.normal(k[2], (C_mid, C_in), jnp.float32) * 0.02
    w2 = jax.random.normal(k[3], (C_out, C_mid), jnp.float32) * 0.02
    g1 = jax.random.normal(k[4], (C_mid,), jnp.float32) * 0.1 + 1.0
    b1 = jax.random.normal(k[5], (C_mid,), jnp.float32) * 0.1
    g2 = jax.random.normal(k[6], (C_out,), jnp.float32) * 0.1 + 1.0
    b2 = jax.random.normal(k[7], (C_out,), jnp.float32) * 0.1

    out = fused_forward(x165, x170, w1, g1, b1, w2, g2, b2)
    out = jax.block_until_ready(out)

    ref = reference_forward(x165, x170, w1, g1, b1, w2, g2, b2)
    assert out.shape == (N, C_out, H, W), out.shape
    # bf16 matmul operands (f32 accumulation / BN math) against an all-f32
    # reference: tolerance set for bf16's ~2^-9 operand rounding amplified by
    # the two BatchNorm normalizations.
    max_err = float(jnp.max(jnp.abs(out - ref)))
    assert jnp.allclose(out, ref, atol=6e-2, rtol=6e-2), max_err

    print("KERNEL_OK")
</pallas_src>

<mosaic_0001>
module attributes {stable_mosaic.version = 11 : i64} {
  func.func @fused_kernel(%arg0: i32, %arg1: memref<768x196xbf16, #tpu.memory_space<vmem>>, %arg2: memref<160x768xbf16, #tpu.memory_space<vmem>>, %arg3: memref<160x1xf32, #tpu.memory_space<vmem>>, %arg4: memref<160x1xf32, #tpu.memory_space<vmem>>, %arg5: memref<480x160xbf16, #tpu.memory_space<vmem>>, %arg6: memref<480x1xf32, #tpu.memory_space<vmem>>, %arg7: memref<480x1xf32, #tpu.memory_space<vmem>>, %arg8: memref<480x196xf32, #tpu.memory_space<vmem>>) attributes {dimension_semantics = [#tpu.dimension_semantics<parallel>], iteration_bounds = array<i64: 2>, scalar_prefetch = 0 : i64, scratch_operands = 0 : i64, tpu.core_type = #tpu.core_type<tc>, window_params = [{pipeline_mode = #tpu.pipeline_mode<synchronous>, transform_indices = @transform_0, window_bounds = array<i64: 768, 196>}, {pipeline_mode = #tpu.pipeline_mode<synchronous>, transform_indices = @transform_1, window_bounds = array<i64: 160, 768>}, {pipeline_mode = #tpu.pipeline_mode<synchronous>, transform_indices = @transform_2, window_bounds = array<i64: 160, 1>}, {pipeline_mode = #tpu.pipeline_mode<synchronous>, transform_indices = @transform_3, window_bounds = array<i64: 160, 1>}, {transform_indices = @transform_4, window_bounds = array<i64: 480, 160>}, {transform_indices = @transform_5, window_bounds = array<i64: 480, 1>}, {transform_indices = @transform_6, window_bounds = array<i64: 480, 1>}, {transform_indices = @transform_7, window_bounds = array<i64: 480, 196>}]} {
    %c0 = arith.constant 0 : index
    %c0_0 = arith.constant 0 : index
    %0 = vector.load %arg2[%c0, %c0_0] : memref<160x768xbf16, #tpu.memory_space<vmem>>, vector<160x768xbf16>
    %c0_1 = arith.constant 0 : index
    %c0_2 = arith.constant 0 : index
    %1 = vector.load %arg1[%c0_1, %c0_2] : memref<768x196xbf16, #tpu.memory_space<vmem>>, vector<768x196xbf16>
    %cst = arith.constant dense<0.000000e+00> : vector<160x196xf32>
    %2 = tpu.matmul %0, %1, %cst {dimension_numbers = #tpu.dot_dimension_numbers<[1], [0], [0], [1], [0, 0, 1, 1], [], []>} : vector<160x768xbf16>, vector<768x196xbf16>, vector<160x196xf32> -> vector<160x196xf32>
    %cst_3 = arith.constant dense<0.000000e+00> : vector<160xf32>
    %3 = vector.multi_reduction <add>, %2, %cst_3 [1] : vector<160x196xf32> to vector<160xf32>
    %4 = vector.shape_cast %3 : vector<160xf32> to vector<160x1xf32>
    %cst_4 = arith.constant 1.960000e+02 : f32
    %5 = vector.broadcast %cst_4 : f32 to vector<160x1xf32>
    %6 = arith.divf %4, %5 : vector<160x1xf32>
    %7 = arith.mulf %2, %2 : vector<160x196xf32>
    %cst_5 = arith.constant dense<0.000000e+00> : vector<160xf32>
    %8 = vector.multi_reduction <add>, %7, %cst_5 [1] : vector<160x196xf32> to vector<160xf32>
    %9 = vector.shape_cast %8 : vector<160xf32> to vector<160x1xf32>
    %cst_6 = arith.constant 1.960000e+02 : f32
    %10 = vector.broadcast %cst_6 : f32 to vector<160x1xf32>
    %11 = arith.divf %9, %10 : vector<160x1xf32>
    %12 = arith.mulf %6, %6 : vector<160x1xf32>
    %13 = arith.subf %11, %12 : vector<160x1xf32>
    %cst_7 = arith.constant 0.000000e+00 : f32
    %14 = vector.broadcast %cst_7 : f32 to vector<160x1xf32>
    %15 = arith.maximumf %13, %14 : vector<160x1xf32>
    %c0_8 = arith.constant 0 : index
    %c0_9 = arith.constant 0 : index
    %16 = vector.load %arg3[%c0_8, %c0_9] : memref<160x1xf32, #tpu.memory_space<vmem>>, vector<160x1xf32>
    %cst_10 = arith.constant 1.000000e-03 : f32
    %17 = vector.broadcast %cst_10 : f32 to vector<160x1xf32>
    %18 = arith.addf %15, %17 : vector<160x1xf32>
    %19 = math.rsqrt %18 : vector<160x1xf32>
    %20 = arith.mulf %16, %19 : vector<160x1xf32>
    %c0_11 = arith.constant 0 : index
    %c0_12 = arith.constant 0 : index
    %21 = vector.load %arg4[%c0_11, %c0_12] : memref<160x1xf32, #tpu.memory_space<vmem>>, vector<160x1xf32>
    %22 = arith.mulf %6, %20 : vector<160x1xf32>
    %23 = arith.subf %21, %22 : vector<160x1xf32>
    %24 = vector.broadcast %20 : vector<160x1xf32> to vector<160x196xf32>
    %25 = arith.mulf %2, %24 : vector<160x196xf32>
    %26 = vector.broadcast %23 : vector<160x1xf32> to vector<160x196xf32>
    %27 = arith.addf %25, %26 : vector<160x196xf32>
    %28 = arith.truncf %27 : vector<160x196xf32> to vector<160x196xbf16>
    %c0_13 = arith.constant 0 : index
    %c0_14 = arith.constant 0 : index
    %29 = vector.load %arg5[%c0_13, %c0_14] : memref<480x160xbf16, #tpu.memory_space<vmem>>, vector<480x160xbf16>
    %cst_15 = arith.constant dense<0.000000e+00> : vector<480x196xf32>
    %30 = tpu.matmul %29, %28, %cst_15 {dimension_numbers = #tpu.dot_dimension_numbers<[1], [0], [0], [1], [0, 0, 1, 1], [], []>} : vector<480x160xbf16>, vector<160x196xbf16>, vector<480x196xf32> -> vector<480x196xf32>
    %cst_16 = arith.constant dense<0.000000e+00> : vector<480xf32>
    %31 = vector.multi_reduction <add>, %30, %cst_16 [1] : vector<480x196xf32> to vector<480xf32>
    %32 = vector.shape_cast %31 : vector<480xf32> to vector<480x1xf32>
    %cst_17 = arith.constant 1.960000e+02 : f32
    %33 = vector.broadcast %cst_17 : f32 to vector<480x1xf32>
    %34 = arith.divf %32, %33 : vector<480x1xf32>
    %35 = arith.mulf %30, %30 : vector<480x196xf32>
    %cst_18 = arith.constant dense<0.000000e+00> : vector<480xf32>
    %36 = vector.multi_reduction <add>, %35, %cst_18 [1] : vector<480x196xf32> to vector<480xf32>
    %37 = vector.shape_cast %36 : vector<480xf32> to vector<480x1xf32>
    %cst_19 = arith.constant 1.960000e+02 : f32
    %38 = vector.broadcast %cst_19 : f32 to vector<480x1xf32>
    %39 = arith.divf %37, %38 : vector<480x1xf32>
    %40 = arith.mulf %34, %34 : vector<480x1xf32>
    %41 = arith.subf %39, %40 : vector<480x1xf32>
    %cst_20 = arith.constant 0.000000e+00 : f32
    %42 = vector.broadcast %cst_20 : f32 to vector<480x1xf32>
    %43 = arith.maximumf %41, %42 : vector<480x1xf32>
    %c0_21 = arith.constant 0 : index
    %c0_22 = arith.constant 0 : index
    %44 = vector.load %arg6[%c0_21, %c0_22] : memref<480x1xf32, #tpu.memory_space<vmem>>, vector<480x1xf32>
    %cst_23 = arith.constant 1.000000e-03 : f32
    %45 = vector.broadcast %cst_23 : f32 to vector<480x1xf32>
    %46 = arith.addf %43, %45 : vector<480x1xf32>
    %47 = math.rsqrt %46 : vector<480x1xf32>
    %48 = arith.mulf %44, %47 : vector<480x1xf32>
    %c0_24 = arith.constant 0 : index
    %c0_25 = arith.constant 0 : index
    %49 = vector.load %arg7[%c0_24, %c0_25] : memref<480x1xf32, #tpu.memory_space<vmem>>, vector<480x1xf32>
    %50 = arith.mulf %34, %48 : vector<480x1xf32>
    %51 = arith.subf %49, %50 : vector<480x1xf32>
    %52 = vector.broadcast %48 : vector<480x1xf32> to vector<480x196xf32>
    %53 = arith.mulf %30, %52 : vector<480x196xf32>
    %54 = vector.broadcast %51 : vector<480x1xf32> to vector<480x196xf32>
    %55 = arith.addf %53, %54 : vector<480x196xf32>
    %c0_26 = arith.constant 0 : index
    %c0_27 = arith.constant 0 : index
    %56 = vector.load %arg8[%c0_26, %c0_27] : memref<480x196xf32, #tpu.memory_space<vmem>>, vector<480x196xf32>
    tpu.vector_store %arg8[%c0_26, %c0_27], %55 {strides = array<i32>} : memref<480x196xf32, #tpu.memory_space<vmem>>, vector<480x196xf32>,
    return
  }
  func.func @transform_0(%arg0: i32) -> (i32, i32) {
    %c0_i32 = arith.constant 0 : i32
    %c0_i32_0 = arith.constant 0 : i32
    %c0_i32_1 = arith.constant 0 : i32
    return %c0_i32, %c0_i32_0 : i32, i32
  }
  func.func @transform_1(%arg0: i32) -> (i32, i32) {
    %c0_i32 = arith.constant 0 : i32
    %c0_i32_0 = arith.constant 0 : i32
    %c0_i32_1 = arith.constant 0 : i32
    return %c0_i32, %c0_i32_0 : i32, i32
  }
  func.func @transform_2(%arg0: i32) -> (i32, i32) {
    %c0_i32 = arith.constant 0 : i32
    %c0_i32_0 = arith.constant 0 : i32
    %c0_i32_1 = arith.constant 0 : i32
    return %c0_i32, %c0_i32_0 : i32, i32
  }
  func.func @transform_3(%arg0: i32) -> (i32, i32) {
    %c0_i32 = arith.constant 0 : i32
    %c0_i32_0 = arith.constant 0 : i32
    %c0_i32_1 = arith.constant 0 : i32
    return %c0_i32, %c0_i32_0 : i32, i32
  }
  func.func @transform_4(%arg0: i32) -> (i32, i32) {
    %c0_i32 = arith.constant 0 : i32
    %c0_i32_0 = arith.constant 0 : i32
    return %arg0, %c0_i32 : i32, i32
  }
  func.func @transform_5(%arg0: i32) -> (i32, i32) {
    %c0_i32 = arith.constant 0 : i32
    %c0_i32_0 = arith.constant 0 : i32
    return %arg0, %c0_i32 : i32, i32
  }
  func.func @transform_6(%arg0: i32) -> (i32, i32) {
    %c0_i32 = arith.constant 0 : i32
    %c0_i32_0 = arith.constant 0 : i32
    return %arg0, %c0_i32 : i32, i32
  }
  func.func @transform_7(%arg0: i32) -> (i32, i32) {
    %c0_i32 = arith.constant 0 : i32
    %c0_i32_0 = arith.constant 0 : i32
    return %arg0, %c0_i32 : i32, i32
  }
}

</mosaic_0001>

<bundles_post_ra>
// kernel: tpu_custom_call.1
= control target key start
LH: loop header
LB: loop body
LE: loop exit
PB: predicated region body
PF: predicated region fallthrough
CT: control target
= control target key end

     0   :  { %s8243_s24 = smov 0   ;;  %s12743_s0 = inlined_call_operand.vmem [shape: bf16[768,196], index: 0, kind: input, shape index: {}]   ;;  %s12744_s1 = inlined_call_operand.vmem [shape: bf16[160,768], index: 1, kind: input, shape index: {}]   ;;  %s12745_s2 = inlined_call_operand.vmem [shape: f32[160,1], index: 2, kind: input, shape index: {}]   ;;  %s12746_s3 = inlined_call_operand.vmem [shape: f32[160,1], index: 3, kind: input, shape index: {}]   ;;  %s12747_s4 = inlined_call_operand.vmem [shape: bf16[960,160], index: 4, kind: input, shape index: {}]   ;;  %s12748_s5 = inlined_call_operand.vmem [shape: f32[960,1], index: 5, kind: input, shape index: {}]   ;;  %s12749_s6 = inlined_call_operand.vmem [shape: f32[960,1], index: 6, kind: input, shape index: {}]   ;;  %s12750_s7 = inlined_call_operand.vmem [shape: f32[960,196], index: 7, kind: output, shape index: {}]  }
   0x1 LB: > { %s6863_s25 = sadd.s32 4294967295, %s8199_s24   ;;  %p6867_p0 = scmp.ge.s32.totalorder %s8199_s24, 1  ;;  %s8199_s24 = sphi %s8243_s24, %s17_s24  }
   0x2   : > { %p261_p1 = scmp.lt.s32.totalorder %s8199_s24, 3 }
   0x4   : > { %p262_p2 = pnand %p6867_p0, %p261_p1 }
   0x6   : > { %265 = sbr.rel (%p262_p2) target bundleno = 2673 (0xa71), region = 48 }
   0xb   : > { %v7172_v0 = vld [vmem:[%s12743_s0 + $0x70] sm:$0xf]  ;;  %v7877_v1 = vld [vmem:[%s12743_s0 + $0x74] sm:$0xf0]  ;;  %v7164_v11 = vld [vmem:[%s12743_s0 + $0x60] sm:$0xf] }
   0xc   : > { %v7236_v2 = vld [vmem:[%s12743_s0 + $0xf0] sm:$0xf]  ;;  %v7173_v3 = vor.u32 %v7877_v1, %v7172_v0  ;;  %v7893_v4 = vld [vmem:[%s12743_s0 + $0xf4] sm:$0xf0]  ;;  %v7875_v13 = vld [vmem:[%s12743_s0 + $0x64] sm:$0xf0] }
   0xd   : > { %v7300_v5 = vld [vmem:[%s12743_s0 + $0x170] sm:$0xf]  ;;  %v7909_v6 = vld [vmem:[%s12743_s0 + $0x174] sm:$0xf0]  ;;  %v7237_v7 = vor.u32 %v7893_v4, %v7236_v2  ;;  %v7228_v14 = vld [vmem:[%s12743_s0 + $0xe0] sm:$0xf]  ;;  %v7165_v16 = vor.u32 %v7875_v13, %v7164_v11 }
   0xe   : > { %v7301_v8 = vor.u32 %v7909_v6, %v7300_v5  ;;  %v7364_v9 = vld [vmem:[%s12743_s0 + $0x1f0] sm:$0xf]  ;;  %v7925_v10 = vld [vmem:[%s12743_s0 + $0x1f4] sm:$0xf0]  ;;  %1268 = vmatpush.bf16.msra.mxu0 %v7173_v3  ;;  %v7891_v15 = vld [vmem:[%s12743_s0 + $0xe4] sm:$0xf0] }
   0xf   : > { %v7365_v12 = vor.u32 %v7925_v10, %v7364_v9  ;;  %1327 = vmatpush.bf16.msra.mxu1 %v7237_v7  ;;  %v7229_v17 = vor.u32 %v7891_v15, %v7228_v14  ;;  %v7292_v18 = vld [vmem:[%s12743_s0 + $0x160] sm:$0xf]  ;;  %v7907_v19 = vld [vmem:[%s12743_s0 + $0x164] sm:$0xf0]  ;;  %v7156_v23 = vld [vmem:[%s12743_s0 + $0x50] sm:$0xf] }
  0x10   : > { %1386 = vmatpush.bf16.msra.mxu2 %v7301_v8  ;;  %v7356_v20 = vld [vmem:[%s12743_s0 + $0x1e0] sm:$0xf]  ;;  %v7293_v21 = vor.u32 %v7907_v19, %v7292_v18  ;;  %v7923_v22 = vld [vmem:[%s12743_s0 + $0x1e4] sm:$0xf0]  ;;  %v7873_v24 = vld [vmem:[%s12743_s0 + $0x54] sm:$0xf0] }
  0x11   : > { %1445 = vmatpush.bf16.msra.mxu3 %v7365_v12  ;;  %v7357_v25 = vor.u32 %v7923_v22, %v7356_v20  ;;  %v7220_v26 = vld [vmem:[%s12743_s0 + $0xd0] sm:$0xf]  ;;  %v7889_v27 = vld [vmem:[%s12743_s0 + $0xd4] sm:$0xf0]  ;;  %v7157_v29 = vor.u32 %v7873_v24, %v7156_v23  ;;  %v7148_v35 = vld [vmem:[%s12743_s0 + $0x40] sm:$0xf] }
  0x12   : > { %v7284_v28 = vld [vmem:[%s12743_s0 + $0x150] sm:$0xf]  ;;  %1269 = vmatpush.bf16.msra.mxu0 %v7165_v16  ;;  %v7905_v30 = vld [vmem:[%s12743_s0 + $0x154] sm:$0xf0]  ;;  %v7221_v33 = vor.u32 %v7889_v27, %v7220_v26  ;;  %v7871_v36 = vld [vmem:[%s12743_s0 + $0x44] sm:$0xf0] }
  0x13   : > { %v7348_v31 = vld [vmem:[%s12743_s0 + $0x1d0] sm:$0xf]  ;;  %v7921_v32 = vld [vmem:[%s12743_s0 + $0x1d4] sm:$0xf0]  ;;  %1328 = vmatpush.bf16.msra.mxu1 %v7229_v17  ;;  %v7285_v34 = vor.u32 %v7905_v30, %v7284_v28  ;;  %v7212_v37 = vld [vmem:[%s12743_s0 + $0xc0] sm:$0xf]  ;;  %v7149_v44 = vor.u32 %v7871_v36, %v7148_v35 }
  0x14   : > { %1387 = vmatpush.bf16.msra.mxu2 %v7293_v21  ;;  %v7349_v38 = vor.u32 %v7921_v32, %v7348_v31  ;;  %v7887_v39 = vld [vmem:[%s12743_s0 + $0xc4] sm:$0xf0]  ;;  %v7276_v40 = vld [vmem:[%s12743_s0 + $0x140] sm:$0xf]  ;;  %v7140_v47 = vld [vmem:[%s12743_s0 + $0x30] sm:$0xf] }
  0x15   : > { %1446 = vmatpush.bf16.msra.mxu3 %v7357_v25  ;;  %v7903_v41 = vld [vmem:[%s12743_s0 + $0x144] sm:$0xf0]  ;;  %v7340_v42 = vld [vmem:[%s12743_s0 + $0x1c0] sm:$0xf]  ;;  %v7213_v45 = vor.u32 %v7887_v39, %v7212_v37  ;;  %v7869_v48 = vld [vmem:[%s12743_s0 + $0x34] sm:$0xf0] }
  0x16   : > { %v7919_v43 = vld [vmem:[%s12743_s0 + $0x1c4] sm:$0xf0]  ;;  %1270 = vmatpush.bf16.msra.mxu0 %v7157_v29  ;;  %v7277_v46 = vor.u32 %v7903_v41, %v7276_v40  ;;  %v7204_v49 = vld [vmem:[%s12743_s0 + $0xb0] sm:$0xf]  ;;  %v7885_v51 = vld [vmem:[%s12743_s0 + $0xb4] sm:$0xf0]  ;;  %v7141_v56 = vor.u32 %v7869_v48, %v7140_v47 }
  0x17   : > { %1329 = vmatpush.bf16.msra.mxu1 %v7221_v33  ;;  %v7341_v50 = vor.u32 %v7919_v43, %v7340_v42  ;;  %v7268_v52 = vld [vmem:[%s12743_s0 + $0x130] sm:$0xf]  ;;  %v7901_v53 = vld [vmem:[%s12743_s0 + $0x134] sm:$0xf0]  ;;  %v7205_v57 = vor.u32 %v7885_v51, %v7204_v49  ;;  %v7132_v59 = vld [vmem:[%s12743_s0 + $0x20] sm:$0xf] }
  0x18   : > { %1388 = vmatpush.bf16.msra.mxu2 %v7285_v34  ;;  %v7332_v54 = vld [vmem:[%s12743_s0 + $0x1b0] sm:$0xf]  ;;  %v7917_v55 = vld [vmem:[%s12743_s0 + $0x1b4] sm:$0xf0]  ;;  %v7269_v58 = vor.u32 %v7901_v53, %v7268_v52  ;;  %v7867_v60 = vld [vmem:[%s12743_s0 + $0x24] sm:$0xf0] }
  0x19   : > { %1447 = vmatpush.bf16.msra.mxu3 %v7349_v38  ;;  %v7196_v61 = vld [vmem:[%s12743_s0 + $0xa0] sm:$0xf]  ;;  %v7333_v62 = vor.u32 %v7917_v55, %v7332_v54  ;;  %v7883_v63 = vld [vmem:[%s12743_s0 + $0xa4] sm:$0xf0]  ;;  %v7133_v4 = vor.u32 %v7867_v60, %v7132_v59  ;;  %v7124_v7 = vld [vmem:[%s12743_s0 + $0x10] sm:$0xf] }
  0x1a   : > { %1271 = vmatpush.bf16.msra.mxu0 %v7149_v44  ;;  %v7260_v0 = vld [vmem:[%s12743_s0 + $0x120] sm:$0xf]  ;;  %v7899_v1 = vld [vmem:[%s12743_s0 + $0x124] sm:$0xf0]  ;;  %v7197_v5 = vor.u32 %v7883_v63, %v7196_v61  ;;  %v7865_v8 = vld [vmem:[%s12743_s0 + $0x14] sm:$0xf0] }
  0x1b   : > { %1330 = vmatpush.bf16.msra.mxu1 %v7213_v45  ;;  %v7324_v2 = vld [vmem:[%s12743_s0 + $0x1a0] sm:$0xf]  ;;  %v7915_v3 = vld [vmem:[%s12743_s0 + $0x1a4] sm:$0xf0]  ;;  %v7261_v6 = vor.u32 %v7899_v1, %v7260_v0  ;;  %v7188_v9 = vld [vmem:[%s12743_s0 + $0x90] sm:$0xf]  ;;  %v7125_v16 = vor.u32 %v7865_v8, %v7124_v7 }
  0x1c   : > { %1389 = vmatpush.bf16.msra.mxu2 %v7277_v46  ;;  %v7325_v10 = vor.u32 %v7915_v3, %v7324_v2  ;;  %v7881_v11 = vld [vmem:[%s12743_s0 + $0x94] sm:$0xf0]  ;;  %v7252_v12 = vld [vmem:[%s12743_s0 + $0x110] sm:$0xf]  ;;  %v7116_v19 = vld [vmem:[%s12743_s0] sm:$0xf] }
  0x1d   : > { %1448 = vmatpush.bf16.msra.mxu3 %v7341_v50  ;;  %v7897_v13 = vld [vmem:[%s12743_s0 + $0x114] sm:$0xf0]  ;;  %v7316_v14 = vld [vmem:[%s12743_s0 + $0x190] sm:$0xf]  ;;  %v7189_v17 = vor.u32 %v7881_v11, %v7188_v9  ;;  %v7863_v20 = vld [vmem:[%s12743_s0 + $0x4] sm:$0xf0] }
  0x1e   : > { %1272 = vmatpush.bf16.msra.mxu0 %v7141_v56  ;;  %v7913_v15 = vld [vmem:[%s12743_s0 + $0x194] sm:$0xf0]  ;;  %v7253_v18 = vor.u32 %v7897_v13, %v7252_v12  ;;  %v7180_v21 = vld [vmem:[%s12743_s0 + $0x80] sm:$0xf]  ;;  %v7879_v23 = vld [vmem:[%s12743_s0 + $0x84] sm:$0xf0]  ;;  %v7117_v28 = vor.u32 %v7863_v20, %v7116_v19 }
  0x1f   : > { %1331 = vmatpush.bf16.msra.mxu1 %v7205_v57  ;;  %v7317_v22 = vor.u32 %v7913_v15, %v7316_v14  ;;  %v7244_v24 = vld [vmem:[%s12743_s0 + $0x100] sm:$0xf]  ;;  %v7895_v25 = vld [vmem:[%s12743_s0 + $0x104] sm:$0xf0]  ;;  %v7805_v30 = vld [vmem:[%s12744_s1 + $0x14] sm:$0xf0]  ;;  %v7181_v32 = vor.u32 %v7879_v23, %v7180_v21 }
  0x20   : > { %1390 = vmatpush.bf16.msra.mxu2 %v7269_v58  ;;  %v7308_v26 = vld [vmem:[%s12743_s0 + $0x180] sm:$0xf]  ;;  %v7911_v27 = vld [vmem:[%s12743_s0 + $0x184] sm:$0xf0]  ;;  %v7802_v31 = vld [vmem:[%s12744_s1 + $0x4] sm:$0xf]  ;;  %v7245_v33 = vor.u32 %v7895_v25, %v7244_v24 }
  0x21   : > { %1449 = vmatpush.bf16.msra.mxu3 %v7333_v62  ;;  %v6876_v29 = vld [vmem:[%s12744_s1] sm:$0xf]  ;;  %v6878_v34 = vld [vmem:[%s12744_s1 + $0x18] sm:$0xf0]  ;;  %v6884_v35 = vld [vmem:[%s12744_s1 + $0x8] sm:$0xf]  ;;  %v7309_v37 = vor.u32 %v7911_v27, %v7308_v26 }
  0x22   : > { %1273 = vmatpush.bf16.msra.mxu0 %v7133_v4  ;;  %v7806_v36 = vld [vmem:[%s12744_s1 + $0x1c] sm:$0xf0]  ;;  %v7803_v38 = vld [vmem:[%s12744_s1 + $0xc] sm:$0xf]  ;;  %v6886_v39 = vld [vmem:[%s12744_s1 + $0x20] sm:$0xf0]  ;;  %v8467_v40 = vor.u32 %v7805_v30, %v6876_v29  ;;  %v8469_v41 = vor.u32 %v7802_v31, %v6878_v34 }
  0x23   : > { %1332 = vmatpush.bf16.msra.mxu1 %v7197_v5  ;;  %v8471_v42 = vor.u32 %v7806_v36, %v6884_v35  ;;  %v8473_v43 = vor.u32 %v7803_v38, %v6886_v39  ;;  %v6900_v44 = vld [vmem:[%s12744_s1 + $0x30] sm:$0xf]  ;;  %v7811_v45 = vld [vmem:[%s12744_s1 + $0x44] sm:$0xf0]  ;;  %v7808_v46 = vld [vmem:[%s12744_s1 + $0x34] sm:$0xf] }
  0x24   : > { %1391 = vmatpush.bf16.msra.mxu2 %v7261_v6  ;;  %v6902_v47 = vld [vmem:[%s12744_s1 + $0x48] sm:$0xf0]  ;;  %v6908_v48 = vld [vmem:[%s12744_s1 + $0x38] sm:$0xf]  ;;  %v7812_v49 = vld [vmem:[%s12744_s1 + $0x4c] sm:$0xf0]  ;;  %v8503_v52 = vor.u32 %v7811_v45, %v6900_v44 }
  0x25   : > { %1450 = vmatpush.bf16.msra.mxu3 %v7325_v10  ;;  %v7809_v50 = vld [vmem:[%s12744_s1 + $0x3c] sm:$0xf]  ;;  %v6910_v51 = vld [vmem:[%s12744_s1 + $0x50] sm:$0xf0]  ;;  %v8505_v53 = vor.u32 %v7808_v46, %v6902_v47  ;;  %v8507_v54 = vor.u32 %v7812_v49, %v6908_v48  ;;  %v6924_v56 = vld [vmem:[%s12744_s1 + $0x60] sm:$0xf] }
  0x26   : > { %1274 = vmatpush.bf16.msra.mxu0 %v7125_v16  ;;  %v8509_v55 = vor.u32 %v7809_v50, %v6910_v51  ;;  %v7817_v57 = vld [vmem:[%s12744_s1 + $0x74] sm:$0xf0]  ;;  %v7814_v58 = vld [vmem:[%s12744_s1 + $0x64] sm:$0xf]  ;;  %v6926_v59 = vld [vmem:[%s12744_s1 + $0x78] sm:$0xf0] }
  0x27   : > { %1333 = vmatpush.bf16.msra.mxu1 %v7189_v17  ;;  %v6932_v60 = vld [vmem:[%s12744_s1 + $0x68] sm:$0xf]  ;;  %v7818_v61 = vld [vmem:[%s12744_s1 + $0x7c] sm:$0xf0]  ;;  %v7815_v62 = vld [vmem:[%s12744_s1 + $0x6c] sm:$0xf]  ;;  %v8539_v0 = vor.u32 %v7817_v57, %v6924_v56  ;;  %v8541_v1 = vor.u32 %v7814_v58, %v6926_v59 }
  0x28   : > { %1392 = vmatpush.bf16.msra.mxu2 %v7253_v18  ;;  %v6934_v63 = vld [vmem:[%s12744_s1 + $0x80] sm:$0xf0]  ;;  %v8543_v2 = vor.u32 %v7818_v61, %v6932_v60  ;;  %v6948_v4 = vld [vmem:[%s12744_s1 + $0x90] sm:$0xf]  ;;  %v7823_v5 = vld [vmem:[%s12744_s1 + $0xa4] sm:$0xf0] }
  0x29   : > { %1451 = vmatpush.bf16.msra.mxu3 %v7317_v22  ;;  %v8545_v3 = vor.u32 %v7815_v62, %v6934_v63  ;;  %v7820_v6 = vld [vmem:[%s12744_s1 + $0x94] sm:$0xf]  ;;  %v6950_v7 = vld [vmem:[%s12744_s1 + $0xa8] sm:$0xf0]  ;;  %v6956_v8 = vld [vmem:[%s12744_s1 + $0x98] sm:$0xf]  ;;  %v8575_v12 = vor.u32 %v7823_v5, %v6948_v4 }
  0x2a   : > { %1275 = vmatpush.bf16.msra.mxu0 %v7117_v28  ;;  %v7824_v9 = vld [vmem:[%s12744_s1 + $0xac] sm:$0xf0]  ;;  %v7821_v10 = vld [vmem:[%s12744_s1 + $0x9c] sm:$0xf]  ;;  %v6958_v11 = vld [vmem:[%s12744_s1 + $0xb0] sm:$0xf0]  ;;  %v8577_v13 = vor.u32 %v7820_v6, %v6950_v7 }
  0x2b   : > { %1334 = vmatpush.bf16.msra.mxu1 %v7181_v32  ;;  %v8579_v14 = vor.u32 %v7824_v9, %v6956_v8  ;;  %v8581_v15 = vor.u32 %v7821_v10, %v6958_v11  ;;  %v6972_v16 = vld [vmem:[%s12744_s1 + $0xc0] sm:$0xf]  ;;  %v7829_v17 = vld [vmem:[%s12744_s1 + $0xd4] sm:$0xf0]  ;;  %v7826_v18 = vld [vmem:[%s12744_s1 + $0xc4] sm:$0xf] }
  0x2c   : > { %1393 = vmatpush.bf16.msra.mxu2 %v7245_v33  ;;  %v6974_v19 = vld [vmem:[%s12744_s1 + $0xd8] sm:$0xf0]  ;;  %v6980_v20 = vld [vmem:[%s12744_s1 + $0xc8] sm:$0xf]  ;;  %v7830_v21 = vld [vmem:[%s12744_s1 + $0xdc] sm:$0xf0]  ;;  %v8611_v24 = vor.u32 %v7829_v17, %v6972_v16 }
  0x2d   : > { %1452 = vmatpush.bf16.msra.mxu3 %v7309_v37  ;;  %1276 = vmatmul.bf16.vlgmr.msra.gmra.mxu0 %v8467_v40  ;;  %v7827_v22 = vld [vmem:[%s12744_s1 + $0xcc] sm:$0xf]  ;;  %v6982_v23 = vld [vmem:[%s12744_s1 + $0xe0] sm:$0xf0]  ;;  %v8613_v25 = vor.u32 %v7826_v18, %v6974_v19  ;;  %v8615_v26 = vor.u32 %v7830_v21, %v6980_v20  ;;  %v6996_v28 = vld [vmem:[%s12744_s1 + $0xf0] sm:$0xf] }
  0x2e   : > { %1335 = vmatmul.bf16.vlgmr.msra.gmra.mxu1 %v8469_v41  ;;  %v8617_v27 = vor.u32 %v7827_v22, %v6982_v23  ;;  %v7835_v29 = vld [vmem:[%s12744_s1 + $0x104] sm:$0xf0]  ;;  %v7832_v30 = vld [vmem:[%s12744_s1 + $0xf4] sm:$0xf]  ;;  %v6998_v31 = vld [vmem:[%s12744_s1 + $0x108] sm:$0xf0] }
  0x2f   : > { %1394 = vmatmul.bf16.vlgmr.msra.gmra.mxu2 %v8471_v42  ;;  %v7004_v32 = vld [vmem:[%s12744_s1 + $0xf8] sm:$0xf]  ;;  %v7836_v33 = vld [vmem:[%s12744_s1 + $0x10c] sm:$0xf0]  ;;  %v7833_v34 = vld [vmem:[%s12744_s1 + $0xfc] sm:$0xf]  ;;  %v8647_v36 = vor.u32 %v7835_v29, %v6996_v28  ;;  %v8649_v37 = vor.u32 %v7832_v30, %v6998_v31 }
  0x30   : > { %1453 = vmatmul.bf16.vlgmr.msra.gmra.mxu3 %v8473_v43  ;;  %v7006_v35 = vld [vmem:[%s12744_s1 + $0x110] sm:$0xf0]  ;;  %v8651_v38 = vor.u32 %v7836_v33, %v7004_v32  ;;  %v7020_v44 = vld [vmem:[%s12744_s1 + $0x120] sm:$0xf]  ;;  %v7841_v45 = vld [vmem:[%s12744_s1 + $0x134] sm:$0xf0] }
  0x31   : > { %v8653_v39 = vor.u32 %v7833_v34, %v7006_v35  ;;  %v7838_v46 = vld [vmem:[%s12744_s1 + $0x124] sm:$0xf]  ;;  %v7022_v47 = vld [vmem:[%s12744_s1 + $0x138] sm:$0xf0]  ;;  %v7028_v48 = vld [vmem:[%s12744_s1 + $0x128] sm:$0xf]  ;;  %v8683_v56 = vor.u32 %v7841_v45, %v7020_v44 }
  0x32   : > { %v7842_v49 = vld [vmem:[%s12744_s1 + $0x13c] sm:$0xf0]  ;;  %v7839_v50 = vld [vmem:[%s12744_s1 + $0x12c] sm:$0xf]  ;;  %v7030_v51 = vld [vmem:[%s12744_s1 + $0x140] sm:$0xf0]  ;;  %v8685_v57 = vor.u32 %v7838_v46, %v7022_v47 }
  0x33   : > { %v8687_v58 = vor.u32 %v7842_v49, %v7028_v48  ;;  %v8689_v59 = vor.u32 %v7839_v50, %v7030_v51  ;;  %v7428_v60 = vld [vmem:[%s12743_s0 + $0x270] sm:$0xf]  ;;  %v7941_v61 = vld [vmem:[%s12743_s0 + $0x274] sm:$0xf0]  ;;  %v7876_v6 = vld [vmem:[%s12743_s0 + $0x74] sm:$0xf] }
  0x34   : > { %v7492_v62 = vld [vmem:[%s12743_s0 + $0x2f0] sm:$0xf]  ;;  %v7957_v63 = vld [vmem:[%s12743_s0 + $0x2f4] sm:$0xf0]  ;;  %v7429_v4 = vor.u32 %v7941_v61, %v7428_v60  ;;  %v7174_v7 = vld [vmem:[%s12743_s0 + $0x78] sm:$0xf0] }
  0x35   : > { %12858 = vst [vmem:[#allocation2_spill] sm:$0xff] %v8687_v58  ;;  %v7493_v5 = vor.u32 %v7957_v63, %v7492_v62  ;;  %v7892_v8 = vld [vmem:[%s12743_s0 + $0xf4] sm:$0xf]  ;;  %v7177_v9 = vor.u32 %v7876_v6, %v7174_v7  ;;  %v7238_v10 = vld [vmem:[%s12743_s0 + $0xf8] sm:$0xf0]  ;;  %vm1976_vm0 = vcmask 556032  }
  0x36   : > { %12859 = vst [vmem:[#allocation3_spill] sm:$0xff] %v8689_v59  ;;  %v7420_v11 = vld [vmem:[%s12743_s0 + $0x260] sm:$0xf]  ;;  %v7939_v16 = vld [vmem:[%s12743_s0 + $0x264] sm:$0xf0]  ;;  %1504 = vmatpush.bf16.msrb.mxu0 %v7429_v4  ;;  %v7241_v17 = vor.u32 %v7892_v8, %v7238_v10  ;;  %s305_s14 = smul.u32 60, %s6863_s25 }
  0x37   : > { %1563 = vmatpush.bf16.msrb.mxu1 %v7493_v5  ;;  %v7421_v18 = vor.u32 %v7939_v16, %v7420_v11  ;;  %v7484_v19 = vld [vmem:[%s12743_s0 + $0x2e0] sm:$0xf]  ;;  %v7955_v20 = vld [vmem:[%s12743_s0 + $0x2e4] sm:$0xf0]  ;;  %v7874_v21 = vld [vmem:[%s12743_s0 + $0x64] sm:$0xf]  ;;  %1622 = vmatpush.bf16.msrb.mxu2 %v7177_v9 }
  0x38   : > { %v7485_v22 = vor.u32 %v7955_v20, %v7484_v19  ;;  %v7166_v23 = vld [vmem:[%s12743_s0 + $0x68] sm:$0xf0]  ;;  %v7890_v28 = vld [vmem:[%s12743_s0 + $0xe4] sm:$0xf]  ;;  %v7044_v30 = vld [vmem:[%s12744_s1 + $0x150] sm:$0xf]  ;;  %1681 = vmatpush.bf16.msrb.mxu3 %v7241_v17 }
  0x39   : > { %v7230_v29 = vld [vmem:[%s12743_s0 + $0xe8] sm:$0xf0]  ;;  %v7847_v31 = vld [vmem:[%s12744_s1 + $0x164] sm:$0xf0]  ;;  %v7169_v32 = vor.u32 %v7874_v21, %v7166_v23  ;;  %v7412_v34 = vld [vmem:[%s12743_s0 + $0x250] sm:$0xf] }
  0x3a   : > { %v7233_v33 = vor.u32 %v7890_v28, %v7230_v29  ;;  %v7937_v35 = vld [vmem:[%s12743_s0 + $0x254] sm:$0xf0]  ;;  %v7476_v44 = vld [vmem:[%s12743_s0 + $0x2d0] sm:$0xf]  ;;  %v7872_v46 = vld [vmem:[%s12743_s0 + $0x54] sm:$0xf]  ;;  %1505 = vmatpush.bf16.msrb.mxu0 %v7421_v18  ;;  %v8791_v8 = vor.u32 %v7847_v31, %v7044_v30 }
  0x3b   : > { %v7953_v45 = vld [vmem:[%s12743_s0 + $0x2d4] sm:$0xf0]  ;;  %v7158_v47 = vld [vmem:[%s12743_s0 + $0x58] sm:$0xf0]  ;;  %v7844_v48 = vld [vmem:[%s12744_s1 + $0x154] sm:$0xf]  ;;  %1564 = vmatpush.bf16.msrb.mxu1 %v7485_v22  ;;  %v7413_v49 = vor.u32 %v7937_v35, %v7412_v34  ;;  %1623 = vmatpush.bf16.msrb.mxu2 %v7169_v32 }
  0x3c   : > { %v7477_v50 = vor.u32 %v7953_v45, %v7476_v44  ;;  %v7888_v51 = vld [vmem:[%s12743_s0 + $0xd4] sm:$0xf]  ;;  %v7222_v60 = vld [vmem:[%s12743_s0 + $0xd8] sm:$0xf0]  ;;  %v7046_v61 = vld [vmem:[%s12744_s1 + $0x168] sm:$0xf0]  ;;  %v7161_v4 = vor.u32 %v7872_v46, %v7158_v47  ;;  %1682 = vmatpush.bf16.msrb.mxu3 %v7233_v33 }
  0x3d   : > { %1281 = vmatmul.bf16.gmra.mxu0 %v8503_v52  ;;  %v7052_v62 = vld [vmem:[%s12744_s1 + $0x158] sm:$0xf]  ;;  %v7848_v63 = vld [vmem:[%s12744_s1 + $0x16c] sm:$0xf0]  ;;  %v7845_v5 = vld [vmem:[%s12744_s1 + $0x15c] sm:$0xf]  ;;  %v7225_v7 = vor.u32 %v7888_v51, %v7222_v60  ;;  %v8802_v16 = vor.u32 %v7844_v48, %v7046_v61 }
  0x3e   : > { %1340 = vmatmul.bf16.gmra.mxu1 %v8505_v53  ;;  %v7054_v6 = vld [vmem:[%s12744_s1 + $0x170] sm:$0xf0]  ;;  %v7404_v9 = vld [vmem:[%s12743_s0 + $0x240] sm:$0xf]  ;;  %v7935_v10 = vld [vmem:[%s12743_s0 + $0x244] sm:$0xf0]  ;;  %v8804_v17 = vor.u32 %v7848_v63, %v7052_v62  ;;  %1506 = vmatpush.bf16.msrb.mxu0 %v7413_v49 }
  0x3f   : > { %1399 = vmatmul.bf16.gmra.mxu2 %v8507_v54  ;;  %v7468_v11 = vld [vmem:[%s12743_s0 + $0x2c0] sm:$0xf]  ;;  %1565 = vmatpush.bf16.msrb.mxu1 %v7477_v50  ;;  %v7951_v18 = vld [vmem:[%s12743_s0 + $0x2c4] sm:$0xf0]  ;;  %v7870_v19 = vld [vmem:[%s12743_s0 + $0x44] sm:$0xf]  ;;  %v8815_v21 = vor.u32 %v7845_v5, %v7054_v6  ;;  %v7405_v22 = vor.u32 %v7935_v10, %v7404_v9 }
  0x40   : > { %1458 = vmatmul.bf16.gmra.mxu3 %v8509_v55  ;;  %12860 = vst [vmem:[#allocation4_spill] sm:$0xff] %v8804_v17  ;;  %v7150_v20 = vld [vmem:[%s12743_s0 + $0x48] sm:$0xf0]  ;;  %1624 = vmatpush.bf16.msrb.mxu2 %v7161_v4  ;;  %v7886_v23 = vld [vmem:[%s12743_s0 + $0xc4] sm:$0xf]  ;;  %v7469_v29 = vor.u32 %v7951_v18, %v7468_v11  ;;  %p306_p3 = scmp.lt.s32.totalorder %s305_s14, 119 }
  0x41   : > { %12861 = vst [vmem:[#allocation5_spill] sm:$0xff] %v8815_v21  ;;  %v7214_v28 = vld [vmem:[%s12743_s0 + $0xc8] sm:$0xf0]  ;;  %1683 = vmatpush.bf16.msrb.mxu3 %v7225_v7  ;;  %v7153_v30 = vor.u32 %v7870_v19, %v7150_v20  ;;  %v7396_v32 = vld [vmem:[%s12743_s0 + $0x230] sm:$0xf] }
  0x42   : > { %v7217_v31 = vor.u32 %v7886_v23, %v7214_v28  ;;  %1507 = vmatpush.bf16.msrb.mxu0 %v7405_v22  ;;  %v7933_v33 = vld [vmem:[%s12743_s0 + $0x234] sm:$0xf0]  ;;  %v7460_v34 = vld [vmem:[%s12743_s0 + $0x2b0] sm:$0xf]  ;;  %v7868_v46 = vld [vmem:[%s12743_s0 + $0x34] sm:$0xf] }
  0x43   : > { %v7949_v35 = vld [vmem:[%s12743_s0 + $0x2b4] sm:$0xf0]  ;;  %1566 = vmatpush.bf16.msrb.mxu1 %v7469_v29  ;;  %v7397_v44 = vor.u32 %v7933_v33, %v7396_v32  ;;  %v7142_v47 = vld [vmem:[%s12743_s0 + $0x38] sm:$0xf0]  ;;  %v7884_v48 = vld [vmem:[%s12743_s0 + $0xb4] sm:$0xf] }
  0x44   : > { %1625 = vmatpush.bf16.msrb.mxu2 %v7153_v30  ;;  %v7461_v45 = vor.u32 %v7949_v35, %v7460_v34  ;;  %v7145_v49 = vor.u32 %v7868_v46, %v7142_v47  ;;  %v7206_v50 = vld [vmem:[%s12743_s0 + $0xb8] sm:$0xf0]  ;;  %v7388_v51 = vld [vmem:[%s12743_s0 + $0x220] sm:$0xf]  ;;  %v7931_v60 = vld [vmem:[%s12743_s0 + $0x224] sm:$0xf0] }
  0x45   : > { %1684 = vmatpush.bf16.msrb.mxu3 %v7217_v31  ;;  %v7209_v61 = vor.u32 %v7884_v48, %v7206_v50  ;;  %v7452_v62 = vld [vmem:[%s12743_s0 + $0x2a0] sm:$0xf]  ;;  %v7947_v63 = vld [vmem:[%s12743_s0 + $0x2a4] sm:$0xf0]  ;;  %v7866_v4 = vld [vmem:[%s12743_s0 + $0x24] sm:$0xf]  ;;  %v7389_v5 = vor.u32 %v7931_v60, %v7388_v51 }
  0x46   : > { %1508 = vmatpush.bf16.msrb.mxu0 %v7397_v44  ;;  %v7134_v6 = vld [vmem:[%s12743_s0 + $0x28] sm:$0xf0]  ;;  %v7882_v7 = vld [vmem:[%s12743_s0 + $0xa4] sm:$0xf]  ;;  %v7068_v10 = vld [vmem:[%s12744_s1 + $0x180] sm:$0xf]  ;;  %v7453_v18 = vor.u32 %v7947_v63, %v7452_v62 }
  0x47   : > { %v7198_v9 = vld [vmem:[%s12743_s0 + $0xa8] sm:$0xf0]  ;;  %v7853_v11 = vld [vmem:[%s12744_s1 + $0x194] sm:$0xf0]  ;;  %1567 = vmatpush.bf16.msrb.mxu1 %v7461_v45  ;;  %v7137_v19 = vor.u32 %v7866_v4, %v7134_v6  ;;  %v7380_v20 = vld [vmem:[%s12743_s0 + $0x210] sm:$0xf] }
  0x48   : > { %1626 = vmatpush.bf16.msrb.mxu2 %v7145_v49  ;;  %v7929_v22 = vld [vmem:[%s12743_s0 + $0x214] sm:$0xf0]  ;;  %v7444_v23 = vld [vmem:[%s12743_s0 + $0x290] sm:$0xf]  ;;  %v7201_v28 = vor.u32 %v7882_v7, %v7198_v9  ;;  %v7864_v30 = vld [vmem:[%s12743_s0 + $0x14] sm:$0xf]  ;;  %v8923_v51 = vor.u32 %v7853_v11, %v7068_v10 }
  0x49   : > { %1685 = vmatpush.bf16.msrb.mxu3 %v7209_v61  ;;  %v7945_v29 = vld [vmem:[%s12743_s0 + $0x294] sm:$0xf0]  ;;  %v7126_v31 = vld [vmem:[%s12743_s0 + $0x18] sm:$0xf0]  ;;  %v7850_v32 = vld [vmem:[%s12744_s1 + $0x184] sm:$0xf]  ;;  %v7381_v46 = vor.u32 %v7929_v22, %v7380_v20 }
  0x4a   : > { %v7880_v33 = vld [vmem:[%s12743_s0 + $0x94] sm:$0xf]  ;;  %v7190_v34 = vld [vmem:[%s12743_s0 + $0x98] sm:$0xf0]  ;;  %v7076_v44 = vld [vmem:[%s12744_s1 + $0x188] sm:$0xf]  ;;  %1509 = vmatpush.bf16.msrb.mxu0 %v7389_v5  ;;  %v7445_v49 = vor.u32 %v7945_v29, %v7444_v23  ;;  %v7129_v50 = vor.u32 %v7864_v30, %v7126_v31 }
  0x4b   : > { %v7070_v35 = vld [vmem:[%s12744_s1 + $0x198] sm:$0xf0]  ;;  %v7854_v45 = vld [vmem:[%s12744_s1 + $0x19c] sm:$0xf0]  ;;  %v7851_v47 = vld [vmem:[%s12744_s1 + $0x18c] sm:$0xf]  ;;  %1568 = vmatpush.bf16.msrb.mxu1 %v7453_v18  ;;  %v7193_v60 = vor.u32 %v7880_v33, %v7190_v34 }
  0x4c   : > { %v7078_v48 = vld [vmem:[%s12744_s1 + $0x1a0] sm:$0xf0]  ;;  %1627 = vmatpush.bf16.msrb.mxu2 %v7137_v19  ;;  %v7372_v61 = vld [vmem:[%s12743_s0 + $0x200] sm:$0xf]  ;;  %v7927_v62 = vld [vmem:[%s12743_s0 + $0x204] sm:$0xf0]  ;;  %v8934_v5 = vor.u32 %v7850_v32, %v7070_v35  ;;  %v8936_v6 = vor.u32 %v7854_v45, %v7076_v44 }
  0x4d   : > { %1286 = vmatmul.bf16.gmra.mxu0 %v8539_v0  ;;  %1686 = vmatpush.bf16.msrb.mxu3 %v7201_v28  ;;  %v7436_v63 = vld [vmem:[%s12743_s0 + $0x280] sm:$0xf]  ;;  %v7943_v7 = vld [vmem:[%s12743_s0 + $0x284] sm:$0xf0]  ;;  %v7862_v9 = vld [vmem:[%s12743_s0 + $0x4] sm:$0xf]  ;;  %v8947_v18 = vor.u32 %v7851_v47, %v7078_v48  ;;  %v7373_v19 = vor.u32 %v7927_v62, %v7372_v61 }
  0x4e   : > { %1345 = vmatmul.bf16.gmra.mxu1 %v8541_v1  ;;  %12862 = vst [vmem:[#allocation6_spill] sm:$0xff] %v8936_v6  ;;  %v7118_v10 = vld [vmem:[%s12743_s0 + $0x8] sm:$0xf0]  ;;  %1510 = vmatpush.bf16.msrb.mxu0 %v7381_v46  ;;  %v7878_v20 = vld [vmem:[%s12743_s0 + $0x84] sm:$0xf]  ;;  %v7437_v28 = vor.u32 %v7943_v7, %v7436_v63  ;;  %s13125_s14 = smov (!%p306_p3, %s305_s14), 119 }
  0x4f   : > { %1404 = vmatmul.bf16.gmra.mxu2 %v8543_v2  ;;  %12863 = vst [vmem:[#allocation7_spill] sm:$0xff] %v8947_v18  ;;  %v7182_v22 = vld [vmem:[%s12743_s0 + $0x88] sm:$0xf0]  ;;  %1569 = vmatpush.bf16.msrb.mxu1 %v7445_v49  ;;  %v7121_v29 = vor.u32 %v7862_v9, %v7118_v10  ;;  %v7092_v46 = vld [vmem:[%s12744_s1 + $0x1b0] sm:$0xf]  ;;  %s10282_s25 = sshll.u32 %s13125_s14, 3 }
  0x50   : > { %1463 = vmatmul.bf16.gmra.mxu3 %v8545_v3  ;;  %1628 = vmatpush.bf16.msrb.mxu2 %v7129_v50  ;;  %v7185_v30 = vor.u32 %v7878_v20, %v7182_v22  ;;  %v7859_v47 = vld [vmem:[%s12744_s1 + $0x1c4] sm:$0xf0]  ;;  %v7856_v48 = vld [vmem:[%s12744_s1 + $0x1b4] sm:$0xf]  ;;  %v7094_v49 = vld [vmem:[%s12744_s1 + $0x1c8] sm:$0xf0]  ;;  %s10298_s17 = scalar_lea.vmem %s12747_s4, %s10282_s25  ;;  %s10661_s20 = scalar_lea.vmem %s12748_s5, %s10282_s25 }
  0x51   : > { %1687 = vmatpush.bf16.msrb.mxu3 %v7193_v60  ;;  %v7100_v50 = vld [vmem:[%s12744_s1 + $0x1b8] sm:$0xf]  ;;  %v7860_v60 = vld [vmem:[%s12744_s1 + $0x1cc] sm:$0xf0]  ;;  %v7857_v61 = vld [vmem:[%s12744_s1 + $0x1bc] sm:$0xf]  ;;  %s10671_s23 = scalar_lea.vmem %s12749_s6, %s10282_s25 }
  0x52   : > { %1511 = vmatpush.bf16.msrb.mxu0 %v7373_v19  ;;  %v7102_v62 = vld [vmem:[%s12744_s1 + $0x1d0] sm:$0xf0]  ;;  %v8989_v19 = vor.u32 %v7860_v60, %v7100_v50  ;;  %s7801_s26 = sshll.u32 %s13125_s14, 4 }
  0x53   : > { %1570 = vmatpush.bf16.msrb.mxu1 %v7437_v28  ;;  %v8991_v22 = vor.u32 %v7857_v61, %v7102_v62  ;;  %s10867_s29 = scalar_lea.vmem %s12750_s7, %s7801_s26 }
  0x54   : > { %1629 = vmatpush.bf16.msrb.mxu2 %v7121_v29  ;;  %12864 = vst [vmem:[#allocation8_spill] sm:$0xff] %v8989_v19 }
  0x55   : > { %1688 = vmatpush.bf16.msrb.mxu3 %v7185_v30  ;;  %12865 = vst [vmem:[#allocation9_spill] sm:$0xff] %v8991_v22 }
  0x5d   : > { %1291 = vmatmul.bf16.gmra.mxu0 %v8575_v12 }
  0x5e   : > { %1350 = vmatmul.bf16.gmra.mxu1 %v8577_v13 }
  0x5f   : > { %1409 = vmatmul.bf16.gmra.mxu2 %v8579_v14 }
  0x60   : > { %1468 = vmatmul.bf16.gmra.mxu3 %v8581_v15 }
  0x6d   : > { %1296 = vmatmul.bf16.gmra.mxu0 %v8611_v24 }
  0x6e   : > { %1355 = vmatmul.bf16.gmra.mxu1 %v8613_v25 }
  0x6f   : > { %1414 = vmatmul.bf16.gmra.mxu2 %v8615_v26 }
  0x70   : > { %1473 = vmatmul.bf16.gmra.mxu3 %v8617_v27 }
  0x7d   : > { %1301 = vmatmul.bf16.gmra.mxu0 %v8647_v36 }
  0x7e   : > { %1360 = vmatmul.bf16.gmra.mxu1 %v8649_v37 }
  0x7f   : > { %1419 = vmatmul.bf16.gmra.mxu2 %v8651_v38 }
  0x80   : > { %1478 = vmatmul.bf16.gmra.mxu3 %v8653_v39 }
  0x8d   : > { %1306 = vmatmul.bf16.gmra.mxu0 %v8683_v56 }
  0x8e   : > { %1365 = vmatmul.bf16.gmra.mxu1 %v8685_v57 }
  0x8f   : > { %1424 = vmatmul.bf16.gmra.mxu2 %v8687_v58 }
  0x90   : > { %1483 = vmatmul.bf16.gmra.mxu3 %v8689_v59 }
  0x9d   : > { %1311 = vmatmul.bf16.gmra.mxu0 %v8791_v8 }
  0x9e   : > { %1370 = vmatmul.bf16.gmra.mxu1 %v8802_v16 }
  0x9f   : > { %1429 = vmatmul.bf16.gmra.mxu2 %v8804_v17  ;;  %v7908_v17 = vld [vmem:[%s12743_s0 + $0x174] sm:$0xf] }
  0xa0   : > { %1488 = vmatmul.bf16.gmra.mxu3 %v8815_v21 }
  0xaa   : > { %v1277_v4 = vpop.f32.mrf.mxu0 }
  0xab   : > { %v1336_v11 = vpop.f32.mrf.mxu1 }
  0xac   : > { %v1337_v23 = vadd.f32 %v1336_v11, %v1277_v4  ;;  %v8985_v4 = vor.u32 %v7859_v47, %v7092_v46  ;;  %v8987_v11 = vor.u32 %v7856_v48, %v7094_v49  ;;  %v7807_v46 = vld [vmem:[%s12744_s1 + $0x24] sm:$0xf0]  ;;  %v7804_v47 = vld [vmem:[%s12744_s1 + $0x14] sm:$0xf]  ;;  %v6894_v48 = vld [vmem:[%s12744_s1 + $0x28] sm:$0xf0] }
  0xad   : > { %1316 = vmatmul.bf16.gmra.mxu0 %v8923_v51 }
  0xae   : > { %1375 = vmatmul.bf16.gmra.mxu1 %v8934_v5 }
  0xaf   : > { %1434 = vmatmul.bf16.gmra.mxu2 %v8936_v6 }
  0xb0   : > { %1493 = vmatmul.bf16.gmra.mxu3 %v8947_v18 }
  0xb2   : > { %v1395_v31 = vpop.f32.mrf.mxu2  ;;  %v1279_v34 = vpop.f32.mrf.mxu0 }
  0xb3   : > { %v1396_v32 = vadd.f32 %v1395_v31, %v1337_v23  ;;  %v1454_v33 = vpop.f32.mrf.mxu3  ;;  %v1338_v35 = vpop.f32.mrf.mxu1 }
  0xb4   : > { %v1339_v45 = vadd.f32 %v1338_v35, %v1279_v34 }
  0xb5   : > { %v8959_v44 = vadd.f32 %v1454_v33, %v1396_v32 }
  0xba   : > { %v1397_v63 = vpop.f32.mrf.mxu2  ;;  %v1282_v10 = vpop.f32.mrf.mxu0 }
  0xbb   : > { %v1398_v7 = vadd.f32 %v1397_v63, %v1339_v45  ;;  %v1456_v9 = vpop.f32.mrf.mxu3  ;;  %v1341_v20 = vpop.f32.mrf.mxu1  ;;  %v6892_v45 = vld [vmem:[%s12744_s1 + $0x10] sm:$0xf]  ;;  %v9015_v63 = vor.u32 %v7804_v47, %v6894_v48 }
  0xbc   : > { %v1342_v28 = vadd.f32 %v1341_v20, %v1282_v10  ;;  %v9013_v50 = vor.u32 %v7807_v46, %v6892_v45  ;;  %v7813_v45 = vld [vmem:[%s12744_s1 + $0x54] sm:$0xf0] }
  0xbd   : > { %v8993_v23 = vadd.f32 %v1456_v9, %v1398_v7  ;;  %1321 = vmatmul.bf16.gmra.mxu0 %v8985_v4 }
  0xbe   : > { %1380 = vmatmul.bf16.gmra.mxu1 %v8987_v11 }
  0xbf   : > { %1439 = vmatmul.bf16.gmra.mxu2 %v8989_v19 }
  0xc0   : > { %1498 = vmatmul.bf16.gmra.mxu3 %v8991_v22 }
  0xc2   : > { %v1400_v29 = vpop.f32.mrf.mxu2  ;;  %v1284_v32 = vpop.f32.mrf.mxu0 }
  0xc3   : > { %v1401_v30 = vadd.f32 %v1400_v29, %v1342_v28  ;;  %v1459_v31 = vpop.f32.mrf.mxu3  ;;  %v1343_v33 = vpop.f32.mrf.mxu1 }
  0xc4   : > { %v1344_v35 = vadd.f32 %v1343_v33, %v1284_v32 }
  0xc5   : > { %v8999_v34 = vadd.f32 %v1459_v31, %v1401_v30 }
  0xca   : > { %v1402_v49 = vpop.f32.mrf.mxu2  ;;  %v1287_v62 = vpop.f32.mrf.mxu0 }
  0xcb   : > { %v1403_v60 = vadd.f32 %v1402_v49, %v1344_v35  ;;  %v1461_v61 = vpop.f32.mrf.mxu3  ;;  %v1346_v7 = vpop.f32.mrf.mxu1  ;;  %v6916_v35 = vld [vmem:[%s12744_s1 + $0x40] sm:$0xf] }
  0xcc   : > { %v1347_v10 = vadd.f32 %v1346_v7, %v1287_v62  ;;  %v9037_v47 = vor.u32 %v7813_v45, %v6916_v35  ;;  %v6940_v45 = vld [vmem:[%s12744_s1 + $0x70] sm:$0xf] }
  0xcd   : > { %v9017_v9 = vadd.f32 %v1461_v61, %v1403_v60  ;;  %1512 = vmatmul.bf16.vlgmr.msrb.gmra.mxu0 %v9013_v50 }
  0xce   : > { %1571 = vmatmul.bf16.vlgmr.msrb.gmra.mxu1 %v9015_v63 }
  0xcf   : > { %1630 = vmatmul.bf16.vlgmr.msrb.gmra.mxu2 %v8467_v40  ;;  %v7810_v40 = vld [vmem:[%s12744_s1 + $0x44] sm:$0xf] }
  0xd0   : > { %1689 = vmatmul.bf16.vlgmr.msrb.gmra.mxu3 %v8469_v41  ;;  %v6918_v41 = vld [vmem:[%s12744_s1 + $0x58] sm:$0xf0] }
  0xd1   : > { %v9039_v61 = vor.u32 %v7810_v40, %v6918_v41  ;;  %v7819_v40 = vld [vmem:[%s12744_s1 + $0x84] sm:$0xf0] }
  0xd2   : > { %v1405_v20 = vpop.f32.mrf.mxu2  ;;  %v1289_v30 = vpop.f32.mrf.mxu0 }
  0xd3   : > { %v1406_v28 = vadd.f32 %v1405_v20, %v1347_v10  ;;  %v1464_v29 = vpop.f32.mrf.mxu3  ;;  %v1348_v31 = vpop.f32.mrf.mxu1 }
  0xd4   : > { %v1349_v33 = vadd.f32 %v1348_v31, %v1289_v30 }
  0xd5   : > { %v9023_v32 = vadd.f32 %v1464_v29, %v1406_v28 }
  0xda   : > { %v1407_v46 = vpop.f32.mrf.mxu2  ;;  %v1292_v60 = vpop.f32.mrf.mxu0 }
  0xdb   : > { %v1408_v48 = vadd.f32 %v1407_v46, %v1349_v33  ;;  %v1466_v49 = vpop.f32.mrf.mxu3  ;;  %v1351_v62 = vpop.f32.mrf.mxu1  ;;  %v9061_v46 = vor.u32 %v7819_v40, %v6940_v45 }
  0xdc   : > { %v1352_v10 = vadd.f32 %v1351_v62, %v1292_v60 }
  0xdd   : > { %v9041_v7 = vadd.f32 %v1466_v49, %v1408_v48  ;;  %1517 = vmatmul.bf16.gmra.mxu0 %v9037_v47 }
  0xde   : > { %1576 = vmatmul.bf16.gmra.mxu1 %v9039_v61 }
  0xdf   : > { %1635 = vmatmul.bf16.gmra.mxu2 %v8503_v52  ;;  %v7816_v52 = vld [vmem:[%s12744_s1 + $0x74] sm:$0xf] }
  0xe0   : > { %1694 = vmatmul.bf16.gmra.mxu3 %v8505_v53  ;;  %v6942_v53 = vld [vmem:[%s12744_s1 + $0x88] sm:$0xf0] }
  0xe1   : > { %v9063_v62 = vor.u32 %v7816_v52, %v6942_v53  ;;  %v6964_v53 = vld [vmem:[%s12744_s1 + $0xa0] sm:$0xf] }
  0xe2   : > { %v1410_v20 = vpop.f32.mrf.mxu2  ;;  %v1294_v30 = vpop.f32.mrf.mxu0 }
  0xe3   : > { %v1411_v28 = vadd.f32 %v1410_v20, %v1352_v10  ;;  %v1469_v29 = vpop.f32.mrf.mxu3  ;;  %v1353_v31 = vpop.f32.mrf.mxu1 }
  0xe4   : > { %v1354_v35 = vadd.f32 %v1353_v31, %v1294_v30 }
  0xe5   : > { %v9047_v33 = vadd.f32 %v1469_v29, %v1411_v28 }
  0xea   : > { %v1412_v41 = vpop.f32.mrf.mxu2  ;;  %v1297_v60 = vpop.f32.mrf.mxu0 }
  0xeb   : > { %v1413_v48 = vadd.f32 %v1412_v41, %v1354_v35  ;;  %v1471_v49 = vpop.f32.mrf.mxu3  ;;  %v1356_v10 = vpop.f32.mrf.mxu1  ;;  %v7825_v41 = vld [vmem:[%s12744_s1 + $0xb4] sm:$0xf0] }
  0xec   : > { %v1357_v28 = vadd.f32 %v1356_v10, %v1297_v60 }
  0xed   : > { %v9065_v20 = vadd.f32 %v1471_v49, %v1413_v48  ;;  %1522 = vmatmul.bf16.gmra.mxu0 %v9061_v46  ;;  %v9085_v49 = vor.u32 %v7825_v41, %v6964_v53 }
  0xee   : > { %1581 = vmatmul.bf16.gmra.mxu1 %v9063_v62 }
  0xef   : > { %1640 = vmatmul.bf16.gmra.mxu2 %v8539_v0  ;;  %v7822_v0 = vld [vmem:[%s12744_s1 + $0xa4] sm:$0xf] }
  0xf0   : > { %1699 = vmatmul.bf16.gmra.mxu3 %v8541_v1  ;;  %v6966_v1 = vld [vmem:[%s12744_s1 + $0xb8] sm:$0xf0] }
  0xf2   : > { %v1415_v29 = vpop.f32.mrf.mxu2  ;;  %v1299_v35 = vpop.f32.mrf.mxu0 }
  0xf3   : > { %v1416_v30 = vadd.f32 %v1415_v29, %v1357_v28  ;;  %v1474_v31 = vpop.f32.mrf.mxu3  ;;  %v1358_v45 = vpop.f32.mrf.mxu1  ;;  %v9087_v29 = vor.u32 %v7822_v0, %v6966_v1  ;;  %v6988_v1 = vld [vmem:[%s12744_s1 + $0xd0] sm:$0xf] }
  0xf4   : > { %v1359_v52 = vadd.f32 %v1358_v45, %v1299_v35 }
  0xf5   : > { %v9071_v40 = vadd.f32 %v1474_v31, %v1416_v30 }
  0xfa   : > { %v1417_v48 = vpop.f32.mrf.mxu2  ;;  %v1302_v28 = vpop.f32.mrf.mxu0 }
  0xfb   : > { %v1418_v60 = vadd.f32 %v1417_v48, %v1359_v52  ;;  %v1476_v10 = vpop.f32.mrf.mxu3  ;;  %v1361_v30 = vpop.f32.mrf.mxu1 }
  0xfc   : > { %v1362_v35 = vadd.f32 %v1361_v30, %v1302_v28 }
  0xfd   : > { %v9089_v31 = vadd.f32 %v1476_v10, %v1418_v60  ;;  %1527 = vmatmul.bf16.gmra.mxu0 %v9085_v49  ;;  %v7831_v60 = vld [vmem:[%s12744_s1 + $0xe4] sm:$0xf0] }
  0xfe   : > { %1586 = vmatmul.bf16.gmra.mxu1 %v9087_v29  ;;  %v9109_v28 = vor.u32 %v7831_v60, %v6988_v1 }
  0xff   : > { %1645 = vmatmul.bf16.gmra.mxu2 %v8575_v12  ;;  %v7828_v12 = vld [vmem:[%s12744_s1 + $0xd4] sm:$0xf] }
 0x100   : > { %1704 = vmatmul.bf16.gmra.mxu3 %v8577_v13  ;;  %v6990_v13 = vld [vmem:[%s12744_s1 + $0xe8] sm:$0xf0] }
 0x102   : > { %v1420_v45 = vpop.f32.mrf.mxu2  ;;  %v1304_v52 = vpop.f32.mrf.mxu0 }
 0x103   : > { %v1421_v53 = vadd.f32 %v1420_v45, %v1362_v35  ;;  %v1479_v41 = vpop.f32.mrf.mxu3  ;;  %v1363_v48 = vpop.f32.mrf.mxu1 }
 0x104   : > { %v1364_v0 = vadd.f32 %v1363_v48, %v1304_v52 }
 0x105   : > { %v9095_v22 = vadd.f32 %v1479_v41, %v1421_v53  ;;  %v9111_v53 = vor.u32 %v7828_v12, %v6990_v13  ;;  %v7012_v13 = vld [vmem:[%s12744_s1 + $0x100] sm:$0xf] }
 0x10a   : > { %v1422_v10 = vpop.f32.mrf.mxu2  ;;  %v1307_v45 = vpop.f32.mrf.mxu0 }
 0x10b   : > { %v1423_v30 = vadd.f32 %v1422_v10, %v1364_v0  ;;  %v1481_v35 = vpop.f32.mrf.mxu3  ;;  %v1366_v41 = vpop.f32.mrf.mxu1 }
 0x10c   : > { %v1367_v48 = vadd.f32 %v1366_v41, %v1307_v45 }
 0x10d   : > { %v9113_v52 = vadd.f32 %v1481_v35, %v1423_v30  ;;  %1532 = vmatmul.bf16.gmra.mxu0 %v9109_v28  ;;  %v7837_v30 = vld [vmem:[%s12744_s1 + $0x114] sm:$0xf0] }
 0x10e   : > { %1591 = vmatmul.bf16.gmra.mxu1 %v9111_v53  ;;  %v9133_v35 = vor.u32 %v7837_v30, %v7012_v13 }
 0x10f   : > { %1650 = vmatmul.bf16.gmra.mxu2 %v8611_v24  ;;  %v7834_v24 = vld [vmem:[%s12744_s1 + $0x104] sm:$0xf] }
 0x110   : > { %1709 = vmatmul.bf16.gmra.mxu3 %v8613_v25  ;;  %v7014_v25 = vld [vmem:[%s12744_s1 + $0x118] sm:$0xf0] }
 0x112   : > { %v1425_v19 = vpop.f32.mrf.mxu2  ;;  %v1309_v0 = vpop.f32.mrf.mxu0 }
 0x113   : > { %v1426_v1 = vadd.f32 %v1425_v19, %v1367_v48  ;;  %v1484_v60 = vpop.f32.mrf.mxu3  ;;  %v1368_v10 = vpop.f32.mrf.mxu1 }
 0x114   : > { %v1369_v12 = vadd.f32 %v1368_v10, %v1309_v0 }
 0x115   : > { %v9119_v18 = vadd.f32 %v1484_v60, %v1426_v1  ;;  %v9135_v1 = vor.u32 %v7834_v24, %v7014_v25  ;;  %v7036_v25 = vld [vmem:[%s12744_s1 + $0x130] sm:$0xf] }
 0x11a   : > { %v1427_v19 = vpop.f32.mrf.mxu2  ;;  %v1312_v48 = vpop.f32.mrf.mxu0 }
 0x11b   : > { %v1428_v45 = vadd.f32 %v1427_v19, %v1369_v12  ;;  %v1486_v41 = vpop.f32.mrf.mxu3  ;;  %v1371_v60 = vpop.f32.mrf.mxu1 }
 0x11c   : > { %v1372_v10 = vadd.f32 %v1371_v60, %v1312_v48 }
 0x11d   : > { %v9137_v0 = vadd.f32 %v1486_v41, %v1428_v45  ;;  %1537 = vmatmul.bf16.gmra.mxu0 %v9133_v35  ;;  %v7843_v45 = vld [vmem:[%s12744_s1 + $0x144] sm:$0xf0] }
 0x11e   : > { %1596 = vmatmul.bf16.gmra.mxu1 %v9135_v1  ;;  %v9157_v41 = vor.u32 %v7843_v45, %v7036_v25  ;;  %v7302_v25 = vld [vmem:[%s12743_s0 + $0x178] sm:$0xf0]  ;;  %v7924_v45 = vld [vmem:[%s12743_s0 + $0x1f4] sm:$0xf] }
 0x11f   : > { %1655 = vmatmul.bf16.gmra.mxu2 %v8647_v36  ;;  %v7840_v36 = vld [vmem:[%s12744_s1 + $0x134] sm:$0xf] }
 0x120   : > { %1714 = vmatmul.bf16.gmra.mxu3 %v8649_v37  ;;  %v7038_v37 = vld [vmem:[%s12744_s1 + $0x148] sm:$0xf0]  ;;  %12866 = vst [vmem:[#allocation10_spill] sm:$0xff] %v9157_v41 }
 0x122   : > { %v1430_v6 = vpop.f32.mrf.mxu2  ;;  %v1314_v12 = vpop.f32.mrf.mxu0 }
 0x123   : > { %v1431_v13 = vadd.f32 %v1430_v6, %v1372_v10  ;;  %v1489_v30 = vpop.f32.mrf.mxu3  ;;  %v1373_v19 = vpop.f32.mrf.mxu1 }
 0x124   : > { %v1374_v24 = vadd.f32 %v1373_v19, %v1314_v12 }
 0x125   : > { %v9143_v21 = vadd.f32 %v1489_v30, %v1431_v13  ;;  %v9159_v13 = vor.u32 %v7840_v36, %v7038_v37  ;;  %v7366_v36 = vld [vmem:[%s12743_s0 + $0x1f8] sm:$0xf0]  ;;  %v7940_v37 = vld [vmem:[%s12743_s0 + $0x274] sm:$0xf] }
 0x127   : > { %12867 = vst [vmem:[#allocation11_spill] sm:$0xff] %v9159_v13 }
 0x12a   : > { %v1432_v6 = vpop.f32.mrf.mxu2  ;;  %v1317_v10 = vpop.f32.mrf.mxu0 }
 0x12b   : > { %v1433_v48 = vadd.f32 %v1432_v6, %v1374_v24  ;;  %v1491_v60 = vpop.f32.mrf.mxu3  ;;  %v1376_v30 = vpop.f32.mrf.mxu1  ;;  %v7305_v24 = vor.u32 %v7908_v17, %v7302_v25  ;;  %v7369_v6 = vor.u32 %v7924_v45, %v7366_v36  ;;  %v7956_v17 = vld [vmem:[%s12743_s0 + $0x2f4] sm:$0xf]  ;;  %v7294_v25 = vld [vmem:[%s12743_s0 + $0x168] sm:$0xf0]  ;;  %v7922_v45 = vld [vmem:[%s12743_s0 + $0x1e4] sm:$0xf] }
 0x12c   : > { %v1377_v19 = vadd.f32 %v1376_v30, %v1317_v10 }
 0x12d   : > { %v9161_v12 = vadd.f32 %v1491_v60, %v1433_v48  ;;  %1542 = vmatmul.bf16.gmra.mxu0 %v9157_v41  ;;  %v7494_v48 = vld [vmem:[%s12743_s0 + $0x2f8] sm:$0xf0]  ;;  %1799 = vmatpush.bf16.msra.mxu1 %v7369_v6  ;;  %v7938_v6 = vld [vmem:[%s12743_s0 + $0x264] sm:$0xf] }
 0x12e   : > { %1601 = vmatmul.bf16.gmra.mxu1 %v9159_v13  ;;  %1740 = vmatpush.bf16.msra.mxu0 %v7305_v24  ;;  %v7497_v10 = vor.u32 %v7956_v17, %v7494_v48 }
 0x12f   : > { %12868 = vst [vmem:[#allocation12_spill] sm:$0xff] %v9161_v12  ;;  %1660 = vmatmul.bf16.gmra.mxu2 %v8683_v56  ;;  %v7430_v56 = vld [vmem:[%s12743_s0 + $0x278] sm:$0xf0] }
 0x130   : > { %1719 = vmatmul.bf16.gmra.mxu3 %v8685_v57  ;;  %v7433_v60 = vor.u32 %v7940_v37, %v7430_v56  ;;  %v7906_v57 = vld [vmem:[%s12743_s0 + $0x164] sm:$0xf]  ;;  %v7358_v37 = vld [vmem:[%s12743_s0 + $0x1e8] sm:$0xf0] }
 0x131   : > { %1917 = vmatpush.bf16.msra.mxu3 %v7497_v10  ;;  %v7297_v24 = vor.u32 %v7906_v57, %v7294_v25  ;;  %v7422_v56 = vld [vmem:[%s12743_s0 + $0x268] sm:$0xf0]  ;;  %v7361_v48 = vor.u32 %v7922_v45, %v7358_v37  ;;  %v7060_v25 = vld [vmem:[%s12744_s1 + $0x160] sm:$0xf]  ;;  %v7849_v45 = vld [vmem:[%s12744_s1 + $0x174] sm:$0xf0] }
 0x132   : > { %v1435_v30 = vpop.f32.mrf.mxu2  ;;  %v1319_v41 = vpop.f32.mrf.mxu0  ;;  %1858 = vmatpush.bf16.msra.mxu2 %v7433_v60  ;;  %v7954_v60 = vld [vmem:[%s12743_s0 + $0x2e4] sm:$0xf]  ;;  %v7486_v10 = vld [vmem:[%s12743_s0 + $0x2e8] sm:$0xf0]  ;;  %v9253_v58 = vor.u32 %v7849_v45, %v7060_v25 }
 0x133   : > { %v1436_v36 = vadd.f32 %v1435_v30, %v1377_v19  ;;  %v1494_v13 = vpop.f32.mrf.mxu3  ;;  %v1378_v17 = vpop.f32.mrf.mxu1  ;;  %v7425_v19 = vor.u32 %v7938_v6, %v7422_v56  ;;  %1741 = vmatpush.bf16.msra.mxu0 %v7297_v24  ;;  %v7489_v37 = vor.u32 %v7954_v60, %v7486_v10  ;;  %v7846_v6 = vld [vmem:[%s12744_s1 + $0x164] sm:$0xf]  ;;  %1800 = vmatpush.bf16.msra.mxu1 %v7361_v48  ;;  %v7350_v56 = vld [vmem:[%s12743_s0 + $0x1d8] sm:$0xf0]  ;;  %v7342_v45 = vld [vmem:[%s12743_s0 + $0x1c8] sm:$0xf0] }
 0x134   : > { %v1379_v57 = vadd.f32 %v1378_v17, %v1319_v41  ;;  %v7286_v41 = vld [vmem:[%s12743_s0 + $0x158] sm:$0xf0]  ;;  %v7936_v17 = vld [vmem:[%s12743_s0 + $0x254] sm:$0xf]  ;;  %12870 = vst [vmem:[#allocation14_spill] sm:$0xff] %v9253_v58 }
 0x135   : > { %v9215_v30 = vadd.f32 %v1494_v13, %v1436_v36  ;;  %v7904_v13 = vld [vmem:[%s12743_s0 + $0x154] sm:$0xf]  ;;  %1918 = vmatpush.bf16.msra.mxu3 %v7489_v37  ;;  %v7414_v48 = vld [vmem:[%s12743_s0 + $0x258] sm:$0xf0] }
 0x136   : > { %v7920_v36 = vld [vmem:[%s12743_s0 + $0x1d4] sm:$0xf]  ;;  %1859 = vmatpush.bf16.msra.mxu2 %v7425_v19  ;;  %v7289_v24 = vor.u32 %v7904_v13, %v7286_v41  ;;  %v7062_v60 = vld [vmem:[%s12744_s1 + $0x178] sm:$0xf0]  ;;  %v7417_v19 = vor.u32 %v7936_v17, %v7414_v48 }
 0x137   : > { %12869 = vst [vmem:[#allocation13_spill] sm:$0xff] %v9215_v30  ;;  %v7353_v10 = vor.u32 %v7920_v36, %v7350_v56  ;;  %v7952_v37 = vld [vmem:[%s12743_s0 + $0x2d4] sm:$0xf]  ;;  %v7478_v13 = vld [vmem:[%s12743_s0 + $0x2d8] sm:$0xf0] }
 0x138   : > { %1742 = vmatpush.bf16.msra.mxu0 %v7289_v24  ;;  %v7481_v41 = vor.u32 %v7952_v37, %v7478_v13  ;;  %v7902_v30 = vld [vmem:[%s12743_s0 + $0x144] sm:$0xf]  ;;  %v7278_v36 = vld [vmem:[%s12743_s0 + $0x148] sm:$0xf0]  ;;  %v9264_v37 = vor.u32 %v7846_v6, %v7062_v60 }
 0x139   : > { %1801 = vmatpush.bf16.msra.mxu1 %v7353_v10  ;;  %v7918_v56 = vld [vmem:[%s12743_s0 + $0x1c4] sm:$0xf]  ;;  %v7281_v25 = vor.u32 %v7902_v30, %v7278_v36  ;;  %v7406_v13 = vld [vmem:[%s12743_s0 + $0x248] sm:$0xf0]  ;;  %v7900_v36 = vld [vmem:[%s12743_s0 + $0x134] sm:$0xf] }
 0x13a   : > { %v1437_v59 = vpop.f32.mrf.mxu2  ;;  %v1322_v24 = vpop.f32.mrf.mxu0  ;;  %12871 = vst [vmem:[#allocation15_spill] sm:$0xff] %v9264_v37  ;;  %1860 = vmatpush.bf16.msra.mxu2 %v7417_v19  ;;  %1919 = vmatpush.bf16.msra.mxu3 %v7481_v41  ;;  %v7934_v10 = vld [vmem:[%s12743_s0 + $0x244] sm:$0xf]  ;;  %v7470_v30 = vld [vmem:[%s12743_s0 + $0x2c8] sm:$0xf0] }
 0x13b   : > { %v1438_v17 = vadd.f32 %v1437_v59, %v1379_v57  ;;  %v1496_v48 = vpop.f32.mrf.mxu3  ;;  %v1381_v59 = vpop.f32.mrf.mxu1  ;;  %v7345_v57 = vor.u32 %v7918_v56, %v7342_v45  ;;  %v7409_v12 = vor.u32 %v7934_v10, %v7406_v13  ;;  %v7950_v6 = vld [vmem:[%s12743_s0 + $0x2c4] sm:$0xf]  ;;  %v7270_v56 = vld [vmem:[%s12743_s0 + $0x138] sm:$0xf0]  ;;  %v7948_v10 = vld [vmem:[%s12743_s0 + $0x2b4] sm:$0xf] }
 0x13c   : > { %v1382_v19 = vadd.f32 %v1381_v59, %v1322_v24  ;;  %1743 = vmatpush.bf16.msra.mxu0 %v7281_v25  ;;  %v7473_v41 = vor.u32 %v7950_v6, %v7470_v30  ;;  %v7334_v24 = vld [vmem:[%s12743_s0 + $0x1b8] sm:$0xf0]  ;;  %v7932_v25 = vld [vmem:[%s12743_s0 + $0x234] sm:$0xf]  ;;  %v7914_v30 = vld [vmem:[%s12743_s0 + $0x1a4] sm:$0xf] }
 0x13d   : > { %v9281_v60 = vadd.f32 %v1496_v48, %v1438_v17  ;;  %1547 = vmatmul.bf16.gmra.mxu0 %v9253_v58  ;;  %1802 = vmatpush.bf16.msra.mxu1 %v7345_v57  ;;  %v7273_v17 = vor.u32 %v7900_v36, %v7270_v56  ;;  %v7916_v48 = vld [vmem:[%s12743_s0 + $0x1b4] sm:$0xf]  ;;  %v7462_v13 = vld [vmem:[%s12743_s0 + $0x2b8] sm:$0xf0] }
 0x13e   : > { %1606 = vmatmul.bf16.gmra.mxu1 %v9264_v37  ;;  %1861 = vmatpush.bf16.msra.mxu2 %v7409_v12  ;;  %v7337_v45 = vor.u32 %v7916_v48, %v7334_v24  ;;  %v7465_v57 = vor.u32 %v7948_v10, %v7462_v13  ;;  %v7262_v12 = vld [vmem:[%s12743_s0 + $0x128] sm:$0xf0]  ;;  %v7930_v24 = vld [vmem:[%s12743_s0 + $0x224] sm:$0xf] }
 0x13f   : > { %12872 = vst [vmem:[#allocation16_spill] sm:$0xff] %v9281_v60  ;;  %1665 = vmatmul.bf16.gmra.mxu2 %v8791_v8  ;;  %v7398_v8 = vld [vmem:[%s12743_s0 + $0x238] sm:$0xf0]  ;;  %1920 = vmatpush.bf16.msra.mxu3 %v7473_v41  ;;  %v7326_v48 = vld [vmem:[%s12743_s0 + $0x1a8] sm:$0xf0] }
 0x140   : > { %1724 = vmatmul.bf16.gmra.mxu3 %v8802_v16  ;;  %1744 = vmatpush.bf16.msra.mxu0 %v7273_v17  ;;  %v7401_v59 = vor.u32 %v7932_v25, %v7398_v8  ;;  %v7898_v16 = vld [vmem:[%s12743_s0 + $0x124] sm:$0xf]  ;;  %v7390_v25 = vld [vmem:[%s12743_s0 + $0x228] sm:$0xf0]  ;;  %v7329_v8 = vor.u32 %v7914_v30, %v7326_v48  ;;  %v7852_v48 = vld [vmem:[%s12744_s1 + $0x194] sm:$0xf] }
 0x141   : > { %1803 = vmatpush.bf16.msra.mxu1 %v7337_v45  ;;  %v7265_v17 = vor.u32 %v7898_v16, %v7262_v12  ;;  %v7393_v10 = vor.u32 %v7930_v24, %v7390_v25  ;;  %v7454_v13 = vld [vmem:[%s12743_s0 + $0x2a8] sm:$0xf0]  ;;  %v7084_v12 = vld [vmem:[%s12744_s1 + $0x190] sm:$0xf]  ;;  %v7928_v24 = vld [vmem:[%s12743_s0 + $0x214] sm:$0xf] }
 0x142   : > { %v1440_v6 = vpop.f32.mrf.mxu2  ;;  %v1324_v41 = vpop.f32.mrf.mxu0  ;;  %1862 = vmatpush.bf16.msra.mxu2 %v7401_v59  ;;  %v7855_v59 = vld [vmem:[%s12744_s1 + $0x1a4] sm:$0xf0]  ;;  %v7382_v25 = vld [vmem:[%s12743_s0 + $0x218] sm:$0xf0] }
 0x143   : > { %v1441_v36 = vadd.f32 %v1440_v6, %v1382_v19  ;;  %v1499_v56 = vpop.f32.mrf.mxu3  ;;  %v1383_v45 = vpop.f32.mrf.mxu1  ;;  %v7946_v19 = vld [vmem:[%s12743_s0 + $0x2a4] sm:$0xf]  ;;  %1921 = vmatpush.bf16.msra.mxu3 %v7465_v57  ;;  %v9373_v37 = vor.u32 %v7855_v59, %v7084_v12  ;;  %v7310_v59 = vld [vmem:[%s12743_s0 + $0x188] sm:$0xf0] }
 0x144   : > { %v1384_v16 = vadd.f32 %v1383_v45, %v1324_v41  ;;  %1745 = vmatpush.bf16.msra.mxu0 %v7265_v17  ;;  %v7457_v30 = vor.u32 %v7946_v19, %v7454_v13  ;;  %v7912_v41 = vld [vmem:[%s12743_s0 + $0x194] sm:$0xf]  ;;  %v7318_v17 = vld [vmem:[%s12743_s0 + $0x198] sm:$0xf0]  ;;  %v7086_v45 = vld [vmem:[%s12744_s1 + $0x1a8] sm:$0xf0]  ;;  %v7385_v19 = vor.u32 %v7928_v24, %v7382_v25 }
 0x145   : > { %v9335_v6 = vadd.f32 %v1499_v56, %v1441_v36  ;;  %1804 = vmatpush.bf16.msra.mxu1 %v7329_v8  ;;  %v7896_v36 = vld [vmem:[%s12743_s0 + $0x114] sm:$0xf]  ;;  %v7254_v56 = vld [vmem:[%s12743_s0 + $0x118] sm:$0xf0]  ;;  %v7321_v8 = vor.u32 %v7912_v41, %v7318_v17  ;;  %v7246_v41 = vld [vmem:[%s12743_s0 + $0x108] sm:$0xf0]  ;;  %v9384_v25 = vor.u32 %v7852_v48, %v7086_v45 }
 0x146   : > { %v7257_v57 = vor.u32 %v7896_v36, %v7254_v56  ;;  %1863 = vmatpush.bf16.msra.mxu2 %v7393_v10  ;;  %v7944_v13 = vld [vmem:[%s12743_s0 + $0x294] sm:$0xf]  ;;  %v7446_v36 = vld [vmem:[%s12743_s0 + $0x298] sm:$0xf0]  ;;  %v7894_v10 = vld [vmem:[%s12743_s0 + $0x104] sm:$0xf] }
 0x147   : > { %12873 = vst [vmem:[#allocation17_spill] sm:$0xff] %v9335_v6  ;;  %1922 = vmatpush.bf16.msra.mxu3 %v7457_v30  ;;  %v7449_v56 = vor.u32 %v7944_v13, %v7446_v36  ;;  %v7910_v17 = vld [vmem:[%s12743_s0 + $0x184] sm:$0xf]  ;;  %v7249_v12 = vor.u32 %v7894_v10, %v7246_v41  ;;  %v7374_v13 = vld [vmem:[%s12743_s0 + $0x208] sm:$0xf0] }
 0x148   : > { %1746 = vmatpush.bf16.msra.mxu0 %v7257_v57  ;;  %v7942_v45 = vld [vmem:[%s12743_s0 + $0x284] sm:$0xf]  ;;  %v7438_v10 = vld [vmem:[%s12743_s0 + $0x288] sm:$0xf0] }
 0x149   : > { %1805 = vmatpush.bf16.msra.mxu1 %v7321_v8  ;;  %v7926_v8 = vld [vmem:[%s12743_s0 + $0x204] sm:$0xf]  ;;  %v7441_v58 = vor.u32 %v7942_v45, %v7438_v10 }
 0x14a   : > { %v1442_v60 = vpop.f32.mrf.mxu2  ;;  %v1513_v57 = vpop.f32.mrf.mxu0  ;;  %1864 = vmatpush.bf16.msra.mxu2 %v7385_v19  ;;  %v7377_v48 = vor.u32 %v7926_v8, %v7374_v13 }
 0x14b   : > { %v1443_v24 = vadd.f32 %v1442_v60, %v1384_v16  ;;  %v1501_v30 = vpop.f32.mrf.mxu3  ;;  %v1514_v36 = vadd.f32 %v1513_v57, %v8959_v44  ;;  %v1572_v60 = vpop.f32.mrf.mxu1  ;;  %v7313_v16 = vor.u32 %v7910_v17, %v7310_v59  ;;  %1923 = vmatpush.bf16.msra.mxu3 %v7449_v56 }
 0x14c   : > { %1747 = vmatpush.bf16.msra.mxu0 %v7249_v12  ;;  %v7108_v12 = vld [vmem:[%s12744_s1 + $0x1c0] sm:$0xf] }
 0x14d   : > { %v9402_v41 = vadd.f32 %v1501_v30, %v1443_v24  ;;  %v9404_v6 = vadd.f32 %v1572_v60, %v1514_v36  ;;  %1552 = vmatmul.bf16.gmra.mxu0 %v9373_v37  ;;  %1806 = vmatpush.bf16.msra.mxu1 %v7313_v16 }
 0x14e   : > { %1611 = vmatmul.bf16.gmra.mxu1 %v9384_v25  ;;  %1865 = vmatpush.bf16.msra.mxu2 %v7377_v48 }
 0x14f   : > { %12874 = vst [vmem:[#allocation18_spill] sm:$0xff] %v9404_v6  ;;  %1670 = vmatmul.bf16.gmra.mxu2 %v8923_v51  ;;  %1924 = vmatpush.bf16.msra.mxu3 %v7441_v58  ;;  %v7861_v51 = vld [vmem:[%s12744_s1 + $0x1d4] sm:$0xf0]  ;;  %v7858_v58 = vld [vmem:[%s12744_s1 + $0x1c4] sm:$0xf] }
 0x150   : > { %1729 = vmatmul.bf16.gmra.mxu3 %v8934_v5  ;;  %v7110_v5 = vld [vmem:[%s12744_s1 + $0x1d8] sm:$0xf0]  ;;  %v9427_v59 = vor.u32 %v7861_v51, %v7108_v12 }
 0x151   : > { %v9429_v36 = vor.u32 %v7858_v58, %v7110_v5 }
 0x152   : > { %v1631_v44 = vpop.f32.mrf.mxu2  ;;  %v1515_v17 = vpop.f32.mrf.mxu0 }
 0x153   : > { %v1690_v19 = vpop.f32.mrf.mxu3  ;;  %v1516_v56 = vadd.f32 %v1515_v17, %v8993_v23  ;;  %v1574_v30 = vpop.f32.mrf.mxu1 }
 0x154   : > { %v9410_v24 = vadd.f32 %v1690_v19, %v1631_v44 }
 0x155   : > { %v9413_v57 = vadd.f32 %v1574_v30, %v1516_v56 }
 0x157   : > { %12875 = vst [vmem:[#allocation19_spill] sm:$0xff] %v9413_v57 }
 0x15a   : > { %v1633_v23 = vpop.f32.mrf.mxu2  ;;  %v1518_v13 = vpop.f32.mrf.mxu0 }
 0x15b   : > { %v1692_v8 = vpop.f32.mrf.mxu3  ;;  %v1519_v16 = vadd.f32 %v1518_v13, %v8999_v34  ;;  %v1577_v48 = vpop.f32.mrf.mxu1 }
 0x15c   : > { %v9431_v60 = vadd.f32 %v1692_v8, %v1633_v23 }
 0x15d   : > { %v9434_v45 = vadd.f32 %v1577_v48, %v1519_v16  ;;  %1557 = vmatmul.bf16.gmra.mxu0 %v9427_v59 }
 0x15e   : > { %1616 = vmatmul.bf16.gmra.mxu1 %v9429_v36 }
 0x15f   : > { %1675 = vmatmul.bf16.gmra.mxu2 %v8985_v4 }
 0x160   : > { %1734 = vmatmul.bf16.gmra.mxu3 %v8987_v11 }
 0x162   : > { %v1636_v10 = vpop.f32.mrf.mxu2  ;;  %v1520_v19 = vpop.f32.mrf.mxu0 }
 0x163   : > { %v1695_v44 = vpop.f32.mrf.mxu3  ;;  %v1521_v56 = vadd.f32 %v1520_v19, %v9017_v9  ;;  %v1579_v30 = vpop.f32.mrf.mxu1 }
 0x164   : > { %v9440_v17 = vadd.f32 %v1695_v44, %v1636_v10 }
 0x165   : > { %v9443_v34 = vadd.f32 %v1579_v30, %v1521_v56 }
 0x16a   : > { %v1638_v12 = vpop.f32.mrf.mxu2  ;;  %v1523_v58 = vpop.f32.mrf.mxu0 }
 0x16b   : > { %v1697_v51 = vpop.f32.mrf.mxu3  ;;  %v1524_v23 = vadd.f32 %v1523_v58, %v9023_v32  ;;  %v1582_v4 = vpop.f32.mrf.mxu1 }
 0x16c   : > { %v9445_v5 = vadd.f32 %v1697_v51, %v1638_v12 }
 0x16d   : > { %v9448_v8 = vadd.f32 %v1582_v4, %v1524_v23  ;;  %1748 = vmatmul.bf16.vlgmr.msra.gmra.mxu0 %v8471_v42 }
 0x16e   : > { %1807 = vmatmul.bf16.vlgmr.msra.gmra.mxu1 %v8473_v43 }
 0x16f   : > { %1866 = vmatmul.bf16.vlgmr.msra.gmra.mxu2 %v9013_v50 }
 0x170   : > { %1925 = vmatmul.bf16.vlgmr.msra.gmra.mxu3 %v9015_v63 }
 0x172   : > { %v1641_v11 = vpop.f32.mrf.mxu2  ;;  %v1525_v13 = vpop.f32.mrf.mxu0 }
 0x173   : > { %v1700_v9 = vpop.f32.mrf.mxu3  ;;  %v1526_v48 = vadd.f32 %v1525_v13, %v9041_v7  ;;  %v1584_v10 = vpop.f32.mrf.mxu1 }
 0x174   : > { %v9454_v16 = vadd.f32 %v1700_v9, %v1641_v11 }
 0x175   : > { %v9457_v32 = vadd.f32 %v1584_v10, %v1526_v48 }
 0x17a   : > { %v1643_v44 = vpop.f32.mrf.mxu2  ;;  %v1528_v56 = vpop.f32.mrf.mxu0 }
 0x17b   : > { %v1702_v19 = vpop.f32.mrf.mxu3  ;;  %v1529_v43 = vadd.f32 %v1528_v56, %v9047_v33  ;;  %v1587_v50 = vpop.f32.mrf.mxu1 }
 0x17c   : > { %v9459_v42 = vadd.f32 %v1702_v19, %v1643_v44 }
 0x17d   : > { %v9462_v30 = vadd.f32 %v1587_v50, %v1529_v43  ;;  %1753 = vmatmul.bf16.gmra.mxu0 %v8507_v54 }
 0x17e   : > { %1812 = vmatmul.bf16.gmra.mxu1 %v8509_v55 }
 0x17f   : > { %1871 = vmatmul.bf16.gmra.mxu2 %v9037_v47 }
 0x180   : > { %1930 = vmatmul.bf16.gmra.mxu3 %v9039_v61 }
 0x182   : > { %v1646_v63 = vpop.f32.mrf.mxu2  ;;  %v1530_v12 = vpop.f32.mrf.mxu0 }
 0x183   : > { %v1705_v7 = vpop.f32.mrf.mxu3  ;;  %v1531_v58 = vadd.f32 %v1530_v12, %v9065_v20  ;;  %v1589_v23 = vpop.f32.mrf.mxu1 }
 0x184   : > { %v9468_v51 = vadd.f32 %v1705_v7, %v1646_v63 }
 0x185   : > { %v9471_v33 = vadd.f32 %v1589_v23, %v1531_v58 }
 0x18a   : > { %v1648_v4 = vpop.f32.mrf.mxu2  ;;  %v1533_v9 = vpop.f32.mrf.mxu0 }
 0x18b   : > { %v1707_v11 = vpop.f32.mrf.mxu3  ;;  %v1534_v55 = vadd.f32 %v1533_v9, %v9071_v40  ;;  %v1592_v47 = vpop.f32.mrf.mxu1 }
 0x18c   : > { %v9473_v54 = vadd.f32 %v1707_v11, %v1648_v4 }
 0x18d   : > { %v9476_v13 = vadd.f32 %v1592_v47, %v1534_v55  ;;  %1758 = vmatmul.bf16.gmra.mxu0 %v8543_v2 }
 0x18e   : > { %1817 = vmatmul.bf16.gmra.mxu1 %v8545_v3 }
 0x18f   : > { %1876 = vmatmul.bf16.gmra.mxu2 %v9061_v46 }
 0x190   : > { %1935 = vmatmul.bf16.gmra.mxu3 %v9063_v62 }
 0x192   : > { %v1651_v61 = vpop.f32.mrf.mxu2  ;;  %v1535_v48 = vpop.f32.mrf.mxu0 }
 0x193   : > { %v1710_v20 = vpop.f32.mrf.mxu3  ;;  %v1536_v44 = vadd.f32 %v1535_v48, %v9089_v31  ;;  %v1594_v19 = vpop.f32.mrf.mxu1 }
 0x194   : > { %v9482_v10 = vadd.f32 %v1710_v20, %v1651_v61 }
 0x195   : > { %v9485_v40 = vadd.f32 %v1594_v19, %v1536_v44 }
 0x19a   : > { %v1653_v56 = vpop.f32.mrf.mxu2  ;;  %v1538_v50 = vpop.f32.mrf.mxu0 }
 0x19b   : > { %v1712_v43 = vpop.f32.mrf.mxu3  ;;  %v1539_v3 = vadd.f32 %v1538_v50, %v9095_v22  ;;  %v1597_v46 = vpop.f32.mrf.mxu1 }
 0x19c   : > { %v9487_v2 = vadd.f32 %v1712_v43, %v1653_v56 }
 0x19d   : > { %v9490_v63 = vadd.f32 %v1597_v46, %v1539_v3  ;;  %1763 = vmatmul.bf16.gmra.mxu0 %v8579_v14  ;;  %v12876_v46 = vld [vmem:[#allocation12_spill] sm:$0xff] }
 0x19e   : > { %1822 = vmatmul.bf16.gmra.mxu1 %v8581_v15 }
 0x19f   : > { %1881 = vmatmul.bf16.gmra.mxu2 %v9085_v49 }
 0x1a0   : > { %1940 = vmatmul.bf16.gmra.mxu3 %v9087_v29 }
 0x1a2   : > { %v1656_v62 = vpop.f32.mrf.mxu2  ;;  %v1540_v7 = vpop.f32.mrf.mxu0 }
 0x1a3   : > { %v1715_v31 = vpop.f32.mrf.mxu3  ;;  %v1541_v58 = vadd.f32 %v1540_v7, %v9113_v52  ;;  %v1599_v23 = vpop.f32.mrf.mxu1 }
 0x1a4   : > { %v9496_v12 = vadd.f32 %v1715_v31, %v1656_v62 }
 0x1a5   : > { %v9499_v22 = vadd.f32 %v1599_v23, %v1541_v58 }
 0x1aa   : > { %v1658_v4 = vpop.f32.mrf.mxu2  ;;  %v1543_v9 = vpop.f32.mrf.mxu0 }
 0x1ab   : > { %v1717_v11 = vpop.f32.mrf.mxu3  ;;  %v1544_v15 = vadd.f32 %v1543_v9, %v9119_v18  ;;  %v1602_v49 = vpop.f32.mrf.mxu1  ;;  %v12880_v9 = vld [vmem:[#allocation3_spill] sm:$0xff] }
 0x1ac   : > { %v9501_v14 = vadd.f32 %v1717_v11, %v1658_v4 }
 0x1ad   : > { %v9504_v55 = vadd.f32 %v1602_v49, %v1544_v15  ;;  %1768 = vmatmul.bf16.gmra.mxu0 %v8615_v26  ;;  %v12881_v15 = vld [vmem:[#allocation10_spill] sm:$0xff]  ;;  %v12882_v49 = vld [vmem:[#allocation11_spill] sm:$0xff] }
 0x1ae   : > { %1827 = vmatmul.bf16.gmra.mxu1 %v8617_v27 }
 0x1af   : > { %1886 = vmatmul.bf16.gmra.mxu2 %v9109_v28 }
 0x1b0   : > { %1945 = vmatmul.bf16.gmra.mxu3 %v9111_v53 }
 0x1b2   : > { %v1661_v29 = vpop.f32.mrf.mxu2  ;;  %v1545_v47 = vpop.f32.mrf.mxu0 }
 0x1b3   : > { %v1720_v52 = vpop.f32.mrf.mxu3  ;;  %v1546_v20 = vadd.f32 %v1545_v47, %v9137_v0  ;;  %v1604_v48 = vpop.f32.mrf.mxu1 }
 0x1b4   : > { %v9510_v61 = vadd.f32 %v1720_v52, %v1661_v29 }
 0x1b5   : > { %v9513_v18 = vadd.f32 %v1604_v48, %v1546_v20 }
 0x1ba   : > { %v1663_v44 = vpop.f32.mrf.mxu2  ;;  %v1548_v56 = vpop.f32.mrf.mxu0 }
 0x1bb   : > { %v1722_v19 = vpop.f32.mrf.mxu3  ;;  %v1549_v27 = vadd.f32 %v1548_v56, %v9143_v21  ;;  %v1607_v28 = vpop.f32.mrf.mxu1 }
 0x1bc   : > { %v9515_v26 = vadd.f32 %v1722_v19, %v1663_v44 }
 0x1bd   : > { %v9518_v43 = vadd.f32 %v1607_v28, %v1549_v27  ;;  %1773 = vmatmul.bf16.gmra.mxu0 %v8651_v38  ;;  %v12883_v27 = vld [vmem:[#allocation17_spill] sm:$0xff] }
 0x1be   : > { %1832 = vmatmul.bf16.gmra.mxu1 %v8653_v39  ;;  %v12877_v39 = vld [vmem:[#allocation13_spill] sm:$0xff] }
 0x1bf   : > { %1891 = vmatmul.bf16.gmra.mxu2 %v9133_v35 }
 0x1c0   : > { %1950 = vmatmul.bf16.gmra.mxu3 %v9135_v1  ;;  %v12879_v1 = vld [vmem:[#allocation2_spill] sm:$0xff] }
 0x1c2   : > { %v1666_v53 = vpop.f32.mrf.mxu2  ;;  %v1550_v50 = vpop.f32.mrf.mxu0 }
 0x1c3   : > { %v1725_v0 = vpop.f32.mrf.mxu3  ;;  %v1551_v62 = vadd.f32 %v1550_v50, %v12876_v46  ;;  %v1609_v31 = vpop.f32.mrf.mxu1  ;;  %v12885_v50 = vld [vmem:[#allocation4_spill] sm:$0xff]  ;;  %v12886_v46 = vld [vmem:[#allocation5_spill] sm:$0xff] }
 0x1c4   : > { %v9524_v3 = vadd.f32 %v1725_v0, %v1666_v53 }
 0x1c5   : > { %v9527_v21 = vadd.f32 %v1609_v31, %v1551_v62  ;;  %v12887_v62 = vld [vmem:[#allocation14_spill] sm:$0xff]  ;;  %v12888_v31 = vld [vmem:[#allocation15_spill] sm:$0xff] }
 0x1ca   : > { %v1668_v7 = vpop.f32.mrf.mxu2  ;;  %v1553_v23 = vpop.f32.mrf.mxu0 }
 0x1cb   : > { %v1727_v58 = vpop.f32.mrf.mxu3  ;;  %v1554_v4 = vadd.f32 %v1553_v23, %v12877_v39  ;;  %v1612_v35 = vpop.f32.mrf.mxu1 }
 0x1cc   : > { %v9529_v38 = vadd.f32 %v1727_v58, %v1668_v7 }
 0x1cd   : > { %v9532_v11 = vadd.f32 %v1612_v35, %v1554_v4  ;;  %1778 = vmatmul.bf16.gmra.mxu0 %v12879_v1 }
 0x1ce   : > { %1837 = vmatmul.bf16.gmra.mxu1 %v12880_v9 }
 0x1cf   : > { %12878 = vst [vmem:[#allocation12_spill] sm:$0xff] %v9532_v11  ;;  %1896 = vmatmul.bf16.gmra.mxu2 %v12881_v15 }
 0x1d0   : > { %1955 = vmatmul.bf16.gmra.mxu3 %v12882_v49 }
 0x1d2   : > { %v1671_v29 = vpop.f32.mrf.mxu2  ;;  %v9538_v47 = vpop.f32.mrf.mxu0 }
 0x1d3   : > { %v1730_v52 = vpop.f32.mrf.mxu3  ;;  %v9542_v48 = vpop.f32.mrf.mxu1 }
 0x1d4   : > { %v9540_v20 = vadd.f32 %v1730_v52, %v1671_v29  ;;  %v12889_v29 = vld [vmem:[#allocation6_spill] sm:$0xff]  ;;  %v12890_v52 = vld [vmem:[#allocation7_spill] sm:$0xff] }
 0x1da   : > { %v9544_v44 = vpop.f32.mrf.mxu2  ;;  %v1558_v56 = vpop.f32.mrf.mxu0 }
 0x1db   : > { %v9546_v19 = vpop.f32.mrf.mxu3  ;;  %v1559_v28 = vadd.f32 %v1558_v56, %v12883_v27  ;;  %v1617_v53 = vpop.f32.mrf.mxu1 }
 0x1dd   : > { %v9549_v0 = vadd.f32 %v1617_v53, %v1559_v28  ;;  %1783 = vmatmul.bf16.gmra.mxu0 %v12885_v50 }
 0x1de   : > { %1842 = vmatmul.bf16.gmra.mxu1 %v12886_v46 }
 0x1df   : > { %12884 = vst [vmem:[#allocation13_spill] sm:$0xff] %v9549_v0  ;;  %1901 = vmatmul.bf16.gmra.mxu2 %v12887_v62 }
 0x1e0   : > { %1960 = vmatmul.bf16.gmra.mxu3 %v12888_v31 }
 0x1e2   : > { %v1676_v7 = vpop.f32.mrf.mxu2  ;;  %v9555_v23 = vpop.f32.mrf.mxu0 }
 0x1e3   : > { %v1735_v58 = vpop.f32.mrf.mxu3  ;;  %v9559_v4 = vpop.f32.mrf.mxu1 }
 0x1e4   : > { %v9557_v39 = vadd.f32 %v1735_v58, %v1676_v7 }
 0x1ea   : > { %v9561_v35 = vpop.f32.mrf.mxu2  ;;  %v1749_v9 = vpop.f32.mrf.mxu0 }
 0x1eb   : > { %v9563_v1 = vpop.f32.mrf.mxu3  ;;  %v1808_v15 = vpop.f32.mrf.mxu1  ;;  %v1750_v49 = vadd.f32 %v1749_v9, %v9410_v24 }
 0x1ed   : > { %1788 = vmatmul.bf16.gmra.mxu0 %v12889_v29  ;;  %v1809_v56 = vadd.f32 %v1808_v15, %v1750_v49 }
 0x1ee   : > { %1847 = vmatmul.bf16.gmra.mxu1 %v12890_v52 }
 0x1ef   : > { %1906 = vmatmul.bf16.gmra.mxu2 %v9373_v37 }
 0x1f0   : > { %1965 = vmatmul.bf16.gmra.mxu3 %v9384_v25  ;;  %v2084_v25 = vmul.f32 %v9404_v6, %v9404_v6 }
 0x1f2   : > { %v1867_v27 = vpop.f32.mrf.mxu2  ;;  %v1751_v50 = vpop.f32.mrf.mxu0 }
 0x1f3   : > { %v1868_v28 = vadd.f32 %v1867_v27, %v1809_v56  ;;  %v1926_v53 = vpop.f32.mrf.mxu3  ;;  %v1810_v46 = vpop.f32.mrf.mxu1  ;;  %v1752_v31 = vadd.f32 %v1751_v50, %v9431_v60  ;;  %v12894_v50 = vld [vmem:[#allocation9_spill] sm:$0xff] }
 0x1f5   : > { %v9570_v62 = vadd.f32 %v1926_v53, %v1868_v28  ;;  %v1811_v58 = vadd.f32 %v1810_v46, %v1752_v31  ;;  %v12893_v53 = vld [vmem:[#allocation8_spill] sm:$0xff] }
 0x1f7   : > { %12891 = vst [vmem:[#allocation2_spill] sm:$0xff] %v9570_v62  ;;  %v1977_v24 = vsel %vm1976_vm0, %v9570_v62, 0.0  ;;  %v2085_v7 = vmul.f32 %v9570_v62, %v9570_v62 }
 0x1f8   : > { %v1978_v37 = vadd.f32 %v1977_v24, %v9404_v6 }
 0x1f9   : > { %v2124_v9 = vsel %vm1976_vm0, %v2085_v7, 0.0 }
 0x1fa   : > { %v1869_v15 = vpop.f32.mrf.mxu2  ;;  %1979 = vadd.xlane.f32.xlu0 %v1978_v37  ;;  %v2125_v49 = vadd.f32 %v2124_v9, %v2084_v25  ;;  %v1754_v60 = vpop.f32.mrf.mxu0 }
 0x1fb   : > { %v1870_v29 = vadd.f32 %v1869_v15, %v1811_v58  ;;  %v1928_v52 = vpop.f32.mrf.mxu3  ;;  %v1813_v56 = vpop.f32.mrf.mxu1  ;;  %v1755_v28 = vadd.f32 %v1754_v60, %v9440_v17 }
 0x1fc   : > { %2126 = vadd.xlane.f32.xlu2 %v2125_v49 }
 0x1fd   : > { %v9581_v27 = vadd.f32 %v1928_v52, %v1870_v29  ;;  %1793 = vmatmul.bf16.gmra.mxu0 %v12893_v53  ;;  %v1814_v24 = vadd.f32 %v1813_v56, %v1755_v28 }
 0x1fe   : > { %1852 = vmatmul.bf16.gmra.mxu1 %v12894_v50 }
 0x1ff   : > { %12892 = vst [vmem:[#allocation3_spill] sm:$0xff] %v9581_v27  ;;  %1911 = vmatmul.bf16.gmra.mxu2 %v9427_v59  ;;  %v1981_v46 = vsel %vm1976_vm0, %v9581_v27, 0.0  ;;  %v2087_v7 = vmul.f32 %v9581_v27, %v9581_v27 }
 0x200   : > { %1970 = vmatmul.bf16.gmra.mxu3 %v9429_v36  ;;  %v1982_v31 = vadd.f32 %v1981_v46, %v9413_v57  ;;  %v2086_v36 = vmul.f32 %v9413_v57, %v9413_v57 }
 0x201   : > { %v2128_v49 = vsel %vm1976_vm0, %v2087_v7, 0.0 }
 0x202   : > { %v1872_v37 = vpop.f32.mrf.mxu2  ;;  %1983 = vadd.xlane.f32.xlu0 %v1982_v31  ;;  %v1756_v58 = vpop.f32.mrf.mxu0  ;;  %v2129_v60 = vadd.f32 %v2128_v49, %v2086_v36 }
 0x203   : > { %v1873_v17 = vadd.f32 %v1872_v37, %v1814_v24  ;;  %v1931_v25 = vpop.f32.mrf.mxu3  ;;  %v1815_v9 = vpop.f32.mrf.mxu1  ;;  %v1757_v15 = vadd.f32 %v1756_v58, %v9445_v5 }
 0x205   : > { %v9593_v59 = vadd.f32 %v1931_v25, %v1873_v17  ;;  %v1816_v56 = vadd.f32 %v1815_v9, %v1757_v15  ;;  %v2088_v17 = vmul.f32 %v9434_v45, %v9434_v45  ;;  %v2090_v9 = vmul.f32 %v9443_v34, %v9443_v34 }
 0x207   : > { %12895 = vst [vmem:[#allocation10_spill] sm:$0xff] %v9593_v59  ;;  %v1985_v29 = vsel %vm1976_vm0, %v9593_v59, 0.0  ;;  %v2089_v28 = vmul.f32 %v9593_v59, %v9593_v59 }
 0x208   : > { %v1986_v52 = vadd.f32 %v1985_v29, %v9434_v45 }
 0x209   : > { %v2132_v37 = vsel %vm1976_vm0, %v2089_v28, 0.0 }
 0x20a   : > { %v1874_v53 = vpop.f32.mrf.mxu2  ;;  %1987 = vadd.xlane.f32.xlu1 %v1986_v52  ;;  %2130 = vadd.xlane.f32.xlu0 %v2129_v60  ;;  %v1759_v46 = vpop.f32.mrf.mxu0  ;;  %v2133_v58 = vadd.f32 %v2132_v37, %v2088_v17 }
 0x20b   : > { %v1875_v50 = vadd.f32 %v1874_v53, %v1816_v56  ;;  %v1933_v5 = vpop.f32.mrf.mxu3  ;;  %v1818_v31 = vpop.f32.mrf.mxu1  ;;  %v1760_v7 = vadd.f32 %v1759_v46, %v9454_v16 }
 0x20d   : > { %v9604_v24 = vadd.f32 %v1933_v5, %v1875_v50  ;;  %v1819_v15 = vadd.f32 %v1818_v31, %v1760_v7  ;;  %v2092_v7 = vmul.f32 %v9448_v8, %v9448_v8 }
 0x20f   : > { %v2091_v25 = vmul.f32 %v9604_v24, %v9604_v24  ;;  %v1989_v50 = vsel %vm1976_vm0, %v9604_v24, 0.0 }
 0x210   : > { %v1990_v31 = vadd.f32 %v1989_v50, %v9443_v34 }
 0x211   : > { %v2136_v49 = vsel %vm1976_vm0, %v2091_v25, 0.0 }
 0x212   : > { %v1877_v36 = vpop.f32.mrf.mxu2  ;;  %2134 = vadd.xlane.f32.xlu1 %v2133_v58  ;;  %v2137_v29 = vadd.f32 %v2136_v49, %v2090_v9  ;;  %v1761_v60 = vpop.f32.mrf.mxu0 }
 0x213   : > { %v1878_v52 = vadd.f32 %v1877_v36, %v1819_v15  ;;  %v1936_v16 = vpop.f32.mrf.mxu3  ;;  %v1820_v56 = vpop.f32.mrf.mxu1  ;;  %v1762_v53 = vadd.f32 %v1761_v60, %v9459_v42 }
 0x214   : > { %2138 = vadd.xlane.f32.xlu2 %v2137_v29 }
 0x215   : > { %v9615_v28 = vadd.f32 %v1936_v16, %v1878_v52  ;;  %v1821_v37 = vadd.f32 %v1820_v56, %v1762_v53  ;;  %v2094_v56 = vmul.f32 %v9457_v32, %v9457_v32 }
 0x217   : > { %v1993_v5 = vsel %vm1976_vm0, %v9615_v28, 0.0  ;;  %v2093_v46 = vmul.f32 %v9615_v28, %v9615_v28 }
 0x218   : > { %v1994_v42 = vadd.f32 %v1993_v5, %v9448_v8 }
 0x219   : > { %v2140_v17 = vsel %vm1976_vm0, %v2093_v46, 0.0 }
 0x21a   : > { %v1879_v25 = vpop.f32.mrf.mxu2  ;;  %1991 = vadd.xlane.f32.xlu1 %v1990_v31  ;;  %v2141_v58 = vadd.f32 %v2140_v17, %v2092_v7  ;;  %v1764_v49 = vpop.f32.mrf.mxu0 }
 0x21b   : > { %v1880_v9 = vadd.f32 %v1879_v25, %v1821_v37  ;;  %v1938_v15 = vpop.f32.mrf.mxu3  ;;  %v1823_v36 = vpop.f32.mrf.mxu1  ;;  %v1765_v52 = vadd.f32 %v1764_v49, %v9468_v51  ;;  %v2096_v49 = vmul.f32 %v9462_v30, %v9462_v30 }
 0x21c   : > { %1995 = vadd.xlane.f32.xlu2 %v1994_v42  ;;  %2142 = vadd.xlane.f32.xlu0 %v2141_v58 }
 0x21d   : > { %v9629_v29 = vadd.f32 %v1938_v15, %v1880_v9  ;;  %v1824_v53 = vadd.f32 %v1823_v36, %v1765_v52 }
 0x21f   : > { %v2095_v16 = vmul.f32 %v9629_v29, %v9629_v29  ;;  %v1997_v60 = vsel %vm1976_vm0, %v9629_v29, 0.0 }
 0x220   : > { %v1998_v31 = vadd.f32 %v1997_v60, %v9457_v32 }
 0x221   : > { %v2144_v50 = vsel %vm1976_vm0, %v2095_v16, 0.0 }
 0x222   : > { %v1882_v5 = vpop.f32.mrf.mxu2  ;;  %v2145_v46 = vadd.f32 %v2144_v50, %v2094_v56  ;;  %v1766_v17 = vpop.f32.mrf.mxu0 }
 0x223   : > { %v1883_v7 = vadd.f32 %v1882_v5, %v1824_v53  ;;  %v1941_v37 = vpop.f32.mrf.mxu3  ;;  %v1825_v51 = vpop.f32.mrf.mxu1  ;;  %v1767_v42 = vadd.f32 %v1766_v17, %v9473_v54  ;;  %v2098_v17 = vmul.f32 %v9471_v33, %v9471_v33 }
 0x224   : > { %2146 = vadd.xlane.f32.xlu1 %v2145_v46  ;;  %1999 = vadd.xlane.f32.xlu2 %v1998_v31 }
 0x225   : > { %v9640_v25 = vadd.f32 %v1941_v37, %v1883_v7  ;;  %v1826_v36 = vadd.f32 %v1825_v51, %v1767_v42 }
 0x227   : > { %v2001_v58 = vsel %vm1976_vm0, %v9640_v25, 0.0  ;;  %v2097_v9 = vmul.f32 %v9640_v25, %v9640_v25 }
 0x228   : > { %v2002_v15 = vadd.f32 %v2001_v58, %v9462_v30 }
 0x229   : > { %v2148_v52 = vsel %vm1976_vm0, %v2097_v9, 0.0 }
 0x22a   : > { %v1884_v16 = vpop.f32.mrf.mxu2  ;;  %2003 = vadd.xlane.f32.xlu0 %v2002_v15  ;;  %v2149_v60 = vadd.f32 %v2148_v52, %v2096_v49  ;;  %v1769_v54 = vpop.f32.mrf.mxu0 }
 0x22b   : > { %v1885_v56 = vadd.f32 %v1884_v16, %v1826_v36  ;;  %v1943_v53 = vpop.f32.mrf.mxu3  ;;  %v1828_v50 = vpop.f32.mrf.mxu1  ;;  %v1770_v46 = vadd.f32 %v1769_v54, %v9482_v10  ;;  %v2100_v54 = vmul.f32 %v9476_v13, %v9476_v13 }
 0x22c   : > { %2150 = vadd.xlane.f32.xlu2 %v2149_v60 }
 0x22d   : > { %v9651_v5 = vadd.f32 %v1943_v53, %v1885_v56  ;;  %v1829_v51 = vadd.f32 %v1828_v50, %v1770_v46 }
 0x22f   : > { %v2005_v31 = vsel %vm1976_vm0, %v9651_v5, 0.0  ;;  %v2099_v7 = vmul.f32 %v9651_v5, %v9651_v5 }
 0x230   : > { %v2006_v37 = vadd.f32 %v2005_v31, %v9471_v33 }
 0x231   : > { %v2152_v42 = vsel %vm1976_vm0, %v2099_v7, 0.0 }
 0x232   : > { %v1887_v58 = vpop.f32.mrf.mxu2  ;;  %2007 = vadd.xlane.f32.xlu1 %v2006_v37  ;;  %v2153_v9 = vadd.f32 %v2152_v42, %v2098_v17  ;;  %v1771_v10 = vpop.f32.mrf.mxu0 }
 0x233   : > { %v1888_v15 = vadd.f32 %v1887_v58, %v1829_v51  ;;  %v1946_v49 = vpop.f32.mrf.mxu3  ;;  %v1830_v36 = vpop.f32.mrf.mxu1  ;;  %v1772_v16 = vadd.f32 %v1771_v10, %v9487_v2  ;;  %v2102_v10 = vmul.f32 %v9485_v40, %v9485_v40 }
 0x234   : > { %2154 = vadd.xlane.f32.xlu0 %v2153_v9 }
 0x235   : > { %v9662_v52 = vadd.f32 %v1946_v49, %v1888_v15  ;;  %v1831_v50 = vadd.f32 %v1830_v36, %v1772_v16 }
 0x237   : > { %v2009_v60 = vsel %vm1976_vm0, %v9662_v52, 0.0  ;;  %v2101_v56 = vmul.f32 %v9662_v52, %v9662_v52 }
 0x238   : > { %v2010_v53 = vadd.f32 %v2009_v60, %v9476_v13 }
 0x239   : > { %v2156_v46 = vsel %vm1976_vm0, %v2101_v56, 0.0 }
 0x23a   : > { %v1889_v31 = vpop.f32.mrf.mxu2  ;;  %2011 = vadd.xlane.f32.xlu2 %v2010_v53  ;;  %v2157_v7 = vadd.f32 %v2156_v46, %v2100_v54  ;;  %v1774_v2 = vpop.f32.mrf.mxu0 }
 0x23b   : > { %v1890_v37 = vadd.f32 %v1889_v31, %v1831_v50  ;;  %v1948_v17 = vpop.f32.mrf.mxu3  ;;  %v1833_v51 = vpop.f32.mrf.mxu1  ;;  %v1775_v58 = vadd.f32 %v1774_v2, %v9496_v12  ;;  %v2104_v2 = vmul.f32 %v9490_v63, %v9490_v63 }
 0x23c   : > { %2158 = vadd.xlane.f32.xlu1 %v2157_v7 }
 0x23d   : > { %v9673_v42 = vadd.f32 %v1948_v17, %v1890_v37  ;;  %v1834_v36 = vadd.f32 %v1833_v51, %v1775_v58 }
 0x23f   : > { %v2013_v9 = vsel %vm1976_vm0, %v9673_v42, 0.0  ;;  %v2103_v15 = vmul.f32 %v9673_v42, %v9673_v42 }
 0x240   : > { %v2014_v49 = vadd.f32 %v2013_v9, %v9485_v40 }
 0x241   : > { %v2160_v16 = vsel %vm1976_vm0, %v2103_v15, 0.0 }
 0x242   : > { %v1892_v60 = vpop.f32.mrf.mxu2  ;;  %2015 = vadd.xlane.f32.xlu0 %v2014_v49  ;;  %v2161_v56 = vadd.f32 %v2160_v16, %v2102_v10  ;;  %v1776_v12 = vpop.f32.mrf.mxu0 }
 0x243   : > { %v1893_v53 = vadd.f32 %v1892_v60, %v1834_v36  ;;  %v1951_v54 = vpop.f32.mrf.mxu3  ;;  %v1835_v50 = vpop.f32.mrf.mxu1  ;;  %v1777_v31 = vadd.f32 %v1776_v12, %v9501_v14  ;;  %v2106_v12 = vmul.f32 %v9499_v22, %v9499_v22 }
 0x244   : > { %2162 = vadd.xlane.f32.xlu2 %v2161_v56 }
 0x245   : > { %v9684_v46 = vadd.f32 %v1951_v54, %v1893_v53  ;;  %v1836_v51 = vadd.f32 %v1835_v50, %v1777_v31 }
 0x247   : > { %v2017_v7 = vsel %vm1976_vm0, %v9684_v46, 0.0  ;;  %v2105_v37 = vmul.f32 %v9684_v46, %v9684_v46 }
 0x248   : > { %v2018_v17 = vadd.f32 %v2017_v7, %v9490_v63 }
 0x249   : > { %v2164_v58 = vsel %vm1976_vm0, %v2105_v37, 0.0 }
 0x24a   : > { %v1894_v9 = vpop.f32.mrf.mxu2  ;;  %2019 = vadd.xlane.f32.xlu1 %v2018_v17  ;;  %v2165_v15 = vadd.f32 %v2164_v58, %v2104_v2  ;;  %v1779_v14 = vpop.f32.mrf.mxu0  ;;  %v8201_v17 = vmov 196.0  }
 0x24b   : > { %v1895_v49 = vadd.f32 %v1894_v9, %v1836_v51  ;;  %v1953_v10 = vpop.f32.mrf.mxu3  ;;  %v1838_v36 = vpop.f32.mrf.mxu1  ;;  %v1780_v60 = vadd.f32 %v1779_v14, %v9510_v61  ;;  %8031 = vrcp.f32 %v8201_v17 }
 0x24c   : > { %2166 = vadd.xlane.f32.xlu0 %v2165_v15 }
 0x24d   : > { %v9695_v16 = vadd.f32 %v1953_v10, %v1895_v49  ;;  %v1839_v50 = vadd.f32 %v1838_v36, %v1780_v60  ;;  %v2108_v60 = vmul.f32 %v9504_v55, %v9504_v55 }
 0x24f   : > { %v2021_v56 = vsel %vm1976_vm0, %v9695_v16, 0.0  ;;  %v2107_v53 = vmul.f32 %v9695_v16, %v9695_v16 }
 0x250   : > { %v2022_v54 = vadd.f32 %v2021_v56, %v9499_v22 }
 0x251   : > { %v2168_v31 = vsel %vm1976_vm0, %v2107_v53, 0.0  ;;  %v8032_v14 = vpop.eup %8031 }
 0x252   : > { %v1897_v7 = vpop.f32.mrf.mxu2  ;;  %2023 = vadd.xlane.f32.xlu2 %v2022_v54  ;;  %v2169_v37 = vadd.f32 %v2168_v31, %v2106_v12  ;;  %v1781_v51 = vpop.f32.mrf.mxu0  ;;  %vm2062_vm1 = vweird.f32 %v8032_v14 }
 0x253   : > { %v1898_v61 = vadd.f32 %v1897_v7, %v1839_v50  ;;  %v1956_v2 = vpop.f32.mrf.mxu3  ;;  %v1840_v58 = vpop.f32.mrf.mxu1  ;;  %v1782_v15 = vadd.f32 %v1781_v51, %v9515_v26  ;;  %v2058_v7 = vmul.f32 196.0, %v8032_v14 }
 0x254   : > { %2170 = vadd.xlane.f32.xlu1 %v2169_v37 }
 0x255   : > { %v9706_v9 = vadd.f32 %v1956_v2, %v1898_v61  ;;  %v1841_v56 = vadd.f32 %v1840_v58, %v1782_v15  ;;  %v2059_v58 = vsub.f32 1.0, %v2058_v7 }
 0x257   : > { %v2025_v49 = vsel %vm1976_vm0, %v9706_v9, 0.0  ;;  %v2109_v10 = vmul.f32 %v9706_v9, %v9706_v9 }
 0x258   : > { %v2026_v36 = vadd.f32 %v2025_v49, %v9504_v55  ;;  %v2110_v49 = vmul.f32 %v9513_v18, %v9513_v18 }
 0x259   : > { %v2172_v53 = vsel %vm1976_vm0, %v2109_v10, 0.0 }
 0x25a   : > { %v1899_v54 = vpop.f32.mrf.mxu2  ;;  %2027 = vadd.xlane.f32.xlu0 %v2026_v36  ;;  %v2173_v12 = vadd.f32 %v2172_v53, %v2108_v60  ;;  %v1784_v31 = vpop.f32.mrf.mxu0 }
 0x25b   : > { %v1900_v50 = vadd.f32 %v1899_v54, %v1841_v56  ;;  %v1958_v26 = vpop.f32.mrf.mxu3  ;;  %v1843_v37 = vpop.f32.mrf.mxu1  ;;  %v1785_v61 = vadd.f32 %v1784_v31, %v9524_v3 }
 0x25c   : > { %2174 = vadd.xlane.f32.xlu2 %v2173_v12  ;;  %v2060_v12 = vmul.f32 %v8032_v14, %v2059_v58 }
 0x25d   : > { %v9717_v17 = vadd.f32 %v1958_v26, %v1900_v50  ;;  %v1844_v10 = vadd.f32 %v1843_v37, %v1785_v61 }
 0x25e   : > { %v2061_v61 = vadd.f32 %v8032_v14, %v2060_v12 }
 0x25f   : > { %v2029_v2 = vsel %vm1976_vm0, %v9717_v17, 0.0  ;;  %v2111_v51 = vmul.f32 %v9717_v17, %v9717_v17 }
 0x260   : > { %v2030_v15 = vadd.f32 %v2029_v2, %v9513_v18 }
 0x261   : > { %v2176_v36 = vsel %vm1976_vm0, %v2111_v51, 0.0  ;;  %v2112_v51 = vmul.f32 %v9518_v43, %v9518_v43 }
 0x262   : > { %v1902_v60 = vpop.f32.mrf.mxu2  ;;  %2031 = vadd.xlane.f32.xlu1 %v2030_v15  ;;  %v2177_v56 = vadd.f32 %v2176_v36, %v2110_v49  ;;  %v1786_v54 = vpop.f32.mrf.mxu0 }
 0x263   : > { %v1903_v53 = vadd.f32 %v1902_v60, %v1844_v10  ;;  %v1961_v3 = vpop.f32.mrf.mxu3  ;;  %v1845_v50 = vpop.f32.mrf.mxu1  ;;  %v1787_v31 = vadd.f32 %v1786_v54, %v9529_v38 }
 0x264   : > { %2178 = vadd.xlane.f32.xlu0 %v2177_v56  ;;  %v9739_v56 = vsel %vm2062_vm1, %v8032_v14, %v2061_v61 }
 0x265   : > { %v9728_v26 = vadd.f32 %v1961_v3, %v1903_v53  ;;  %v1846_v58 = vadd.f32 %v1845_v50, %v1787_v31  ;;  %12896 = vst [vmem:[#allocation11_spill] sm:$0xff] %v9739_v56 }
 0x267   : > { %v2033_v7 = vsel %vm1976_vm0, %v9728_v26, 0.0  ;;  %v2113_v37 = vmul.f32 %v9728_v26, %v9728_v26 }
 0x268   : > { %v2034_v2 = vadd.f32 %v2033_v7, %v9518_v43 }
 0x269   : > { %v2180_v15 = vsel %vm1976_vm0, %v2113_v37, 0.0 }
 0x26a   : > { %v1904_v49 = vpop.f32.mrf.mxu2  ;;  %2035 = vadd.xlane.f32.xlu2 %v2034_v2  ;;  %v2181_v10 = vadd.f32 %v2180_v15, %v2112_v51  ;;  %v1789_v60 = vpop.f32.mrf.mxu0 }
 0x26b   : > { %v1905_v38 = vadd.f32 %v1904_v49, %v1846_v58  ;;  %v1963_v36 = vpop.f32.mrf.mxu3  ;;  %v1848_v53 = vpop.f32.mrf.mxu1  ;;  %v1790_v54 = vadd.f32 %v1789_v60, %v9540_v20  ;;  %v2114_v20 = vmul.f32 %v9527_v21, %v9527_v21 }
 0x26c   : > { %2182 = vadd.xlane.f32.xlu1 %v2181_v10 }
 0x26d   : > { %v9741_v3 = vadd.f32 %v1963_v36, %v1905_v38  ;;  %v1980_v12 = vpop.xlane.xlu0 %1979  ;;  %v1849_v51 = vadd.f32 %v1848_v53, %v1790_v54  ;;  %v1733_v38 = vadd.f32 %v9546_v19, %v9544_v44 }
 0x26e   : > { %v9745_v7 = vmul.f32 %v9739_v56, %v1980_v12 }
 0x26f   : > { %v2127_v50 = vpop.xlane.xlu2 %2126  ;;  %v2037_v31 = vsel %vm1976_vm0, %v9741_v3, 0.0  ;;  %v2115_v37 = vmul.f32 %v9741_v3, %v9741_v3 }
 0x270   : > { %v2224_v14 = vmul.f32 %v9745_v7, %v9745_v7  ;;  %v2204_v61 = vmul.f32 %v2127_v50, %v9739_v56  ;;  %v2038_v2 = vadd.f32 %v2037_v31, %v9527_v21 }
 0x271   : > { %v2184_v58 = vsel %vm1976_vm0, %v2115_v37, 0.0 }
 0x272   : > { %v2244_v15 = vsub.f32 %v2204_v61, %v2224_v14  ;;  %v1907_v49 = vpop.f32.mrf.mxu2  ;;  %2039 = vadd.xlane.f32.xlu0 %v2038_v2  ;;  %v2185_v10 = vadd.f32 %v2184_v58, %v2114_v20  ;;  %v1791_v12 = vpop.f32.mrf.mxu0  ;;  %v12898_v14 = vld [vmem:[#allocation16_spill] sm:$0xff]  ;;  %v2116_v61 = vmul.f32 %v9532_v11, %v9532_v11 }
 0x273   : > { %v1908_v36 = vadd.f32 %v1907_v49, %v1849_v51  ;;  %v1966_v60 = vpop.f32.mrf.mxu3  ;;  %v1850_v50 = vpop.f32.mrf.mxu1  ;;  %v1792_v6 = vadd.f32 %v1791_v12, %v1733_v38  ;;  %v1556_v44 = vadd.f32 %v9538_v47, %v12898_v14 }
 0x274   : > { %v2264_v62 = vmax.f32 %v2244_v15, 0.0  ;;  %2186 = vadd.xlane.f32.xlu2 %v2185_v10 }
 0x275   : > { %v9760_v31 = vadd.f32 %v1966_v60, %v1908_v36  ;;  %v1984_v27 = vpop.xlane.xlu0 %1983  ;;  %v1851_v2 = vadd.f32 %v1850_v50, %v1792_v6  ;;  %v9779_v47 = vadd.f32 %v9542_v48, %v1556_v44  ;;  %v8202_v50 = vmov 0  }
 0x276   : > { %v9762_v53 = vadd.f32 0.001, %v2264_v62  ;;  %v9776_v62 = vmul.f32 %v9739_v56, %v1984_v27  ;;  %8028 = vset.pattern.permute.xlu1 %v8202_v50  ;;  %8029 = vset.pattern.permute.xlu2 %v8202_v50 }
 0x277   : > { %12897 = vst [vmem:[#allocation17_spill] sm:$0xff] %v9760_v31  ;;  %v2041_v54 = vsel %vm1976_vm0, %v9760_v31, 0.0  ;;  %v2117_v37 = vmul.f32 %v9760_v31, %v9760_v31  ;;  %8030 = vset.pattern.permute.xlu0 %v8202_v50 }
 0x278   : > { %v2042_v19 = vadd.f32 %v2041_v54, %v9532_v11  ;;  %8033 = vrsqrt.f32 %v9762_v53  ;;  %12899 = vst [vmem:[#allocation4_spill] sm:$0xff] %v9779_v47  ;;  %v2225_v27 = vmul.f32 %v9776_v62, %v9776_v62  ;;  %vm2330_vm3 = vweird.f32 %v9762_v53 }
 0x279   : > { %v2188_v20 = vsel %vm1976_vm0, %v2117_v37, 0.0 }
 0x27a   : > { %v1909_v51 = vpop.f32.mrf.mxu2  ;;  %2043 = vadd.xlane.f32.xlu1 %v2042_v19  ;;  %v2189_v58 = vadd.f32 %v2188_v20, %v2116_v61  ;;  %v1794_v10 = vpop.f32.mrf.mxu0  ;;  %v2118_v19 = vmul.f32 %v9779_v47, %v9779_v47 }
 0x27b   : > { %v1910_v15 = vadd.f32 %v1909_v51, %v1851_v2  ;;  %v1968_v49 = vpop.f32.mrf.mxu3  ;;  %v1853_v38 = vpop.f32.mrf.mxu1  ;;  %v1795_v6 = vadd.f32 %v1794_v10, %v9557_v39 }
 0x27c   : > { %2190 = vadd.xlane.f32.xlu0 %v2189_v58 }
 0x27d   : > { %v9781_v36 = vadd.f32 %v1968_v49, %v1910_v15  ;;  %v1988_v60 = vpop.xlane.xlu1 %1987  ;;  %v2131_v12 = vpop.xlane.xlu0 %2130  ;;  %v1854_v61 = vadd.f32 %v1853_v38, %v1795_v6  ;;  %v1738_v49 = vadd.f32 %v9563_v1, %v9561_v35 }
 0x27e   : > { %v2205_v54 = vmul.f32 %v2131_v12, %v9739_v56  ;;  %v9791_v14 = vpop.eup %8033  ;;  %v9798_v20 = vmul.f32 %v9739_v56, %v1988_v60 }
 0x27f   : > { %12900 = vst [vmem:[#allocation5_spill] sm:$0xff] %v9781_v36  ;;  %v2045_v48 = vsel %vm1976_vm0, %v9781_v36, 0.0  ;;  %v2119_v37 = vmul.f32 %v9781_v36, %v9781_v36  ;;  %v2325_v10 = vmul.f32 %v9791_v14, %v9762_v53  ;;  %vm2331_vm2 = vweird.f32 %v9791_v14 }
 0x280   : > { %v2245_v39 = vsub.f32 %v2205_v54, %v2225_v27  ;;  %v2046_v44 = vadd.f32 %v2045_v48, %v9779_v47  ;;  %v2226_v48 = vmul.f32 %v9798_v20, %v9798_v20  ;;  %vm2332_vm4 = vmor %vm2330_vm3, %vm2331_vm2 }
 0x281   : > { %v2192_v2 = vsel %vm1976_vm0, %v2119_v37, 0.0  ;;  %v2326_v37 = vmul.f32 %v9791_v14, %v2325_v10 }
 0x282   : > { %v2265_v51 = vmax.f32 %v2245_v39, 0.0  ;;  %v1912_v58 = vpop.f32.mrf.mxu2  ;;  %2047 = vadd.xlane.f32.xlu2 %v2046_v44  ;;  %v2193_v15 = vadd.f32 %v2192_v2, %v2118_v19  ;;  %v1796_v50 = vpop.f32.mrf.mxu0 }
 0x283   : > { %v1913_v12 = vadd.f32 %v1912_v58, %v1854_v61  ;;  %v1971_v27 = vpop.f32.mrf.mxu3  ;;  %v1797_v38 = vadd.f32 %v1796_v50, %v1738_v49  ;;  %v1855_v1 = vpop.f32.mrf.mxu1  ;;  %v1561_v61 = vadd.f32 %v9555_v23, %v9402_v41  ;;  %v2120_v58 = vmul.f32 %v9549_v0, %v9549_v0 }
 0x284   : > { %v9804_v54 = vadd.f32 0.001, %v2265_v51  ;;  %2194 = vadd.xlane.f32.xlu1 %v2193_v15 }
 0x285   : > { %v9806_v6 = vadd.f32 %v1971_v27, %v1913_v12  ;;  %v2135_v60 = vpop.xlane.xlu1 %2134  ;;  %v1856_v15 = vadd.f32 %v1855_v1, %v1797_v38  ;;  %v2327_v27 = vmul.f32 0.5, %v2326_v37  ;;  %v9826_v41 = vadd.f32 %v9559_v4, %v1561_v61 }
 0x286   : > { %8035 = vrsqrt.f32 %v9804_v54  ;;  %v2206_v35 = vmul.f32 %v2135_v60, %v9739_v56  ;;  %vm2340_vm6 = vweird.f32 %v9804_v54 }
 0x287   : > { %12901 = vst [vmem:[#allocation14_spill] sm:$0xff] %v9806_v6  ;;  %v2139_v39 = vpop.xlane.xlu2 %2138  ;;  %v2049_v44 = vsel %vm1976_vm0, %v9806_v6, 0.0  ;;  %v2121_v19 = vmul.f32 %v9806_v6, %v9806_v6  ;;  %v2328_v61 = vsub.f32 1.5, %v2327_v27 }
 0x288   : > { %v2246_v2 = vsub.f32 %v2206_v35, %v2226_v48  ;;  %v2050_v51 = vadd.f32 %v2049_v44, %v9549_v0  ;;  %12902 = vst [vmem:[#allocation15_spill] sm:$0xff] %v9826_v41 }
 0x289   : > { %v2196_v49 = vsel %vm1976_vm0, %v2121_v19, 0.0 }
 0x28a   : > { %v2266_v10 = vmax.f32 %v2246_v2, 0.0  ;;  %v1914_v12 = vpop.f32.mrf.mxu2  ;;  %2051 = vadd.xlane.f32.xlu0 %v2050_v51  ;;  %v2197_v50 = vadd.f32 %v2196_v49, %v2120_v58  ;;  %v2207_v2 = vmul.f32 %v2139_v39, %v9739_v56  ;;  %v2122_v58 = vmul.f32 %v9826_v41, %v9826_v41 }
 0x28b   : > { %v1915_v60 = vadd.f32 %v1914_v12, %v1856_v15  ;;  %v1973_v31 = vpop.f32.mrf.mxu3  ;;  %v2329_v39 = vmul.f32 %v9791_v14, %v2328_v61 }
 0x28c   : > { %v9823_v11 = vpop.eup %8035  ;;  %v2306_v23 = vadd.f32 0.001, %v2266_v10  ;;  %2198 = vadd.xlane.f32.xlu2 %v2197_v50 }
 0x28d   : > { %v2335_v48 = vmul.f32 %v9823_v11, %v9804_v54  ;;  %v9830_v38 = vadd.f32 %v1973_v31, %v1915_v60  ;;  %v1992_v35 = vpop.xlane.xlu1 %1991  ;;  %v2333_v61 = vsel %vm2332_vm4, %v9791_v14, %v2329_v39  ;;  %vm2341_vm5 = vweird.f32 %v9823_v11 }
 0x28e   : > { %8037 = vrsqrt.f32 %v2306_v23  ;;  %v9833_v1 = vmul.f32 %v9739_v56, %v1992_v35  ;;  %vm2342_vm8 = vmor %vm2340_vm6, %vm2341_vm5  ;;  %vm2350_vm9 = vweird.f32 %v2306_v23 }
 0x28f   : > { %12903 = vst [vmem:[#allocation6_spill] sm:$0xff] %v9830_v38  ;;  %v2336_v37 = vmul.f32 %v9823_v11, %v2335_v48  ;;  %v1996_v44 = vpop.xlane.xlu2 %1995  ;;  %v2143_v19 = vpop.xlane.xlu0 %2142  ;;  %v2123_v4 = vmul.f32 %v9830_v38, %v9830_v38 }
 0x290   : > { %v2227_v51 = vmul.f32 %v9833_v1, %v9833_v1  ;;  %v9842_v31 = vmul.f32 %v9739_v56, %v1996_v44  ;;  %v2208_v50 = vmul.f32 %v2143_v19, %v9739_v56  ;;  %v2284_v19 = vld [vmem:[%s12745_s2] sm:$0xff] }
 0x291   : > { %v2337_v15 = vmul.f32 0.5, %v2336_v37  ;;  %v2200_v49 = vsel %vm1976_vm0, %v2123_v4, 0.0 }
 0x292   : > { %v2247_v10 = vsub.f32 %v2207_v2, %v2227_v51  ;;  %v2228_v12 = vmul.f32 %v9842_v31, %v9842_v31  ;;  %v2201_v27 = vadd.f32 %v2200_v49, %v2122_v58 }
 0x293   : > { %v2338_v60 = vsub.f32 1.5, %v2337_v15 }
 0x294   : > { %v8038_v48 = vpop.eup %8037  ;;  %v2267_v35 = vmax.f32 %v2247_v10, 0.0  ;;  %v2248_v44 = vsub.f32 %v2208_v50, %v2228_v12  ;;  %2202 = vadd.xlane.f32.xlu0 %v2201_v27  ;;  %v2285_v27 = vld [vmem:[%s12745_s2 + $0x8] sm:$0xff] }
 0x295   : > { %v2345_v36 = vmul.f32 %v8038_v48, %v2306_v23  ;;  %v2339_v58 = vmul.f32 %v9823_v11, %v2338_v60  ;;  %vm2351_vm7 = vweird.f32 %v8038_v48 }
 0x296   : > { %v9853_v37 = vadd.f32 0.001, %v2267_v35  ;;  %v2268_v4 = vmax.f32 %v2248_v44, 0.0  ;;  %vm2352_vm10 = vmor %vm2350_vm9, %vm2351_vm7 }
 0x297   : > { %v2346_v2 = vmul.f32 %v8038_v48, %v2345_v36  ;;  %v2000_v51 = vpop.xlane.xlu2 %1999  ;;  %v2147_v53 = vpop.xlane.xlu1 %2146  ;;  %v2524_v36 = vmul.f32 %v2333_v61, %v2284_v19  ;;  %v2343_v39 = vsel %vm2342_vm8, %v9823_v11, %v2339_v58  ;;  %v2286_v11 = vld [vmem:[%s12745_s2 + $0x10] sm:$0xff]  ;;  %v2544_v58 = vld [vmem:[%s12746_s3] sm:$0xff] }
 0x298   : > { %8039 = vrsqrt.f32 %v9853_v37  ;;  %v2308_v15 = vadd.f32 0.001, %v2268_v4  ;;  %v9863_v10 = vmul.f32 %v9739_v56, %v2000_v51  ;;  %v2209_v14 = vmul.f32 %v2147_v53, %v9739_v56 }
 0x299   : > { %v2347_v49 = vmul.f32 0.5, %v2346_v2  ;;  %v2525_v44 = vmul.f32 %v2343_v39, %v2285_v27  ;;  %v2564_v19 = vmul.f32 %v2524_v36, %v9745_v7  ;;  %vm2360_vm15 = vweird.f32 %v9853_v37 }
 0x29a   : > { %8041 = vrsqrt.f32 %v2308_v15  ;;  %v2229_v50 = vmul.f32 %v9863_v10, %v9863_v10  ;;  %vm2370_vm12 = vweird.f32 %v2308_v15 }
 0x29b   : > { %v2348_v12 = vsub.f32 1.5, %v2347_v49 }
 0x29c   : > { %v2249_v60 = vsub.f32 %v2209_v14, %v2229_v50  ;;  %v2565_v14 = vmul.f32 %v2525_v44, %v9776_v62 }
 0x29d   : > { %2606 = vperm.xlu1 %8028, %v2524_v36   ;;  %v2349_v54 = vmul.f32 %v8038_v48, %v2348_v12  ;;  %v9877_v51 = vpop.xlane.xlu0 %2003  ;;  %v2584_v36 = vsub.f32 %v2544_v58, %v2564_v19  ;;  %v2546_v58 = vld [vmem:[%s12746_s3 + $0x10] sm:$0xff] }
 0x29e   : > { %v9873_v35 = vpop.eup %8039  ;;  %v2269_v2 = vmax.f32 %v2249_v60, 0.0 }
 0x29f   : > { %v2355_v4 = vmul.f32 %v9873_v35, %v9853_v37  ;;  %v2353_v23 = vsel %vm2352_vm10, %v8038_v48, %v2349_v54  ;;  %v2545_v48 = vld [vmem:[%s12746_s3 + $0x8] sm:$0xff]  ;;  %v9894_v60 = vpop.xlane.xlu2 %2150  ;;  %vm2361_vm14 = vweird.f32 %v9873_v35 }
 0x2a0   : > { %v8042_v61 = vpop.eup %8041  ;;  %v9887_v12 = vadd.f32 0.001, %v2269_v2  ;;  %v2526_v50 = vmul.f32 %v2353_v23, %v2286_v11  ;;  %v2585_v62 = vsub.f32 %v2545_v48, %v2565_v14  ;;  %vm2362_vm1 = vmor %vm2360_vm15, %vm2361_vm14 }
 0x2a1   : > { %v2356_v53 = vmul.f32 %v9873_v35, %v2355_v4  ;;  %v2365_v49 = vmul.f32 %v8042_v61, %v2308_v15  ;;  %vm2371_vm11 = vweird.f32 %v8042_v61 }
 0x2a2   : > { %8043 = vrsqrt.f32 %v9887_v12  ;;  %v2566_v2 = vmul.f32 %v2526_v50, %v9798_v20  ;;  %vm9906_vm13 = vmor %vm2370_vm12, %vm2371_vm11  ;;  %vm2380_vm3 = vweird.f32 %v9887_v12 }
 0x2a3   : > { %v2357_v27 = vmul.f32 0.5, %v2356_v53  ;;  %v2366_v7 = vmul.f32 %v8042_v61, %v2365_v49 }
 0x2a4   : > { %2611 = vperm.xlu2 %8029, %v2525_v44  }
 0x2a5   : > { %v2367_v39 = vmul.f32 0.5, %v2366_v7  ;;  %v2008_v54 = vpop.xlane.xlu1 %2007  ;;  %2746 = vperm.xlu1 %8028, %v2584_v36   ;;  %v2358_v11 = vsub.f32 1.5, %v2357_v27  ;;  %v2586_v36 = vsub.f32 %v2546_v58, %v2566_v2 }
 0x2a6   : > { %v9897_v4 = vmul.f32 %v9739_v56, %v2008_v54 }
 0x2a7   : > { %v2368_v23 = vsub.f32 1.5, %v2367_v39  ;;  %v2155_v19 = vpop.xlane.xlu0 %2154  ;;  %v2359_v48 = vmul.f32 %v9873_v35, %v2358_v11  ;;  %v2288_v39 = vld [vmem:[%s12745_s2 + $0x20] sm:$0xff] }
 0x2a8   : > { %v2231_v44 = vmul.f32 %v9897_v4, %v9897_v4  ;;  %v2211_v53 = vmul.f32 %v2155_v19, %v9739_v56  ;;  %2751 = vperm.xlu0 %8030, %v2585_v62   ;;  %v8044_v49 = vpop.eup %8043 }
 0x2a9   : > { %v2369_v7 = vmul.f32 %v8042_v61, %v2368_v23  ;;  %v2375_v20 = vmul.f32 %v8044_v49, %v9887_v12  ;;  %vm2381_vm2 = vweird.f32 %v8044_v49 }
 0x2aa   : > { %v2251_v27 = vsub.f32 %v2211_v53, %v2231_v44  ;;  %v2287_v44 = vld [vmem:[%s12745_s2 + $0x18] sm:$0xff]  ;;  %vm2382_vm4 = vmor %vm2380_vm3, %vm2381_vm2 }
 0x2ab   : > { %v2373_v15 = vsel %vm9906_vm13, %v8042_v61, %v2369_v7  ;;  %v2376_v54 = vmul.f32 %v8044_v49, %v2375_v20  ;;  %v2363_v61 = vsel %vm2362_vm1, %v9873_v35, %v2359_v48  ;;  %v2548_v35 = vld [vmem:[%s12746_s3 + $0x20] sm:$0xff] }
 0x2ac   : > { %v2271_v62 = vmax.f32 %v2251_v27, 0.0  ;;  %2756 = vperm.xlu2 %8029, %v2586_v36   ;;  %v9922_v58 = vmul.f32 %v2373_v15, %v2288_v39  ;;  %v9931_v20 = vmul.f32 %v2363_v61, %v2287_v44 }
 0x2ad   : > { %v2012_v23 = vpop.xlane.xlu2 %2011  ;;  %v2377_v19 = vmul.f32 0.5, %v2376_v54 }
 0x2ae   : > { %v2311_v2 = vadd.f32 0.001, %v2271_v62  ;;  %v9920_v11 = vmul.f32 %v9739_v56, %v2012_v23  ;;  %v2568_v27 = vmul.f32 %v9922_v58, %v9842_v31  ;;  %v2289_v31 = vld [vmem:[%s12745_s2 + $0x28] sm:$0xff] }
 0x2af   : > { %v2159_v53 = vpop.xlane.xlu1 %2158  ;;  %v2378_v7 = vsub.f32 1.5, %v2377_v19 }
 0x2b0   : > { %8045 = vrsqrt.f32 %v2311_v2  ;;  %v2232_v37 = vmul.f32 %v9920_v11, %v9920_v11  ;;  %2616 = vperm.xlu0 %8030, %v2526_v50   ;;  %v2212_v14 = vmul.f32 %v2159_v53, %v9739_v56  ;;  %v2588_v62 = vsub.f32 %v2548_v35, %v2568_v27 }
 0x2b1   : > { %v2379_v36 = vmul.f32 %v8044_v49, %v2378_v7  ;;  %vm2400_vm6 = vweird.f32 %v2311_v2 }
 0x2b2   : > { %v2252_v39 = vsub.f32 %v2212_v14, %v2232_v37 }
 0x2b3   : > { %v2383_v23 = vsel %vm2382_vm4, %v8044_v49, %v2379_v36 }
 0x2b4   : > { %2621 = vperm.xlu2 %8029, %v9931_v20   ;;  %v2272_v48 = vmax.f32 %v2252_v39, 0.0  ;;  %v2529_v37 = vmul.f32 %v2383_v23, %v2289_v31  ;;  %v2549_v31 = vld [vmem:[%s12746_s3 + $0x28] sm:$0xff]  ;;  %v2291_v23 = vld [vmem:[%s12745_s2 + $0x38] sm:$0xff] }
 0x2b5   : > { %v2016_v50 = vpop.xlane.xlu0 %2015 }
 0x2b6   : > { %v8046_v15 = vpop.eup %8045  ;;  %v9941_v54 = vmul.f32 %v9739_v56, %v2016_v50  ;;  %v2312_v44 = vadd.f32 0.001, %v2272_v48  ;;  %v2569_v49 = vmul.f32 %v2529_v37, %v9863_v10 }
 0x2b7   : > { %v2395_v19 = vmul.f32 %v8046_v15, %v2311_v2  ;;  %v2163_v61 = vpop.xlane.xlu2 %2162  ;;  %vm2401_vm5 = vweird.f32 %v8046_v15  ;;  %v9966_v2 = vmul.f32 %v9739_v56, %v9877_v51  ;;  %v2210_v51 = vmul.f32 %v9894_v60, %v9739_v56 }
 0x2b8   : > { %v2233_v53 = vmul.f32 %v9941_v54, %v9941_v54  ;;  %v2213_v12 = vmul.f32 %v2163_v61, %v9739_v56  ;;  %2766 = vperm.xlu0 %8030, %v2588_v62   ;;  %8047 = vrsqrt.f32 %v2312_v44  ;;  %vm2402_vm7 = vmor %vm2400_vm6, %vm2401_vm5  ;;  %vm2410_vm9 = vweird.f32 %v2312_v44 }
 0x2b9   : > { %v2396_v7 = vmul.f32 %v8046_v15, %v2395_v19  ;;  %v2230_v6 = vmul.f32 %v9966_v2, %v9966_v2 }
 0x2ba   : > { %v2253_v14 = vsub.f32 %v2213_v12, %v2233_v53 }
 0x2bb   : > { %v2397_v39 = vmul.f32 0.5, %v2396_v7 }
 0x2bc   : > { %v2273_v27 = vmax.f32 %v2253_v14, 0.0  ;;  %2631 = vperm.xlu2 %8029, %v2529_v37   ;;  %v2589_v37 = vsub.f32 %v2549_v31, %v2569_v49 }
 0x2bd   : > { %v2398_v35 = vsub.f32 1.5, %v2397_v39  ;;  %v2020_v50 = vpop.xlane.xlu1 %2019 }
 0x2be   : > { %v9950_v36 = vadd.f32 0.001, %v2273_v27  ;;  %v9953_v48 = vmul.f32 %v9739_v56, %v2020_v50  ;;  %v8048_v47 = vpop.eup %8047  ;;  %v2551_v27 = vld [vmem:[%s12746_s3 + $0x38] sm:$0xff] }
 0x2bf   : > { %v2167_v62 = vpop.xlane.xlu0 %2166  ;;  %v2399_v19 = vmul.f32 %v8046_v15, %v2398_v35  ;;  %v2405_v61 = vmul.f32 %v8048_v47, %v2312_v44  ;;  %vm2411_vm8 = vweird.f32 %v8048_v47  ;;  %v2053_v44 = vsel %vm1976_vm0, %v9830_v38, 0.0 }
 0x2c0   : > { %8049 = vrsqrt.f32 %v9950_v36  ;;  %v2234_v10 = vmul.f32 %v9953_v48, %v9953_v48  ;;  %v2214_v53 = vmul.f32 %v2167_v62, %v9739_v56  ;;  %vm2412_vm10 = vmor %vm2410_vm9, %vm2411_vm8  ;;  %vm2420_vm12 = vweird.f32 %v9950_v36 }
 0x2c1   : > { %v2403_v12 = vsel %vm2402_vm7, %v8046_v15, %v2399_v19  ;;  %v2406_v7 = vmul.f32 %v8048_v47, %v2405_v61 }
 0x2c2   : > { %v2531_v14 = vmul.f32 %v2403_v12, %v2291_v23  ;;  %v2254_v39 = vsub.f32 %v2214_v53, %v2234_v10  ;;  %v2292_v12 = vld [vmem:[%s12745_s2 + $0x40] sm:$0xff] }
 0x2c3   : > { %v2407_v35 = vmul.f32 0.5, %v2406_v7 }
 0x2c4   : > { %2771 = vperm.xlu2 %8029, %v2589_v37   ;;  %v2571_v50 = vmul.f32 %v2531_v14, %v9897_v4  ;;  %v2274_v62 = vmax.f32 %v2254_v39, 0.0  ;;  %v2250_v39 = vsub.f32 %v2210_v51, %v2230_v6 }
 0x2c5   : > { %v2024_v15 = vpop.xlane.xlu2 %2023  ;;  %v2408_v49 = vsub.f32 1.5, %v2407_v35 }
 0x2c6   : > { %v8050_v19 = vpop.eup %8049  ;;  %v9978_v31 = vmul.f32 %v9739_v56, %v2024_v15  ;;  %v2591_v23 = vsub.f32 %v2551_v27, %v2571_v50  ;;  %v9981_v10 = vadd.f32 0.001, %v2274_v62 }
 0x2c7   : > { %v2415_v61 = vmul.f32 %v8050_v19, %v9950_v36  ;;  %v2171_v4 = vpop.xlane.xlu1 %2170  ;;  %v2409_v7 = vmul.f32 %v8048_v47, %v2408_v49  ;;  %vm2421_vm11 = vweird.f32 %v8050_v19  ;;  %v2270_v49 = vmax.f32 %v2250_v39, 0.0 }
 0x2c8   : > { %v2235_v53 = vmul.f32 %v9978_v31, %v9978_v31  ;;  %v2215_v60 = vmul.f32 %v2171_v4, %v9739_v56  ;;  %2781 = vperm.xlu0 %8030, %v2591_v23   ;;  %8051 = vrsqrt.f32 %v9981_v10  ;;  %v2054_v4 = vadd.f32 %v2053_v44, %v9826_v41  ;;  %vm2422_vm13 = vmor %vm2420_vm12, %vm2421_vm11 }
 0x2c9   : > { %v2416_v37 = vmul.f32 %v8050_v19, %v2415_v61  ;;  %v2413_v35 = vsel %vm2412_vm10, %v8048_v47, %v2409_v7  ;;  %vm2430_vm15 = vweird.f32 %v9981_v10 }
 0x2ca   : > { %v2255_v27 = vsub.f32 %v2215_v60, %v2235_v53  ;;  %v9992_v62 = vmul.f32 %v2413_v35, %v2292_v12  ;;  %v2293_v60 = vld [vmem:[%s12745_s2 + $0x48] sm:$0xff] }
 0x2cb   : > { %v2417_v50 = vmul.f32 0.5, %v2416_v37 }
 0x2cc   : > { %v2275_v15 = vmax.f32 %v2255_v27, 0.0  ;;  %2641 = vperm.xlu2 %8029, %v2531_v14   ;;  %v2572_v51 = vmul.f32 %v9992_v62, %v9920_v11  ;;  %v2552_v14 = vld [vmem:[%s12746_s3 + $0x40] sm:$0xff]  ;;  %v10015_v27 = vadd.f32 0.001, %v2270_v49 }
 0x2cd   : > { %v2028_v23 = vpop.xlane.xlu0 %2027  ;;  %v2418_v0 = vsub.f32 1.5, %v2417_v50 }
 0x2ce   : > { %v9995_v61 = vadd.f32 0.001, %v2275_v15  ;;  %v9998_v6 = vmul.f32 %v9739_v56, %v2028_v23  ;;  %v8052_v47 = vpop.eup %8051  ;;  %v2592_v35 = vsub.f32 %v2552_v14, %v2572_v51  ;;  %vm2390_vm12 = vweird.f32 %v10015_v27 }
 0x2cf   : > { %v2175_v53 = vpop.xlane.xlu2 %2174  ;;  %2055 = vadd.xlane.f32.xlu1 %v2054_v4  ;;  %v2419_v12 = vmul.f32 %v8050_v19, %v2418_v0  ;;  %v2425_v7 = vmul.f32 %v8052_v47, %v9981_v10  ;;  %vm2431_vm14 = vweird.f32 %v8052_v47 }
 0x2d0   : > { %8053 = vrsqrt.f32 %v9995_v61  ;;  %v2236_v11 = vmul.f32 %v9998_v6, %v9998_v6  ;;  %v2216_v37 = vmul.f32 %v2175_v53, %v9739_v56  ;;  %vm2432_vm1 = vmor %vm2430_vm15, %vm2431_vm14  ;;  %vm2440_vm3 = vweird.f32 %v9995_v61 }
 0x2d1   : > { %v2423_v39 = vsel %vm2422_vm13, %v8050_v19, %v2419_v12  ;;  %v2426_v44 = vmul.f32 %v8052_v47, %v2425_v7  ;;  %8055 = vrsqrt.f32 %v10015_v27  ;;  %v2294_v12 = vld [vmem:[%s12745_s2 + $0x50] sm:$0xff] }
 0x2d2   : > { %v10017_v50 = vmul.f32 %v2423_v39, %v2293_v60  ;;  %v2256_v0 = vsub.f32 %v2216_v37, %v2236_v11 }
 0x2d3   : > { %v2427_v36 = vmul.f32 0.5, %v2426_v44 }
 0x2d4   : > { %2786 = vperm.xlu2 %8029, %v2592_v35   ;;  %2651 = vperm.xlu0 %8030, %v10017_v50   ;;  %v2276_v15 = vmax.f32 %v2256_v0, 0.0 }
 0x2d5   : > { %v2032_v23 = vpop.xlane.xlu1 %2031  ;;  %v2428_v19 = vsub.f32 1.5, %v2427_v36 }
 0x2d6   : > { %v8054_v4 = vpop.eup %8053  ;;  %v10022_v38 = vmul.f32 %v9739_v56, %v2032_v23  ;;  %v10025_v51 = vadd.f32 0.001, %v2276_v15  ;;  %v2554_v15 = vld [vmem:[%s12746_s3 + $0x50] sm:$0xff] }
 0x2d7   : > { %v2435_v49 = vmul.f32 %v8054_v4, %v9995_v61  ;;  %v2179_v53 = vpop.xlane.xlu0 %2178  ;;  %v2429_v7 = vmul.f32 %v8052_v47, %v2428_v19  ;;  %v10035_v0 = vpop.eup %8055  ;;  %vm2441_vm2 = vweird.f32 %v8054_v4  ;;  %v2567_v61 = vmul.f32 %v9931_v20, %v9833_v1 }
 0x2d8   : > { %v2237_v14 = vmul.f32 %v10022_v38, %v10022_v38  ;;  %v2217_v60 = vmul.f32 %v2179_v53, %v9739_v56  ;;  %8057 = vrsqrt.f32 %v10025_v51  ;;  %vm2442_vm4 = vmor %vm2440_vm3, %vm2441_vm2  ;;  %vm2450_vm6 = vweird.f32 %v10025_v51 }
 0x2d9   : > { %v2436_v11 = vmul.f32 %v8054_v4, %v2435_v49  ;;  %v2433_v39 = vsel %vm2432_vm1, %v8052_v47, %v2429_v7  ;;  %v2295_v7 = vld [vmem:[%s12745_s2 + $0x58] sm:$0xff]  ;;  %vm2391_vm9 = vweird.f32 %v10035_v0 }
 0x2da   : > { %v2257_v37 = vsub.f32 %v2217_v60, %v2237_v14  ;;  %v2534_v35 = vmul.f32 %v2433_v39, %v2294_v12  ;;  %v2385_v14 = vmul.f32 %v10035_v0, %v10015_v27  ;;  %vm2392_vm13 = vmor %vm2390_vm12, %vm2391_vm9 }
 0x2db   : > { %v2437_v44 = vmul.f32 0.5, %v2436_v11 }
 0x2dc   : > { %v2277_v36 = vmax.f32 %v2257_v37, 0.0  ;;  %2656 = vperm.xlu2 %8029, %v2534_v35   ;;  %v2574_v10 = vmul.f32 %v2534_v35, %v9953_v48 }
 0x2dd   : > { %v2438_v23 = vsub.f32 1.5, %v2437_v44  ;;  %v2036_v19 = vpop.xlane.xlu2 %2035 }
 0x2de   : > { %v10041_v49 = vadd.f32 0.001, %v2277_v36  ;;  %v10044_v53 = vmul.f32 %v9739_v56, %v2036_v19  ;;  %v8058_v47 = vpop.eup %8057  ;;  %v2594_v12 = vsub.f32 %v2554_v15, %v2574_v10  ;;  %v2547_v15 = vld [vmem:[%s12746_s3 + $0x18] sm:$0xff]  ;;  %v2386_v19 = vmul.f32 %v10035_v0, %v2385_v14 }
 0x2df   : > { %v2183_v60 = vpop.xlane.xlu1 %2182  ;;  %v2439_v11 = vmul.f32 %v8054_v4, %v2438_v23  ;;  %v2445_v48 = vmul.f32 %v8058_v47, %v10025_v51  ;;  %v2555_v10 = vld [vmem:[%s12746_s3 + $0x58] sm:$0xff]  ;;  %vm2451_vm5 = vweird.f32 %v8058_v47 }
 0x2e0   : > { %8059 = vrsqrt.f32 %v10041_v49  ;;  %v2238_v37 = vmul.f32 %v10044_v53, %v10044_v53  ;;  %v2218_v39 = vmul.f32 %v2183_v60, %v9739_v56  ;;  %2796 = vperm.xlu0 %8030, %v2594_v12   ;;  %v2387_v14 = vmul.f32 0.5, %v2386_v19  ;;  %vm2452_vm7 = vmor %vm2450_vm6, %vm2451_vm5 }
 0x2e1   : > { %v2443_v44 = vsel %vm2442_vm4, %v8054_v4, %v2439_v11  ;;  %v2446_v35 = vmul.f32 %v8058_v47, %v2445_v48  ;;  %v2587_v4 = vsub.f32 %v2547_v15, %v2567_v61  ;;  %vm2460_vm10 = vweird.f32 %v10041_v49 }
 0x2e2   : > { %v2258_v36 = vsub.f32 %v2218_v39, %v2238_v37  ;;  %v10062_v23 = vmul.f32 %v2443_v44, %v2295_v7 }
 0x2e3   : > { %v2447_v60 = vmul.f32 0.5, %v2446_v35  ;;  %v2296_v35 = vld [vmem:[%s12745_s2 + $0x60] sm:$0xff] }
 0x2e4   : > { %v2278_v41 = vmax.f32 %v2258_v36, 0.0  ;;  %v2575_v1 = vmul.f32 %v10062_v23, %v9978_v31 }
 0x2e5   : > { %v2040_v20 = vpop.xlane.xlu0 %2039  ;;  %v2448_v37 = vsub.f32 1.5, %v2447_v60  ;;  %v2388_v60 = vsub.f32 1.5, %v2387_v14  ;;  %v2297_v14 = vld [vmem:[%s12745_s2 + $0x68] sm:$0xff] }
 0x2e6   : > { %v8060_v12 = vpop.eup %8059  ;;  %v10070_v11 = vadd.f32 0.001, %v2278_v41  ;;  %v10073_v48 = vmul.f32 %v9739_v56, %v2040_v20  ;;  %v2595_v7 = vsub.f32 %v2555_v10, %v2575_v1 }
 0x2e7   : > { %v2455_v39 = vmul.f32 %v8060_v12, %v10041_v49  ;;  %v2187_v44 = vpop.xlane.xlu2 %2186  ;;  %v2449_v36 = vmul.f32 %v8058_v47, %v2448_v37  ;;  %vm2461_vm8 = vweird.f32 %v8060_v12 }
 0x2e8   : > { %8061 = vrsqrt.f32 %v10070_v11  ;;  %v2239_v31 = vmul.f32 %v10073_v48, %v10073_v48  ;;  %v2219_v61 = vmul.f32 %v2187_v44, %v9739_v56  ;;  %2761 = vperm.xlu1 %8028, %v2587_v4   ;;  %2801 = vperm.xlu2 %8029, %v2595_v7   ;;  %vm2462_vm11 = vmor %vm2460_vm10, %vm2461_vm8  ;;  %vm2470_vm15 = vweird.f32 %v10070_v11 }
 0x2e9   : > { %v2456_v41 = vmul.f32 %v8060_v12, %v2455_v39  ;;  %v2453_v10 = vsel %vm2452_vm7, %v8058_v47, %v2449_v36 }
 0x2ea   : > { %v2259_v15 = vsub.f32 %v2219_v61, %v2239_v31  ;;  %v10084_v20 = vmul.f32 %v2453_v10, %v2296_v35  ;;  %v2389_v31 = vmul.f32 %v10035_v0, %v2388_v60 }
 0x2eb   : > { %v2457_v19 = vmul.f32 0.5, %v2456_v41 }
 0x2ec   : > { %v2279_v1 = vmax.f32 %v2259_v15, 0.0  ;;  %2666 = vperm.xlu0 %8030, %v10084_v20   ;;  %v2393_v10 = vsel %vm2392_vm13, %v10035_v0, %v2389_v31 }
 0x2ed   : > { %v2044_v57 = vpop.xlane.xlu1 %2043  ;;  %v2458_v44 = vsub.f32 1.5, %v2457_v19  ;;  %v2290_v19 = vld [vmem:[%s12745_s2 + $0x30] sm:$0xff] }
 0x2ee   : > { %v8062_v4 = vpop.eup %8061  ;;  %v10086_v7 = vadd.f32 0.001, %v2279_v1  ;;  %v10090_v37 = vmul.f32 %v9739_v56, %v2044_v57 }
 0x2ef   : > { %v2465_v51 = vmul.f32 %v8062_v4, %v10070_v11  ;;  %v2191_v47 = vpop.xlane.xlu0 %2190  ;;  %v2459_v39 = vmul.f32 %v8060_v12, %v2458_v44  ;;  %vm2471_vm14 = vweird.f32 %v8062_v4 }
 0x2f0   : > { %8063 = vrsqrt.f32 %v10086_v7  ;;  %v2240_v57 = vmul.f32 %v10090_v37, %v10090_v37  ;;  %v2220_v61 = vmul.f32 %v2191_v47, %v9739_v56  ;;  %2626 = vperm.xlu1 %8028, %v9922_v58   ;;  %v2557_v58 = vld [vmem:[%s12746_s3 + $0x68] sm:$0xff]  ;;  %vm2472_vm1 = vmor %vm2470_vm15, %vm2471_vm14  ;;  %vm2480_vm3 = vweird.f32 %v10086_v7 }
 0x2f1   : > { %v2466_v41 = vmul.f32 %v8062_v4, %v2465_v51  ;;  %v2463_v35 = vsel %vm2462_vm11, %v8060_v12, %v2459_v39 }
 0x2f2   : > { %v2260_v36 = vsub.f32 %v2220_v61, %v2240_v57  ;;  %v2537_v15 = vmul.f32 %v2463_v35, %v2297_v14  ;;  %v2530_v14 = vmul.f32 %v2393_v10, %v2290_v19  ;;  %v2298_v57 = vld [vmem:[%s12745_s2 + $0x70] sm:$0xff] }
 0x2f3   : > { %v2467_v49 = vmul.f32 0.5, %v2466_v41  ;;  %v2550_v10 = vld [vmem:[%s12746_s3 + $0x30] sm:$0xff] }
 0x2f4   : > { %v2280_v60 = vmax.f32 %v2260_v36, 0.0  ;;  %2671 = vperm.xlu2 %8029, %v2537_v15   ;;  %v2577_v27 = vmul.f32 %v2537_v15, %v10022_v38  ;;  %v2570_v15 = vmul.f32 %v2530_v14, %v9966_v2 }
 0x2f5   : > { %v2468_v12 = vsub.f32 1.5, %v2467_v49  ;;  %v2048_v1 = vpop.xlane.xlu2 %2047 }
 0x2f6   : > { %v8064_v44 = vpop.eup %8063  ;;  %v2320_v51 = vadd.f32 0.001, %v2280_v60  ;;  %v10117_v47 = vmul.f32 %v9739_v56, %v2048_v1  ;;  %v2597_v39 = vsub.f32 %v2557_v58, %v2577_v27  ;;  %v2558_v58 = vld [vmem:[%s12746_s3 + $0x70] sm:$0xff] }
 0x2f7   : > { %v2475_v0 = vmul.f32 %v8064_v44, %v10086_v7  ;;  %v2195_v31 = vpop.xlane.xlu1 %2194  ;;  %v2469_v38 = vmul.f32 %v8062_v4, %v2468_v12  ;;  %vm2481_vm2 = vweird.f32 %v8064_v44 }
 0x2f8   : > { %8065 = vrsqrt.f32 %v2320_v51  ;;  %v2241_v61 = vmul.f32 %v10117_v47, %v10117_v47  ;;  %v2221_v41 = vmul.f32 %v2195_v31, %v9739_v56  ;;  %2636 = vperm.xlu1 %8028, %v2530_v14   ;;  %2811 = vperm.xlu0 %8030, %v2597_v39   ;;  %v2590_v39 = vsub.f32 %v2550_v10, %v2570_v15  ;;  %vm2482_vm4 = vmor %vm2480_vm3, %vm2481_vm2 }
 0x2f9   : > { %v2476_v35 = vmul.f32 %v8064_v44, %v2475_v0  ;;  %v2473_v36 = vsel %vm2472_vm1, %v8062_v4, %v2469_v38  ;;  %v2299_v38 = vld [vmem:[%s12745_s2 + $0x78] sm:$0xff]  ;;  %vm2490_vm6 = vweird.f32 %v2320_v51  ;;  %vm3234_vm2 = vcmask 261120  }
 0x2fa   : > { %v2261_v11 = vsub.f32 %v2221_v41, %v2241_v61  ;;  %v10128_v49 = vmul.f32 %v2473_v36, %v2298_v57 }
 0x2fb   : > { %v2477_v19 = vmul.f32 0.5, %v2476_v35 }
 0x2fc   : > { %v2281_v60 = vmax.f32 %v2261_v11, 0.0  ;;  %v2578_v27 = vmul.f32 %v10128_v49, %v10044_v53 }
 0x2fd   : > { %v2052_v12 = vpop.xlane.xlu0 %2051  ;;  %v2478_v4 = vsub.f32 1.5, %v2477_v19 }
 0x2fe   : > { %v8066_v1 = vpop.eup %8065  ;;  %v2321_v2 = vadd.f32 0.001, %v2281_v60  ;;  %v10139_v14 = vmul.f32 %v9739_v56, %v2052_v12  ;;  %v2598_v0 = vsub.f32 %v2558_v58, %v2578_v27  ;;  %v2300_v12 = vld [vmem:[%s12745_s2 + $0x80] sm:$0xff] }
 0x2ff   : > { %v2485_v31 = vmul.f32 %v8066_v1, %v2320_v51  ;;  %v2199_v57 = vpop.xlane.xlu2 %2198  ;;  %v2479_v61 = vmul.f32 %v8064_v44, %v2478_v4  ;;  %vm2491_vm5 = vweird.f32 %v8066_v1 }
 0x300   : > { %8067 = vrsqrt.f32 %v2321_v2  ;;  %v2242_v53 = vmul.f32 %v10139_v14, %v10139_v14  ;;  %v2222_v41 = vmul.f32 %v2199_v57, %v9739_v56  ;;  %2776 = vperm.xlu1 %8028, %v2590_v39   ;;  %2816 = vperm.xlu2 %8029, %v2598_v0   ;;  %vm2492_vm7 = vmor %vm2490_vm6, %vm2491_vm5  ;;  %vm2500_vm9 = vweird.f32 %v2321_v2 }
 0x301   : > { %v2486_v35 = vmul.f32 %v8066_v1, %v2485_v31  ;;  %v2483_v36 = vsel %vm2482_vm4, %v8064_v44, %v2479_v61  ;;  %v2573_v31 = vmul.f32 %v10017_v50, %v9941_v54  ;;  %v2560_v61 = vld [vmem:[%s12746_s3 + $0x80] sm:$0xff]  ;;  %v2301_v54 = vld [vmem:[%s12745_s2 + $0x88] sm:$0xff] }
 0x302   : > { %v2262_v11 = vsub.f32 %v2222_v41, %v2242_v53  ;;  %v2539_v15 = vmul.f32 %v2483_v36, %v2299_v38  ;;  %v2553_v38 = vld [vmem:[%s12746_s3 + $0x48] sm:$0xff] }
 0x303   : > { %v2487_v19 = vmul.f32 0.5, %v2486_v35 }
 0x304   : > { %v2282_v10 = vmax.f32 %v2262_v11, 0.0  ;;  %2681 = vperm.xlu0 %8030, %v2539_v15  }
 0x305   : > { %v2488_v58 = vsub.f32 1.5, %v2487_v19 }
 0x306   : > { %v8068_v7 = vpop.eup %8067  ;;  %v2322_v60 = vadd.f32 0.001, %v2282_v10 }
 0x307   : > { %v2495_v27 = vmul.f32 %v8068_v7, %v2321_v2  ;;  %v2489_v4 = vmul.f32 %v8066_v1, %v2488_v58  ;;  %vm2501_vm8 = vweird.f32 %v8068_v7 }
 0x308   : > { %8069 = vrsqrt.f32 %v2322_v60  ;;  %2646 = vperm.xlu1 %8028, %v9992_v62   ;;  %vm2502_vm10 = vmor %vm2500_vm9, %vm2501_vm8  ;;  %vm2510_vm12 = vweird.f32 %v2322_v60 }
 0x309   : > { %v2496_v44 = vmul.f32 %v8068_v7, %v2495_v27  ;;  %v2493_v39 = vsel %vm2492_vm7, %v8066_v1, %v2489_v4  ;;  %v2593_v1 = vsub.f32 %v2553_v38, %v2573_v31  ;;  %v2562_v38 = vld [vmem:[%s12746_s3 + $0x90] sm:$0xff] }
 0x30a   : > { %v2540_v0 = vmul.f32 %v2493_v39, %v2300_v12  ;;  %v2302_v12 = vld [vmem:[%s12745_s2 + $0x90] sm:$0xff]  ;;  %v2576_v39 = vmul.f32 %v10084_v20, %v9998_v6 }
 0x30b   : > { %v2497_v57 = vmul.f32 0.5, %v2496_v44 }
 0x30c   : > { %2686 = vperm.xlu2 %8029, %v2540_v0   ;;  %v2580_v51 = vmul.f32 %v2540_v0, %v10090_v37  ;;  %v2561_v37 = vld [vmem:[%s12746_s3 + $0x88] sm:$0xff] }
 0x30d   : > { %v2498_v62 = vsub.f32 1.5, %v2497_v57 }
 0x30e   : > { %v8070_v53 = vpop.eup %8069  ;;  %v2600_v41 = vsub.f32 %v2560_v61, %v2580_v51  ;;  %v10191_v61 = vpop.permute.xlu2 %2611 }
 0x30f   : > { %v2505_v35 = vmul.f32 %v8070_v53, %v2322_v60  ;;  %v2499_v50 = vmul.f32 %v8068_v7, %v2498_v62  ;;  %vm2511_vm11 = vweird.f32 %v8070_v53  ;;  %v2579_v60 = vmul.f32 %v2539_v15, %v10073_v48  ;;  %v10183_v57 = vpop.permute.xlu1 %2606  ;;  %12908 = vst [vmem:[#allocation9_spill] sm:$0xff] %v10191_v61  ;;  %v2203_v48 = vpop.xlane.xlu0 %2202 }
 0x310   : > { %2791 = vperm.xlu1 %8028, %v2593_v1   ;;  %2826 = vperm.xlu0 %8030, %v2600_v41   ;;  %vm2512_vm13 = vmor %vm2510_vm12, %vm2511_vm11  ;;  %12906 = vst [vmem:[#allocation7_spill] sm:$0xff] %v10183_v57  ;;  %v2223_v62 = vmul.f32 %v2203_v48, %v9739_v56 }
 0x311   : > { %v2506_v36 = vmul.f32 %v8070_v53, %v2505_v35  ;;  %v2503_v11 = vsel %vm2502_vm10, %v8068_v7, %v2499_v50 }
 0x312   : > { %v2541_v19 = vmul.f32 %v2503_v11, %v2301_v54 }
 0x313   : > { %v2507_v10 = vmul.f32 0.5, %v2506_v36 }
 0x314   : > { %v2581_v58 = vmul.f32 %v2541_v19, %v10117_v47  ;;  %v2556_v47 = vld [vmem:[%s12746_s3 + $0x60] sm:$0xff] }
 0x315   : > { %v2508_v2 = vsub.f32 1.5, %v2507_v10  ;;  %v2596_v0 = vsub.f32 %v2556_v47, %v2576_v39 }
 0x316   : > { %v2601_v27 = vsub.f32 %v2561_v37, %v2581_v58  ;;  %v10195_v35 = vpop.permute.xlu2 %2756 }
 0x317   : > { %v2509_v4 = vmul.f32 %v8070_v53, %v2508_v2  ;;  %v10185_v6 = vpop.permute.xlu1 %2746  ;;  %12909 = vst [vmem:[#allocation16_spill] sm:$0xff] %v10195_v35  ;;  %v2303_v2 = vld [vmem:[%s12745_s2 + $0x98] sm:$0xff] }
 0x318   : > { %2661 = vperm.xlu1 %8028, %v10062_v23   ;;  %2831 = vperm.xlu2 %8029, %v2601_v27   ;;  %v2559_v23 = vld [vmem:[%s12746_s3 + $0x78] sm:$0xff]  ;;  %12907 = vst [vmem:[#allocation8_spill] sm:$0xff] %v10185_v6 }
 0x319   : > { %v2513_v7 = vsel %vm2512_vm13, %v8070_v53, %v2509_v4  ;;  %v2599_v31 = vsub.f32 %v2559_v23, %v2579_v60 }
 0x31a   : > { %v2542_v44 = vmul.f32 %v2513_v7, %v2302_v12  ;;  %v10199_v10 = vpop.permute.xlu0 %2751 }
 0x31b   : > { %12910 = vst [vmem:[#allocation20_spill] sm:$0xff] %v10199_v10 }
 0x31c   : > { %2696 = vperm.xlu0 %8030, %v2542_v44   ;;  %v2582_v20 = vmul.f32 %v2542_v44, %v10139_v14  ;;  %v2563_v44 = vld [vmem:[%s12746_s3 + $0x98] sm:$0xff] }
 0x31e   : > { %v10197_v50 = vpop.permute.xlu2 %2621 }
 0x320   : > { %2806 = vperm.xlu1 %8028, %v2596_v0  }
 0x322   : > { %v10213_v60 = vpop.permute.xlu0 %2616 }
 0x323   : > { %12912 = vst [vmem:[#allocation22_spill] sm:$0xff] %v10213_v60 }
 0x326   : > { %v10206_v12 = vpop.permute.xlu2 %2631 }
 0x328   : > { %2676 = vperm.xlu1 %8028, %v10128_v49   ;;  %v2602_v49 = vsub.f32 %v2562_v38, %v2582_v20 }
 0x32a   : > { %v10219_v20 = vpop.permute.xlu0 %2766 }
 0x32e   : > { %v10215_v23 = vpop.permute.xlu2 %2771 }
 0x32f   : > { %12913 = vst [vmem:[#allocation23_spill] sm:$0xff] %v10215_v23 }
 0x330   : > { %2821 = vperm.xlu1 %8028, %v2599_v31  }
 0x336   : > { %v10221_v38 = vpop.permute.xlu2 %2641 }
 0x338   : > { %2691 = vperm.xlu1 %8028, %v2541_v19  }
 0x33a   : > { %v10225_v48 = vpop.permute.xlu0 %2781 }
 0x340   : > { %2836 = vperm.xlu1 %8028, %v2602_v49  }
 0x342   : > { %v2056_v15 = vpop.xlane.xlu1 %2055 }
 0x343   : > { %v2083_v51 = vmul.f32 %v9739_v56, %v2056_v15 }
 0x345   : > { %v2243_v53 = vmul.f32 %v2083_v51, %v2083_v51 }
 0x347   : > { %v2263_v1 = vsub.f32 %v2223_v62, %v2243_v53  ;;  %v2652_v62 = vpop.permute.xlu0 %2651 }
 0x349   : > { %v2283_v41 = vmax.f32 %v2263_v1, 0.0 }
 0x34b   : > { %v2323_v14 = vadd.f32 0.001, %v2283_v41 }
 0x34d   : > { %8071 = vrsqrt.f32 %v2323_v14  ;;  %vm2520_vm15 = vweird.f32 %v2323_v14 }
 0x352   : > { %v2797_v41 = vpop.permute.xlu0 %2796 }
 0x353   : > { %v8072_v54 = vpop.eup %8071 }
 0x354   : > { %v2515_v36 = vmul.f32 %v8072_v54, %v2323_v14  ;;  %vm2521_vm14 = vweird.f32 %v8072_v54 }
 0x355   : > { %vm2522_vm1 = vmor %vm2520_vm15, %vm2521_vm14 }
 0x356   : > { %v2516_v11 = vmul.f32 %v8072_v54, %v2515_v36 }
 0x358   : > { %v2517_v19 = vmul.f32 0.5, %v2516_v11 }
 0x35a   : > { %v2518_v37 = vsub.f32 1.5, %v2517_v19  ;;  %v10201_v58 = vpop.permute.xlu1 %2761 }
 0x35b   : > { %12911 = vst [vmem:[#allocation21_spill] sm:$0xff] %v10201_v58 }
 0x35c   : > { %v2519_v27 = vmul.f32 %v8072_v54, %v2518_v37 }
 0x35e   : > { %v2523_v4 = vsel %vm2522_vm1, %v8072_v54, %v2519_v27  ;;  %v2667_v54 = vpop.permute.xlu0 %2666 }
 0x35f   : > { %v2543_v7 = vmul.f32 %v2523_v4, %v2303_v2  ;;  %v2728_v56 = vmul.f32 %v2667_v54, %v9504_v55  ;;  %v2729_v6 = vmul.f32 %v2667_v54, %v9706_v9 }
 0x361   : > { %v2583_v39 = vmul.f32 %v2543_v7, %v2083_v51  ;;  %2701 = vperm.xlu2 %8029, %v2543_v7   ;;  %v2787_v51 = vpop.permute.xlu2 %2786 }
 0x362   : > { %v10211_v47 = vpop.permute.xlu1 %2626 }
 0x363   : > { %v2603_v0 = vsub.f32 %v2563_v44, %v2583_v39 }
 0x365   : > { %2841 = vperm.xlu0 %8030, %v2603_v0  }
 0x369   : > { %v2657_v1 = vpop.permute.xlu2 %2656 }
 0x36a   : > { %v10217_v31 = vpop.permute.xlu1 %2636  ;;  %v2812_v19 = vpop.permute.xlu0 %2811  ;;  %v2724_v9 = vmul.f32 %v2657_v1, %v9490_v63 }
 0x371   : > { %v2802_v36 = vpop.permute.xlu2 %2801 }
 0x372   : > { %v10223_v49 = vpop.permute.xlu1 %2776 }
 0x376   : > { %v2682_v27 = vpop.permute.xlu0 %2681 }
 0x377   : > { %v2734_v44 = vmul.f32 %v2682_v27, %v9527_v21  ;;  %v2735_v39 = vmul.f32 %v2682_v27, %v9741_v3 }
 0x379   : > { %v2672_v37 = vpop.permute.xlu2 %2671 }
 0x37a   : > { %v2647_v15 = vpop.permute.xlu1 %2646  ;;  %v2730_v23 = vmul.f32 %v2672_v37, %v9513_v18 }
 0x37c   : > { %v2870_v55 = vadd.f32 %v2812_v19, %v2730_v23  ;;  %v2712_v23 = vmul.f32 %v10211_v47, %v9448_v8  ;;  %v2715_v8 = vmul.f32 %v10206_v12, %v9629_v29 }
 0x381   : > { %v2817_v0 = vpop.permute.xlu2 %2816 }
 0x382   : > { %v2792_v53 = vpop.permute.xlu1 %2791 }
 0x38a   : > { %v2662_v14 = vpop.permute.xlu1 %2661 }
 0x38b   : > { %v2727_v21 = vmul.f32 %v2662_v14, %v9695_v16  ;;  %v2723_v16 = vmul.f32 %v2652_v62, %v9673_v42 }
 0x38d   : > { %v2867_v18 = vadd.f32 %v2802_v36, %v2727_v21  ;;  %v12923_v21 = vld [vmem:[#allocation7_spill] sm:$0xff] }
 0x392   : > { %v2807_v11 = vpop.permute.xlu1 %2806 }
 0x393   : > { %v2869_v3 = vadd.f32 %v2807_v11, %v2729_v6  ;;  %v2720_v6 = vmul.f32 %v2647_v15, %v9476_v13  ;;  %v2718_v13 = vmul.f32 %v10221_v38, %v9471_v33 }
 0x395   : > { %v2860_v42 = vadd.f32 %v2787_v51, %v2720_v6 }
 0x39a   : > { %v2677_v2 = vpop.permute.xlu1 %2676 }
 0x39b   : > { %v2732_v4 = vmul.f32 %v2677_v2, %v9518_v43  ;;  %v2733_v7 = vmul.f32 %v2677_v2, %v9728_v26  ;;  %v2731_v43 = vmul.f32 %v2672_v37, %v9717_v17  ;;  %v2726_v26 = vmul.f32 %v2662_v14, %v9499_v22 }
 0x39c   : > { %v2868_v2 = vadd.f32 %v2807_v11, %v2728_v56  ;;  %v2722_v22 = vmul.f32 %v2652_v62, %v9485_v40  ;;  %v2864_v56 = vadd.f32 %v2797_v41, %v2724_v9  ;;  %v2717_v40 = vmul.f32 %v10217_v31, %v9640_v25 }
 0x39d   : > { %v2872_v57 = vadd.f32 %v2817_v0, %v2732_v4  ;;  %v2873_v35 = vadd.f32 %v2817_v0, %v2733_v7  ;;  %v2871_v60 = vadd.f32 %v2812_v19, %v2731_v43  ;;  %v2866_v54 = vadd.f32 %v2802_v36, %v2726_v26  ;;  %v12917_v36 = vld [vmem:[#allocation21_spill] sm:$0xff]  ;;  %v12920_v7 = vld [vmem:[#allocation3_spill] sm:$0xff]  ;;  %v12922_v26 = vld [vmem:[#allocation18_spill] sm:$0xff] }
 0x39e   : > { %v2896_v17 = vpack.c.bf16 %v2870_v55, %v2868_v2  ;;  %v2862_v63 = vadd.f32 %v2792_v53, %v2722_v22  ;;  %v2857_v25 = vadd.f32 %v10223_v49, %v2717_v40  ;;  %v2858_v62 = vadd.f32 %v10225_v48, %v2718_v13  ;;  %v12925_v55 = vld [vmem:[#allocation20_spill] sm:$0xff] }
 0x39f   : > { %v2897_v37 = vpack.c.bf16 %v2871_v60, %v2869_v3  ;;  %v2704_v2 = vmul.f32 %v12923_v21, %v12922_v26  ;;  %v12924_v3 = vld [vmem:[#allocation2_spill] sm:$0xff]  ;;  %v7508_v40 = vld [vmem:[%s10298_s17 + $0x10] sm:$0xf]  ;;  %v7510_v26 = vld [vmem:[%s10298_s17 + $0x18] sm:$0xf0] }
 0x3a2   : > { %v2822_v10 = vpop.permute.xlu1 %2821 }
 0x3a3   : > { %v2874_v61 = vadd.f32 %v2822_v10, %v2734_v44  ;;  %v2875_v58 = vadd.f32 %v2822_v10, %v2735_v39  ;;  %v2725_v10 = vmul.f32 %v2657_v1, %v9684_v46  ;;  %v2894_v46 = vpack.c.bf16 %v2866_v54, %v2864_v56  ;;  %v12921_v39 = vld [vmem:[#allocation16_spill] sm:$0xff]  ;;  %v7959_v56 = vld [vmem:[%s10298_s17 + $0x4] sm:$0xf0] }
 0x3a5   : > { %v2898_v27 = vpack.c.bf16 %v2874_v61, %v2872_v57  ;;  %v2899_v59 = vpack.c.bf16 %v2875_v58, %v2873_v35  ;;  %v2865_v57 = vadd.f32 %v2797_v41, %v2725_v10  ;;  %v2721_v61 = vmul.f32 %v2647_v15, %v9662_v52  ;;  %v12915_v41 = vld [vmem:[#allocation10_spill] sm:$0xff] }
 0x3a6   : > { %v2716_v58 = vmul.f32 %v10217_v31, %v9462_v30  ;;  %v2719_v52 = vmul.f32 %v10221_v38, %v9651_v5  ;;  %v2713_v15 = vmul.f32 %v10211_v47, %v9615_v28  ;;  %v2892_v31 = vpack.c.bf16 %v2862_v63, %v2860_v42  ;;  %v2687_v63 = vpop.permute.xlu2 %2686  ;;  %v7961_v42 = vld [vmem:[%s10298_s17 + $0x14] sm:$0xf0] }
 0x3a7   : > { %3325 = vmatpush.bf16.msrb.mxu0 %v2898_v27  ;;  %3643 = vmatpush.bf16.msrb.mxu2 %v2899_v59  ;;  %v2863_v59 = vadd.f32 %v2792_v53, %v2723_v16  ;;  %v2895_v35 = vpack.c.bf16 %v2867_v18, %v2865_v57  ;;  %v2861_v60 = vadd.f32 %v2787_v51, %v2721_v61  ;;  %v7500_v16 = vld [vmem:[%s10298_s17] sm:$0xf] }
 0x3a8   : > { %v2856_v30 = vadd.f32 %v10223_v49, %v2716_v58  ;;  %v2859_v33 = vadd.f32 %v10225_v48, %v2719_v52  ;;  %v2714_v5 = vmul.f32 %v10206_v12, %v9457_v32  ;;  %v2852_v28 = vadd.f32 %v10219_v20, %v2712_v23  ;;  %v12914_v32 = vld [vmem:[#allocation22_spill] sm:$0xff]  ;;  %v12916_v12 = vld [vmem:[#allocation23_spill] sm:$0xff]  ;;  %v12927_v52 = vld [vmem:[#allocation13_spill] sm:$0xff] }
 0x3a9   : > { %v2893_v51 = vpack.c.bf16 %v2863_v59, %v2861_v60  ;;  %v2853_v47 = vadd.f32 %v10219_v20, %v2713_v15  ;;  %v2710_v48 = vmul.f32 %v10197_v50, %v9443_v34  ;;  %v2711_v53 = vmul.f32 %v10197_v50, %v9604_v24  ;;  %v12918_v24 = vld [vmem:[#allocation19_spill] sm:$0xff]  ;;  %v12919_v50 = vld [vmem:[#allocation9_spill] sm:$0xff]  ;;  %v2827_v59 = vpop.permute.xlu0 %2826  ;;  %v12928_v15 = vld [vmem:[#allocation14_spill] sm:$0xff] }
 0x3aa   : > { %v2890_v38 = vpack.c.bf16 %v2858_v62, %v2856_v30  ;;  %v2891_v49 = vpack.c.bf16 %v2859_v33, %v2857_v25  ;;  %v2708_v1 = vmul.f32 %v12914_v32, %v9434_v45  ;;  %v2709_v29 = vmul.f32 %v12914_v32, %v12915_v41  ;;  %v12929_v25 = vld [vmem:[#allocation4_spill] sm:$0xff]  ;;  %v12930_v62 = vld [vmem:[#allocation5_spill] sm:$0xff] }
 0x3ab   : > { %3326 = vmatpush.bf16.msrb.mxu0 %v2896_v17  ;;  %3644 = vmatpush.bf16.msrb.mxu2 %v2897_v37  ;;  %v2854_v14 = vadd.f32 %v12916_v12, %v2714_v5  ;;  %v2855_v20 = vadd.f32 %v12916_v12, %v2715_v8  ;;  %v2850_v11 = vadd.f32 %v12917_v36, %v2710_v48  ;;  %v12926_v17 = vld [vmem:[#allocation8_spill] sm:$0xff]  ;;  %v12931_v5 = vld [vmem:[#allocation15_spill] sm:$0xff] }
 0x3ac   : > { %v2851_v19 = vadd.f32 %v12917_v36, %v2711_v53  ;;  %v2706_v45 = vmul.f32 %v12919_v50, %v12918_v24  ;;  %v2707_v44 = vmul.f32 %v12919_v50, %v12920_v7  ;;  %v2848_v0 = vadd.f32 %v12921_v39, %v2708_v1  ;;  %v12933_v1 = vld [vmem:[#allocation12_spill] sm:$0xff]  ;;  %v7502_v24 = vld [vmem:[%s10298_s17 + $0x8] sm:$0xf0] }
 0x3ad   : > { %v2888_v34 = vpack.c.bf16 %v2854_v14, %v2852_v28  ;;  %v2889_v4 = vpack.c.bf16 %v2855_v20, %v2853_v47  ;;  %v2849_v43 = vadd.f32 %v12921_v39, %v2709_v29  ;;  %v2705_v27 = vmul.f32 %v12923_v21, %v12924_v3  ;;  %v12932_v28 = vld [vmem:[#allocation6_spill] sm:$0xff]  ;;  %v12934_v29 = vld [vmem:[#allocation17_spill] sm:$0xff]  ;;  %v7963_v39 = vld [vmem:[%s10298_s17 + $0x24] sm:$0xf0] }
 0x3ae   : > { %v2846_v9 = vadd.f32 %v12925_v55, %v2706_v45  ;;  %v2847_v10 = vadd.f32 %v12925_v55, %v2707_v44  ;;  %v2886_v54 = vpack.c.bf16 %v2850_v11, %v2848_v0  ;;  %v2844_v37 = vadd.f32 %v12926_v17, %v2704_v2  ;;  %v7516_v44 = vld [vmem:[%s10298_s17 + $0x20] sm:$0xf]  ;;  %v7524_v2 = vld [vmem:[%s10298_s17 + $0x30] sm:$0xf]  ;;  %v7965_v3 = vld [vmem:[%s10298_s17 + $0x34] sm:$0xf0] }
 0x3af   : > { %3327 = vmatpush.bf16.msrb.mxu0 %v2894_v46  ;;  %3645 = vmatpush.bf16.msrb.mxu2 %v2895_v35  ;;  %v2887_v18 = vpack.c.bf16 %v2851_v19, %v2849_v43  ;;  %v2845_v22 = vadd.f32 %v12926_v17, %v2705_v27  ;;  %v7501_v61 = vor.u32 %v7959_v56, %v7500_v16  ;;  %v2832_v46 = vpop.permute.xlu2 %2831  ;;  %v2692_v35 = vpop.permute.xlu1 %2691  ;;  %v7960_v43 = vld [vmem:[%s10298_s17 + $0x14] sm:$0xf]  ;;  %v7962_v55 = vld [vmem:[%s10298_s17 + $0x24] sm:$0xf]  ;;  %v7540_v56 = vld [vmem:[%s10298_s17 + $0x50] sm:$0xf] }
 0x3b0   : > { %v2884_v57 = vpack.c.bf16 %v2846_v9, %v2844_v37  ;;  %v7509_v60 = vor.u32 %v7961_v42, %v7508_v40  ;;  %v2739_v33 = vmul.f32 %v2692_v35, %v12930_v62  ;;  %v2736_v41 = vmul.f32 %v2687_v63, %v12933_v1  ;;  %v7518_v9 = vld [vmem:[%s10298_s17 + $0x28] sm:$0xf0]  ;;  %v7964_v37 = vld [vmem:[%s10298_s17 + $0x34] sm:$0xf]  ;;  %v7542_v42 = vld [vmem:[%s10298_s17 + $0x58] sm:$0xf0] }
 0x3b1   : > { %v2885_v6 = vpack.c.bf16 %v2847_v10, %v2845_v22  ;;  %v2697_v58 = vpop.permute.xlu0 %2696  ;;  %v2737_v12 = vmul.f32 %v2687_v63, %v12934_v29  ;;  %v7517_v0 = vor.u32 %v7963_v39, %v7516_v44  ;;  %v7513_v21 = vor.u32 %v7960_v43, %v7510_v26  ;;  %v7526_v22 = vld [vmem:[%s10298_s17 + $0x38] sm:$0xf0]  ;;  %v7534_v63 = vld [vmem:[%s10298_s17 + $0x48] sm:$0xf0]  ;;  %v7968_v40 = vld [vmem:[%s10298_s17 + $0x54] sm:$0xf] }
 0x3b2   : > { %v2740_v23 = vmul.f32 %v2697_v58, %v12927_v52  ;;  %v2741_v30 = vmul.f32 %v2697_v58, %v12928_v15  ;;  %v2879_v20 = vadd.f32 %v2832_v46, %v2739_v33  ;;  %v2876_v19 = vadd.f32 %v2827_v59, %v2736_v41  ;;  %v7973_v52 = vld [vmem:[%s10298_s17 + $0x74] sm:$0xf0]  ;;  %v7970_v15 = vld [vmem:[%s10298_s17 + $0x64] sm:$0xf]  ;;  %v7976_v26 = vld [vmem:[%s10298_s17 + $0x94] sm:$0xf] }
 0x3b3   : > { %3328 = vmatpush.bf16.msrb.mxu0 %v2892_v31  ;;  %3646 = vmatpush.bf16.msrb.mxu2 %v2893_v51  ;;  %v2738_v31 = vmul.f32 %v2692_v35, %v12929_v25  ;;  %v7525_v27 = vor.u32 %v7965_v3, %v7524_v2  ;;  %v7521_v10 = vor.u32 %v7962_v55, %v7518_v9  ;;  %v7971_v35 = vld [vmem:[%s10298_s17 + $0x64] sm:$0xf0]  ;;  %v7974_v29 = vld [vmem:[%s10298_s17 + $0x84] sm:$0xf] }
 0x3b4   : > { %v7529_v16 = vor.u32 %v7964_v37, %v7526_v22 }
 0x3b5   : > { %v2878_v14 = vadd.f32 %v2832_v46, %v2738_v31  ;;  %v7548_v46 = vld [vmem:[%s10298_s17 + $0x60] sm:$0xf] }
 0x3b6   : > { %v7549_v58 = vor.u32 %v7971_v35, %v7548_v46  ;;  %v7564_v31 = vld [vmem:[%s10298_s17 + $0x80] sm:$0xf] }
 0x3b7   : > { %3329 = vmatpush.bf16.msrb.mxu0 %v2890_v38  ;;  %3647 = vmatpush.bf16.msrb.mxu2 %v2891_v49  ;;  %v2837_v51 = vpop.permute.xlu1 %2836  ;;  %v2900_v50 = vpack.c.bf16 %v2878_v14, %v2876_v19 }
 0x3b8   : > { %v2880_v49 = vadd.f32 %v2837_v51, %v2740_v23  ;;  %v2881_v48 = vadd.f32 %v2837_v51, %v2741_v30  ;;  %v7550_v30 = vld [vmem:[%s10298_s17 + $0x68] sm:$0xf0]  ;;  %v7975_v51 = vld [vmem:[%s10298_s17 + $0x84] sm:$0xf0] }
 0x3b9   : > { %v7553_v25 = vor.u32 %v7970_v15, %v7550_v30  ;;  %v7565_v62 = vor.u32 %v7975_v51, %v7564_v31 }
 0x3bb   : > { %3330 = vmatpush.bf16.msrb.mxu0 %v2888_v34  ;;  %3648 = vmatpush.bf16.msrb.mxu2 %v2889_v4  ;;  %v2702_v13 = vpop.permute.xlu2 %2701  ;;  %v2877_v34 = vadd.f32 %v2827_v59, %v2737_v12  ;;  %v7958_v4 = vld [vmem:[%s10298_s17 + $0x4] sm:$0xf]  ;;  %v7566_v12 = vld [vmem:[%s10298_s17 + $0x88] sm:$0xf0] }
 0x3bc   : > { %v2742_v8 = vmul.f32 %v2702_v13, %v12931_v5  ;;  %v2743_v47 = vmul.f32 %v2702_v13, %v12932_v28  ;;  %v7505_v7 = vor.u32 %v7958_v4, %v7502_v24  ;;  %v7556_v13 = vld [vmem:[%s10298_s17 + $0x70] sm:$0xf]  ;;  %v7972_v28 = vld [vmem:[%s10298_s17 + $0x74] sm:$0xf] }
 0x3bd   : > { %v2901_v45 = vpack.c.bf16 %v2879_v20, %v2877_v34  ;;  %v7557_v23 = vor.u32 %v7973_v52, %v7556_v13  ;;  %v7569_v20 = vor.u32 %v7974_v29, %v7566_v12  ;;  %v7580_v29 = vld [vmem:[%s10298_s17 + $0xa0] sm:$0xf]  ;;  %v7979_v12 = vld [vmem:[%s10298_s17 + $0xa4] sm:$0xf0] }
 0x3bf   : > { %3331 = vmatpush.bf16.msrb.mxu0 %v2886_v54  ;;  %3649 = vmatpush.bf16.msrb.mxu2 %v2887_v18  ;;  %v7532_v54 = vld [vmem:[%s10298_s17 + $0x40] sm:$0xf]  ;;  %v7967_v18 = vld [vmem:[%s10298_s17 + $0x44] sm:$0xf0] }
 0x3c0   : > { %v7533_v17 = vor.u32 %v7967_v18, %v7532_v54 }
 0x3c3   : > { %3332 = vmatpush.bf16.msrb.mxu0 %v2884_v57  ;;  %3650 = vmatpush.bf16.msrb.mxu2 %v2885_v6  ;;  %v7969_v57 = vld [vmem:[%s10298_s17 + $0x54] sm:$0xf0] }
 0x3c4   : > { %v7541_v6 = vor.u32 %v7969_v57, %v7540_v56 }
 0x3c6   : > { %3651 = vmatmul.bf16.vlgmr.msrb.gmra.mxu2 %v7501_v61  ;;  %3333 = vmatmul.bf16.vlgmr.msrb.gmra.mxu0 %v7501_v61  ;;  %v7966_v61 = vld [vmem:[%s10298_s17 + $0x44] sm:$0xf] }
 0x3c7   : > { %v7537_v59 = vor.u32 %v7966_v61, %v7534_v63 }
 0x3d6   : > { %3656 = vmatmul.bf16.gmra.mxu2 %v7509_v60  ;;  %3338 = vmatmul.bf16.gmra.mxu0 %v7509_v60  ;;  %v7545_v60 = vor.u32 %v7968_v40, %v7542_v42 }
 0x3d7   : > { %v2842_v38 = vpop.permute.xlu0 %2841 }
 0x3d8   : > { %v2882_v53 = vadd.f32 %v2842_v38, %v2742_v8  ;;  %v2883_v32 = vadd.f32 %v2842_v38, %v2743_v47  ;;  %v7558_v47 = vld [vmem:[%s10298_s17 + $0x78] sm:$0xf0] }
 0x3d9   : > { %v7561_v38 = vor.u32 %v7972_v28, %v7558_v47 }
 0x3da   : > { %v2902_v36 = vpack.c.bf16 %v2882_v53, %v2880_v49  ;;  %v2903_v11 = vpack.c.bf16 %v2883_v32, %v2881_v48  ;;  %v7572_v49 = vld [vmem:[%s10298_s17 + $0x90] sm:$0xf]  ;;  %v7977_v48 = vld [vmem:[%s10298_s17 + $0x94] sm:$0xf0] }
 0x3db   : > { %v7573_v32 = vor.u32 %v7977_v48, %v7572_v49 }
 0x3dc   : > { %3490 = vmatpush.bf16.msrb.mxu1 %v2902_v36  ;;  %3808 = vmatpush.bf16.msrb.mxu3 %v2903_v11 }
 0x3e0   : > { %3491 = vmatpush.bf16.msrb.mxu1 %v2900_v50  ;;  %3809 = vmatpush.bf16.msrb.mxu3 %v2901_v45 }
 0x3e3   : > { %7768 = vmatmul.msk.bf16.vlgmr.msrb.gmra.mxu3 %vm3234_vm2, %v7505_v7  ;;  %7738 = vmatmul.msk.bf16.vlgmr.msrb.gmra.mxu1 %vm3234_vm2, %v7505_v7 }
 0x3e6   : > { %3661 = vmatmul.bf16.gmra.mxu2 %v7517_v0  ;;  %3343 = vmatmul.bf16.gmra.mxu0 %v7517_v0 }
 0x3f3   : > { %7769 = vmatmul.msk.bf16.gmra.mxu3 %vm3234_vm2, %v7513_v21  ;;  %7739 = vmatmul.msk.bf16.gmra.mxu1 %vm3234_vm2, %v7513_v21  ;;  %v7574_v21 = vld [vmem:[%s10298_s17 + $0x98] sm:$0xf0] }
 0x3f4   : > { %v7577_v55 = vor.u32 %v7976_v26, %v7574_v21 }
 0x3f6   : > { %3666 = vmatmul.bf16.gmra.mxu2 %v7525_v27  ;;  %3348 = vmatmul.bf16.gmra.mxu0 %v7525_v27 }
 0x403   : > { %7770 = vmatmul.msk.bf16.gmra.mxu3 %vm3234_vm2, %v7521_v10  ;;  %7740 = vmatmul.msk.bf16.gmra.mxu1 %vm3234_vm2, %v7521_v10 }
 0x406   : > { %3671 = vmatmul.bf16.gmra.mxu2 %v7533_v17  ;;  %3353 = vmatmul.bf16.gmra.mxu0 %v7533_v17 }
 0x413   : > { %7771 = vmatmul.msk.bf16.gmra.mxu3 %vm3234_vm2, %v7529_v16  ;;  %7741 = vmatmul.msk.bf16.gmra.mxu1 %vm3234_vm2, %v7529_v16 }
 0x416   : > { %3676 = vmatmul.bf16.gmra.mxu2 %v7541_v6  ;;  %3358 = vmatmul.bf16.gmra.mxu0 %v7541_v6 }
 0x423   : > { %7772 = vmatmul.msk.bf16.gmra.mxu3 %vm3234_vm2, %v7537_v59  ;;  %7742 = vmatmul.msk.bf16.gmra.mxu1 %vm3234_vm2, %v7537_v59 }
 0x426   : > { %3681 = vmatmul.bf16.gmra.mxu2 %v7549_v58  ;;  %3363 = vmatmul.bf16.gmra.mxu0 %v7549_v58 }
 0x433   : > { %7773 = vmatmul.msk.bf16.gmra.mxu3 %vm3234_vm2, %v7545_v60  ;;  %7743 = vmatmul.msk.bf16.gmra.mxu1 %vm3234_vm2, %v7545_v60 }
 0x436   : > { %3686 = vmatmul.bf16.gmra.mxu2 %v7557_v23  ;;  %3368 = vmatmul.bf16.gmra.mxu0 %v7557_v23 }
 0x443   : > { %7774 = vmatmul.msk.bf16.gmra.mxu3 %vm3234_vm2, %v7553_v25  ;;  %7744 = vmatmul.msk.bf16.gmra.mxu1 %vm3234_vm2, %v7553_v25  ;;  %v3334_v33 = vpop.f32.mrf.mxu0 }
 0x446   : > { %3691 = vmatmul.bf16.gmra.mxu2 %v7565_v62  ;;  %3373 = vmatmul.bf16.gmra.mxu0 %v7565_v62 }
 0x449   : > { %v3652_v5 = vpop.f32.mrf.mxu2 }
 0x44b   : > { %v3336_v8 = vpop.f32.mrf.mxu0 }
 0x451   : > { %v3654_v53 = vpop.f32.mrf.mxu2 }
 0x453   : > { %7775 = vmatmul.msk.bf16.gmra.mxu3 %vm3234_vm2, %v7561_v38  ;;  %7745 = vmatmul.msk.bf16.gmra.mxu1 %vm3234_vm2, %v7561_v38  ;;  %v3339_v1 = vpop.f32.mrf.mxu0 }
 0x456   : > { %3696 = vmatmul.bf16.gmra.mxu2 %v7573_v32  ;;  %3378 = vmatmul.bf16.gmra.mxu0 %v7573_v32 }
 0x459   : > { %v3657_v41 = vpop.f32.mrf.mxu2 }
 0x45b   : > { %v3341_v14 = vpop.f32.mrf.mxu0 }
 0x460   : > { %v3493_v36 = vpop.f32.mrf.mxu1 }
 0x461   : > { %v3659_v11 = vpop.f32.mrf.mxu2  ;;  %v10368_v19 = vadd.f32 %v3493_v36, %v3334_v33  ;;  %v7582_v36 = vld [vmem:[%s10298_s17 + $0xa8] sm:$0xf0] }
 0x463   : > { %7776 = vmatmul.msk.bf16.gmra.mxu3 %vm3234_vm2, %v7569_v20  ;;  %7746 = vmatmul.msk.bf16.gmra.mxu1 %vm3234_vm2, %v7569_v20  ;;  %v3344_v4 = vpop.f32.mrf.mxu0  ;;  %v4261_v45 = vmul.f32 %v10368_v19, %v10368_v19  ;;  %v7581_v20 = vor.u32 %v7979_v12, %v7580_v29 }
 0x466   : > { %v3811_v34 = vpop.f32.mrf.mxu3  ;;  %3701 = vmatmul.bf16.gmra.mxu2 %v7581_v20  ;;  %3383 = vmatmul.bf16.gmra.mxu0 %v7581_v20 }
 0x467   : > { %v10370_v24 = vadd.f32 %v3811_v34, %v3652_v5 }
 0x468   : > { %v3495_v50 = vpop.f32.mrf.mxu1 }
 0x469   : > { %v3961_v7 = vsel %vm1976_vm0, %v10370_v24, 0.0  ;;  %v4262_v44 = vmul.f32 %v10370_v24, %v10370_v24  ;;  %v3662_v39 = vpop.f32.mrf.mxu2  ;;  %v10384_v9 = vadd.f32 %v3495_v50, %v3336_v8 }
 0x46a   : > { %v3962_v0 = vadd.f32 %v3961_v7, %v10368_v19 }
 0x46b   : > { %v4381_v43 = vsel %vm1976_vm0, %v4262_v44, 0.0  ;;  %v3346_v54 = vpop.f32.mrf.mxu0  ;;  %v4263_v59 = vmul.f32 %v10384_v9, %v10384_v9 }
 0x46c   : > { %3963 = vadd.xlane.f32.xlu2 %v3962_v0  ;;  %v4382_v2 = vadd.f32 %v4381_v43, %v4261_v45 }
 0x46e   : > { %v3813_v3 = vpop.f32.mrf.mxu3  ;;  %4383 = vadd.xlane.f32.xlu0 %v4382_v2 }
 0x46f   : > { %v10382_v27 = vadd.f32 %v3813_v3, %v3654_v53 }
 0x470   : > { %v3498_v10 = vpop.f32.mrf.mxu1 }
 0x471   : > { %v3965_v18 = vsel %vm1976_vm0, %v10382_v27, 0.0  ;;  %v3664_v37 = vpop.f32.mrf.mxu2  ;;  %v4264_v22 = vmul.f32 %v10382_v27, %v10382_v27  ;;  %v10393_v16 = vadd.f32 %v3498_v10, %v3339_v1 }
 0x472   : > { %v3966_v17 = vadd.f32 %v3965_v18, %v10384_v9 }
 0x473   : > { %7777 = vmatmul.msk.bf16.gmra.mxu3 %vm3234_vm2, %v7577_v55  ;;  %7747 = vmatmul.msk.bf16.gmra.mxu1 %vm3234_vm2, %v7577_v55  ;;  %v4385_v6 = vsel %vm1976_vm0, %v4264_v22, 0.0  ;;  %v4265_v63 = vmul.f32 %v10393_v16, %v10393_v16  ;;  %v3349_v42 = vpop.f32.mrf.mxu0 }
 0x474   : > { %3967 = vadd.xlane.f32.xlu1 %v3966_v17  ;;  %v4386_v40 = vadd.f32 %v4385_v6, %v4263_v59 }
 0x476   : > { %v3816_v56 = vpop.f32.mrf.mxu3 }
 0x477   : > { %v10395_v57 = vadd.f32 %v3816_v56, %v3657_v41 }
 0x478   : > { %v3500_v61 = vpop.f32.mrf.mxu1 }
 0x479   : > { %v3969_v46 = vsel %vm1976_vm0, %v10395_v57, 0.0  ;;  %v4266_v35 = vmul.f32 %v10395_v57, %v10395_v57  ;;  %v3667_v52 = vpop.f32.mrf.mxu2  ;;  %v10408_v15 = vadd.f32 %v3500_v61, %v3341_v14  ;;  %v7978_v14 = vld [vmem:[%s10298_s17 + $0xa4] sm:$0xf] }
 0x47a   : > { %v3970_v58 = vadd.f32 %v3969_v46, %v10393_v16 }
 0x47b   : > { %v4389_v60 = vsel %vm1976_vm0, %v4266_v35, 0.0  ;;  %v4267_v62 = vmul.f32 %v10408_v15, %v10408_v15  ;;  %v3351_v5 = vpop.f32.mrf.mxu0 }
 0x47c   : > { %3971 = vadd.xlane.f32.xlu0 %v3970_v58  ;;  %v4390_v13 = vadd.f32 %v4389_v60, %v4265_v63  ;;  %4387 = vadd.xlane.f32.xlu1 %v4386_v40 }
 0x47e   : > { %v3818_v23 = vpop.f32.mrf.mxu3  ;;  %4391 = vadd.xlane.f32.xlu2 %v4390_v13 }
 0x47f   : > { %v10410_v30 = vadd.f32 %v3818_v23, %v3659_v11 }
 0x480   : > { %v3503_v25 = vpop.f32.mrf.mxu1 }
 0x481   : > { %v3973_v31 = vsel %vm1976_vm0, %v10410_v30, 0.0  ;;  %v4268_v51 = vmul.f32 %v10410_v30, %v10410_v30  ;;  %v10420_v38 = vadd.f32 %v3503_v25, %v3344_v4  ;;  %v3669_v49 = vpop.f32.mrf.mxu2  ;;  %v7585_v4 = vor.u32 %v7978_v14, %v7582_v36 }
 0x482   : > { %v3974_v8 = vadd.f32 %v3973_v31, %v10408_v15 }
 0x483   : > { %v4393_v33 = vsel %vm1976_vm0, %v4268_v51, 0.0  ;;  %v3354_v34 = vpop.f32.mrf.mxu0  ;;  %v4269_v50 = vmul.f32 %v10420_v38, %v10420_v38  ;;  %7778 = vmatmul.msk.bf16.gmra.mxu3 %vm3234_vm2, %v7585_v4  ;;  %7748 = vmatmul.msk.bf16.gmra.mxu1 %vm3234_vm2, %v7585_v4 }
 0x484   : > { %v4394_v28 = vadd.f32 %v4393_v33, %v4267_v62 }
 0x486   : > { %v3821_v47 = vpop.f32.mrf.mxu3  ;;  %3975 = vadd.xlane.f32.xlu2 %v3974_v8  ;;  %4395 = vadd.xlane.f32.xlu0 %v4394_v28  ;;  %v7588_v8 = vld [vmem:[%s10298_s17 + $0xb0] sm:$0xf]  ;;  %v7981_v28 = vld [vmem:[%s10298_s17 + $0xb4] sm:$0xf0] }
 0x487   : > { %v10422_v48 = vadd.f32 %v3821_v47, %v3662_v39 }
 0x488   : > { %v3505_v53 = vpop.f32.mrf.mxu1 }
 0x489   : > { %v3977_v32 = vsel %vm1976_vm0, %v10422_v48, 0.0  ;;  %v4270_v41 = vmul.f32 %v10422_v48, %v10422_v48  ;;  %v10438_v44 = vadd.f32 %v3505_v53, %v3346_v54  ;;  %v3672_v0 = vpop.f32.mrf.mxu2  ;;  %v7589_v53 = vor.u32 %v7981_v28, %v7588_v8 }
 0x48a   : > { %v3978_v1 = vadd.f32 %v3977_v32, %v10420_v38 }
 0x48b   : > { %v4397_v7 = vsel %vm1976_vm0, %v4270_v41, 0.0  ;;  %v3356_v17 = vpop.f32.mrf.mxu0  ;;  %3706 = vmatmul.bf16.gmra.mxu2 %v7589_v53  ;;  %3388 = vmatmul.bf16.gmra.mxu0 %v7589_v53 }
 0x48c   : > { %3979 = vadd.xlane.f32.xlu1 %v3978_v1  ;;  %v4398_v21 = vadd.f32 %v4397_v7, %v4269_v50 }
 0x48e   : > { %v3823_v11 = vpop.f32.mrf.mxu3 }
 0x48f   : > { %v10435_v45 = vadd.f32 %v3823_v11, %v3664_v37  ;;  %v4271_v37 = vmul.f32 %v10438_v44, %v10438_v44  ;;  %v7980_v11 = vld [vmem:[%s10298_s17 + $0xb4] sm:$0xf] }
 0x490   : > { %v3508_v39 = vpop.f32.mrf.mxu1 }
 0x491   : > { %v3981_v43 = vsel %vm1976_vm0, %v10435_v45, 0.0  ;;  %v4272_v2 = vmul.f32 %v10435_v45, %v10435_v45  ;;  %v10447_v55 = vadd.f32 %v3508_v39, %v3349_v42  ;;  %v3674_v56 = vpop.f32.mrf.mxu2 }
 0x492   : > { %v3982_v26 = vadd.f32 %v3981_v43, %v10438_v44 }
 0x493   : > { %v4401_v54 = vsel %vm1976_vm0, %v4272_v2, 0.0  ;;  %v4273_v46 = vmul.f32 %v10447_v55, %v10447_v55  ;;  %v3359_v13 = vpop.f32.mrf.mxu0 }
 0x494   : > { %3983 = vadd.xlane.f32.xlu2 %v3982_v26  ;;  %4399 = vadd.xlane.f32.xlu1 %v4398_v21  ;;  %v4402_v61 = vadd.f32 %v4401_v54, %v4271_v37 }
 0x496   : > { %v3826_v3 = vpop.f32.mrf.mxu3 }
 0x497   : > { %v10449_v10 = vadd.f32 %v3826_v3, %v3667_v52 }
 0x498   : > { %v3510_v18 = vpop.f32.mrf.mxu1 }
 0x499   : > { %v3985_v22 = vsel %vm1976_vm0, %v10449_v10, 0.0  ;;  %v4274_v63 = vmul.f32 %v10449_v10, %v10449_v10  ;;  %v10464_v40 = vadd.f32 %v3510_v18, %v3351_v5  ;;  %v3677_v31 = vpop.f32.mrf.mxu2 }
 0x49a   : > { %v3986_v6 = vadd.f32 %v3985_v22, %v10447_v55 }
 0x49b   : > { %v4405_v58 = vsel %vm1976_vm0, %v4274_v63, 0.0  ;;  %v3361_v12 = vpop.f32.mrf.mxu0 }
 0x49c   : > { %3987 = vadd.xlane.f32.xlu0 %v3986_v6  ;;  %4403 = vadd.xlane.f32.xlu2 %v4402_v61  ;;  %v4406_v23 = vadd.f32 %v4405_v58, %v4273_v46 }
 0x49e   : > { %v3828_v59 = vpop.f32.mrf.mxu3 }
 0x49f   : > { %v10461_v35 = vadd.f32 %v3828_v59, %v3669_v49  ;;  %v4275_v49 = vmul.f32 %v10464_v40, %v10464_v40 }
 0x4a0   : > { %v3513_v42 = vpop.f32.mrf.mxu1 }
 0x4a1   : > { %v3989_v60 = vsel %vm1976_vm0, %v10461_v35, 0.0  ;;  %v4276_v25 = vmul.f32 %v10461_v35, %v10461_v35  ;;  %v10471_v62 = vadd.f32 %v3513_v42, %v3354_v34  ;;  %v3679_v20 = vpop.f32.mrf.mxu2  ;;  %v7590_v34 = vld [vmem:[%s10298_s17 + $0xb8] sm:$0xf0] }
 0x4a2   : > { %v3990_v52 = vadd.f32 %v3989_v60, %v10464_v40  ;;  %v7593_v7 = vor.u32 %v7980_v11, %v7590_v34 }
 0x4a3   : > { %v4409_v5 = vsel %vm1976_vm0, %v4276_v25, 0.0  ;;  %v4277_v36 = vmul.f32 %v10471_v62, %v10471_v62  ;;  %v3364_v18 = vpop.f32.mrf.mxu0 }
 0x4a4   : > { %3991 = vadd.xlane.f32.xlu1 %v3990_v52  ;;  %4407 = vadd.xlane.f32.xlu0 %v4406_v23  ;;  %v4410_v41 = vadd.f32 %v4409_v5, %v4275_v49 }
 0x4a5   : > { %7779 = vmatmul.msk.bf16.gmra.mxu3 %vm3234_vm2, %v7593_v7  ;;  %7749 = vmatmul.msk.bf16.gmra.mxu1 %vm3234_vm2, %v7593_v7 }
 0x4a6   : > { %v3831_v51 = vpop.f32.mrf.mxu3 }
 0x4a7   : > { %v10473_v33 = vadd.f32 %v3831_v51, %v3672_v0 }
 0x4a8   : > { %v3515_v47 = vpop.f32.mrf.mxu1 }
 0x4a9   : > { %v3993_v32 = vsel %vm1976_vm0, %v10473_v33, 0.0  ;;  %v4278_v29 = vmul.f32 %v10473_v33, %v10473_v33  ;;  %v10492_v39 = vadd.f32 %v3515_v47, %v3356_v17 }
 0x4aa   : > { %v3994_v1 = vadd.f32 %v3993_v32, %v10471_v62 }
 0x4ab   : > { %v4413_v50 = vsel %vm1976_vm0, %v4278_v29, 0.0  ;;  %v4279_v6 = vmul.f32 %v10492_v39, %v10492_v39  ;;  %v3366_v25 = vpop.f32.mrf.mxu0 }
 0x4ac   : > { %3995 = vadd.xlane.f32.xlu2 %v3994_v1  ;;  %4411 = vadd.xlane.f32.xlu1 %v4410_v41  ;;  %v4414_v21 = vadd.f32 %v4413_v50, %v4277_v36 }
 0x4ae   : > { %v3833_v14 = vpop.f32.mrf.mxu3 }
 0x4af   : > { %v10489_v4 = vadd.f32 %v3833_v14, %v3674_v56  ;;  %v3682_v56 = vpop.f32.mrf.mxu2 }
 0x4b0   : > { %v3518_v0 = vpop.f32.mrf.mxu1 }
 0x4b1   : > { %v3997_v43 = vsel %vm1976_vm0, %v10489_v4, 0.0  ;;  %v4280_v2 = vmul.f32 %v10489_v4, %v10489_v4  ;;  %v10501_v54 = vadd.f32 %v3518_v0, %v3359_v13 }
 0x4b2   : > { %v3998_v26 = vadd.f32 %v3997_v43, %v10492_v39 }
 0x4b3   : > { %12935 = vst [vmem:[#allocation22_spill] sm:$0xff] %v10501_v54  ;;  %v4417_v37 = vsel %vm1976_vm0, %v4280_v2, 0.0  ;;  %v4281_v42 = vmul.f32 %v10501_v54, %v10501_v54 }
 0x4b4   : > { %3999 = vadd.xlane.f32.xlu0 %v3998_v26  ;;  %4415 = vadd.xlane.f32.xlu2 %v4414_v21  ;;  %v4418_v59 = vadd.f32 %v4417_v37, %v4279_v6 }
 0x4b6   : > { %v3836_v3 = vpop.f32.mrf.mxu3 }
 0x4b7   : > { %v10503_v17 = vadd.f32 %v3836_v3, %v3677_v31  ;;  %v3684_v51 = vpop.f32.mrf.mxu2 }
 0x4b8   : > { %v3520_v22 = vpop.f32.mrf.mxu1 }
 0x4b9   : > { %12936 = vst [vmem:[#allocation10_spill] sm:$0xff] %v10503_v17  ;;  %v4001_v61 = vsel %vm1976_vm0, %v10503_v17, 0.0  ;;  %v4282_v46 = vmul.f32 %v10503_v17, %v10503_v17  ;;  %v10518_v52 = vadd.f32 %v3520_v22, %v3361_v12  ;;  %v3369_v12 = vpop.f32.mrf.mxu0 }
 0x4ba   : > { %v4002_v63 = vadd.f32 %v4001_v61, %v10501_v54 }
 0x4bb   : > { %v4421_v13 = vsel %vm1976_vm0, %v4282_v46, 0.0  ;;  %v4283_v41 = vmul.f32 %v10518_v52, %v10518_v52 }
 0x4bc   : > { %4003 = vadd.xlane.f32.xlu1 %v4002_v63  ;;  %4419 = vadd.xlane.f32.xlu0 %v4418_v59  ;;  %v4422_v8 = vadd.f32 %v4421_v13, %v4281_v42 }
 0x4be   : > { %v3838_v58 = vpop.f32.mrf.mxu3 }
 0x4bf   : > { %v10515_v60 = vadd.f32 %v3838_v58, %v3679_v20  ;;  %v3687_v11 = vpop.f32.mrf.mxu2 }
 0x4c0   : > { %v3523_v23 = vpop.f32.mrf.mxu1 }
 0x4c1   : > { %v4005_v31 = vsel %vm1976_vm0, %v10515_v60, 0.0  ;;  %v4284_v28 = vmul.f32 %v10515_v60, %v10515_v60  ;;  %v10525_v49 = vadd.f32 %v3523_v23, %v3364_v18  ;;  %v3371_v37 = vpop.f32.mrf.mxu0 }
 0x4c2   : > { %v4006_v5 = vadd.f32 %v4005_v31, %v10518_v52 }
 0x4c3   : > { %12937 = vst [vmem:[#allocation23_spill] sm:$0xff] %v10525_v49  ;;  %v4425_v32 = vsel %vm1976_vm0, %v4284_v28, 0.0  ;;  %v4285_v50 = vmul.f32 %v10525_v49, %v10525_v49 }
 0x4c4   : > { %4007 = vadd.xlane.f32.xlu2 %v4006_v5  ;;  %4423 = vadd.xlane.f32.xlu1 %v4422_v8  ;;  %v4426_v20 = vadd.f32 %v4425_v32, %v4283_v41  ;;  %v12945_v41 = vld [vmem:[#allocation11_spill] sm:$0xff] }
 0x4c6   : > { %v3841_v47 = vpop.f32.mrf.mxu3 }
 0x4c7   : > { %v10527_v53 = vadd.f32 %v3841_v47, %v3682_v56  ;;  %v3689_v6 = vpop.f32.mrf.mxu2 }
 0x4c8   : > { %v3525_v1 = vpop.f32.mrf.mxu1 }
 0x4c9   : > { %12938 = vst [vmem:[#allocation21_spill] sm:$0xff] %v10527_v53  ;;  %v4009_v29 = vsel %vm1976_vm0, %v10527_v53, 0.0  ;;  %v4286_v36 = vmul.f32 %v10527_v53, %v10527_v53  ;;  %v10542_v43 = vadd.f32 %v3525_v1, %v3366_v25  ;;  %v3374_v31 = vpop.f32.mrf.mxu0 }
 0x4ca   : > { %v4010_v14 = vadd.f32 %v4009_v29, %v10525_v49 }
 0x4cb   : > { %v4429_v0 = vsel %vm1976_vm0, %v4286_v36, 0.0  ;;  %12940 = vst [vmem:[#allocation9_spill] sm:$0xff] %v10542_v43  ;;  %v4287_v46 = vmul.f32 %v10542_v43, %v10542_v43 }
 0x4cc   : > { %4011 = vadd.xlane.f32.xlu0 %v4010_v14  ;;  %4427 = vadd.xlane.f32.xlu2 %v4426_v20  ;;  %v4430_v3 = vadd.f32 %v4429_v0, %v4285_v50 }
 0x4ce   : > { %v3843_v34 = vpop.f32.mrf.mxu3 }
 0x4cf   : > { %v10539_v7 = vadd.f32 %v3843_v34, %v3684_v51  ;;  %v3692_v32 = vpop.f32.mrf.mxu2 }
 0x4d0   : > { %v3528_v26 = vpop.f32.mrf.mxu1 }
 0x4d1   : > { %12939 = vst [vmem:[#allocation19_spill] sm:$0xff] %v10539_v7  ;;  %v4013_v21 = vsel %vm1976_vm0, %v10539_v7, 0.0  ;;  %v4288_v18 = vmul.f32 %v10539_v7, %v10539_v7  ;;  %v10549_v56 = vadd.f32 %v3528_v26, %v3369_v12  ;;  %v4864_v7 = vld [vmem:[%s10661_s20 + $0x18] sm:$0xff] }
 0x4d2   : > { %v4014_v2 = vadd.f32 %v4013_v21, %v10542_v43 }
 0x4d3   : > { %12941 = vst [vmem:[#allocation3_spill] sm:$0xff] %v10549_v56  ;;  %v4433_v63 = vsel %vm1976_vm0, %v4288_v18, 0.0  ;;  %v4289_v51 = vmul.f32 %v10549_v56, %v10549_v56 }
 0x4d4   : > { %4015 = vadd.xlane.f32.xlu1 %v4014_v2  ;;  %4431 = vadd.xlane.f32.xlu0 %v4430_v3  ;;  %v4434_v13 = vadd.f32 %v4433_v63, %v4287_v46 }
 0x4d6   : > { %v3846_v22 = vpop.f32.mrf.mxu3 }
 0x4d7   : > { %v10551_v61 = vadd.f32 %v3846_v22, %v3687_v11  ;;  %v3376_v22 = vpop.f32.mrf.mxu0 }
 0x4d8   : > { %v3530_v59 = vpop.f32.mrf.mxu1 }
 0x4d9   : > { %12942 = vst [vmem:[#allocation16_spill] sm:$0xff] %v10551_v61  ;;  %v4017_v58 = vsel %vm1976_vm0, %v10551_v61, 0.0  ;;  %v4290_v23 = vmul.f32 %v10551_v61, %v10551_v61  ;;  %v10566_v47 = vadd.f32 %v3530_v59, %v3371_v37 }
 0x4da   : > { %v4018_v42 = vadd.f32 %v4017_v58, %v10549_v56  ;;  %v3694_v58 = vpop.f32.mrf.mxu2 }
 0x4db   : > { %v4437_v8 = vsel %vm1976_vm0, %v4290_v23, 0.0  ;;  %12944 = vst [vmem:[#allocation7_spill] sm:$0xff] %v10566_v47  ;;  %v4291_v63 = vmul.f32 %v10566_v47, %v10566_v47 }
 0x4dc   : > { %4019 = vadd.xlane.f32.xlu2 %v4018_v42  ;;  %4435 = vadd.xlane.f32.xlu1 %v4434_v13  ;;  %v4438_v36 = vadd.f32 %v4437_v8, %v4289_v51 }
 0x4de   : > { %v3848_v25 = vpop.f32.mrf.mxu3 }
 0x4df   : > { %v10563_v5 = vadd.f32 %v3848_v25, %v3689_v6  ;;  %v3964_v28 = vpop.xlane.xlu2 %3963 }
 0x4e0   : > { %v3533_v1 = vpop.f32.mrf.mxu1  ;;  %v10569_v29 = vmul.f32 %v3964_v28, %v12945_v41 }
 0x4e1   : > { %12943 = vst [vmem:[#allocation18_spill] sm:$0xff] %v10563_v5  ;;  %v4021_v12 = vsel %vm1976_vm0, %v10563_v5, 0.0  ;;  %v4384_v14 = vpop.xlane.xlu0 %4383  ;;  %v4292_v50 = vmul.f32 %v10563_v5, %v10563_v5  ;;  %v10579_v21 = vadd.f32 %v3533_v1, %v3374_v31 }
 0x4e2   : > { %v4022_v20 = vadd.f32 %v4021_v12, %v10566_v47  ;;  %v4681_v11 = vmul.f32 %v10569_v29, %v10569_v29  ;;  %v4621_v34 = vmul.f32 %v4384_v14, %v12945_v41  ;;  %v3379_v12 = vpop.f32.mrf.mxu0  ;;  %v7614_v47 = vld [vmem:[%s10298_s17 + $0xe8] sm:$0xf0] }
 0x4e3   : > { %12946 = vst [vmem:[#allocation2_spill] sm:$0xff] %v10579_v21  ;;  %v4441_v18 = vsel %vm1976_vm0, %v4292_v50, 0.0  ;;  %v4293_v31 = vmul.f32 %v10579_v21, %v10579_v21 }
 0x4e4   : > { %4023 = vadd.xlane.f32.xlu0 %v4022_v20  ;;  %4439 = vadd.xlane.f32.xlu2 %v4438_v36  ;;  %v4741_v0 = vsub.f32 %v4621_v34, %v4681_v11  ;;  %v4442_v13 = vadd.f32 %v4441_v18, %v4291_v63 }
 0x4e6   : > { %v3851_v26 = vpop.f32.mrf.mxu3  ;;  %v4801_v2 = vmax.f32 %v4741_v0, 0.0 }
 0x4e7   : > { %v10581_v3 = vadd.f32 %v3851_v26, %v3692_v32  ;;  %v3968_v37 = vpop.xlane.xlu1 %3967  ;;  %v3697_v26 = vpop.f32.mrf.mxu2 }
 0x4e8   : > { %v10584_v6 = vadd.f32 0.001, %v4801_v2  ;;  %v3535_v59 = vpop.f32.mrf.mxu1  ;;  %v10609_v50 = vmul.f32 %v3968_v37, %v12945_v41 }
 0x4e9   : > { %12947 = vst [vmem:[#allocation20_spill] sm:$0xff] %v10581_v3  ;;  %v4025_v46 = vsel %vm1976_vm0, %v10581_v3, 0.0  ;;  %v4294_v23 = vmul.f32 %v10581_v3, %v10581_v3  ;;  %v10601_v1 = vadd.f32 %v3535_v59, %v3376_v22 }
 0x4ea   : > { %8073 = vrsqrt.f32 %v10584_v6  ;;  %v4026_v42 = vadd.f32 %v4025_v46, %v10579_v21  ;;  %vm4987_vm4 = vweird.f32 %v10584_v6 }
 0x4eb   : > { %v4445_v8 = vsel %vm1976_vm0, %v4294_v23, 0.0  ;;  %12949 = vst [vmem:[#allocation13_spill] sm:$0xff] %v10601_v1 }
 0x4ec   : > { %4027 = vadd.xlane.f32.xlu1 %v4026_v42  ;;  %4443 = vadd.xlane.f32.xlu0 %v4442_v13  ;;  %v4446_v2 = vadd.f32 %v4445_v8, %v4293_v31  ;;  %v7983_v42 = vld [vmem:[%s10298_s17 + $0xc4] sm:$0xf0]  ;;  %v4682_v13 = vmul.f32 %v10609_v50, %v10609_v50  ;;  %v7598_v31 = vld [vmem:[%s10298_s17 + $0xc8] sm:$0xf0] }
 0x4ee   : > { %v3853_v25 = vpop.f32.mrf.mxu3 }
 0x4ef   : > { %v10596_v51 = vadd.f32 %v3853_v25, %v3694_v58  ;;  %v3972_v28 = vpop.xlane.xlu0 %3971  ;;  %v4388_v20 = vpop.xlane.xlu1 %4387  ;;  %v7596_v58 = vld [vmem:[%s10298_s17 + $0xc0] sm:$0xf]  ;;  %v7982_v25 = vld [vmem:[%s10298_s17 + $0xc4] sm:$0xf] }
 0x4f0   : > { %v10599_v32 = vpop.eup %8073  ;;  %v10604_v14 = vmul.f32 %v3972_v28, %v12945_v41  ;;  %v3538_v11 = vpop.f32.mrf.mxu1  ;;  %v4622_v37 = vmul.f32 %v4388_v20, %v12945_v41  ;;  %v7597_v23 = vor.u32 %v7983_v42, %v7596_v58 }
 0x4f1   : > { %12948 = vst [vmem:[#allocation8_spill] sm:$0xff] %v10596_v51  ;;  %v4029_v36 = vsel %vm1976_vm0, %v10596_v51, 0.0  ;;  %v4392_v34 = vpop.xlane.xlu2 %4391  ;;  %v4982_v63 = vmul.f32 %v10599_v32, %v10584_v6  ;;  %v4296_v59 = vmul.f32 %v10596_v51, %v10596_v51  ;;  %v10626_v28 = vadd.f32 %v3538_v11, %v3379_v12  ;;  %v3699_v58 = vpop.f32.mrf.mxu2 }
 0x4f2   : > { %v4030_v0 = vadd.f32 %v4029_v36, %v10601_v1  ;;  %v4683_v18 = vmul.f32 %v10604_v14, %v10604_v14  ;;  %v4623_v22 = vmul.f32 %v4392_v34, %v12945_v41  ;;  %v7601_v34 = vor.u32 %v7982_v25, %v7598_v31  ;;  %3711 = vmatmul.bf16.gmra.mxu2 %v7597_v23 }
 0x4f3   : > { %12950 = vst [vmem:[#allocation14_spill] sm:$0xff] %v10626_v28  ;;  %v4983_v3 = vmul.f32 %v10599_v32, %v4982_v63  ;;  %v4449_v20 = vsel %vm1976_vm0, %v4296_v59, 0.0  ;;  %3393 = vmatmul.bf16.gmra.mxu0 %v7597_v23  ;;  %v3381_v59 = vpop.f32.mrf.mxu0  ;;  %v4297_v42 = vmul.f32 %v10626_v28, %v10626_v28  ;;  %vm4988_vm3 = vweird.f32 %v10599_v32 }
 0x4f4   : > { %4031 = vadd.xlane.f32.xlu2 %v4030_v0  ;;  %4447 = vadd.xlane.f32.xlu1 %v4446_v2  ;;  %v4743_v46 = vsub.f32 %v4623_v22, %v4683_v18  ;;  %v4742_v0 = vsub.f32 %v4622_v37, %v4682_v13  ;;  %v4295_v2 = vmul.f32 %v10601_v1, %v10601_v1  ;;  %vm4989_vm5 = vmor %vm4987_vm4, %vm4988_vm3 }
 0x4f5   : > { %7780 = vmatmul.msk.bf16.gmra.mxu3 %vm3234_vm2, %v7601_v34  ;;  %7750 = vmatmul.msk.bf16.gmra.mxu1 %vm3234_vm2, %v7601_v34  ;;  %v4984_v63 = vmul.f32 0.5, %v4983_v3 }
 0x4f6   : > { %v3856_v8 = vpop.f32.mrf.mxu3  ;;  %v4803_v36 = vmax.f32 %v4743_v46, 0.0  ;;  %v4450_v22 = vadd.f32 %v4449_v20, %v4295_v2  ;;  %v4802_v46 = vmax.f32 %v4742_v0, 0.0 }
 0x4f7   : > { %v10629_v21 = vadd.f32 %v3856_v8, %v3697_v26  ;;  %v4985_v31 = vsub.f32 1.5, %v4984_v63 }
 0x4f8   : > { %v4923_v18 = vadd.f32 0.001, %v4803_v36  ;;  %v3540_v37 = vpop.f32.mrf.mxu1  ;;  %v4922_v36 = vadd.f32 0.001, %v4802_v46 }
 0x4f9   : > { %12951 = vst [vmem:[#allocation4_spill] sm:$0xff] %v10629_v21  ;;  %v4033_v12 = vsel %vm1976_vm0, %v10629_v21, 0.0  ;;  %v4298_v11 = vmul.f32 %v10629_v21, %v10629_v21  ;;  %v10644_v25 = vadd.f32 %v3540_v37, %v3381_v59  ;;  %v4861_v37 = vld [vmem:[%s10661_s20] sm:$0xff] }
 0x4fa   : > { %v4034_v26 = vadd.f32 %v4033_v12, %v10626_v28  ;;  %8075 = vrsqrt.f32 %v4923_v18  ;;  %vm5007_vm7 = vweird.f32 %v4923_v18  ;;  %vm4997_vm10 = vweird.f32 %v4922_v36 }
 0x4fb   : > { %v4453_v13 = vsel %vm1976_vm0, %v4298_v11, 0.0  ;;  %12952 = vst [vmem:[#allocation5_spill] sm:$0xff] %v10644_v25  ;;  %8077 = vrsqrt.f32 %v4922_v36 }
 0x4fc   : > { %4035 = vadd.xlane.f32.xlu0 %v4034_v26  ;;  %4451 = vadd.xlane.f32.xlu2 %v4450_v22  ;;  %v4454_v34 = vadd.f32 %v4453_v13, %v4297_v42  ;;  %v4986_v26 = vmul.f32 %v10599_v32, %v4985_v31  ;;  %v4299_v22 = vmul.f32 %v10644_v25, %v10644_v25 }
 0x4fe   : > { %v3858_v23 = vpop.f32.mrf.mxu3  ;;  %v4990_v46 = vsel %vm4989_vm5, %v10599_v32, %v4986_v26 }
 0x4ff   : > { %v10646_v8 = vadd.f32 %v3858_v23, %v3699_v58  ;;  %v5581_v13 = vmul.f32 %v4990_v46, %v4861_v37 }
 0x500   : > { %v8076_v3 = vpop.eup %8075 }
 0x501   : > { %12953 = vst [vmem:[#allocation15_spill] sm:$0xff] %v10646_v8  ;;  %v5002_v20 = vmul.f32 %v8076_v3, %v4923_v18  ;;  %v4037_v0 = vsel %vm1976_vm0, %v10646_v8, 0.0  ;;  %v4300_v2 = vmul.f32 %v10646_v8, %v10646_v8  ;;  %v8078_v42 = vpop.eup %8077  ;;  %v5701_v6 = vmul.f32 %v5581_v13, %v10569_v29  ;;  %v4862_v18 = vld [vmem:[%s10661_s20 + $0x8] sm:$0xff] }
 0x502   : > { %v4038_v12 = vadd.f32 %v4037_v0, %v10644_v25  ;;  %v4992_v31 = vmul.f32 %v8078_v42, %v4922_v36  ;;  %vm5008_vm6 = vweird.f32 %v8076_v3  ;;  %vm4998_vm9 = vweird.f32 %v8078_v42 }
 0x503   : > { %v5003_v11 = vmul.f32 %v8076_v3, %v5002_v20  ;;  %v4457_v63 = vsel %vm1976_vm0, %v4300_v2, 0.0  ;;  %vm5009_vm8 = vmor %vm5007_vm7, %vm5008_vm6  ;;  %v4863_v2 = vld [vmem:[%s10661_s20 + $0x10] sm:$0xff] }
 0x504   : > { %4039 = vadd.xlane.f32.xlu1 %v4038_v12  ;;  %4455 = vadd.xlane.f32.xlu0 %v4454_v34  ;;  %v4458_v58 = vadd.f32 %v4457_v63, %v4299_v22  ;;  %v5641_v34 = vld [vmem:[%s10671_s23] sm:$0xff]  ;;  %v4993_v32 = vmul.f32 %v8078_v42, %v4992_v31  ;;  %v5643_v63 = vld [vmem:[%s10671_s23 + $0x10] sm:$0xff]  ;;  %vm4999_vm11 = vmor %vm4997_vm10, %vm4998_vm9 }
 0x505   : > { %v5004_v59 = vmul.f32 0.5, %v5003_v11  ;;  %v5761_v0 = vsub.f32 %v5641_v34, %v5701_v6  ;;  %v5642_v31 = vld [vmem:[%s10671_s23 + $0x8] sm:$0xff]  ;;  %v3980_v34 = vpop.xlane.xlu1 %3979 }
 0x506   : > { %v4994_v11 = vmul.f32 0.5, %v4993_v32  ;;  %v7985_v32 = vld [vmem:[%s10298_s17 + $0xd4] sm:$0xf0] }
 0x507   : > { %v5005_v23 = vsub.f32 1.5, %v5004_v59 }
 0x508   : > { %v4995_v22 = vsub.f32 1.5, %v4994_v11 }
 0x509   : > { %v5006_v20 = vmul.f32 %v8076_v3, %v5005_v23  ;;  %v4396_v23 = vpop.xlane.xlu0 %4395 }
 0x50a   : > { %v4996_v59 = vmul.f32 %v8078_v42, %v4995_v22  ;;  %v7984_v22 = vld [vmem:[%s10298_s17 + $0xd4] sm:$0xf] }
 0x50b   : > { %v5010_v12 = vsel %vm5009_vm8, %v8076_v3, %v5006_v20  ;;  %v7604_v20 = vld [vmem:[%s10298_s17 + $0xd0] sm:$0xf] }
 0x50c   : > { %4459 = vadd.xlane.f32.xlu1 %v4458_v58  ;;  %v10676_v26 = vmul.f32 %v5010_v12, %v4863_v2  ;;  %v5000_v3 = vsel %vm4999_vm11, %v8078_v42, %v4996_v59  ;;  %v3976_v58 = vpop.xlane.xlu2 %3975  ;;  %v4624_v42 = vmul.f32 %v4396_v23, %v12945_v41  ;;  %v7605_v11 = vor.u32 %v7985_v32, %v7604_v20  ;;  %v3861_v59 = vpop.f32.mrf.mxu3 }
 0x50d   : > { %v5582_v46 = vmul.f32 %v5000_v3, %v4862_v18  ;;  %v3384_v3 = vpop.f32.mrf.mxu0 }
 0x50e   : > { %v5703_v29 = vmul.f32 %v10676_v26, %v10604_v14  ;;  %3716 = vmatmul.bf16.gmra.mxu2 %v7605_v11  ;;  %3398 = vmatmul.bf16.gmra.mxu0 %v7605_v11 }
 0x50f   : > { %v5702_v14 = vmul.f32 %v5582_v46, %v10609_v50 }
 0x510   : > { %v5763_v37 = vsub.f32 %v5643_v63, %v5703_v29  ;;  %v7606_v29 = vld [vmem:[%s10298_s17 + $0xd8] sm:$0xf0]  ;;  %v3702_v63 = vpop.f32.mrf.mxu2 }
 0x511   : > { %v5762_v6 = vsub.f32 %v5642_v31, %v5702_v14  ;;  %v10692_v12 = vpop.xlane.xlu0 %3987  ;;  %v7609_v50 = vor.u32 %v7984_v22, %v7606_v29  ;;  %v4400_v14 = vpop.xlane.xlu1 %4399 }
 0x513   : > { %7781 = vmatmul.msk.bf16.gmra.mxu3 %vm3234_vm2, %v7609_v50  ;;  %7751 = vmatmul.msk.bf16.gmra.mxu1 %vm3234_vm2, %v7609_v50 }
 0x514   : > { %6243 = vperm.xlu2 %8029, %v5761_v0   ;;  %v3984_v0 = vpop.xlane.xlu2 %3983  ;;  %v3863_v50 = vpop.f32.mrf.mxu3 }
 0x515   : > { %v10710_v20 = vmul.f32 %v3984_v0, %v12945_v41 }
 0x517   : > { %v4686_v22 = vmul.f32 %v10710_v20, %v10710_v20 }
 0x518   : > { %5823 = vperm.xlu0 %8030, %v5581_v13   ;;  %v10683_v13 = vmul.f32 %v3976_v58, %v12945_v41  ;;  %v3704_v29 = vpop.f32.mrf.mxu2 }
 0x519   : > { %v10716_v11 = vpop.xlane.xlu1 %3991 }
 0x51a   : > { %v4684_v36 = vmul.f32 %v10683_v13, %v10683_v13 }
 0x51c   : > { %v4744_v2 = vsub.f32 %v4624_v42, %v4684_v36  ;;  %v4404_v36 = vpop.xlane.xlu2 %4403  ;;  %v10707_v42 = vpop.xlane.xlu0 %4407 }
 0x51d   : > { %v4626_v32 = vmul.f32 %v4404_v36, %v12945_v41  ;;  %v10727_v36 = vadd.f32 %v3863_v50, %v3704_v29 }
 0x51e   : > { %v4804_v18 = vmax.f32 %v4744_v2, 0.0 }
 0x51f   : > { %v4746_v0 = vsub.f32 %v4626_v32, %v4686_v22  ;;  %12956 = vst [vmem:[#allocation17_spill] sm:$0xff] %v10727_v36  ;;  %v4625_v22 = vmul.f32 %v4400_v14, %v12945_v41 }
 0x520   : > { %6253 = vperm.xlu0 %8030, %v5763_v37   ;;  %v10696_v37 = vadd.f32 %v3861_v59, %v3702_v63  ;;  %v10704_v31 = vadd.f32 0.001, %v4804_v18  ;;  %v3386_v59 = vpop.f32.mrf.mxu0 }
 0x521   : > { %v4806_v25 = vmax.f32 %v4746_v0, 0.0  ;;  %v10741_v29 = vpop.xlane.xlu1 %4411 }
 0x522   : > { %12954 = vst [vmem:[#allocation6_spill] sm:$0xff] %v10696_v37  ;;  %v4041_v23 = vsel %vm1976_vm0, %v10696_v37, 0.0  ;;  %8079 = vrsqrt.f32 %v10704_v31  ;;  %v4302_v2 = vmul.f32 %v10696_v37, %v10696_v37  ;;  %vm5017_vm13 = vweird.f32 %v10704_v31 }
 0x523   : > { %v10743_v50 = vadd.f32 0.001, %v4806_v25 }
 0x525   : > { %5828 = vperm.xlu1 %8028, %v5582_v46   ;;  %v3543_v46 = vpop.f32.mrf.mxu1  ;;  %8081 = vrsqrt.f32 %v10743_v50  ;;  %vm5037_vm1 = vweird.f32 %v10743_v50 }
 0x526   : > { %v10700_v58 = vadd.f32 %v3543_v46, %v3384_v3  ;;  %v4461_v3 = vsel %vm1976_vm0, %v4302_v2, 0.0  ;;  %v4045_v2 = vsel %vm1976_vm0, %v10727_v36, 0.0 }
 0x528   : > { %12955 = vst [vmem:[#allocation12_spill] sm:$0xff] %v10700_v58  ;;  %v4301_v63 = vmul.f32 %v10700_v58, %v10700_v58  ;;  %v10723_v46 = vpop.eup %8079  ;;  %v3389_v28 = vpop.f32.mrf.mxu0 }
 0x529   : > { %v5012_v37 = vmul.f32 %v10723_v46, %v10704_v31  ;;  %vm5018_vm12 = vweird.f32 %v10723_v46 }
 0x52a   : > { %v4462_v8 = vadd.f32 %v4461_v3, %v4301_v63  ;;  %v3707_v3 = vpop.f32.mrf.mxu2  ;;  %vm5019_vm14 = vmor %vm5017_vm13, %vm5018_vm12 }
 0x52b   : > { %v5013_v63 = vmul.f32 %v10723_v46, %v5012_v37 }
 0x52d   : > { %6248 = vperm.xlu1 %8028, %v5762_v6   ;;  %v4042_v6 = vadd.f32 %v4041_v23, %v10700_v58  ;;  %v3545_v18 = vpop.f32.mrf.mxu1  ;;  %v10725_v23 = vpop.xlane.xlu2 %3995  ;;  %v10734_v58 = vmul.f32 %v3980_v34, %v12945_v41  ;;  %v5014_v25 = vmul.f32 0.5, %v5013_v63 }
 0x52e   : > { %v10736_v32 = vadd.f32 %v3545_v18, %v3386_v59  ;;  %v3866_v59 = vpop.f32.mrf.mxu3  ;;  %v10848_v53 = vmul.f32 %v10725_v23, %v12945_v41 }
 0x52f   : > { %v4685_v0 = vmul.f32 %v10734_v58, %v10734_v58  ;;  %v10756_v37 = vadd.f32 %v3866_v59, %v3707_v3  ;;  %v8082_v3 = vpop.eup %8081 }
 0x530   : > { %12957 = vst [vmem:[#allocation11_spill] sm:$0xff] %v10736_v32  ;;  %v4046_v34 = vadd.f32 %v4045_v2, %v10736_v32  ;;  %v4303_v2 = vmul.f32 %v10736_v32, %v10736_v32  ;;  %vm5038_vm15 = vweird.f32 %v8082_v3  ;;  %v4689_v23 = vmul.f32 %v10848_v53, %v10848_v53 }
 0x531   : > { %v4745_v18 = vsub.f32 %v4625_v22, %v4685_v0  ;;  %12958 = vst [vmem:[#allocation24_spill] sm:$0xff] %v10756_v37  ;;  %v10763_v0 = vpop.xlane.xlu1 %4003  ;;  %v4049_v63 = vsel %vm1976_vm0, %v10756_v37, 0.0  ;;  %vm5039_vm3 = vmor %vm5037_vm1, %vm5038_vm15 }
 0x535   : > { %v10751_v21 = vpop.xlane.xlu2 %4415  ;;  %v3548_v51 = vpop.f32.mrf.mxu1 }
 0x536   : > { %v10761_v22 = vadd.f32 %v3548_v51, %v3389_v28  ;;  %v4306_v28 = vmul.f32 %v10756_v37, %v10756_v37 }
 0x538   : > { %12959 = vst [vmem:[#allocation25_spill] sm:$0xff] %v10761_v22  ;;  %v4305_v37 = vmul.f32 %v10761_v22, %v10761_v22 }
 0x539   : > { %v10791_v31 = vpop.xlane.xlu1 %4423 }
 0x53d   : > { %4043 = vadd.xlane.f32.xlu2 %v4042_v6  ;;  %v10729_v6 = vpop.xlane.xlu0 %3999 }
 0x545   : > { %4463 = vadd.xlane.f32.xlu2 %v4462_v8  ;;  %v4304_v8 = vmul.f32 %v10727_v36, %v10727_v36  ;;  %v10753_v14 = vpop.xlane.xlu0 %4419  ;;  %v4805_v36 = vmax.f32 %v4745_v18, 0.0  ;;  %v10771_v18 = vpop.xlane.xlu2 %4007 }
 0x547   : > { %v4465_v1 = vsel %vm1976_vm0, %v4304_v8, 0.0  ;;  %v10767_v59 = vadd.f32 0.001, %v4805_v36  ;;  %v4050_v8 = vadd.f32 %v4049_v63, %v10761_v22  ;;  %v5032_v36 = vmul.f32 %v8082_v3, %v10743_v50 }
 0x548   : > { %v4466_v5 = vadd.f32 %v4465_v1, %v4303_v2  ;;  %v7987_v2 = vld [vmem:[%s10298_s17 + $0xe4] sm:$0xf0] }
 0x549   : > { %8083 = vrsqrt.f32 %v10767_v59  ;;  %vm5027_vm5 = vweird.f32 %v10767_v59 }
 0x54a   : > { %4047 = vadd.xlane.f32.xlu0 %v4046_v34  ;;  %v5015_v34 = vsub.f32 1.5, %v5014_v25  ;;  %v7612_v25 = vld [vmem:[%s10298_s17 + $0xe0] sm:$0xf] }
 0x54b   : > { %v7613_v32 = vor.u32 %v7987_v2, %v7612_v25  ;;  %v5033_v25 = vmul.f32 %v8082_v3, %v5032_v36  ;;  %v10802_v36 = vpop.xlane.xlu1 %4015 }
 0x54c   : > { %v5016_v1 = vmul.f32 %v10723_v46, %v5015_v34  ;;  %v4469_v34 = vsel %vm1976_vm0, %v4306_v28, 0.0 }
 0x54d   : > { %v10773_v51 = vpop.xlane.xlu0 %4011  ;;  %3721 = vmatmul.bf16.gmra.mxu2 %v7613_v32  ;;  %3403 = vmatmul.bf16.gmra.mxu0 %v7613_v32  ;;  %v10795_v22 = vpop.xlane.xlu2 %4427 }
 0x54e   : > { %v5020_v43 = vsel %vm5019_vm14, %v10723_v46, %v5016_v1  ;;  %v5644_v1 = vld [vmem:[%s10671_s23 + $0x18] sm:$0xff] }
 0x54f   : > { %v8084_v2 = vpop.eup %8083 }
 0x550   : > { %v5022_v46 = vmul.f32 %v8084_v2, %v10767_v59  ;;  %vm5028_vm4 = vweird.f32 %v8084_v2  ;;  %v5645_v59 = vld [vmem:[%s10671_s23 + $0x20] sm:$0xff] }
 0x551   : > { %vm5029_vm6 = vmor %vm5027_vm5, %vm5028_vm4 }
 0x552   : > { %4467 = vadd.xlane.f32.xlu0 %v4466_v5  ;;  %v7986_v5 = vld [vmem:[%s10298_s17 + $0xe4] sm:$0xf] }
 0x553   : > { %v7617_v63 = vor.u32 %v7986_v5, %v7614_v47  ;;  %v4470_v47 = vadd.f32 %v4469_v34, %v4305_v37  ;;  %v5034_v5 = vmul.f32 0.5, %v5033_v25  ;;  %v5023_v37 = vmul.f32 %v8084_v2, %v5022_v46  ;;  %v10810_v61 = vpop.xlane.xlu1 %4435 }
 0x555   : > { %7782 = vmatmul.msk.bf16.gmra.mxu3 %vm3234_vm2, %v7617_v63  ;;  %7752 = vmatmul.msk.bf16.gmra.mxu1 %vm3234_vm2, %v7617_v63  ;;  %v10797_v28 = vpop.xlane.xlu0 %4431  ;;  %v5035_v63 = vsub.f32 1.5, %v5034_v5  ;;  %v5024_v25 = vmul.f32 0.5, %v5023_v37  ;;  %v5646_v37 = vld [vmem:[%s10671_s23 + $0x28] sm:$0xff] }
 0x557   : > { %4051 = vadd.xlane.f32.xlu1 %v4050_v8  ;;  %v5584_v8 = vmul.f32 %v5020_v43, %v4864_v7  ;;  %v5036_v43 = vmul.f32 %v8082_v3, %v5035_v63  ;;  %v5025_v5 = vsub.f32 1.5, %v5024_v25 }
 0x559   : > { %v5704_v32 = vmul.f32 %v5584_v8, %v10683_v13  ;;  %v4866_v13 = vld [vmem:[%s10661_s20 + $0x28] sm:$0xff] }
 0x55b   : > { %v5764_v7 = vsub.f32 %v5644_v1, %v5704_v32  ;;  %v5026_v32 = vmul.f32 %v8084_v2, %v5025_v5  ;;  %v10828_v5 = vmul.f32 %v10692_v12, %v12945_v41 }
 0x55d   : > { %5833 = vperm.xlu2 %8029, %v10676_v26   ;;  %v10804_v26 = vpop.xlane.xlu2 %4019  ;;  %v10806_v34 = vpop.xlane.xlu0 %4023 }
 0x55f   : > { %4471 = vadd.xlane.f32.xlu1 %v4470_v47  ;;  %v5040_v47 = vsel %vm5039_vm3, %v8082_v3, %v5036_v43  ;;  %v10819_v50 = vpop.xlane.xlu1 %4027  ;;  %v4865_v3 = vld [vmem:[%s10661_s20 + $0x20] sm:$0xff] }
 0x560   : > { %v5586_v46 = vmul.f32 %v5040_v47, %v4866_v13  ;;  %12960 = vst [vmem:[#allocation26_spill] sm:$0xff] %v10819_v50 }
 0x562   : > { %v5706_v63 = vmul.f32 %v5586_v46, %v10710_v20 }
 0x564   : > { %v5766_v43 = vsub.f32 %v5646_v37, %v5706_v63  ;;  %v3709_v37 = vpop.f32.mrf.mxu2 }
 0x565   : > { %6258 = vperm.xlu2 %8029, %v5764_v7   ;;  %v10812_v1 = vpop.xlane.xlu2 %4439  ;;  %v5030_v7 = vsel %vm5029_vm6, %v8084_v2, %v5026_v32  ;;  %v4687_v2 = vmul.f32 %v10828_v5, %v10828_v5 }
 0x566   : > { %5838 = vperm.xlu0 %8030, %v5584_v8   ;;  %v10814_v8 = vpop.xlane.xlu0 %4443  ;;  %v5585_v25 = vmul.f32 %v5030_v7, %v4865_v3  ;;  %v3868_v3 = vpop.f32.mrf.mxu3 }
 0x567   : > { %v10834_v56 = vpop.xlane.xlu1 %4447 }
 0x568   : > { %v5705_v20 = vmul.f32 %v5585_v25, %v10734_v58  ;;  %12962 = vst [vmem:[#allocation28_spill] sm:$0xff] %v10834_v56 }
 0x56a   : > { %v5765_v32 = vsub.f32 %v5645_v59, %v5705_v20 }
 0x56d   : > { %v10822_v13 = vpop.xlane.xlu2 %4031 }
 0x56e   : > { %5848 = vperm.xlu0 %8030, %v5586_v46   ;;  %v4627_v46 = vmul.f32 %v10707_v42, %v12945_v41  ;;  %v10844_v42 = vadd.f32 %v3868_v3, %v3709_v37 }
 0x56f   : > { %v10824_v47 = vpop.xlane.xlu0 %4035 }
 0x570   : > { %12961 = vst [vmem:[#allocation27_spill] sm:$0xff] %v10824_v47  ;;  %v4747_v63 = vsub.f32 %v4627_v46, %v4687_v2  ;;  %v3550_v47 = vpop.f32.mrf.mxu1  ;;  %v4053_v46 = vsel %vm1976_vm0, %v10844_v42, 0.0  ;;  %v4629_v2 = vmul.f32 %v10751_v21, %v12945_v41 }
 0x571   : > { %12965 = vst [vmem:[#allocation31_spill] sm:$0xff] %v10844_v42 }
 0x572   : > { %v4807_v58 = vmax.f32 %v4747_v63, 0.0 }
 0x574   : > { %v10850_v20 = vadd.f32 0.001, %v4807_v58  ;;  %v4749_v58 = vsub.f32 %v4629_v2, %v4689_v23  ;;  %v7988_v2 = vld [vmem:[%s10298_s17 + $0xf4] sm:$0xf] }
 0x575   : > { %v10838_v7 = vpop.xlane.xlu2 %4451 }
 0x576   : > { %6268 = vperm.xlu0 %8030, %v5766_v43   ;;  %v3391_v43 = vpop.f32.mrf.mxu0  ;;  %8085 = vrsqrt.f32 %v10850_v20  ;;  %vm5047_vm8 = vweird.f32 %v10850_v20 }
 0x577   : > { %v10840_v12 = vpop.xlane.xlu0 %4455  ;;  %v10852_v59 = vadd.f32 %v3550_v47, %v3391_v43  ;;  %v4308_v47 = vmul.f32 %v10844_v42, %v10844_v42  ;;  %v7989_v42 = vld [vmem:[%s10298_s17 + $0xf4] sm:$0xf0] }
 0x578   : > { %5843 = vperm.xlu1 %8028, %v5585_v25   ;;  %12963 = vst [vmem:[#allocation29_spill] sm:$0xff] %v10840_v12  ;;  %v10842_v25 = vpop.xlane.xlu1 %4039  ;;  %v7620_v12 = vld [vmem:[%s10298_s17 + $0xf0] sm:$0xf] }
 0x579   : > { %12964 = vst [vmem:[#allocation30_spill] sm:$0xff] %v10842_v25  ;;  %v4054_v21 = vadd.f32 %v4053_v46, %v10852_v59  ;;  %v4473_v46 = vsel %vm1976_vm0, %v4308_v47, 0.0 }
 0x57a   : > { %12966 = vst [vmem:[#allocation32_spill] sm:$0xff] %v10852_v59 }
 0x57c   : > { %v10880_v25 = vpop.eup %8085 }
 0x57d   : > { %v6244_v3 = vpop.permute.xlu2 %6243  ;;  %vm5048_vm7 = vweird.f32 %v10880_v25 }
 0x57e   : > { %v3394_v49 = vpop.f32.mrf.mxu0  ;;  %vm5049_vm9 = vmor %vm5047_vm8, %vm5048_vm7 }
 0x580   : > { %6263 = vperm.xlu1 %8028, %v5765_v32   ;;  %v10873_v43 = vpop.xlane.xlu1 %4459 }
 0x581   : > { %12967 = vst [vmem:[#allocation33_spill] sm:$0xff] %v10873_v43  ;;  %v5042_v43 = vmul.f32 %v10880_v25, %v10850_v20 }
 0x58a   : > { %v5824_v32 = vpop.permute.xlu0 %5823 }
 0x58b   : > { %v6121_v63 = vmul.f32 %v5824_v32, %v10368_v19  ;;  %v6122_v37 = vmul.f32 %v5824_v32, %v10370_v24  ;;  %v4307_v32 = vmul.f32 %v10852_v59, %v10852_v59  ;;  %v3553_v59 = vpop.f32.mrf.mxu1 }
 0x58d   : > { %v6541_v19 = vadd.f32 %v6244_v3, %v6121_v63  ;;  %v6542_v24 = vadd.f32 %v6244_v3, %v6122_v37  ;;  %v4809_v63 = vmax.f32 %v4749_v58, 0.0  ;;  %v3712_v37 = vpop.f32.mrf.mxu2  ;;  %v3871_v3 = vpop.f32.mrf.mxu3  ;;  %v4474_v23 = vadd.f32 %v4473_v46, %v4307_v32 }
 0x58e   : > { %4055 = vadd.xlane.f32.xlu2 %v4054_v21  ;;  %v7621_v21 = vor.u32 %v7989_v42, %v7620_v12  ;;  %v10894_v58 = vmul.f32 %v10716_v11, %v12945_v41  ;;  %v10897_v12 = vadd.f32 %v3553_v59, %v3394_v49  ;;  %v5043_v42 = vmul.f32 %v10880_v25, %v5042_v43 }
 0x58f   : > { %6661 = vst [vmem:[%s10867_s29] sm:$0xff] %v6541_v19  ;;  %v7622_v19 = vld [vmem:[%s10298_s17 + $0xf8] sm:$0xf0]  ;;  %v10890_v47 = vadd.f32 0.001, %v4809_v63  ;;  %v4628_v32 = vmul.f32 %v10741_v29, %v12945_v41 }
 0x590   : > { %6662 = vst.msk [vmem:[%s10867_s29 + $0x8] sm:$0xff] %vm1976_vm0, %v6542_v24  ;;  %v10888_v24 = vadd.f32 %v3871_v3, %v3712_v37  ;;  %v7625_v17 = vor.u32 %v7988_v2, %v7622_v19  ;;  %3726 = vmatmul.bf16.gmra.mxu2 %v7621_v21  ;;  %3408 = vmatmul.bf16.gmra.mxu0 %v7621_v21  ;;  %v5044_v59 = vmul.f32 0.5, %v5043_v42  ;;  %v3396_v2 = vpop.f32.mrf.mxu0 }
 0x591   : > { %8087 = vrsqrt.f32 %v10890_v47  ;;  %v4688_v11 = vmul.f32 %v10894_v58, %v10894_v58  ;;  %v4309_v42 = vmul.f32 %v10897_v12, %v10897_v12  ;;  %vm5067_vm11 = vweird.f32 %v10890_v47 }
 0x592   : > { %12968 = vst [vmem:[#allocation34_spill] sm:$0xff] %v10888_v24  ;;  %7783 = vmatmul.msk.bf16.gmra.mxu3 %vm3234_vm2, %v7625_v17  ;;  %7753 = vmatmul.msk.bf16.gmra.mxu1 %vm3234_vm2, %v7625_v17  ;;  %v4057_v46 = vsel %vm1976_vm0, %v10888_v24, 0.0  ;;  %v4310_v17 = vmul.f32 %v10888_v24, %v10888_v24  ;;  %v5045_v24 = vsub.f32 1.5, %v5044_v59 }
 0x593   : > { %v4058_v63 = vadd.f32 %v4057_v46, %v10897_v12  ;;  %v4748_v3 = vsub.f32 %v4628_v32, %v4688_v11  ;;  %v3555_v19 = vpop.f32.mrf.mxu1 }
 0x594   : > { %v4477_v11 = vsel %vm1976_vm0, %v4310_v17, 0.0 }
 0x595   : > { %v3714_v37 = vpop.f32.mrf.mxu2  ;;  %v3873_v49 = vpop.f32.mrf.mxu3  ;;  %v4808_v32 = vmax.f32 %v4748_v3, 0.0 }
 0x596   : > { %4475 = vadd.xlane.f32.xlu2 %v4474_v23  ;;  %v10913_v21 = vadd.f32 %v3873_v49, %v3714_v37  ;;  %v4478_v37 = vadd.f32 %v4477_v11, %v4309_v42  ;;  %v5046_v49 = vmul.f32 %v10880_v25, %v5045_v24  ;;  %v5647_v11 = vld [vmem:[%s10671_s23 + $0x30] sm:$0xff] }
 0x597   : > { %v5829_v54 = vpop.permute.xlu1 %5828  ;;  %v8088_v56 = vpop.eup %8087 }
 0x598   : > { %v6123_v29 = vmul.f32 %v5829_v54, %v10384_v9  ;;  %v6124_v43 = vmul.f32 %v5829_v54, %v10382_v27  ;;  %v10919_v27 = vadd.f32 %v3555_v19, %v3396_v2  ;;  %v5062_v9 = vmul.f32 %v8088_v56, %v10890_v47 }
 0x599   : > { %v4061_v54 = vsel %vm1976_vm0, %v10913_v21, 0.0  ;;  %v4312_v17 = vmul.f32 %v10913_v21, %v10913_v21  ;;  %vm5068_vm10 = vweird.f32 %v8088_v56 }
 0x59a   : > { %v4062_v3 = vadd.f32 %v4061_v54, %v10919_v27  ;;  %v5063_v59 = vmul.f32 %v8088_v56, %v5062_v9  ;;  %v4311_v24 = vmul.f32 %v10919_v27, %v10919_v27  ;;  %vm5069_vm12 = vmor %vm5067_vm11, %vm5068_vm10 }
 0x59b   : > { %v4481_v2 = vsel %vm1976_vm0, %v4312_v17, 0.0 }
 0x59c   : > { %v4482_v20 = vadd.f32 %v4481_v2, %v4311_v24 }
 0x59f   : > { %v6249_v23 = vpop.permute.xlu1 %6248 }
 0x5a0   : > { %v6543_v46 = vadd.f32 %v6249_v23, %v6123_v29  ;;  %v6544_v50 = vadd.f32 %v6249_v23, %v6124_v43  ;;  %4059 = vadd.xlane.f32.xlu0 %v4058_v63  ;;  %v4928_v63 = vadd.f32 0.001, %v4808_v32  ;;  %v5050_v29 = vsel %vm5049_vm9, %v10880_v25, %v5046_v49  ;;  %v4869_v49 = vld [vmem:[%s10661_s20 + $0x40] sm:$0xff] }
 0x5a1   : > { %v5064_v43 = vmul.f32 0.5, %v5063_v59 }
 0x5a2   : > { %6663 = vst [vmem:[%s10867_s29 + $0x10] sm:$0xff] %v6543_v46  ;;  %8089 = vrsqrt.f32 %v4928_v63  ;;  %vm5057_vm14 = vweird.f32 %v4928_v63 }
 0x5a3   : > { %6664 = vst.msk [vmem:[%s10867_s29 + $0x18] sm:$0xff] %vm1976_vm0, %v6544_v50  ;;  %v4867_v50 = vld [vmem:[%s10661_s20 + $0x30] sm:$0xff]  ;;  %v5065_v46 = vsub.f32 1.5, %v5064_v43  ;;  %v5649_v43 = vld [vmem:[%s10671_s23 + $0x40] sm:$0xff] }
 0x5a4   : > { %v5587_v23 = vmul.f32 %v5050_v29, %v4867_v50  ;;  %v6254_v29 = vpop.permute.xlu0 %6253 }
 0x5a5   : > { %v5066_v25 = vmul.f32 %v8088_v56, %v5065_v46 }
 0x5a6   : > { %v5707_v32 = vmul.f32 %v5587_v23, %v10828_v5 }
 0x5a8   : > { %4479 = vadd.xlane.f32.xlu0 %v4478_v37  ;;  %v8090_v19 = vpop.eup %8089  ;;  %v5767_v54 = vsub.f32 %v5647_v11, %v5707_v32 }
 0x5a9   : > { %v5052_v9 = vmul.f32 %v8090_v19, %v4928_v63  ;;  %vm5058_vm13 = vweird.f32 %v8090_v19  ;;  %v4630_v63 = vmul.f32 %v10753_v14, %v12945_v41 }
 0x5aa   : > { %4063 = vadd.xlane.f32.xlu1 %v4062_v3  ;;  %v5070_v3 = vsel %vm5069_vm12, %v8088_v56, %v5066_v25  ;;  %vm5059_vm15 = vmor %vm5057_vm14, %vm5058_vm13 }
 0x5ab   : > { %v5053_v37 = vmul.f32 %v8090_v19, %v5052_v9  ;;  %v5589_v50 = vmul.f32 %v5070_v3, %v4869_v49  ;;  %v10957_v9 = vmul.f32 %v10729_v6, %v12945_v41  ;;  %v7628_v3 = vld [vmem:[%s10298_s17 + $0x100] sm:$0xf]  ;;  %v7630_v6 = vld [vmem:[%s10298_s17 + $0x108] sm:$0xf0] }
 0x5ad   : > { %v5054_v17 = vmul.f32 0.5, %v5053_v37  ;;  %v5709_v24 = vmul.f32 %v5589_v50, %v10848_v53  ;;  %v4690_v37 = vmul.f32 %v10957_v9, %v10957_v9 }
 0x5ae   : > { %5853 = vperm.xlu2 %8029, %v5587_v23  }
 0x5af   : > { %v5055_v5 = vsub.f32 1.5, %v5054_v17  ;;  %v5769_v56 = vsub.f32 %v5649_v43, %v5709_v24  ;;  %v7991_v17 = vld [vmem:[%s10298_s17 + $0x104] sm:$0xf0]  ;;  %v3717_v43 = vpop.f32.mrf.mxu2 }
 0x5b0   : > { %v10937_v42 = vpop.xlane.xlu2 %4043 }
 0x5b2   : > { %4483 = vadd.xlane.f32.xlu1 %v4482_v20  ;;  %v5056_v20 = vmul.f32 %v8090_v19, %v5055_v5 }
 0x5b6   : > { %6273 = vperm.xlu2 %8029, %v5767_v54   ;;  %v5648_v54 = vld [vmem:[%s10671_s23 + $0x38] sm:$0xff] }
 0x5b8   : > { %v10943_v59 = vpop.xlane.xlu2 %4463 }
 0x5bc   : > { %5863 = vperm.xlu0 %8030, %v5589_v50   ;;  %v4750_v50 = vsub.f32 %v4630_v63, %v4690_v37 }
 0x5bd   : > { %v10952_v53 = vpop.xlane.xlu0 %4047 }
 0x5c0   : > { %v5834_v2 = vpop.permute.xlu2 %5833 }
 0x5c1   : > { %v6125_v47 = vmul.f32 %v5834_v2, %v10393_v16  ;;  %v6126_v23 = vmul.f32 %v5834_v2, %v10395_v57  ;;  %v4868_v16 = vld [vmem:[%s10661_s20 + $0x38] sm:$0xff]  ;;  %v5060_v57 = vsel %vm5059_vm15, %v8090_v19, %v5056_v20  ;;  %v7990_v19 = vld [vmem:[%s10298_s17 + $0x104] sm:$0xf]  ;;  %v3876_v2 = vpop.f32.mrf.mxu3 }
 0x5c2   : > { %v5588_v11 = vmul.f32 %v5060_v57, %v4868_v16  ;;  %v7633_v24 = vor.u32 %v7990_v19, %v7630_v6  ;;  %v10971_v14 = vadd.f32 %v3876_v2, %v3717_v43 }
 0x5c3   : > { %v6545_v46 = vadd.f32 %v6254_v29, %v6125_v47  ;;  %v6546_v32 = vadd.f32 %v6254_v29, %v6126_v23  ;;  %v7629_v29 = vor.u32 %v7991_v17, %v7628_v3  ;;  %v10977_v47 = vmul.f32 %v10771_v18, %v12945_v41  ;;  %v3399_v23 = vpop.f32.mrf.mxu0 }
 0x5c4   : > { %6283 = vperm.xlu0 %8030, %v5769_v56   ;;  %v5708_v25 = vmul.f32 %v5588_v11, %v10894_v58  ;;  %7784 = vmatmul.msk.bf16.gmra.mxu3 %vm3234_vm2, %v7633_v24  ;;  %v4810_v58 = vmax.f32 %v4750_v50, 0.0  ;;  %v3558_v56 = vpop.f32.mrf.mxu1  ;;  %v4065_v57 = vsel %vm1976_vm0, %v10971_v14, 0.0  ;;  %v4314_v19 = vmul.f32 %v10971_v14, %v10971_v14 }
 0x5c5   : > { %6665 = vst [vmem:[%s10867_s29 + $0x20] sm:$0xff] %v6545_v46  ;;  %v10965_v49 = vpop.xlane.xlu0 %4467  ;;  %3731 = vmatmul.bf16.gmra.mxu2 %v7629_v29  ;;  %3413 = vmatmul.bf16.gmra.mxu0 %v7629_v29  ;;  %v10979_v20 = vadd.f32 %v3558_v56, %v3399_v23  ;;  %v4632_v46 = vmul.f32 %v10795_v22, %v12945_v41 }
 0x5c6   : > { %6666 = vst.msk [vmem:[%s10867_s29 + $0x28] sm:$0xff] %vm1976_vm0, %v6546_v32  ;;  %v5768_v5 = vsub.f32 %v5648_v54, %v5708_v25  ;;  %7754 = vmatmul.msk.bf16.gmra.mxu1 %vm3234_vm2, %v7633_v24  ;;  %v4692_v25 = vmul.f32 %v10977_v47, %v10977_v47  ;;  %v4485_v6 = vsel %vm1976_vm0, %v4314_v19, 0.0 }
 0x5c7   : > { %v4066_v22 = vadd.f32 %v4065_v57, %v10979_v20  ;;  %v4313_v50 = vmul.f32 %v10979_v20, %v10979_v20 }
 0x5c8   : > { %v6259_v54 = vpop.permute.xlu2 %6258  ;;  %v4752_v17 = vsub.f32 %v4632_v46, %v4692_v25 }
 0x5c9   : > { %v3878_v24 = vpop.f32.mrf.mxu3 }
 0x5ca   : > { %v10983_v16 = vpop.xlane.xlu1 %4051 }
 0x5cb   : > { %5858 = vperm.xlu1 %8028, %v5588_v11   ;;  %v10987_v11 = vadd.f32 0.001, %v4810_v58  ;;  %v4486_v58 = vadd.f32 %v4485_v6, %v4313_v50  ;;  %v3401_v56 = vpop.f32.mrf.mxu0 }
 0x5cc   : > { %v3560_v46 = vpop.f32.mrf.mxu1 }
 0x5cd   : > { %8091 = vrsqrt.f32 %v10987_v11  ;;  %v11016_v25 = vadd.f32 %v3560_v46, %v3401_v56  ;;  %vm5077_vm3 = vweird.f32 %v10987_v11 }
 0x5d2   : > { %v11002_v29 = vpop.xlane.xlu1 %4471 }
 0x5d3   : > { %6278 = vperm.xlu1 %8028, %v5768_v5   ;;  %v3719_v5 = vpop.f32.mrf.mxu2  ;;  %v11005_v43 = vpop.eup %8091 }
 0x5d4   : > { %v11009_v23 = vadd.f32 %v3878_v24, %v3719_v5  ;;  %vm5078_vm1 = vweird.f32 %v11005_v43 }
 0x5d5   : > { %vm5079_vm4 = vmor %vm5077_vm3, %vm5078_vm1 }
 0x5d8   : > { %v5839_v32 = vpop.permute.xlu0 %5838  ;;  %v3881_v6 = vpop.f32.mrf.mxu3 }
 0x5d9   : > { %v6127_v18 = vmul.f32 %v5839_v32, %v10408_v15  ;;  %v6128_v63 = vmul.f32 %v5839_v32, %v10410_v30  ;;  %v4812_v15 = vmax.f32 %v4752_v17, 0.0  ;;  %v5072_v32 = vmul.f32 %v11005_v43, %v10987_v11 }
 0x5da   : > { %v11023_v17 = vmul.f32 %v10763_v0, %v12945_v41 }
 0x5db   : > { %v6547_v37 = vadd.f32 %v6259_v54, %v6127_v18  ;;  %v6548_v3 = vadd.f32 %v6259_v54, %v6128_v63  ;;  %v11007_v2 = vadd.f32 0.001, %v4812_v15  ;;  %v4316_v15 = vmul.f32 %v11009_v23, %v11009_v23  ;;  %v3722_v0 = vpop.f32.mrf.mxu2 }
 0x5dc   : > { %v4691_v5 = vmul.f32 %v11023_v17, %v11023_v17 }
 0x5dd   : > { %6667 = vst [vmem:[%s10867_s29 + $0x30] sm:$0xff] %v6547_v37  ;;  %8093 = vrsqrt.f32 %v11007_v2  ;;  %vm5097_vm6 = vweird.f32 %v11007_v2 }
 0x5de   : > { %6668 = vst.msk [vmem:[%s10867_s29 + $0x38] sm:$0xff] %vm1976_vm0, %v6548_v3  ;;  %v4069_v3 = vsel %vm1976_vm0, %v11009_v23, 0.0 }
 0x5df   : > { %4067 = vadd.xlane.f32.xlu2 %v4066_v22  ;;  %v5073_v22 = vmul.f32 %v11005_v43, %v5072_v32  ;;  %v4070_v19 = vadd.f32 %v4069_v3, %v11016_v25  ;;  %v4489_v32 = vsel %vm1976_vm0, %v4316_v15, 0.0 }
 0x5e0   : > { %v5849_v30 = vpop.permute.xlu0 %5848 }
 0x5e1   : > { %v6131_v57 = vmul.f32 %v5849_v30, %v10438_v44  ;;  %v6132_v18 = vmul.f32 %v5849_v30, %v10435_v45  ;;  %v4631_v45 = vmul.f32 %v10791_v31, %v12945_v41  ;;  %v5074_v50 = vmul.f32 0.5, %v5073_v22 }
 0x5e2   : > { %v4315_v31 = vmul.f32 %v11016_v25, %v11016_v25 }
 0x5e3   : > { %v11033_v30 = vpop.eup %8093  ;;  %v4751_v24 = vsub.f32 %v4631_v45, %v4691_v5 }
 0x5e4   : > { %vm5098_vm5 = vweird.f32 %v11033_v30 }
 0x5e5   : > { %v4811_v45 = vmax.f32 %v4751_v24, 0.0  ;;  %vm5099_vm7 = vmor %vm5097_vm6, %vm5098_vm5 }
 0x5e7   : > { %4487 = vadd.xlane.f32.xlu2 %v4486_v58  ;;  %v5092_v58 = vmul.f32 %v11033_v30, %v11007_v2  ;;  %v4931_v15 = vadd.f32 0.001, %v4811_v45 }
 0x5e8   : > { %v6269_v63 = vpop.permute.xlu0 %6268 }
 0x5e9   : > { %v6551_v54 = vadd.f32 %v6269_v63, %v6131_v57  ;;  %v6552_v37 = vadd.f32 %v6269_v63, %v6132_v18  ;;  %v3404_v57 = vpop.f32.mrf.mxu0  ;;  %v5075_v18 = vsub.f32 1.5, %v5074_v50  ;;  %v5093_v5 = vmul.f32 %v11033_v30, %v5092_v58  ;;  %v7636_v58 = vld [vmem:[%s10298_s17 + $0x110] sm:$0xf] }
 0x5ea   : > { %v5844_v44 = vpop.permute.xlu1 %5843  ;;  %8095 = vrsqrt.f32 %v4931_v15  ;;  %vm5087_vm9 = vweird.f32 %v4931_v15 }
 0x5eb   : > { %6671 = vst [vmem:[%s10867_s29 + $0x50] sm:$0xff] %v6551_v54  ;;  %v6129_v56 = vmul.f32 %v5844_v44, %v10420_v38  ;;  %v6130_v46 = vmul.f32 %v5844_v44, %v10422_v48  ;;  %v11044_v54 = vadd.f32 %v3881_v6, %v3722_v0  ;;  %v5076_v44 = vmul.f32 %v11005_v43, %v5075_v18  ;;  %v4870_v6 = vld [vmem:[%s10661_s20 + $0x48] sm:$0xff] }
 0x5ec   : > { %6672 = vst.msk [vmem:[%s10867_s29 + $0x58] sm:$0xff] %vm1976_vm0, %v6552_v37  ;;  %v3563_v37 = vpop.f32.mrf.mxu1  ;;  %v5094_v50 = vmul.f32 0.5, %v5093_v5 }
 0x5ed   : > { %v11048_v38 = vadd.f32 %v3563_v37, %v3404_v57  ;;  %v4073_v48 = vsel %vm1976_vm0, %v11044_v54, 0.0  ;;  %v4318_v24 = vmul.f32 %v11044_v54, %v11044_v54  ;;  %v7638_v57 = vld [vmem:[%s10298_s17 + $0x118] sm:$0xf0] }
 0x5ee   : > { %4071 = vadd.xlane.f32.xlu0 %v4070_v19  ;;  %v4490_v19 = vadd.f32 %v4489_v32, %v4315_v31  ;;  %v5080_v31 = vsel %vm5079_vm4, %v11005_v43, %v5076_v44 }
 0x5ef   : > { %v4074_v0 = vadd.f32 %v4073_v48, %v11048_v38  ;;  %v4317_v11 = vmul.f32 %v11048_v38, %v11048_v38  ;;  %v5590_v37 = vmul.f32 %v5080_v31, %v4870_v6  ;;  %v5650_v48 = vld [vmem:[%s10671_s23 + $0x48] sm:$0xff] }
 0x5f0   : > { %v8096_v5 = vpop.eup %8095 }
 0x5f1   : > { %v5710_v45 = vmul.f32 %v5590_v37, %v10957_v9  ;;  %v5082_v44 = vmul.f32 %v8096_v5, %v4931_v15  ;;  %vm5088_vm8 = vweird.f32 %v8096_v5 }
 0x5f2   : > { %v6264_v63 = vpop.permute.xlu1 %6263  ;;  %vm5089_vm10 = vmor %vm5087_vm9, %vm5088_vm8 }
 0x5f3   : > { %v6549_v3 = vadd.f32 %v6264_v63, %v6129_v56  ;;  %v6550_v22 = vadd.f32 %v6264_v63, %v6130_v46  ;;  %v7993_v56 = vld [vmem:[%s10298_s17 + $0x114] sm:$0xf0]  ;;  %v7992_v46 = vld [vmem:[%s10298_s17 + $0x114] sm:$0xf]  ;;  %v5095_v63 = vsub.f32 1.5, %v5094_v50  ;;  %v5770_v50 = vsub.f32 %v5650_v48, %v5710_v45 }
 0x5f4   : > { %v7637_v32 = vor.u32 %v7993_v56, %v7636_v58  ;;  %v7641_v18 = vor.u32 %v7992_v46, %v7638_v57  ;;  %v5083_v31 = vmul.f32 %v8096_v5, %v5082_v44  ;;  %v5652_v46 = vld [vmem:[%s10671_s23 + $0x58] sm:$0xff]  ;;  %v11089_v45 = vmul.f32 %v10773_v51, %v12945_v41 }
 0x5f5   : > { %6669 = vst [vmem:[%s10867_s29 + $0x40] sm:$0xff] %v6549_v3  ;;  %v4493_v3 = vsel %vm1976_vm0, %v4318_v24, 0.0 }
 0x5f6   : > { %6670 = vst.msk [vmem:[%s10867_s29 + $0x48] sm:$0xff] %vm1976_vm0, %v6550_v22  ;;  %4491 = vadd.xlane.f32.xlu0 %v4490_v19  ;;  %3736 = vmatmul.bf16.gmra.mxu2 %v7637_v32  ;;  %v4494_v22 = vadd.f32 %v4493_v3, %v4317_v11  ;;  %v5096_v19 = vmul.f32 %v11033_v30, %v5095_v63  ;;  %v5084_v56 = vmul.f32 0.5, %v5083_v31 }
 0x5f7   : > { %7785 = vmatmul.msk.bf16.gmra.mxu3 %vm3234_vm2, %v7641_v18  ;;  %3418 = vmatmul.bf16.gmra.mxu0 %v7637_v32  ;;  %v4635_v31 = vmul.f32 %v10812_v1, %v12945_v41 }
 0x5f8   : > { %7755 = vmatmul.msk.bf16.gmra.mxu1 %vm3234_vm2, %v7641_v18  ;;  %v5100_v6 = vsel %vm5099_vm7, %v11033_v30, %v5096_v19  ;;  %v5085_v2 = vsub.f32 1.5, %v5084_v56  ;;  %v3565_v56 = vpop.f32.mrf.mxu1 }
 0x5fa   : > { %v5086_v18 = vmul.f32 %v8096_v5, %v5085_v2  ;;  %v7995_v2 = vld [vmem:[%s10298_s17 + $0x124] sm:$0xf0] }
 0x5fd   : > { %4075 = vadd.xlane.f32.xlu1 %v4074_v0  ;;  %v4872_v0 = vld [vmem:[%s10661_s20 + $0x58] sm:$0xff] }
 0x5fe   : > { %v5592_v24 = vmul.f32 %v5100_v6, %v4872_v0  ;;  %v3883_v0 = vpop.f32.mrf.mxu3  ;;  %v11104_v6 = vmul.f32 %v10804_v26, %v12945_v41 }
 0x5ff   : > { %5868 = vperm.xlu2 %8029, %v5590_v37   ;;  %v4871_v37 = vld [vmem:[%s10661_s20 + $0x50] sm:$0xff] }
 0x600   : > { %v5712_v9 = vmul.f32 %v5592_v24, %v10977_v47  ;;  %v5090_v47 = vsel %vm5089_vm10, %v8096_v5, %v5086_v18  ;;  %v5651_v5 = vld [vmem:[%s10671_s23 + $0x50] sm:$0xff] }
 0x601   : > { %v11072_v43 = vpop.xlane.xlu2 %4055  ;;  %v5591_v19 = vmul.f32 %v5090_v47, %v4871_v37 }
 0x602   : > { %v5772_v32 = vsub.f32 %v5652_v46, %v5712_v9  ;;  %v3406_v9 = vpop.f32.mrf.mxu0  ;;  %v4695_v46 = vmul.f32 %v11104_v6, %v11104_v6 }
 0x603   : > { %v5711_v15 = vmul.f32 %v5591_v19, %v11023_v17  ;;  %v11119_v26 = vadd.f32 %v3565_v56, %v3406_v9 }
 0x605   : > { %4495 = vadd.xlane.f32.xlu1 %v4494_v22  ;;  %v5771_v44 = vsub.f32 %v5651_v5, %v5711_v15 }
 0x607   : > { %6288 = vperm.xlu2 %8029, %v5770_v50   ;;  %v3724_v50 = vpop.f32.mrf.mxu2 }
 0x608   : > { %v11110_v17 = vadd.f32 %v3883_v0, %v3724_v50  ;;  %v4319_v50 = vmul.f32 %v11119_v26, %v11119_v26 }
 0x609   : > { %v11080_v58 = vpop.xlane.xlu2 %4475 }
 0x60a   : > { %5878 = vperm.xlu0 %8030, %v5592_v24   ;;  %v4077_v1 = vsel %vm1976_vm0, %v11110_v17, 0.0  ;;  %v4320_v15 = vmul.f32 %v11110_v17, %v11110_v17 }
 0x611   : > { %v5854_v57 = vpop.permute.xlu2 %5853 }
 0x612   : > { %6298 = vperm.xlu0 %8030, %v5772_v32   ;;  %v6133_v30 = vmul.f32 %v5854_v57, %v10447_v55  ;;  %v6134_v63 = vmul.f32 %v5854_v57, %v10449_v10  ;;  %v4633_v55 = vmul.f32 %v10797_v28, %v12945_v41  ;;  %v4693_v10 = vmul.f32 %v11089_v45, %v11089_v45  ;;  %v7644_v32 = vld [vmem:[%s10298_s17 + $0x120] sm:$0xf]  ;;  %v7994_v57 = vld [vmem:[%s10298_s17 + $0x124] sm:$0xf] }
 0x613   : > { %v11092_v48 = vpop.xlane.xlu0 %4059 }
 0x614   : > { %v4753_v51 = vsub.f32 %v4633_v55, %v4693_v10 }
 0x615   : > { %v3886_v55 = vpop.f32.mrf.mxu3 }
 0x616   : > { %v4813_v28 = vmax.f32 %v4753_v51, 0.0  ;;  %v3409_v51 = vpop.f32.mrf.mxu0 }
 0x618   : > { %v11117_v18 = vadd.f32 0.001, %v4813_v28  ;;  %v4497_v28 = vsel %vm1976_vm0, %v4320_v15, 0.0 }
 0x619   : > { %v6274_v11 = vpop.permute.xlu2 %6273 }
 0x61a   : > { %v6553_v3 = vadd.f32 %v6274_v11, %v6133_v30  ;;  %v6554_v22 = vadd.f32 %v6274_v11, %v6134_v63  ;;  %v7645_v30 = vor.u32 %v7995_v2, %v7644_v32  ;;  %v7646_v63 = vld [vmem:[%s10298_s17 + $0x128] sm:$0xf0]  ;;  %v4755_v11 = vsub.f32 %v4635_v31, %v4695_v46 }
 0x61b   : > { %v11106_v24 = vpop.xlane.xlu0 %4479  ;;  %v7649_v47 = vor.u32 %v7994_v57, %v7646_v63  ;;  %8097 = vrsqrt.f32 %v11117_v18  ;;  %vm5107_vm12 = vweird.f32 %v11117_v18 }
 0x61c   : > { %6673 = vst [vmem:[%s10867_s29 + $0x60] sm:$0xff] %v6553_v3  ;;  %3741 = vmatmul.bf16.gmra.mxu2 %v7645_v30  ;;  %3423 = vmatmul.bf16.gmra.mxu0 %v7645_v30  ;;  %v3727_v3 = vpop.f32.mrf.mxu2  ;;  %v4815_v10 = vmax.f32 %v4755_v11, 0.0  ;;  %v4498_v30 = vadd.f32 %v4497_v28, %v4319_v50 }
 0x61d   : > { %6674 = vst.msk [vmem:[%s10867_s29 + $0x68] sm:$0xff] %vm1976_vm0, %v6554_v22  ;;  %v11122_v37 = vpop.xlane.xlu1 %4063  ;;  %7786 = vmatmul.msk.bf16.gmra.mxu3 %vm3234_vm2, %v7649_v47  ;;  %7756 = vmatmul.msk.bf16.gmra.mxu1 %vm3234_vm2, %v7649_v47  ;;  %v11132_v5 = vadd.f32 %v3886_v55, %v3727_v3 }
 0x61e   : > { %5873 = vperm.xlu1 %8028, %v5591_v19   ;;  %v4078_v19 = vadd.f32 %v4077_v1, %v11119_v26  ;;  %v11136_v0 = vadd.f32 0.001, %v4815_v10 }
 0x61f   : > { %12969 = vst [vmem:[#allocation35_spill] sm:$0xff] %v11132_v5  ;;  %v4081_v2 = vsel %vm1976_vm0, %v11132_v5, 0.0 }
 0x620   : > { %8099 = vrsqrt.f32 %v11136_v0  ;;  %vm5127_vm15 = vweird.f32 %v11136_v0 }
 0x621   : > { %v8098_v31 = vpop.eup %8097 }
 0x622   : > { %v5102_v63 = vmul.f32 %v8098_v31, %v11117_v18  ;;  %vm5108_vm11 = vweird.f32 %v8098_v31 }
 0x623   : > { %vm5109_vm13 = vmor %vm5107_vm12, %vm5108_vm11 }
 0x625   : > { %v11143_v32 = vpop.xlane.xlu1 %4483 }
 0x626   : > { %6293 = vperm.xlu1 %8028, %v5771_v44   ;;  %v3568_v44 = vpop.f32.mrf.mxu1 }
 0x627   : > { %v11139_v9 = vadd.f32 %v3568_v44, %v3409_v51  ;;  %v4634_v51 = vmul.f32 %v10810_v61, %v12945_v41 }
 0x629   : > { %12970 = vst [vmem:[#allocation36_spill] sm:$0xff] %v11139_v9  ;;  %v4082_v47 = vadd.f32 %v4081_v2, %v11139_v9  ;;  %v4321_v3 = vmul.f32 %v11139_v9, %v11139_v9  ;;  %v8006_v9 = vld [vmem:[%s10298_s17 + $0x184] sm:$0xf] }
 0x62e   : > { %v5864_v22 = vpop.permute.xlu0 %5863 }
 0x62f   : > { %v6137_v56 = vmul.f32 %v5864_v22, %v10471_v62  ;;  %v6138_v46 = vmul.f32 %v5864_v22, %v10473_v33  ;;  %v4322_v62 = vmul.f32 %v11132_v5, %v11132_v5  ;;  %v5103_v33 = vmul.f32 %v8098_v31, %v5102_v63  ;;  %v8100_v22 = vpop.eup %8099  ;;  %v8007_v5 = vld [vmem:[%s10298_s17 + $0x184] sm:$0xf0] }
 0x630   : > { %4079 = vadd.xlane.f32.xlu2 %v4078_v19  ;;  %v11159_v19 = vmul.f32 %v10802_v36, %v12945_v41  ;;  %v5122_v44 = vmul.f32 %v8100_v22, %v11136_v0  ;;  %vm5128_vm14 = vweird.f32 %v8100_v22 }
 0x631   : > { %v4501_v10 = vsel %vm1976_vm0, %v4322_v62, 0.0  ;;  %v5104_v15 = vmul.f32 0.5, %v5103_v33  ;;  %vm5129_vm1 = vmor %vm5127_vm15, %vm5128_vm14 }
 0x632   : > { %v4502_v50 = vadd.f32 %v4501_v10, %v4321_v3  ;;  %v4694_v28 = vmul.f32 %v11159_v19, %v11159_v19  ;;  %v5123_v36 = vmul.f32 %v8100_v22, %v5122_v44 }
 0x633   : > { %v5105_v2 = vsub.f32 1.5, %v5104_v15 }
 0x634   : > { %v5124_v15 = vmul.f32 0.5, %v5123_v36 }
 0x635   : > { %v5106_v10 = vmul.f32 %v8098_v31, %v5105_v2 }
 0x636   : > { %v6284_v57 = vpop.permute.xlu0 %6283 }
 0x637   : > { %v6557_v11 = vadd.f32 %v6284_v57, %v6137_v56  ;;  %v6558_v1 = vadd.f32 %v6284_v57, %v6138_v46  ;;  %v3729_v56 = vpop.f32.mrf.mxu2  ;;  %v3888_v46 = vpop.f32.mrf.mxu3  ;;  %v4754_v57 = vsub.f32 %v4634_v51, %v4694_v28  ;;  %v5110_v44 = vsel %vm5109_vm13, %v8098_v31, %v5106_v10 }
 0x638   : > { %4499 = vadd.xlane.f32.xlu2 %v4498_v30 }
 0x639   : > { %6677 = vst [vmem:[%s10867_s29 + $0x80] sm:$0xff] %v6557_v11  ;;  %v3411_v11 = vpop.f32.mrf.mxu0  ;;  %v4814_v3 = vmax.f32 %v4754_v57, 0.0 }
 0x63a   : > { %6678 = vst.msk [vmem:[%s10867_s29 + $0x88] sm:$0xff] %vm1976_vm0, %v6558_v1  ;;  %v11169_v1 = vadd.f32 %v3888_v46, %v3729_v56 }
 0x63c   : > { %4083 = vadd.xlane.f32.xlu0 %v4082_v47  ;;  %12971 = vst [vmem:[#allocation37_spill] sm:$0xff] %v11169_v1  ;;  %v3570_v47 = vpop.f32.mrf.mxu1  ;;  %v4324_v56 = vmul.f32 %v11169_v1, %v11169_v1 }
 0x63d   : > { %v5859_v55 = vpop.permute.xlu1 %5858  ;;  %v11172_v51 = vadd.f32 %v3570_v47, %v3411_v11  ;;  %v4875_v11 = vld [vmem:[%s10661_s20 + $0x70] sm:$0xff] }
 0x63e   : > { %v6135_v30 = vmul.f32 %v5859_v55, %v10464_v40  ;;  %v6136_v63 = vmul.f32 %v5859_v55, %v10461_v35  ;;  %v4085_v35 = vsel %vm1976_vm0, %v11169_v1, 0.0  ;;  %v4934_v40 = vadd.f32 0.001, %v4814_v3  ;;  %v4873_v55 = vld [vmem:[%s10661_s20 + $0x60] sm:$0xff] }
 0x63f   : > { %12972 = vst [vmem:[#allocation38_spill] sm:$0xff] %v11172_v51  ;;  %v4086_v28 = vadd.f32 %v4085_v35, %v11172_v51  ;;  %v5593_v46 = vmul.f32 %v5110_v44, %v4873_v55  ;;  %v4323_v18 = vmul.f32 %v11172_v51, %v11172_v51  ;;  %v4505_v57 = vsel %vm1976_vm0, %v4324_v56, 0.0  ;;  %v5655_v35 = vld [vmem:[%s10671_s23 + $0x70] sm:$0xff] }
 0x640   : > { %8101 = vrsqrt.f32 %v4934_v40  ;;  %vm5117_vm4 = vweird.f32 %v4934_v40  ;;  %v4879_v51 = vld [vmem:[%s10661_s20 + $0x90] sm:$0xff] }
 0x641   : > { %v5713_v36 = vmul.f32 %v5593_v46, %v11089_v45 }
 0x644   : > { %4503 = vadd.xlane.f32.xlu0 %v4502_v50  ;;  %v5125_v50 = vsub.f32 1.5, %v5124_v15 }
 0x645   : > { %v6279_v61 = vpop.permute.xlu1 %6278 }
 0x646   : > { %v6555_v62 = vadd.f32 %v6279_v61, %v6135_v30  ;;  %v6556_v33 = vadd.f32 %v6279_v61, %v6136_v63  ;;  %v5126_v2 = vmul.f32 %v8100_v22, %v5125_v50  ;;  %v5653_v30 = vld [vmem:[%s10671_s23 + $0x60] sm:$0xff]  ;;  %v4506_v63 = vadd.f32 %v4505_v57, %v4323_v18  ;;  %v8102_v47 = vpop.eup %8101  ;;  %v4874_v57 = vld [vmem:[%s10661_s20 + $0x68] sm:$0xff] }
 0x647   : > { %v5112_v3 = vmul.f32 %v8102_v47, %v4934_v40  ;;  %vm5118_vm3 = vweird.f32 %v8102_v47 }
 0x648   : > { %6675 = vst [vmem:[%s10867_s29 + $0x70] sm:$0xff] %v6555_v62  ;;  %v5130_v61 = vsel %vm5129_vm1, %v8100_v22, %v5126_v2  ;;  %v5773_v62 = vsub.f32 %v5653_v30, %v5713_v36  ;;  %vm5119_vm5 = vmor %vm5117_vm4, %vm5118_vm3  ;;  %v11203_v30 = vmul.f32 %v10806_v34, %v12945_v41 }
 0x649   : > { %6676 = vst.msk [vmem:[%s10867_s29 + $0x78] sm:$0xff] %vm1976_vm0, %v6556_v33  ;;  %v5595_v33 = vmul.f32 %v5130_v61, %v4875_v11  ;;  %v5113_v15 = vmul.f32 %v8102_v47, %v5112_v3  ;;  %v7652_v61 = vld [vmem:[%s10298_s17 + $0x130] sm:$0xf]  ;;  %v5654_v3 = vld [vmem:[%s10671_s23 + $0x68] sm:$0xff] }
 0x64a   : > { %v4696_v40 = vmul.f32 %v11203_v30, %v11203_v30 }
 0x64b   : > { %v5715_v0 = vmul.f32 %v5595_v33, %v11104_v6  ;;  %v5114_v55 = vmul.f32 0.5, %v5113_v15  ;;  %v4638_v15 = vmul.f32 %v10838_v7, %v12945_v41 }
 0x64d   : > { %v5775_v45 = vsub.f32 %v5655_v35, %v5715_v0  ;;  %v5115_v22 = vsub.f32 1.5, %v5114_v55  ;;  %v3732_v35 = vpop.f32.mrf.mxu2 }
 0x64f   : > { %v5116_v50 = vmul.f32 %v8102_v47, %v5115_v22 }
 0x650   : > { %4087 = vadd.xlane.f32.xlu1 %v4086_v28  ;;  %5883 = vperm.xlu2 %8029, %v5593_v46  }
 0x651   : > { %v5120_v36 = vsel %vm5119_vm5, %v8102_v47, %v5116_v50  ;;  %v7997_v47 = vld [vmem:[%s10298_s17 + $0x134] sm:$0xf0]  ;;  %v3414_v50 = vpop.f32.mrf.mxu0 }
 0x652   : > { %v11187_v31 = vpop.xlane.xlu2 %4067  ;;  %v7653_v0 = vor.u32 %v7997_v47, %v7652_v61 }
 0x654   : > { %3746 = vmatmul.bf16.gmra.mxu2 %v7653_v0  ;;  %3428 = vmatmul.bf16.gmra.mxu0 %v7653_v0 }
 0x658   : > { %4507 = vadd.xlane.f32.xlu1 %v4506_v63  ;;  %6303 = vperm.xlu2 %8029, %v5773_v62   ;;  %v11214_v63 = vmul.f32 %v10822_v13, %v12945_v41  ;;  %v7996_v62 = vld [vmem:[%s10298_s17 + $0x134] sm:$0xf] }
 0x659   : > { %5893 = vperm.xlu0 %8030, %v5595_v33   ;;  %v3416_v47 = vpop.f32.mrf.mxu0 }
 0x65a   : > { %v11192_v10 = vpop.xlane.xlu2 %4487  ;;  %v4698_v13 = vmul.f32 %v11214_v63, %v11214_v63 }
 0x661   : > { %6313 = vperm.xlu0 %8030, %v5775_v45   ;;  %v11198_v18 = vpop.xlane.xlu0 %4071  ;;  %v3891_v45 = vpop.f32.mrf.mxu3 }
 0x662   : > { %v5869_v44 = vpop.permute.xlu2 %5868 }
 0x663   : > { %v6139_v28 = vmul.f32 %v5869_v44, %v10492_v39  ;;  %v6140_v56 = vmul.f32 %v5869_v44, %v10489_v4  ;;  %v4636_v4 = vmul.f32 %v10814_v8, %v12945_v41  ;;  %v5594_v39 = vmul.f32 %v5120_v36, %v4874_v57  ;;  %v7654_v8 = vld [vmem:[%s10298_s17 + $0x138] sm:$0xf0] }
 0x664   : > { %v7657_v55 = vor.u32 %v7996_v62, %v7654_v8  ;;  %v11226_v44 = vadd.f32 %v3891_v45, %v3732_v35 }
 0x665   : > { %v4756_v11 = vsub.f32 %v4636_v4, %v4696_v40  ;;  %v5714_v34 = vmul.f32 %v5594_v39, %v11159_v19 }
 0x666   : > { %12973 = vst [vmem:[#allocation39_spill] sm:$0xff] %v11226_v44  ;;  %7787 = vmatmul.msk.bf16.gmra.mxu3 %vm3234_vm2, %v7657_v55  ;;  %7757 = vmatmul.msk.bf16.gmra.mxu1 %vm3234_vm2, %v7657_v55 }
 0x667   : > { %v4816_v19 = vmax.f32 %v4756_v11, 0.0  ;;  %v5774_v22 = vsub.f32 %v5654_v3, %v5714_v34  ;;  %v4326_v11 = vmul.f32 %v11226_v44, %v11226_v44 }
 0x669   : > { %v11220_v33 = vpop.xlane.xlu0 %4491  ;;  %v3893_v40 = vpop.f32.mrf.mxu3  ;;  %v4509_v35 = vsel %vm1976_vm0, %v4326_v11, 0.0  ;;  %v12977_v11 = vld [vmem:[#allocation26_spill] sm:$0xff] }
 0x66a   : > { %v6289_v46 = vpop.permute.xlu2 %6288 }
 0x66b   : > { %v6559_v6 = vadd.f32 %v6289_v46, %v6139_v28  ;;  %v6560_v2 = vadd.f32 %v6289_v46, %v6140_v56  ;;  %v3573_v28 = vpop.f32.mrf.mxu1  ;;  %v4758_v56 = vsub.f32 %v4638_v15, %v4698_v13  ;;  %v4089_v46 = vsel %vm1976_vm0, %v11226_v44, 0.0 }
 0x66c   : > { %v11232_v7 = vadd.f32 %v3573_v28, %v3414_v50 }
 0x66d   : > { %6679 = vst [vmem:[%s10867_s29 + $0x90] sm:$0xff] %v6559_v6  ;;  %v11236_v6 = vadd.f32 0.001, %v4816_v19  ;;  %v4818_v57 = vmax.f32 %v4758_v56, 0.0 }
 0x66e   : > { %6680 = vst.msk [vmem:[%s10867_s29 + $0x98] sm:$0xff] %vm1976_vm0, %v6560_v2  ;;  %v4090_v36 = vadd.f32 %v4089_v46, %v11232_v7  ;;  %v4325_v3 = vmul.f32 %v11232_v7, %v11232_v7 }
 0x66f   : > { %12974 = vst [vmem:[#allocation40_spill] sm:$0xff] %v11232_v7  ;;  %8103 = vrsqrt.f32 %v11236_v6  ;;  %v11244_v34 = vadd.f32 0.001, %v4818_v57  ;;  %vm5137_vm7 = vweird.f32 %v11236_v6 }
 0x670   : > { %v11239_v4 = vpop.xlane.xlu1 %4075  ;;  %v4510_v50 = vadd.f32 %v4509_v35, %v4325_v3 }
 0x671   : > { %5888 = vperm.xlu1 %8028, %v5594_v39   ;;  %v3734_v39 = vpop.f32.mrf.mxu2  ;;  %8105 = vrsqrt.f32 %v11244_v34  ;;  %vm5157_vm10 = vweird.f32 %v11244_v34 }
 0x672   : > { %v11246_v61 = vadd.f32 %v3893_v40, %v3734_v39 }
 0x673   : > { %v3575_v62 = vpop.f32.mrf.mxu1 }
 0x674   : > { %12975 = vst [vmem:[#allocation41_spill] sm:$0xff] %v11246_v61  ;;  %v11254_v19 = vadd.f32 %v3575_v62, %v3416_v47  ;;  %v4328_v56 = vmul.f32 %v11246_v61, %v11246_v61  ;;  %v11276_v47 = vmul.f32 %v12977_v11, %v12945_v41 }
 0x675   : > { %v8104_v45 = vpop.eup %8103 }
 0x676   : > { %12976 = vst [vmem:[#allocation42_spill] sm:$0xff] %v11254_v19  ;;  %v5132_v28 = vmul.f32 %v8104_v45, %v11236_v6  ;;  %v4327_v57 = vmul.f32 %v11254_v19, %v11254_v19  ;;  %v4513_v39 = vsel %vm1976_vm0, %v4328_v56, 0.0  ;;  %vm5138_vm6 = vweird.f32 %v8104_v45 }
 0x677   : > { %v11267_v46 = vpop.eup %8105  ;;  %vm5139_vm8 = vmor %vm5137_vm7, %vm5138_vm6 }
 0x678   : > { %v4514_v3 = vadd.f32 %v4513_v39, %v4327_v57  ;;  %vm5158_vm9 = vweird.f32 %v11267_v46 }
 0x679   : > { %6308 = vperm.xlu1 %8028, %v5774_v22   ;;  %v4093_v22 = vsel %vm1976_vm0, %v11246_v61, 0.0  ;;  %vm11300_vm11 = vmor %vm5157_vm10, %vm5158_vm9 }
 0x67c   : > { %v5879_v2 = vpop.permute.xlu0 %5878 }
 0x67d   : > { %v6143_v0 = vmul.f32 %v5879_v2, %v10518_v52  ;;  %v6144_v8 = vmul.f32 %v5879_v2, %v10515_v60  ;;  %v11262_v60 = vpop.xlane.xlu1 %4495  ;;  %v4094_v52 = vadd.f32 %v4093_v22, %v11254_v19  ;;  %v5133_v2 = vmul.f32 %v8104_v45, %v5132_v28  ;;  %v3896_v22 = vpop.f32.mrf.mxu3 }
 0x67f   : > { %v5134_v40 = vmul.f32 0.5, %v5133_v2  ;;  %v12980_v2 = vld [vmem:[#allocation10_spill] sm:$0xff] }
 0x681   : > { %4091 = vadd.xlane.f32.xlu2 %v4090_v36  ;;  %v5152_v36 = vmul.f32 %v11267_v46, %v11244_v34  ;;  %v5135_v35 = vsub.f32 1.5, %v5134_v40  ;;  %v3578_v40 = vpop.f32.mrf.mxu1 }
 0x684   : > { %v6299_v15 = vpop.permute.xlu0 %6298 }
 0x685   : > { %v6563_v55 = vadd.f32 %v6299_v15, %v6143_v0  ;;  %v6564_v13 = vadd.f32 %v6299_v15, %v6144_v8  ;;  %v5153_v0 = vmul.f32 %v11267_v46, %v5152_v36  ;;  %v12978_v8 = vld [vmem:[#allocation28_spill] sm:$0xff]  ;;  %v3419_v36 = vpop.f32.mrf.mxu0 }
 0x686   : > { %v4637_v15 = vmul.f32 %v12978_v8, %v12945_v41 }
 0x687   : > { %6683 = vst [vmem:[%s10867_s29 + $0xb0] sm:$0xff] %v6563_v55  ;;  %v4697_v55 = vmul.f32 %v11276_v47, %v11276_v47 }
 0x688   : > { %6684 = vst.msk [vmem:[%s10867_s29 + $0xb8] sm:$0xff] %vm1976_vm0, %v6564_v13  ;;  %v3737_v13 = vpop.f32.mrf.mxu2 }
 0x689   : > { %4511 = vadd.xlane.f32.xlu2 %v4510_v50  ;;  %v5154_v50 = vmul.f32 0.5, %v5153_v0  ;;  %v4757_v28 = vsub.f32 %v4637_v15, %v4697_v55  ;;  %v11285_v11 = vadd.f32 %v3896_v22, %v3737_v13  ;;  %v11289_v15 = vadd.f32 %v3578_v40, %v3419_v36 }
 0x68b   : > { %4095 = vadd.xlane.f32.xlu0 %v4094_v52  ;;  %v12979_v52 = vld [vmem:[#allocation22_spill] sm:$0xff]  ;;  %12981 = vst [vmem:[#allocation26_spill] sm:$0xff] %v11285_v11  ;;  %v5155_v19 = vsub.f32 1.5, %v5154_v50  ;;  %v4817_v0 = vmax.f32 %v4757_v28, 0.0  ;;  %v4329_v36 = vmul.f32 %v11289_v15, %v11289_v15 }
 0x68c   : > { %12982 = vst [vmem:[#allocation28_spill] sm:$0xff] %v11289_v15 }
 0x68d   : > { %v4937_v6 = vadd.f32 0.001, %v4817_v0  ;;  %v5156_v13 = vmul.f32 %v11267_v46, %v5155_v19 }
 0x68f   : > { %8107 = vrsqrt.f32 %v4937_v6  ;;  %v5160_v34 = vsel %vm11300_vm11, %v11267_v46, %v5156_v13  ;;  %vm5147_vm13 = vweird.f32 %v4937_v6 }
 0x690   : > { %v5874_v62 = vpop.permute.xlu1 %5873 }
 0x691   : > { %v6141_v56 = vmul.f32 %v5874_v62, %v12979_v52  ;;  %v6142_v57 = vmul.f32 %v5874_v62, %v12980_v2  ;;  %v4876_v62 = vld [vmem:[%s10661_s20 + $0x78] sm:$0xff]  ;;  %v7999_v52 = vld [vmem:[%s10298_s17 + $0x144] sm:$0xf0] }
 0x692   : > { %v4878_v2 = vld [vmem:[%s10661_s20 + $0x88] sm:$0xff] }
 0x693   : > { %4515 = vadd.xlane.f32.xlu0 %v4514_v3  ;;  %v5136_v3 = vmul.f32 %v8104_v45, %v5135_v35  ;;  %v4097_v35 = vsel %vm1976_vm0, %v11285_v11, 0.0 }
 0x694   : > { %v4098_v50 = vadd.f32 %v4097_v35, %v11289_v15 }
 0x695   : > { %v5140_v55 = vsel %vm5139_vm8, %v8104_v45, %v5136_v3  ;;  %v7660_v45 = vld [vmem:[%s10298_s17 + $0x140] sm:$0xf]  ;;  %v8108_v35 = vpop.eup %8107 }
 0x696   : > { %v5596_v22 = vmul.f32 %v5140_v55, %v4876_v62  ;;  %v7661_v19 = vor.u32 %v7999_v52, %v7660_v45  ;;  %v5598_v62 = vmul.f32 %v5160_v34, %v4878_v2  ;;  %v12985_v34 = vld [vmem:[#allocation23_spill] sm:$0xff]  ;;  %vm5148_vm12 = vweird.f32 %v8108_v35 }
 0x697   : > { %vm5149_vm14 = vmor %vm5147_vm13, %vm5148_vm12 }
 0x698   : > { %v6294_v39 = vpop.permute.xlu1 %6293  ;;  %v5716_v40 = vmul.f32 %v5596_v22, %v11203_v30  ;;  %3751 = vmatmul.bf16.gmra.mxu2 %v7661_v19  ;;  %3433 = vmatmul.bf16.gmra.mxu0 %v7661_v19  ;;  %v5718_v13 = vmul.f32 %v5598_v62, %v11214_v63  ;;  %v5142_v30 = vmul.f32 %v8108_v35, %v4937_v6 }
 0x699   : > { %v6561_v8 = vadd.f32 %v6294_v39, %v6141_v56  ;;  %v6562_v61 = vadd.f32 %v6294_v39, %v6142_v57  ;;  %v7998_v56 = vld [vmem:[%s10298_s17 + $0x144] sm:$0xf]  ;;  %v7662_v57 = vld [vmem:[%s10298_s17 + $0x148] sm:$0xf0] }
 0x69a   : > { %v7665_v3 = vor.u32 %v7998_v56, %v7662_v57  ;;  %v12986_v57 = vld [vmem:[#allocation21_spill] sm:$0xff] }
 0x69b   : > { %6681 = vst [vmem:[%s10867_s29 + $0xa0] sm:$0xff] %v6561_v8  ;;  %v5656_v8 = vld [vmem:[%s10671_s23 + $0x78] sm:$0xff] }
 0x69c   : > { %6682 = vst.msk [vmem:[%s10867_s29 + $0xa8] sm:$0xff] %vm1976_vm0, %v6562_v61  ;;  %v4330_v61 = vmul.f32 %v11285_v11, %v11285_v11  ;;  %7788 = vmatmul.msk.bf16.gmra.mxu3 %vm3234_vm2, %v7665_v3  ;;  %7758 = vmatmul.msk.bf16.gmra.mxu1 %vm3234_vm2, %v7665_v3  ;;  %v5776_v46 = vsub.f32 %v5656_v8, %v5716_v40  ;;  %v12987_v3 = vld [vmem:[#allocation27_spill] sm:$0xff] }
 0x69d   : > { %v11333_v8 = vmul.f32 %v12987_v3, %v12945_v41  ;;  %v3580_v3 = vpop.f32.mrf.mxu1 }
 0x69e   : > { %v4517_v0 = vsel %vm1976_vm0, %v4330_v61, 0.0  ;;  %v5143_v61 = vmul.f32 %v8108_v35, %v5142_v30 }
 0x69f   : > { %v4518_v55 = vadd.f32 %v4517_v0, %v4329_v36 }
 0x6a0   : > { %v5144_v45 = vmul.f32 0.5, %v5143_v61  ;;  %v3739_v61 = vpop.f32.mrf.mxu2 }
 0x6a1   : > { %5898 = vperm.xlu2 %8029, %v5596_v22  }
 0x6a2   : > { %v5145_v56 = vsub.f32 1.5, %v5144_v45  ;;  %v4641_v45 = vmul.f32 %v10943_v59, %v12945_v41 }
 0x6a3   : > { %4099 = vadd.xlane.f32.xlu1 %v4098_v50  ;;  %v11316_v39 = vpop.xlane.xlu2 %4079  ;;  %v5658_v50 = vld [vmem:[%s10671_s23 + $0x88] sm:$0xff] }
 0x6a4   : > { %v5778_v28 = vsub.f32 %v5658_v50, %v5718_v13  ;;  %v5146_v40 = vmul.f32 %v8108_v35, %v5145_v56  ;;  %v4699_v13 = vmul.f32 %v11333_v8, %v11333_v8  ;;  %v12988_v50 = vld [vmem:[#allocation29_spill] sm:$0xff] }
 0x6a5   : > { %v4639_v30 = vmul.f32 %v12988_v50, %v12945_v41 }
 0x6a7   : > { %5908 = vperm.xlu0 %8030, %v5598_v62   ;;  %v4759_v56 = vsub.f32 %v4639_v30, %v4699_v13 }
 0x6a8   : > { %v3742_v30 = vpop.f32.mrf.mxu2 }
 0x6a9   : > { %6318 = vperm.xlu2 %8029, %v5776_v46   ;;  %v4877_v46 = vld [vmem:[%s10661_s20 + $0x80] sm:$0xff] }
 0x6ab   : > { %4519 = vadd.xlane.f32.xlu1 %v4518_v55  ;;  %v11325_v22 = vpop.xlane.xlu2 %4499  ;;  %v5150_v55 = vsel %vm5149_vm14, %v8108_v35, %v5146_v40  ;;  %v3898_v35 = vpop.f32.mrf.mxu3 }
 0x6ac   : > { %v5597_v6 = vmul.f32 %v5150_v55, %v4877_v46  ;;  %v3421_v40 = vpop.f32.mrf.mxu0  ;;  %v5657_v46 = vld [vmem:[%s10671_s23 + $0x80] sm:$0xff]  ;;  %v4819_v55 = vmax.f32 %v4759_v56, 0.0  ;;  %v11361_v13 = vadd.f32 %v3898_v35, %v3739_v61  ;;  %v3583_v56 = vpop.f32.mrf.mxu1 }
 0x6ad   : > { %v11363_v1 = vadd.f32 %v3580_v3, %v3421_v40 }
 0x6ae   : > { %12989 = vst [vmem:[#allocation22_spill] sm:$0xff] %v11361_v13  ;;  %v4939_v15 = vadd.f32 0.001, %v4819_v55  ;;  %v4332_v35 = vmul.f32 %v11361_v13, %v11361_v13 }
 0x6af   : > { %6328 = vperm.xlu0 %8030, %v5778_v28   ;;  %v11327_v2 = vpop.xlane.xlu0 %4083  ;;  %v11345_v28 = vmul.f32 %v10937_v42, %v12945_v41  ;;  %v7670_v42 = vld [vmem:[%s10298_s17 + $0x158] sm:$0xf0]  ;;  %12990 = vst [vmem:[#allocation10_spill] sm:$0xff] %v11363_v1  ;;  %v4331_v55 = vmul.f32 %v11363_v1, %v11363_v1 }
 0x6b0   : > { %8109 = vrsqrt.f32 %v4939_v15  ;;  %vm5167_vm15 = vweird.f32 %v4939_v15 }
 0x6b3   : > { %v5884_v52 = vpop.permute.xlu2 %5883  ;;  %v3901_v11 = vpop.f32.mrf.mxu3 }
 0x6b4   : > { %v6145_v19 = vmul.f32 %v5884_v52, %v12985_v34  ;;  %v6146_v63 = vmul.f32 %v5884_v52, %v12986_v57  ;;  %v7668_v34 = vld [vmem:[%s10298_s17 + $0x150] sm:$0xf]  ;;  %v8000_v57 = vld [vmem:[%s10298_s17 + $0x154] sm:$0xf] }
 0x6b7   : > { %v11349_v52 = vpop.xlane.xlu0 %4503 }
 0x6bb   : > { %v6304_v36 = vpop.permute.xlu2 %6303 }
 0x6bc   : > { %v6565_v0 = vadd.f32 %v6304_v36, %v6145_v19  ;;  %v6566_v62 = vadd.f32 %v6304_v36, %v6146_v63  ;;  %v8001_v19 = vld [vmem:[%s10298_s17 + $0x154] sm:$0xf0]  ;;  %v4701_v63 = vmul.f32 %v11345_v28, %v11345_v28 }
 0x6bd   : > { %v7669_v36 = vor.u32 %v8001_v19, %v7668_v34 }
 0x6be   : > { %6685 = vst [vmem:[%s10867_s29 + $0xc0] sm:$0xff] %v6565_v0  ;;  %v5717_v0 = vmul.f32 %v5597_v6, %v11276_v47  ;;  %v4761_v59 = vsub.f32 %v4641_v45, %v4701_v63  ;;  %v4101_v47 = vsel %vm1976_vm0, %v11361_v13, 0.0  ;;  %v3424_v45 = vpop.f32.mrf.mxu0 }
 0x6bf   : > { %6686 = vst.msk [vmem:[%s10867_s29 + $0xc8] sm:$0xff] %vm1976_vm0, %v6566_v62  ;;  %v7673_v62 = vor.u32 %v8000_v57, %v7670_v42  ;;  %3756 = vmatmul.bf16.gmra.mxu2 %v7669_v36  ;;  %3438 = vmatmul.bf16.gmra.mxu0 %v7669_v36  ;;  %v4102_v61 = vadd.f32 %v4101_v47, %v11363_v1  ;;  %v12993_v42 = vld [vmem:[#allocation3_spill] sm:$0xff] }
 0x6c0   : > { %v5777_v50 = vsub.f32 %v5657_v46, %v5717_v0  ;;  %v4821_v34 = vmax.f32 %v4761_v59, 0.0  ;;  %v11374_v63 = vadd.f32 %v3583_v56, %v3424_v45 }
 0x6c1   : > { %7789 = vmatmul.msk.bf16.gmra.mxu3 %vm3234_vm2, %v7673_v62  ;;  %7759 = vmatmul.msk.bf16.gmra.mxu1 %vm3234_vm2, %v7673_v62 }
 0x6c2   : > { %v11369_v57 = vadd.f32 0.001, %v4821_v34  ;;  %12992 = vst [vmem:[#allocation21_spill] sm:$0xff] %v11374_v63  ;;  %v8110_v34 = vpop.eup %8109 }
 0x6c3   : > { %v11376_v36 = vpop.xlane.xlu1 %4087  ;;  %v5162_v56 = vmul.f32 %v8110_v34, %v4939_v15  ;;  %vm5168_vm1 = vweird.f32 %v8110_v34 }
 0x6c4   : > { %5903 = vperm.xlu1 %8028, %v5597_v6   ;;  %v11367_v6 = vadd.f32 %v3901_v11, %v3742_v30  ;;  %v12994_v11 = vld [vmem:[#allocation16_spill] sm:$0xff]  ;;  %8111 = vrsqrt.f32 %v11369_v57  ;;  %v4521_v30 = vsel %vm1976_vm0, %v4332_v35, 0.0  ;;  %vm11406_vm3 = vmor %vm5167_vm15, %vm5168_vm1  ;;  %vm5187_vm5 = vweird.f32 %v11369_v57 }
 0x6c5   : > { %v4522_v47 = vadd.f32 %v4521_v30, %v4331_v55 }
 0x6c6   : > { %12991 = vst [vmem:[#allocation23_spill] sm:$0xff] %v11367_v6  ;;  %v4105_v0 = vsel %vm1976_vm0, %v11367_v6, 0.0  ;;  %v3426_v13 = vpop.f32.mrf.mxu0 }
 0x6ca   : > { %v8112_v45 = vpop.eup %8111 }
 0x6cb   : > { %v5894_v19 = vpop.permute.xlu0 %5893  ;;  %v5182_v35 = vmul.f32 %v8112_v45, %v11369_v57  ;;  %vm5188_vm4 = vweird.f32 %v8112_v45 }
 0x6cc   : > { %6323 = vperm.xlu1 %8028, %v5777_v50   ;;  %v6149_v40 = vmul.f32 %v5894_v19, %v12993_v42  ;;  %v6150_v3 = vmul.f32 %v5894_v19, %v12994_v11  ;;  %v4106_v50 = vadd.f32 %v4105_v0, %v11374_v63  ;;  %v4334_v19 = vmul.f32 %v11367_v6, %v11367_v6  ;;  %vm5189_vm6 = vmor %vm5187_vm5, %vm5188_vm4 }
 0x6cd   : > { %v5163_v11 = vmul.f32 %v8110_v34, %v5162_v56  ;;  %v5183_v0 = vmul.f32 %v8112_v45, %v5182_v35 }
 0x6ce   : > { %v4525_v42 = vsel %vm1976_vm0, %v4334_v19, 0.0  ;;  %v12996_v19 = vld [vmem:[#allocation33_spill] sm:$0xff] }
 0x6cf   : > { %v5184_v30 = vmul.f32 0.5, %v5183_v0  ;;  %v12999_v0 = vld [vmem:[#allocation9_spill] sm:$0xff] }
 0x6d1   : > { %v5185_v56 = vsub.f32 1.5, %v5184_v30  ;;  %v3585_v30 = vpop.f32.mrf.mxu1 }
 0x6d2   : > { %4103 = vadd.xlane.f32.xlu2 %v4102_v61  ;;  %v4333_v61 = vmul.f32 %v11374_v63, %v11374_v63 }
 0x6d3   : > { %v6314_v62 = vpop.permute.xlu0 %6313 }
 0x6d4   : > { %v6569_v59 = vadd.f32 %v6314_v62, %v6149_v40  ;;  %v6570_v46 = vadd.f32 %v6314_v62, %v6150_v3  ;;  %v11395_v40 = vpop.xlane.xlu1 %4507  ;;  %v4526_v3 = vadd.f32 %v4525_v42, %v4333_v61  ;;  %v5164_v62 = vmul.f32 0.5, %v5163_v11  ;;  %v3744_v61 = vpop.f32.mrf.mxu2 }
 0x6d5   : > { %v3903_v42 = vpop.f32.mrf.mxu3 }
 0x6d6   : > { %6689 = vst [vmem:[%s10867_s29 + $0xe0] sm:$0xff] %v6569_v59  ;;  %v12995_v59 = vld [vmem:[#allocation30_spill] sm:$0xff]  ;;  %v5165_v6 = vsub.f32 1.5, %v5164_v62  ;;  %v11412_v15 = vadd.f32 %v3903_v42, %v3744_v61 }
 0x6d7   : > { %6690 = vst.msk [vmem:[%s10867_s29 + $0xe8] sm:$0xff] %vm1976_vm0, %v6570_v46  ;;  %v11400_v46 = vmul.f32 %v12995_v59, %v12945_v41  ;;  %v13000_v59 = vld [vmem:[#allocation19_spill] sm:$0xff] }
 0x6d8   : > { %v5166_v11 = vmul.f32 %v8110_v34, %v5165_v6  ;;  %13001 = vst [vmem:[#allocation27_spill] sm:$0xff] %v11412_v15  ;;  %v5186_v6 = vmul.f32 %v8112_v45, %v5185_v56  ;;  %v4109_v61 = vsel %vm1976_vm0, %v11412_v15, 0.0 }
 0x6d9   : > { %4107 = vadd.xlane.f32.xlu0 %v4106_v50  ;;  %v4700_v50 = vmul.f32 %v11400_v46, %v11400_v46 }
 0x6da   : > { %4523 = vadd.xlane.f32.xlu2 %v4522_v47  ;;  %v4640_v47 = vmul.f32 %v12996_v19, %v12945_v41  ;;  %v5170_v44 = vsel %vm11406_vm3, %v8110_v34, %v5166_v11  ;;  %v5190_v56 = vsel %vm5189_vm6, %v8112_v45, %v5186_v6 }
 0x6db   : > { %v5599_v42 = vmul.f32 %v5170_v44, %v4879_v51 }
 0x6dc   : > { %v4760_v35 = vsub.f32 %v4640_v47, %v4700_v50 }
 0x6dd   : > { %v5719_v11 = vmul.f32 %v5599_v42, %v11333_v8 }
 0x6de   : > { %v4820_v47 = vmax.f32 %v4760_v35, 0.0 }
 0x6e0   : > { %v4940_v35 = vadd.f32 0.001, %v4820_v47 }
 0x6e1   : > { %4527 = vadd.xlane.f32.xlu0 %v4526_v3  ;;  %v5659_v3 = vld [vmem:[%s10671_s23 + $0x90] sm:$0xff] }
 0x6e2   : > { %8113 = vrsqrt.f32 %v4940_v35  ;;  %vm5177_vm7 = vweird.f32 %v4940_v35 }
 0x6e3   : > { %v5889_v55 = vpop.permute.xlu1 %5888 }
 0x6e4   : > { %v6147_v62 = vmul.f32 %v5889_v55, %v12999_v0  ;;  %v6148_v63 = vmul.f32 %v5889_v55, %v13000_v59  ;;  %v11419_v55 = vadd.f32 %v3585_v30, %v3426_v13  ;;  %v5779_v0 = vsub.f32 %v5659_v3, %v5719_v11  ;;  %v13003_v11 = vld [vmem:[#allocation7_spill] sm:$0xff] }
 0x6e6   : > { %13002 = vst [vmem:[#allocation29_spill] sm:$0xff] %v11419_v55  ;;  %v4110_v34 = vadd.f32 %v4109_v61, %v11419_v55  ;;  %v4335_v51 = vmul.f32 %v11419_v55, %v11419_v55 }
 0x6eb   : > { %v6309_v19 = vpop.permute.xlu1 %6308 }
 0x6ec   : > { %v6567_v1 = vadd.f32 %v6309_v19, %v6147_v62  ;;  %v6568_v50 = vadd.f32 %v6309_v19, %v6148_v63  ;;  %v4881_v63 = vld [vmem:[%s10661_s20 + $0xa0] sm:$0xff]  ;;  %v8114_v19 = vpop.eup %8113 }
 0x6ed   : > { %v5601_v13 = vmul.f32 %v5190_v56, %v4881_v63  ;;  %v5661_v62 = vld [vmem:[%s10671_s23 + $0xa0] sm:$0xff]  ;;  %v5172_v8 = vmul.f32 %v8114_v19, %v4940_v35  ;;  %vm5178_vm8 = vweird.f32 %v8114_v19  ;;  %v11458_v35 = vmul.f32 %v11072_v43, %v12945_v41 }
 0x6ee   : > { %6687 = vst [vmem:[%s10867_s29 + $0xd0] sm:$0xff] %v6567_v1  ;;  %v4336_v1 = vmul.f32 %v11412_v15, %v11412_v15  ;;  %vm11452_vm9 = vmor %vm5177_vm7, %vm5178_vm8 }
 0x6ef   : > { %6688 = vst.msk [vmem:[%s10867_s29 + $0xd8] sm:$0xff] %vm1976_vm0, %v6568_v50  ;;  %v5721_v44 = vmul.f32 %v5601_v13, %v11345_v28  ;;  %v5173_v47 = vmul.f32 %v8114_v19, %v5172_v8  ;;  %v11450_v8 = vmul.f32 %v10952_v53, %v12945_v41  ;;  %v4644_v53 = vmul.f32 %v11080_v58, %v12945_v41  ;;  %v7678_v58 = vld [vmem:[%s10298_s17 + $0x168] sm:$0xf0] }
 0x6f0   : > { %v4529_v45 = vsel %vm1976_vm0, %v4336_v1, 0.0 }
 0x6f1   : > { %v4530_v59 = vadd.f32 %v4529_v45, %v4335_v51  ;;  %v5781_v30 = vsub.f32 %v5661_v62, %v5721_v44  ;;  %v5174_v28 = vmul.f32 0.5, %v5173_v47  ;;  %v13004_v51 = vld [vmem:[#allocation18_spill] sm:$0xff] }
 0x6f2   : > { %5913 = vperm.xlu2 %8029, %v5599_v42  }
 0x6f4   : > { %v11429_v57 = vpop.xlane.xlu2 %4091 }
 0x6f5   : > { %5923 = vperm.xlu0 %8030, %v5601_v13   ;;  %v5175_v13 = vsub.f32 1.5, %v5174_v28  ;;  %v3747_v28 = vpop.f32.mrf.mxu2 }
 0x6f6   : > { %4111 = vadd.xlane.f32.xlu1 %v4110_v34 }
 0x6fa   : > { %6333 = vperm.xlu2 %8029, %v5779_v0  }
 0x6fc   : > { %v11438_v50 = vpop.xlane.xlu2 %4511 }
 0x6fd   : > { %6343 = vperm.xlu0 %8030, %v5781_v30  }
 0x6fe   : > { %4531 = vadd.xlane.f32.xlu1 %v4530_v59  ;;  %v4096_v6 = vpop.xlane.xlu0 %4095 }
 0x6ff   : > { %v11441_v61 = vmul.f32 %v4096_v6, %v12945_v41  ;;  %v5176_v6 = vmul.f32 %v8114_v19, %v5175_v13  ;;  %v3429_v13 = vpop.f32.mrf.mxu0 }
 0x701   : > { %v4714_v56 = vmul.f32 %v11441_v61, %v11441_v61  ;;  %v5180_v43 = vsel %vm11452_vm9, %v8114_v19, %v5176_v6 }
 0x704   : > { %v5899_v42 = vpop.permute.xlu2 %5898 }
 0x705   : > { %v6151_v3 = vmul.f32 %v5899_v42, %v13003_v11  ;;  %v6152_v44 = vmul.f32 %v5899_v42, %v13004_v51  ;;  %v4642_v42 = vmul.f32 %v10965_v49, %v12945_v41  ;;  %v7676_v49 = vld [vmem:[%s10298_s17 + $0x160] sm:$0xf]  ;;  %v8003_v11 = vld [vmem:[%s10298_s17 + $0x164] sm:$0xf0] }
 0x706   : > { %v4516_v63 = vpop.xlane.xlu0 %4515 }
 0x707   : > { %v4654_v34 = vmul.f32 %v4516_v63, %v12945_v41  ;;  %v3906_v63 = vpop.f32.mrf.mxu3 }
 0x708   : > { %v11479_v47 = vadd.f32 %v3906_v63, %v3747_v28  ;;  %v3431_v63 = vpop.f32.mrf.mxu0 }
 0x709   : > { %v4774_v1 = vsub.f32 %v4654_v34, %v4714_v56  ;;  %v4702_v56 = vmul.f32 %v11450_v8, %v11450_v8  ;;  %v4880_v34 = vld [vmem:[%s10661_s20 + $0x98] sm:$0xff] }
 0x70a   : > { %13007 = vst [vmem:[#allocation3_spill] sm:$0xff] %v11479_v47 }
 0x70b   : > { %v4834_v45 = vmax.f32 %v4774_v1, 0.0  ;;  %v4704_v1 = vmul.f32 %v11458_v35, %v11458_v35  ;;  %v4762_v51 = vsub.f32 %v4642_v42, %v4702_v56 }
 0x70c   : > { %v6319_v0 = vpop.permute.xlu2 %6318 }
 0x70d   : > { %v6571_v62 = vadd.f32 %v6319_v0, %v6151_v3  ;;  %v6572_v59 = vadd.f32 %v6319_v0, %v6152_v44  ;;  %v4954_v30 = vadd.f32 0.001, %v4834_v45  ;;  %v8002_v3 = vld [vmem:[%s10298_s17 + $0x164] sm:$0xf]  ;;  %v3588_v44 = vpop.f32.mrf.mxu1  ;;  %v7677_v45 = vor.u32 %v8003_v11, %v7676_v49  ;;  %v3749_v11 = vpop.f32.mrf.mxu2 }
 0x70e   : > { %v7681_v15 = vor.u32 %v8002_v3, %v7678_v58  ;;  %v4822_v19 = vmax.f32 %v4762_v51, 0.0  ;;  %v11487_v49 = vadd.f32 %v3588_v44, %v3429_v13  ;;  %v4894_v58 = vld [vmem:[%s10661_s20 + $0x108] sm:$0xff] }
 0x70f   : > { %6691 = vst [vmem:[%s10867_s29 + $0xf0] sm:$0xff] %v6571_v62  ;;  %8115 = vrsqrt.f32 %v4954_v30  ;;  %v4764_v62 = vsub.f32 %v4644_v53, %v4704_v1  ;;  %3761 = vmatmul.bf16.gmra.mxu2 %v7677_v45  ;;  %3443 = vmatmul.bf16.gmra.mxu0 %v7677_v45  ;;  %v5660_v1 = vld [vmem:[%s10671_s23 + $0x98] sm:$0xff]  ;;  %v3908_v3 = vpop.f32.mrf.mxu3  ;;  %vm5317_vm11 = vweird.f32 %v4954_v30 }
 0x710   : > { %6692 = vst.msk [vmem:[%s10867_s29 + $0xf8] sm:$0xff] %vm1976_vm0, %v6572_v59  ;;  %v5600_v59 = vmul.f32 %v5180_v43, %v4880_v34  ;;  %7790 = vmatmul.msk.bf16.gmra.mxu3 %vm3234_vm2, %v7681_v15  ;;  %7760 = vmatmul.msk.bf16.gmra.mxu1 %vm3234_vm2, %v7681_v15  ;;  %v11489_v51 = vadd.f32 0.001, %v4822_v19  ;;  %v4113_v15 = vsel %vm1976_vm0, %v11479_v47, 0.0  ;;  %v11497_v45 = vadd.f32 %v3908_v3, %v3749_v11 }
 0x711   : > { %v4824_v42 = vmax.f32 %v4764_v62, 0.0  ;;  %13008 = vst [vmem:[#allocation16_spill] sm:$0xff] %v11487_v49 }
 0x712   : > { %v5720_v53 = vmul.f32 %v5600_v59, %v11400_v46  ;;  %13009 = vst [vmem:[#allocation30_spill] sm:$0xff] %v11497_v45  ;;  %8117 = vrsqrt.f32 %v11489_v51  ;;  %vm5197_vm4 = vweird.f32 %v11489_v51 }
 0x713   : > { %v11493_v28 = vadd.f32 0.001, %v4824_v42 }
 0x714   : > { %v5780_v46 = vsub.f32 %v5660_v1, %v5720_v53  ;;  %v13011_v53 = vld [vmem:[#allocation8_spill] sm:$0xff] }
 0x715   : > { %v8116_v0 = vpop.eup %8115  ;;  %v3590_v13 = vpop.f32.mrf.mxu1  ;;  %8119 = vrsqrt.f32 %v11493_v28  ;;  %vm5217_vm6 = vweird.f32 %v11493_v28 }
 0x716   : > { %v5312_v55 = vmul.f32 %v8116_v0, %v4954_v30  ;;  %v4100_v7 = vpop.xlane.xlu1 %4099  ;;  %vm5318_vm10 = vweird.f32 %v8116_v0  ;;  %v11506_v11 = vadd.f32 %v3590_v13, %v3431_v63  ;;  %v4337_v63 = vmul.f32 %v11487_v49, %v11487_v49 }
 0x717   : > { %5918 = vperm.xlu1 %8028, %v5600_v59   ;;  %v11484_v34 = vmul.f32 %v4100_v7, %v12945_v41  ;;  %vm5319_vm12 = vmor %vm5317_vm11, %vm5318_vm10  ;;  %v4114_v59 = vadd.f32 %v4113_v15, %v11487_v49  ;;  %v4338_v15 = vmul.f32 %v11479_v47, %v11479_v47 }
 0x718   : > { %v5313_v6 = vmul.f32 %v8116_v0, %v5312_v55  ;;  %13012 = vst [vmem:[#allocation33_spill] sm:$0xff] %v11506_v11 }
 0x719   : > { %v5909_v56 = vpop.permute.xlu0 %5908  ;;  %v4715_v7 = vmul.f32 %v11484_v34, %v11484_v34 }
 0x71a   : > { %v5314_v43 = vmul.f32 0.5, %v5313_v6  ;;  %v13010_v6 = vld [vmem:[#allocation13_spill] sm:$0xff] }
 0x71b   : > { %v6155_v42 = vmul.f32 %v5909_v56, %v13010_v6  ;;  %v4117_v6 = vsel %vm1976_vm0, %v11497_v45, 0.0 }
 0x71c   : > { %v5315_v55 = vsub.f32 1.5, %v5314_v43  ;;  %v6156_v43 = vmul.f32 %v5909_v56, %v13011_v53 }
 0x71e   : > { %v4520_v44 = vpop.xlane.xlu1 %4519  ;;  %v5316_v62 = vmul.f32 %v8116_v0, %v5315_v55 }
 0x71f   : > { %6338 = vperm.xlu1 %8028, %v5780_v46   ;;  %v4655_v19 = vmul.f32 %v4520_v44, %v12945_v41 }
 0x720   : > { %v5320_v30 = vsel %vm5319_vm12, %v8116_v0, %v5316_v62  ;;  %v4340_v62 = vmul.f32 %v11497_v45, %v11497_v45 }
 0x721   : > { %v6329_v1 = vpop.permute.xlu0 %6328  ;;  %v4775_v3 = vsub.f32 %v4655_v19, %v4715_v7  ;;  %v11508_v55 = vmul.f32 %v5320_v30, %v4894_v58  ;;  %v4118_v7 = vadd.f32 %v4117_v6, %v11506_v11  ;;  %v11524_v58 = vpop.eup %8117 }
 0x722   : > { %v6575_v46 = vadd.f32 %v6329_v1, %v6155_v42  ;;  %v6576_v44 = vadd.f32 %v6329_v1, %v6156_v43  ;;  %v8120_v19 = vpop.eup %8119  ;;  %v4339_v42 = vmul.f32 %v11506_v11, %v11506_v11  ;;  %v4537_v30 = vsel %vm1976_vm0, %v4340_v62, 0.0 }
 0x723   : > { %4115 = vadd.xlane.f32.xlu2 %v4114_v59  ;;  %v4835_v56 = vmax.f32 %v4775_v3, 0.0  ;;  %v11516_v0 = vmul.f32 %v11508_v55, %v11441_v61  ;;  %v4533_v59 = vsel %vm1976_vm0, %v4338_v15, 0.0  ;;  %v5192_v61 = vmul.f32 %v11524_v58, %v11489_v51  ;;  %v3434_v51 = vpop.f32.mrf.mxu0 }
 0x724   : > { %6695 = vst [vmem:[%s10867_s29 + $0x110] sm:$0xff] %v6575_v46  ;;  %v4534_v53 = vadd.f32 %v4533_v59, %v4337_v63  ;;  %v5212_v43 = vmul.f32 %v8120_v19, %v11493_v28  ;;  %v4538_v46 = vadd.f32 %v4537_v30, %v4339_v42  ;;  %v11538_v63 = vmul.f32 %v10983_v16, %v12945_v41  ;;  %v4895_v42 = vld [vmem:[%s10661_s20 + $0x110] sm:$0xff] }
 0x725   : > { %13013 = vst [vmem:[#allocation9_spill] sm:$0xff] %v11516_v0  ;;  %v4955_v13 = vadd.f32 0.001, %v4835_v56  ;;  %v5193_v3 = vmul.f32 %v11524_v58, %v5192_v61  ;;  %vm5198_vm1 = vweird.f32 %v11524_v58  ;;  %vm5218_vm3 = vweird.f32 %v8120_v19 }
 0x726   : > { %6696 = vst.msk [vmem:[%s10867_s29 + $0x118] sm:$0xff] %vm1976_vm0, %v6576_v44  ;;  %v5213_v15 = vmul.f32 %v8120_v19, %v5212_v43  ;;  %v4703_v43 = vmul.f32 %v11538_v63, %v11538_v63  ;;  %vm11554_vm5 = vmor %vm5197_vm4, %vm5198_vm1 }
 0x727   : > { %4119 = vadd.xlane.f32.xlu0 %v4118_v7  ;;  %8121 = vrsqrt.f32 %v4955_v13  ;;  %v5194_v56 = vmul.f32 0.5, %v5193_v3  ;;  %vm5327_vm13 = vweird.f32 %v4955_v13  ;;  %v4643_v3 = vmul.f32 %v11002_v29, %v12945_v41  ;;  %vm5219_vm7 = vmor %vm5217_vm6, %vm5218_vm3  ;;  %v5664_v29 = vld [vmem:[%s10671_s23 + $0xb8] sm:$0xff] }
 0x728   : > { %v5214_v7 = vmul.f32 0.5, %v5213_v15 }
 0x729   : > { %v5195_v59 = vsub.f32 1.5, %v5194_v56  ;;  %v4763_v15 = vsub.f32 %v4643_v3, %v4703_v43 }
 0x72b   : > { %4535 = vadd.xlane.f32.xlu2 %v4534_v53  ;;  %v5215_v53 = vsub.f32 1.5, %v5214_v7  ;;  %v4823_v11 = vmax.f32 %v4763_v15, 0.0 }
 0x72d   : > { %v8122_v1 = vpop.eup %8121  ;;  %v5216_v16 = vmul.f32 %v8120_v19, %v5215_v53 }
 0x72e   : > { %v5322_v44 = vmul.f32 %v8122_v1, %v4955_v13  ;;  %vm5328_vm14 = vweird.f32 %v8122_v1 }
 0x72f   : > { %4539 = vadd.xlane.f32.xlu0 %v4538_v46  ;;  %vm5329_vm15 = vmor %vm5327_vm13, %vm5328_vm14 }
 0x730   : > { %v5323_v6 = vmul.f32 %v8122_v1, %v5322_v44  ;;  %v3752_v44 = vpop.f32.mrf.mxu2 }
 0x732   : > { %v5324_v45 = vmul.f32 0.5, %v5323_v6  ;;  %v3911_v6 = vpop.f32.mrf.mxu3 }
 0x733   : > { %v11562_v43 = vadd.f32 %v3911_v6, %v3752_v44 }
 0x734   : > { %v5325_v62 = vsub.f32 1.5, %v5324_v45  ;;  %v5196_v45 = vmul.f32 %v11524_v58, %v5195_v59 }
 0x735   : > { %13020 = vst [vmem:[#allocation18_spill] sm:$0xff] %v11562_v43  ;;  %v4342_v6 = vmul.f32 %v11562_v43, %v11562_v43 }
 0x736   : > { %v5904_v61 = vpop.permute.xlu1 %5903  ;;  %v5326_v30 = vmul.f32 %v8122_v1, %v5325_v62  ;;  %v13019_v62 = vld [vmem:[#allocation20_spill] sm:$0xff]  ;;  %v5200_v3 = vsel %vm11554_vm5, %v11524_v58, %v5196_v45  ;;  %v11575_v58 = vadd.f32 0.001, %v4823_v11  ;;  %v8005_v11 = vld [vmem:[%s10298_s17 + $0x174] sm:$0xf0] }
 0x737   : > { %v6154_v59 = vmul.f32 %v5904_v61, %v13019_v62 }
 0x738   : > { %v5330_v46 = vsel %vm5329_vm15, %v8122_v1, %v5326_v30  ;;  %v13018_v1 = vld [vmem:[#allocation2_spill] sm:$0xff]  ;;  %v5220_v30 = vsel %vm5219_vm7, %v8120_v19, %v5216_v16  ;;  %v4121_v19 = vsel %vm1976_vm0, %v11562_v43, 0.0  ;;  %8123 = vrsqrt.f32 %v11575_v58  ;;  %v4896_v43 = vld [vmem:[%s10661_s20 + $0x118] sm:$0xff] }
 0x739   : > { %v11546_v13 = vmul.f32 %v5330_v46, %v4895_v42  ;;  %v6153_v7 = vmul.f32 %v5904_v61, %v13018_v1  ;;  %v4884_v42 = vld [vmem:[%s10661_s20 + $0xb8] sm:$0xff]  ;;  %v3593_v46 = vpop.f32.mrf.mxu1  ;;  %vm5207_vm8 = vweird.f32 %v11575_v58 }
 0x73a   : > { %v5604_v61 = vmul.f32 %v5220_v30, %v4884_v42  ;;  %v11569_v62 = vadd.f32 %v3593_v46, %v3434_v51 }
 0x73b   : > { %13014 = vst [vmem:[#allocation19_spill] sm:$0xff] %v11546_v13  ;;  %v11552_v56 = vmul.f32 %v11546_v13, %v11484_v34  ;;  %v4882_v34 = vld [vmem:[%s10661_s20 + $0xa8] sm:$0xff]  ;;  %v7692_v13 = vld [vmem:[%s10298_s17 + $0x180] sm:$0xf] }
 0x73c   : > { %v5602_v1 = vmul.f32 %v5200_v3, %v4882_v34  ;;  %13021 = vst [vmem:[#allocation13_spill] sm:$0xff] %v11569_v62  ;;  %v4122_v45 = vadd.f32 %v4121_v19, %v11569_v62  ;;  %v5724_v15 = vmul.f32 %v5604_v61, %v11458_v35  ;;  %v4341_v51 = vmul.f32 %v11569_v62, %v11569_v62  ;;  %v7686_v35 = vld [vmem:[%s10298_s17 + $0x178] sm:$0xf0] }
 0x73d   : > { %13015 = vst [vmem:[#allocation7_spill] sm:$0xff] %v11552_v56  ;;  %v4541_v34 = vsel %vm1976_vm0, %v4342_v6, 0.0 }
 0x73e   : > { %v6324_v53 = vpop.permute.xlu1 %6323  ;;  %v5722_v44 = vmul.f32 %v5602_v1, %v11450_v8 }
 0x73f   : > { %v6573_v28 = vadd.f32 %v6324_v53, %v6153_v7  ;;  %v6574_v47 = vadd.f32 %v6324_v53, %v6154_v59  ;;  %v7684_v7 = vld [vmem:[%s10298_s17 + $0x170] sm:$0xf]  ;;  %v8004_v59 = vld [vmem:[%s10298_s17 + $0x174] sm:$0xf]  ;;  %v5784_v53 = vsub.f32 %v5664_v29, %v5724_v15 }
 0x740   : > { %v7685_v30 = vor.u32 %v8005_v11, %v7684_v7  ;;  %v7689_v3 = vor.u32 %v8004_v59, %v7686_v35 }
 0x741   : > { %6693 = vst [vmem:[%s10867_s29 + $0x100] sm:$0xff] %v6573_v28  ;;  %v11596_v28 = vpop.eup %8123 }
 0x742   : > { %6694 = vst.msk [vmem:[%s10867_s29 + $0x108] sm:$0xff] %vm1976_vm0, %v6574_v47  ;;  %v5662_v47 = vld [vmem:[%s10671_s23 + $0xa8] sm:$0xff]  ;;  %3766 = vmatmul.bf16.gmra.mxu2 %v7685_v30  ;;  %7791 = vmatmul.msk.bf16.gmra.mxu3 %vm3234_vm2, %v7689_v3  ;;  %v5202_v15 = vmul.f32 %v11596_v28, %v11575_v58  ;;  %vm5208_vm9 = vweird.f32 %v11596_v28 }
 0x743   : > { %5938 = vperm.xlu0 %8030, %v5604_v61   ;;  %5928 = vperm.xlu2 %8029, %v5602_v1   ;;  %v5782_v42 = vsub.f32 %v5662_v47, %v5722_v44  ;;  %v4542_v1 = vadd.f32 %v4541_v34, %v4341_v51  ;;  %vm11634_vm10 = vmor %vm5207_vm8, %vm5208_vm9 }
 0x744   : > { %3448 = vmatmul.bf16.gmra.mxu0 %v7685_v30  ;;  %7761 = vmatmul.msk.bf16.gmra.mxu1 %vm3234_vm2, %v7689_v3  ;;  %v5203_v47 = vmul.f32 %v11596_v28, %v5202_v15  ;;  %v11622_v15 = vmul.f32 %v11092_v48, %v12945_v41 }
 0x745   : > { %v4104_v16 = vpop.xlane.xlu2 %4103 }
 0x746   : > { %v11592_v8 = vmul.f32 %v4104_v16, %v12945_v41 }
 0x748   : > { %v4716_v19 = vmul.f32 %v11592_v8, %v11592_v8 }
 0x749   : > { %4123 = vadd.xlane.f32.xlu1 %v4122_v45 }
 0x74b   : > { %6358 = vperm.xlu0 %8030, %v5784_v53   ;;  %6348 = vperm.xlu2 %8029, %v5782_v42   ;;  %v5204_v42 = vmul.f32 0.5, %v5203_v47 }
 0x74c   : > { %v4108_v46 = vpop.xlane.xlu0 %4107 }
 0x74d   : > { %v4524_v61 = vpop.xlane.xlu2 %4523  ;;  %v11603_v45 = vmul.f32 %v4108_v46, %v12945_v41  ;;  %v5205_v3 = vsub.f32 1.5, %v5204_v42  ;;  %v11615_v46 = vmul.f32 %v11187_v31, %v12945_v41  ;;  %v4647_v31 = vmul.f32 %v11192_v10, %v12945_v41  ;;  %v7694_v42 = vld [vmem:[%s10298_s17 + $0x188] sm:$0xf0] }
 0x74e   : > { %v4656_v16 = vmul.f32 %v4524_v61, %v12945_v41  ;;  %v13022_v61 = vld [vmem:[#allocation14_spill] sm:$0xff]  ;;  %v4705_v10 = vmul.f32 %v11622_v15, %v11622_v15 }
 0x74f   : > { %v4717_v29 = vmul.f32 %v11603_v45, %v11603_v45  ;;  %v4707_v48 = vmul.f32 %v11615_v46, %v11615_v46 }
 0x750   : > { %v4776_v44 = vsub.f32 %v4656_v16, %v4716_v19  ;;  %v13023_v19 = vld [vmem:[#allocation4_spill] sm:$0xff] }
 0x751   : > { %4543 = vadd.xlane.f32.xlu1 %v4542_v1 }
 0x752   : > { %v4836_v6 = vmax.f32 %v4776_v44, 0.0 }
 0x754   : > { %v4956_v7 = vadd.f32 0.001, %v4836_v6  ;;  %v4528_v11 = vpop.xlane.xlu0 %4527 }
 0x755   : > { %v5914_v59 = vpop.permute.xlu2 %5913  ;;  %v4657_v51 = vmul.f32 %v4528_v11, %v12945_v41  ;;  %v3754_v11 = vpop.f32.mrf.mxu2 }
 0x756   : > { %8125 = vrsqrt.f32 %v4956_v7  ;;  %v6157_v1 = vmul.f32 %v5914_v59, %v13022_v61  ;;  %v6158_v16 = vmul.f32 %v5914_v59, %v13023_v19  ;;  %v3436_v19 = vpop.f32.mrf.mxu0  ;;  %vm5337_vm12 = vweird.f32 %v4956_v7 }
 0x757   : > { %v4777_v53 = vsub.f32 %v4657_v51, %v4717_v29  ;;  %v3913_v51 = vpop.f32.mrf.mxu3 }
 0x759   : > { %v4837_v30 = vmax.f32 %v4777_v53, 0.0  ;;  %v5206_v53 = vmul.f32 %v11596_v28, %v5205_v3 }
 0x75b   : > { %v11611_v35 = vadd.f32 0.001, %v4837_v30  ;;  %v4645_v30 = vmul.f32 %v11106_v24, %v12945_v41  ;;  %v5210_v24 = vsel %vm11634_vm10, %v11596_v28, %v5206_v53  ;;  %v7693_v53 = vor.u32 %v8007_v5, %v7692_v13 }
 0x75c   : > { %v8126_v34 = vpop.eup %8125 }
 0x75d   : > { %v5332_v44 = vmul.f32 %v8126_v34, %v4956_v7  ;;  %v6334_v6 = vpop.permute.xlu2 %6333  ;;  %8127 = vrsqrt.f32 %v11611_v35  ;;  %vm5338_vm11 = vweird.f32 %v8126_v34  ;;  %vm5347_vm14 = vweird.f32 %v11611_v35  ;;  %3771 = vmatmul.bf16.gmra.mxu2 %v7693_v53  ;;  %3453 = vmatmul.bf16.gmra.mxu0 %v7693_v53 }
 0x75e   : > { %v6577_v29 = vadd.f32 %v6334_v6, %v6157_v1  ;;  %v6578_v47 = vadd.f32 %v6334_v6, %v6158_v16  ;;  %v4767_v1 = vsub.f32 %v4647_v31, %v4707_v48  ;;  %v3595_v16 = vpop.f32.mrf.mxu1  ;;  %v4883_v6 = vld [vmem:[%s10661_s20 + $0xb0] sm:$0xff]  ;;  %vm11649_vm13 = vmor %vm5337_vm12, %vm5338_vm11 }
 0x75f   : > { %v5333_v59 = vmul.f32 %v8126_v34, %v5332_v44  ;;  %v5603_v49 = vmul.f32 %v5210_v24, %v4883_v6  ;;  %v3916_v56 = vpop.f32.mrf.mxu3  ;;  %v3439_v24 = vpop.f32.mrf.mxu0 }
 0x760   : > { %6697 = vst [vmem:[%s10867_s29 + $0x120] sm:$0xff] %v6577_v29  ;;  %v4765_v29 = vsub.f32 %v4645_v30, %v4705_v10  ;;  %v4827_v31 = vmax.f32 %v4767_v1, 0.0  ;;  %v7697_v1 = vor.u32 %v8006_v9, %v7694_v42  ;;  %v11673_v9 = vadd.f32 %v3913_v51, %v3754_v11 }
 0x761   : > { %v5334_v61 = vmul.f32 0.5, %v5333_v59  ;;  %6698 = vst.msk [vmem:[%s10867_s29 + $0x128] sm:$0xff] %vm1976_vm0, %v6578_v47  ;;  %v11688_v11 = vadd.f32 %v3595_v16, %v3436_v19  ;;  %v13032_v59 = vld [vmem:[#allocation12_spill] sm:$0xff] }
 0x762   : > { %v4825_v10 = vmax.f32 %v4765_v29, 0.0  ;;  %7792 = vmatmul.msk.bf16.gmra.mxu3 %vm3234_vm2, %v7697_v1  ;;  %7762 = vmatmul.msk.bf16.gmra.mxu1 %vm3234_vm2, %v7697_v1  ;;  %v4125_v19 = vsel %vm1976_vm0, %v11673_v9, 0.0 }
 0x763   : > { %v8128_v3 = vpop.eup %8127  ;;  %v5335_v44 = vsub.f32 1.5, %v5334_v61  ;;  %v3757_v61 = vpop.f32.mrf.mxu2  ;;  %v4126_v1 = vadd.f32 %v4125_v19, %v11688_v11 }
 0x764   : > { %v5342_v58 = vmul.f32 %v8128_v3, %v11611_v35  ;;  %vm5348_vm15 = vweird.f32 %v8128_v3  ;;  %v11663_v6 = vadd.f32 %v3916_v56, %v3757_v61  ;;  %v5723_v56 = vmul.f32 %v5603_v49, %v11538_v63  ;;  %v4897_v35 = vld [vmem:[%s10661_s20 + $0x120] sm:$0xff] }
 0x765   : > { %v5336_v47 = vmul.f32 %v8126_v34, %v5335_v44  ;;  %vm11669_vm1 = vmor %vm5347_vm14, %vm5348_vm15 }
 0x766   : > { %v5343_v48 = vmul.f32 %v8128_v3, %v5342_v58  ;;  %13028 = vst [vmem:[#allocation8_spill] sm:$0xff] %v11663_v6  ;;  %v3598_v0 = vpop.f32.mrf.mxu1 }
 0x767   : > { %v5924_v62 = vpop.permute.xlu0 %5923  ;;  %v5340_v28 = vsel %vm11649_vm13, %v8126_v34, %v5336_v47  ;;  %v11665_v34 = vadd.f32 0.001, %v4827_v31  ;;  %v11686_v47 = vadd.f32 0.001, %v4825_v10  ;;  %v11690_v51 = vadd.f32 %v3598_v0, %v3439_v24  ;;  %v5663_v31 = vld [vmem:[%s10671_s23 + $0xb0] sm:$0xff] }
 0x768   : > { %v5344_v7 = vmul.f32 0.5, %v5343_v48  ;;  %v11661_v44 = vmul.f32 %v5340_v28, %v4896_v43  ;;  %v6161_v48 = vmul.f32 %v5924_v62, %v13032_v59  ;;  %v5783_v53 = vsub.f32 %v5663_v31, %v5723_v56 }
 0x769   : > { %v4112_v30 = vpop.xlane.xlu1 %4111  ;;  %13031 = vst [vmem:[#allocation2_spill] sm:$0xff] %v11690_v51  ;;  %8129 = vrsqrt.f32 %v11665_v34  ;;  %v4344_v24 = vmul.f32 %v11673_v9, %v11673_v9  ;;  %v4345_v56 = vmul.f32 %v11690_v51, %v11690_v51  ;;  %vm5227_vm7 = vweird.f32 %v11686_v47 }
 0x76a   : > { %v5345_v58 = vsub.f32 1.5, %v5344_v7  ;;  %5933 = vperm.xlu1 %8028, %v5603_v49   ;;  %v11678_v13 = vmul.f32 %v11661_v44, %v11592_v8  ;;  %v11682_v43 = vmul.f32 %v4112_v30, %v12945_v41  ;;  %v13033_v8 = vld [vmem:[#allocation6_spill] sm:$0xff]  ;;  %v4129_v49 = vsel %vm1976_vm0, %v11663_v6, 0.0 }
 0x76b   : > { %v6162_v61 = vmul.f32 %v5924_v62, %v13033_v8  ;;  %v4130_v42 = vadd.f32 %v4129_v49, %v11690_v51  ;;  %8131 = vrsqrt.f32 %v11686_v47  ;;  %v4346_v30 = vmul.f32 %v11663_v6, %v11663_v6 }
 0x76c   : > { %v5346_v29 = vmul.f32 %v8128_v3, %v5345_v58  ;;  %v4718_v62 = vmul.f32 %v11682_v43, %v11682_v43  ;;  %v4545_v59 = vsel %vm1976_vm0, %v4344_v24, 0.0  ;;  %vm5247_vm9 = vweird.f32 %v11665_v34 }
 0x76e   : > { %v5350_v63 = vsel %vm11669_vm1, %v8128_v3, %v5346_v29  ;;  %v4549_v29 = vsel %vm1976_vm0, %v4346_v30, 0.0  ;;  %v11731_v30 = vmul.f32 %v11122_v37, %v12945_v41  ;;  %v4646_v37 = vmul.f32 %v11143_v32, %v12945_v41  ;;  %v3918_v32 = vpop.f32.mrf.mxu3 }
 0x76f   : > { %v6344_v28 = vpop.permute.xlu0 %6343  ;;  %v11702_v0 = vmul.f32 %v5350_v63, %v4897_v35  ;;  %v4343_v35 = vmul.f32 %v11688_v11, %v11688_v11  ;;  %v4550_v49 = vadd.f32 %v4549_v29, %v4345_v56 }
 0x770   : > { %v6581_v16 = vadd.f32 %v6344_v28, %v6161_v48  ;;  %v6582_v7 = vadd.f32 %v6344_v28, %v6162_v61  ;;  %v4706_v56 = vmul.f32 %v11731_v30, %v11731_v30 }
 0x771   : > { %v4532_v10 = vpop.xlane.xlu1 %4531  ;;  %v11709_v3 = vmul.f32 %v11702_v0, %v11603_v45  ;;  %v8130_v45 = vpop.eup %8129  ;;  %v4546_v63 = vadd.f32 %v4545_v59, %v4343_v35 }
 0x772   : > { %6701 = vst [vmem:[%s10867_s29 + $0x140] sm:$0xff] %v6581_v16  ;;  %6353 = vperm.xlu1 %8028, %v5783_v53   ;;  %v4658_v58 = vmul.f32 %v4532_v10, %v12945_v41  ;;  %v8132_v48 = vpop.eup %8131  ;;  %v5242_v8 = vmul.f32 %v8130_v45, %v11665_v34  ;;  %vm5248_vm5 = vweird.f32 %v8130_v45 }
 0x773   : > { %6702 = vst.msk [vmem:[%s10867_s29 + $0x148] sm:$0xff] %vm1976_vm0, %v6582_v7  ;;  %v5222_v28 = vmul.f32 %v8132_v48, %v11686_v47  ;;  %vm5228_vm8 = vweird.f32 %v8132_v48  ;;  %vm5249_vm10 = vmor %vm5247_vm9, %vm5248_vm5 }
 0x774   : > { %4127 = vadd.xlane.f32.xlu2 %v4126_v1  ;;  %v4778_v5 = vsub.f32 %v4658_v58, %v4718_v62  ;;  %v5243_v19 = vmul.f32 %v8130_v45, %v5242_v8  ;;  %vm11740_vm11 = vmor %vm5227_vm7, %vm5228_vm8 }
 0x775   : > { %4131 = vadd.xlane.f32.xlu0 %v4130_v42  ;;  %v5223_v16 = vmul.f32 %v8132_v48, %v5222_v28 }
 0x776   : > { %v4838_v31 = vmax.f32 %v4778_v5, 0.0  ;;  %v5244_v53 = vmul.f32 0.5, %v5243_v19  ;;  %v4766_v19 = vsub.f32 %v4646_v37, %v4706_v56 }
 0x777   : > { %v5224_v42 = vmul.f32 0.5, %v5223_v16  ;;  %v3759_v16 = vpop.f32.mrf.mxu2 }
 0x778   : > { %v4958_v61 = vadd.f32 0.001, %v4838_v31  ;;  %v5245_v1 = vsub.f32 1.5, %v5244_v53  ;;  %v4898_v31 = vld [vmem:[%s10661_s20 + $0x128] sm:$0xff]  ;;  %v11756_v56 = vadd.f32 %v3918_v32, %v3759_v16 }
 0x779   : > { %v5225_v24 = vsub.f32 1.5, %v5224_v42  ;;  %v13036_v42 = vld [vmem:[#allocation5_spill] sm:$0xff] }
 0x77a   : > { %8133 = vrsqrt.f32 %v4958_v61  ;;  %vm5357_vm3 = vweird.f32 %v4958_v61  ;;  %v5246_v35 = vmul.f32 %v8130_v45, %v5245_v1  ;;  %v13037_v1 = vld [vmem:[#allocation15_spill] sm:$0xff]  ;;  %13038 = vst [vmem:[#allocation20_spill] sm:$0xff] %v11756_v56 }
 0x77b   : > { %v5226_v8 = vmul.f32 %v8132_v48, %v5225_v24  ;;  %v4826_v24 = vmax.f32 %v4766_v19, 0.0  ;;  %v5665_v19 = vld [vmem:[%s10671_s23 + $0xc0] sm:$0xff] }
 0x77c   : > { %4547 = vadd.xlane.f32.xlu2 %v4546_v63  ;;  %v4887_v63 = vld [vmem:[%s10661_s20 + $0xd0] sm:$0xff]  ;;  %v5250_v28 = vsel %vm5249_vm10, %v8130_v45, %v5246_v35 }
 0x77d   : > { %4551 = vadd.xlane.f32.xlu0 %v4550_v49  ;;  %v5607_v34 = vmul.f32 %v5250_v28, %v4887_v63 }
 0x780   : > { %v8134_v7 = vpop.eup %8133 }
 0x781   : > { %v5352_v62 = vmul.f32 %v8134_v7, %v4958_v61  ;;  %vm5358_vm4 = vweird.f32 %v8134_v7 }
 0x782   : > { %vm5359_vm6 = vmor %vm5357_vm3, %vm5358_vm4 }
 0x783   : > { %v5353_v10 = vmul.f32 %v8134_v7, %v5352_v62  ;;  %v4885_v62 = vld [vmem:[%s10661_s20 + $0xc0] sm:$0xff] }
 0x785   : > { %v5354_v58 = vmul.f32 0.5, %v5353_v10 }
 0x787   : > { %v5355_v5 = vsub.f32 1.5, %v5354_v58  ;;  %v3441_v58 = vpop.f32.mrf.mxu0 }
 0x789   : > { %v5919_v29 = vpop.permute.xlu1 %5918  ;;  %v5356_v59 = vmul.f32 %v8134_v7, %v5355_v5 }
 0x78a   : > { %v6159_v10 = vmul.f32 %v5919_v29, %v13036_v42  ;;  %v6160_v45 = vmul.f32 %v5919_v29, %v13037_v1  ;;  %v11763_v29 = vadd.f32 0.001, %v4826_v24 }
 0x78b   : > { %v5360_v61 = vsel %vm5359_vm6, %v8134_v7, %v5356_v59  ;;  %v5230_v7 = vsel %vm11740_vm11, %v8132_v48, %v5226_v8  ;;  %v5727_v59 = vmul.f32 %v5607_v34, %v11615_v46  ;;  %v5667_v8 = vld [vmem:[%s10671_s23 + $0xd0] sm:$0xff]  ;;  %v4348_v46 = vmul.f32 %v11756_v56, %v11756_v56 }
 0x78c   : > { %v11745_v47 = vmul.f32 %v5360_v61, %v4898_v31  ;;  %v5605_v31 = vmul.f32 %v5230_v7, %v4885_v62  ;;  %v4133_v61 = vsel %vm1976_vm0, %v11756_v56, 0.0  ;;  %8135 = vrsqrt.f32 %v11763_v29 }
 0x78d   : > { %v5787_v28 = vsub.f32 %v5667_v8, %v5727_v59  ;;  %vm5237_vm12 = vweird.f32 %v11763_v29 }
 0x78e   : > { %v11749_v53 = vmul.f32 %v11745_v47, %v11682_v43  ;;  %v3600_v43 = vpop.f32.mrf.mxu1  ;;  %v5725_v63 = vmul.f32 %v5605_v31, %v11622_v15  ;;  %v4553_v15 = vsel %vm1976_vm0, %v4348_v46, 0.0 }
 0x78f   : > { %v11760_v48 = vadd.f32 %v3600_v43, %v3441_v58 }
 0x790   : > { %v5785_v32 = vsub.f32 %v5665_v19, %v5725_v63 }
 0x791   : > { %5953 = vperm.xlu0 %8030, %v5607_v34   ;;  %v6339_v5 = vpop.permute.xlu1 %6338  ;;  %13039 = vst [vmem:[#allocation14_spill] sm:$0xff] %v11760_v48  ;;  %v4134_v16 = vadd.f32 %v4133_v61, %v11760_v48  ;;  %v4347_v7 = vmul.f32 %v11760_v48, %v11760_v48  ;;  %v4886_v48 = vld [vmem:[%s10661_s20 + $0xc8] sm:$0xff] }
 0x792   : > { %v6579_v35 = vadd.f32 %v6339_v5, %v6159_v10  ;;  %v6580_v37 = vadd.f32 %v6339_v5, %v6160_v45  ;;  %v11781_v10 = vpop.eup %8135  ;;  %v11797_v46 = vpop.f32.mrf.mxu2 }
 0x793   : > { %v4554_v24 = vadd.f32 %v4553_v15, %v4347_v7  ;;  %v5232_v43 = vmul.f32 %v11781_v10, %v11763_v29  ;;  %v7700_v7 = vld [vmem:[%s10298_s17 + $0x190] sm:$0xf]  ;;  %v8009_v15 = vld [vmem:[%s10298_s17 + $0x194] sm:$0xf0]  ;;  %vm5238_vm13 = vweird.f32 %v11781_v10 }
 0x794   : > { %6699 = vst [vmem:[%s10867_s29 + $0x130] sm:$0xff] %v6579_v35  ;;  %5943 = vperm.xlu2 %8029, %v5605_v31   ;;  %vm11833_vm14 = vmor %vm5237_vm12, %vm5238_vm13 }
 0x795   : > { %6700 = vst.msk [vmem:[%s10867_s29 + $0x138] sm:$0xff] %vm1976_vm0, %v6580_v37 }
 0x796   : > { %v4116_v49 = vpop.xlane.xlu2 %4115 }
 0x797   : > { %v11776_v62 = vmul.f32 %v4116_v49, %v12945_v41  ;;  %v5233_v49 = vmul.f32 %v11781_v10, %v5232_v43  ;;  %v13040_v43 = vld [vmem:[#allocation11_spill] sm:$0xff] }
 0x799   : > { %6373 = vperm.xlu0 %8030, %v5787_v28   ;;  %v4719_v1 = vmul.f32 %v11776_v62, %v11776_v62  ;;  %v5234_v19 = vmul.f32 0.5, %v5233_v49 }
 0x79a   : > { %v4120_v34 = vpop.xlane.xlu0 %4119 }
 0x79b   : > { %v11787_v58 = vmul.f32 %v4120_v34, %v12945_v41  ;;  %v3921_v34 = vpop.f32.mrf.mxu3 }
 0x79c   : > { %4135 = vadd.xlane.f32.xlu1 %v4134_v16  ;;  %6363 = vperm.xlu2 %8029, %v5785_v32   ;;  %v11801_v32 = vmul.f32 %v11316_v39, %v12945_v41 }
 0x79d   : > { %v4720_v31 = vmul.f32 %v11787_v58, %v11787_v58 }
 0x79e   : > { %v4536_v42 = vpop.xlane.xlu2 %4535 }
 0x79f   : > { %v4659_v45 = vmul.f32 %v4536_v42, %v12945_v41  ;;  %v8008_v42 = vld [vmem:[%s10298_s17 + $0x194] sm:$0xf] }
 0x7a1   : > { %v4779_v5 = vsub.f32 %v4659_v45, %v4719_v1  ;;  %v7701_v1 = vor.u32 %v8009_v15, %v7700_v7  ;;  %v7702_v45 = vld [vmem:[%s10298_s17 + $0x198] sm:$0xf0]  ;;  %v3603_v7 = vpop.f32.mrf.mxu1  ;;  %v5235_v15 = vsub.f32 1.5, %v5234_v19 }
 0x7a2   : > { %v4540_v35 = vpop.xlane.xlu0 %4539  ;;  %v7705_v39 = vor.u32 %v8008_v42, %v7702_v45 }
 0x7a3   : > { %v4839_v37 = vmax.f32 %v4779_v5, 0.0  ;;  %v4660_v59 = vmul.f32 %v4540_v35, %v12945_v41  ;;  %v4650_v5 = vmul.f32 %v11325_v22, %v12945_v41  ;;  %3776 = vmatmul.bf16.gmra.mxu2 %v7701_v1  ;;  %3458 = vmatmul.bf16.gmra.mxu0 %v7701_v1  ;;  %v4710_v22 = vmul.f32 %v11801_v32, %v11801_v32 }
 0x7a4   : > { %4555 = vadd.xlane.f32.xlu1 %v4554_v24  ;;  %7793 = vmatmul.msk.bf16.gmra.mxu3 %vm3234_vm2, %v7705_v39 }
 0x7a5   : > { %v4959_v8 = vadd.f32 0.001, %v4839_v37  ;;  %v4780_v61 = vsub.f32 %v4660_v59, %v4720_v31  ;;  %v13041_v37 = vld [vmem:[#allocation17_spill] sm:$0xff]  ;;  %v11812_v59 = vpop.f32.mrf.mxu0  ;;  %7763 = vmatmul.msk.bf16.gmra.mxu1 %vm3234_vm2, %v7705_v39  ;;  %v4770_v1 = vsub.f32 %v4650_v5, %v4710_v22  ;;  %v3764_v39 = vpop.f32.mrf.mxu2 }
 0x7a6   : > { %v5929_v63 = vpop.permute.xlu2 %5928 }
 0x7a7   : > { %8137 = vrsqrt.f32 %v4959_v8  ;;  %v4840_v28 = vmax.f32 %v4780_v61, 0.0  ;;  %v6163_v35 = vmul.f32 %v5929_v63, %v13040_v43  ;;  %v6164_v31 = vmul.f32 %v5929_v63, %v13041_v37 }
 0x7a8   : > { %v11816_v61 = vmul.f32 %v11198_v18, %v12945_v41  ;;  %v4648_v18 = vmul.f32 %v11220_v33, %v12945_v41  ;;  %v5236_v33 = vmul.f32 %v11781_v10, %v5235_v15  ;;  %vm5367_vm1 = vweird.f32 %v4959_v8 }
 0x7a9   : > { %v11795_v16 = vadd.f32 0.001, %v4840_v28 }
 0x7aa   : > { %v4708_v45 = vmul.f32 %v11816_v61, %v11816_v61  ;;  %v5240_v15 = vsel %vm11833_vm14, %v11781_v10, %v5236_v33  ;;  %v4900_v33 = vld [vmem:[%s10661_s20 + $0x138] sm:$0xff] }
 0x7ab   : > { %8139 = vrsqrt.f32 %v11795_v16  ;;  %vm5377_vm5 = vweird.f32 %v11795_v16 }
 0x7ac   : > { %v4768_v29 = vsub.f32 %v4648_v18, %v4708_v45 }
 0x7ad   : > { %v8138_v24 = vpop.eup %8137  ;;  %v3446_v45 = vpop.f32.mrf.mxu0 }
 0x7ae   : > { %v5362_v49 = vmul.f32 %v8138_v24, %v4959_v8  ;;  %v6349_v28 = vpop.permute.xlu2 %6348  ;;  %vm5368_vm15 = vweird.f32 %v8138_v24  ;;  %v4828_v6 = vmax.f32 %v4768_v29, 0.0  ;;  %v13047_v29 = vld [vmem:[#allocation32_spill] sm:$0xff] }
 0x7af   : > { %v6583_v43 = vadd.f32 %v6349_v28, %v6163_v35  ;;  %v6584_v63 = vadd.f32 %v6349_v28, %v6164_v31  ;;  %vm5369_vm3 = vmor %vm5367_vm1, %vm5368_vm15 }
 0x7b0   : > { %v5363_v42 = vmul.f32 %v8138_v24, %v5362_v49  ;;  %v4830_v49 = vmax.f32 %v4770_v1, 0.0 }
 0x7b1   : > { %6703 = vst [vmem:[%s10867_s29 + $0x150] sm:$0xff] %v6583_v43  ;;  %v8140_v19 = vpop.eup %8139  ;;  %v3923_v43 = vpop.f32.mrf.mxu3 }
 0x7b2   : > { %v5364_v35 = vmul.f32 0.5, %v5363_v42  ;;  %6704 = vst.msk [vmem:[%s10867_s29 + $0x158] sm:$0xff] %vm1976_vm0, %v6584_v63  ;;  %v5372_v37 = vmul.f32 %v8140_v19, %v11795_v16  ;;  %v4899_v42 = vld [vmem:[%s10661_s20 + $0x130] sm:$0xff]  ;;  %v11842_v18 = vadd.f32 %v3923_v43, %v3764_v39  ;;  %vm5378_vm4 = vweird.f32 %v8140_v19  ;;  %v13048_v39 = vld [vmem:[#allocation31_spill] sm:$0xff] }
 0x7b3   : > { %vm5379_vm6 = vmor %vm5377_vm5, %vm5378_vm4  ;;  %v11863_v16 = vadd.f32 0.001, %v4828_v6 }
 0x7b4   : > { %v5365_v5 = vsub.f32 1.5, %v5364_v35  ;;  %v5373_v28 = vmul.f32 %v8140_v19, %v5372_v37  ;;  %13044 = vst [vmem:[#allocation4_spill] sm:$0xff] %v11842_v18  ;;  %v3605_v35 = vpop.f32.mrf.mxu1  ;;  %v11844_v37 = vadd.f32 0.001, %v4830_v49 }
 0x7b5   : > { %v5939_v22 = vpop.permute.xlu0 %5938  ;;  %v11852_v31 = vadd.f32 %v3605_v35, %v3446_v45  ;;  %v4352_v35 = vmul.f32 %v11842_v18, %v11842_v18  ;;  %vm5257_vm14 = vweird.f32 %v11863_v16 }
 0x7b6   : > { %v5366_v63 = vmul.f32 %v8138_v24, %v5365_v5  ;;  %v5374_v56 = vmul.f32 0.5, %v5373_v28  ;;  %v11849_v5 = vadd.f32 %v3921_v34, %v11797_v46  ;;  %v5606_v28 = vmul.f32 %v5240_v15, %v4886_v48 }
 0x7b7   : > { %13046 = vst [vmem:[#allocation6_spill] sm:$0xff] %v11852_v31  ;;  %v6168_v49 = vmul.f32 %v5939_v22, %v13048_v39  ;;  %v4141_v46 = vsel %vm1976_vm0, %v11842_v18, 0.0  ;;  %8141 = vrsqrt.f32 %v11844_v37  ;;  %v4561_v39 = vsel %vm1976_vm0, %v4352_v35, 0.0  ;;  %v7718_v18 = vld [vmem:[%s10298_s17 + $0x1b8] sm:$0xf0] }
 0x7b8   : > { %v5370_v1 = vsel %vm5369_vm3, %v8138_v24, %v5366_v63  ;;  %v5375_v51 = vsub.f32 1.5, %v5374_v56  ;;  %13045 = vst [vmem:[#allocation12_spill] sm:$0xff] %v11849_v5  ;;  %v6167_v56 = vmul.f32 %v5939_v22, %v13047_v29  ;;  %v4137_v22 = vsel %vm1976_vm0, %v11849_v5, 0.0 }
 0x7b9   : > { %v11846_v8 = vmul.f32 %v5370_v1, %v4899_v42  ;;  %v4142_v15 = vadd.f32 %v4141_v46, %v11852_v31  ;;  %v5726_v6 = vmul.f32 %v5606_v28, %v11731_v30  ;;  %8143 = vrsqrt.f32 %v11863_v16 }
 0x7ba   : > { %v5376_v24 = vmul.f32 %v8140_v19, %v5375_v51  ;;  %vm5277_vm8 = vweird.f32 %v11844_v37 }
 0x7bb   : > { %v11856_v10 = vmul.f32 %v11846_v8, %v11776_v62  ;;  %v11867_v62 = vadd.f32 %v3603_v7, %v11812_v59  ;;  %v5666_v59 = vld [vmem:[%s10671_s23 + $0xc8] sm:$0xff] }
 0x7bc   : > { %v4124_v48 = vpop.xlane.xlu1 %4123  ;;  %v5380_v34 = vsel %vm5379_vm6, %v8140_v19, %v5376_v24  ;;  %v5786_v30 = vsub.f32 %v5666_v59, %v5726_v6  ;;  %v4351_v24 = vmul.f32 %v11852_v31, %v11852_v31 }
 0x7bd   : > { %13049 = vst [vmem:[#allocation5_spill] sm:$0xff] %v11867_v62  ;;  %v6359_v51 = vpop.permute.xlu0 %6358  ;;  %5948 = vperm.xlu1 %8028, %v5606_v28   ;;  %v11871_v63 = vmul.f32 %v5380_v34, %v4900_v33  ;;  %v11876_v45 = vmul.f32 %v4124_v48, %v12945_v41  ;;  %v4138_v19 = vadd.f32 %v4137_v22, %v11867_v62  ;;  %v8142_v1 = vpop.eup %8141 }
 0x7be   : > { %v6587_v43 = vadd.f32 %v6359_v51, %v6167_v56  ;;  %v6588_v42 = vadd.f32 %v6359_v51, %v6168_v49  ;;  %v4350_v33 = vmul.f32 %v11849_v5, %v11849_v5  ;;  %v5272_v56 = vmul.f32 %v8142_v1, %v11844_v37  ;;  %v4901_v37 = vld [vmem:[%s10661_s20 + $0x140] sm:$0xff] }
 0x7bf   : > { %v11882_v7 = vmul.f32 %v11871_v63, %v11787_v58  ;;  %v4721_v28 = vmul.f32 %v11876_v45, %v11876_v45  ;;  %v4349_v49 = vmul.f32 %v11867_v62, %v11867_v62  ;;  %v8144_v48 = vpop.eup %8143  ;;  %v4562_v34 = vadd.f32 %v4561_v39, %v4351_v24 }
 0x7c0   : > { %6707 = vst [vmem:[%s10867_s29 + $0x170] sm:$0xff] %v6587_v43  ;;  %v4557_v51 = vsel %vm1976_vm0, %v4350_v33, 0.0  ;;  %v5252_v22 = vmul.f32 %v8144_v48, %v11863_v16  ;;  %vm5278_vm7 = vweird.f32 %v8142_v1  ;;  %vm5258_vm13 = vweird.f32 %v8144_v48 }
 0x7c1   : > { %6708 = vst.msk [vmem:[%s10867_s29 + $0x178] sm:$0xff] %vm1976_vm0, %v6588_v42  ;;  %v5273_v42 = vmul.f32 %v8142_v1, %v5272_v56  ;;  %v11905_v56 = vmul.f32 %v11239_v4, %v12945_v41  ;;  %vm5279_vm11 = vmor %vm5277_vm8, %vm5278_vm7 }
 0x7c2   : > { %vm5259_vm15 = vmor %vm5257_vm14, %vm5258_vm13 }
 0x7c3   : > { %4143 = vadd.xlane.f32.xlu0 %v4142_v15  ;;  %v4558_v15 = vadd.f32 %v4557_v51, %v4349_v49  ;;  %v5274_v59 = vmul.f32 0.5, %v5273_v42 }
 0x7c4   : > { %v4544_v58 = vpop.xlane.xlu1 %4543 }
 0x7c5   : > { %6368 = vperm.xlu1 %8028, %v5786_v30   ;;  %4139 = vadd.xlane.f32.xlu2 %v4138_v19  ;;  %v4661_v29 = vmul.f32 %v4544_v58, %v12945_v41  ;;  %v5253_v19 = vmul.f32 %v8144_v48, %v5252_v22  ;;  %v5275_v35 = vsub.f32 1.5, %v5274_v59 }
 0x7c7   : > { %v4781_v46 = vsub.f32 %v4661_v29, %v4721_v28  ;;  %v5254_v58 = vmul.f32 0.5, %v5253_v19  ;;  %v5276_v33 = vmul.f32 %v8142_v1, %v5275_v35  ;;  %v4888_v19 = vld [vmem:[%s10661_s20 + $0xd8] sm:$0xff] }
 0x7c9   : > { %v4841_v43 = vmax.f32 %v4781_v46, 0.0  ;;  %v5255_v24 = vsub.f32 1.5, %v5254_v58  ;;  %v4890_v46 = vld [vmem:[%s10661_s20 + $0xe8] sm:$0xff]  ;;  %v5280_v51 = vsel %vm5279_vm11, %v8142_v1, %v5276_v33 }
 0x7ca   : > { %v5670_v33 = vld [vmem:[%s10671_s23 + $0xe8] sm:$0xff] }
 0x7cb   : > { %4563 = vadd.xlane.f32.xlu0 %v4562_v34  ;;  %v4961_v6 = vadd.f32 0.001, %v4841_v43  ;;  %v4709_v34 = vmul.f32 %v11905_v56, %v11905_v56  ;;  %v4649_v43 = vmul.f32 %v11262_v60, %v12945_v41  ;;  %v5256_v42 = vmul.f32 %v8144_v48, %v5255_v24  ;;  %v3926_v60 = vpop.f32.mrf.mxu3  ;;  %v13050_v24 = vld [vmem:[#allocation25_spill] sm:$0xff] }
 0x7cd   : > { %4559 = vadd.xlane.f32.xlu2 %v4558_v15  ;;  %8145 = vrsqrt.f32 %v4961_v6  ;;  %vm5387_vm9 = vweird.f32 %v4961_v6  ;;  %v5610_v15 = vmul.f32 %v5280_v51, %v4890_v46  ;;  %v4769_v59 = vsub.f32 %v4649_v43, %v4709_v34  ;;  %v3449_v46 = vpop.f32.mrf.mxu0 }
 0x7ce   : > { %v5260_v35 = vsel %vm5259_vm15, %v8144_v48, %v5256_v42 }
 0x7cf   : > { %v5730_v58 = vmul.f32 %v5610_v15, %v11801_v32  ;;  %v4829_v51 = vmax.f32 %v4769_v59, 0.0  ;;  %v3608_v32 = vpop.f32.mrf.mxu1 }
 0x7d3   : > { %v8146_v30 = vpop.eup %8145 }
 0x7d4   : > { %v5382_v28 = vmul.f32 %v8146_v30, %v4961_v6  ;;  %vm5388_vm10 = vweird.f32 %v8146_v30 }
 0x7d5   : > { %vm5389_vm12 = vmor %vm5387_vm9, %vm5388_vm10 }
 0x7d6   : > { %v5383_v29 = vmul.f32 %v8146_v30, %v5382_v28  ;;  %v3767_v28 = vpop.f32.mrf.mxu2 }
 0x7d7   : > { %v11926_v34 = vadd.f32 %v3926_v60, %v3767_v28 }
 0x7d8   : > { %v5384_v39 = vmul.f32 0.5, %v5383_v29 }
 0x7d9   : > { %13052 = vst [vmem:[#allocation15_spill] sm:$0xff] %v11926_v34  ;;  %v4145_v59 = vsel %vm1976_vm0, %v11926_v34, 0.0  ;;  %v4354_v60 = vmul.f32 %v11926_v34, %v11926_v34 }
 0x7da   : > { %v5385_v49 = vsub.f32 1.5, %v5384_v39 }
 0x7dc   : > { %v5934_v4 = vpop.permute.xlu1 %5933  ;;  %v5386_v22 = vmul.f32 %v8146_v30, %v5385_v49  ;;  %v5608_v49 = vmul.f32 %v5260_v35, %v4888_v19 }
 0x7dd   : > { %v6165_v16 = vmul.f32 %v5934_v4, %v13050_v24  ;;  %v8011_v24 = vld [vmem:[%s10298_s17 + $0x1a4] sm:$0xf0] }
 0x7de   : > { %v5390_v6 = vsel %vm5389_vm12, %v8146_v30, %v5386_v22  ;;  %v13051_v30 = vld [vmem:[#allocation24_spill] sm:$0xff]  ;;  %v11929_v22 = vadd.f32 %v3608_v32, %v3449_v46 }
 0x7df   : > { %5968 = vperm.xlu0 %8030, %v5610_v15   ;;  %v11915_v1 = vmul.f32 %v5390_v6, %v4901_v37  ;;  %v6166_v39 = vmul.f32 %v5934_v4, %v13051_v30  ;;  %v5790_v37 = vsub.f32 %v5670_v33, %v5730_v58  ;;  %v5728_v4 = vmul.f32 %v5608_v49, %v11816_v61  ;;  %v5668_v6 = vld [vmem:[%s10671_s23 + $0xd8] sm:$0xff]  ;;  %v7708_v33 = vld [vmem:[%s10298_s17 + $0x1a0] sm:$0xf] }
 0x7e0   : > { %13053 = vst [vmem:[#allocation11_spill] sm:$0xff] %v11929_v22  ;;  %v11932_v15 = vadd.f32 0.001, %v4829_v51  ;;  %v4146_v58 = vadd.f32 %v4145_v59, %v11929_v22  ;;  %v4353_v30 = vmul.f32 %v11929_v22, %v11929_v22  ;;  %v7709_v46 = vor.u32 %v8011_v24, %v7708_v33  ;;  %v7710_v51 = vld [vmem:[%s10298_s17 + $0x1a8] sm:$0xf0] }
 0x7e1   : > { %v11921_v29 = vmul.f32 %v11915_v1, %v11876_v45  ;;  %v5788_v35 = vsub.f32 %v5668_v6, %v5728_v4 }
 0x7e2   : > { %8147 = vrsqrt.f32 %v11932_v15  ;;  %3781 = vmatmul.bf16.gmra.mxu2 %v7709_v46  ;;  %3463 = vmatmul.bf16.gmra.mxu0 %v7709_v46  ;;  %v11981_v46 = vpop.f32.mrf.mxu3  ;;  %vm5267_vm1 = vweird.f32 %v11932_v15 }
 0x7e4   : > { %v6354_v48 = vpop.permute.xlu1 %6353 }
 0x7e5   : > { %v6585_v43 = vadd.f32 %v6354_v48, %v6165_v16  ;;  %v6586_v42 = vadd.f32 %v6354_v48, %v6166_v39  ;;  %5958 = vperm.xlu2 %8029, %v5608_v49   ;;  %v8010_v16 = vld [vmem:[%s10298_s17 + $0x1a4] sm:$0xf] }
 0x7e7   : > { %6705 = vst [vmem:[%s10867_s29 + $0x160] sm:$0xff] %v6585_v43  ;;  %6388 = vperm.xlu0 %8030, %v5790_v37   ;;  %v4128_v45 = vpop.xlane.xlu2 %4127  ;;  %v4565_v43 = vsel %vm1976_vm0, %v4354_v60, 0.0  ;;  %v7713_v37 = vor.u32 %v8010_v16, %v7710_v51  ;;  %v4653_v51 = vmul.f32 %v11438_v50, %v12945_v41  ;;  %v12000_v50 = vmul.f32 %v11327_v2, %v12945_v41 }
 0x7e8   : > { %6706 = vst.msk [vmem:[%s10867_s29 + $0x168] sm:$0xff] %vm1976_vm0, %v6586_v42  ;;  %v4132_v19 = vpop.xlane.xlu0 %4131  ;;  %v11945_v61 = vmul.f32 %v4128_v45, %v12945_v41  ;;  %v11962_v4 = vpop.eup %8147  ;;  %v4566_v59 = vadd.f32 %v4565_v43, %v4353_v30 }
 0x7e9   : > { %v11941_v28 = vmul.f32 %v4132_v19, %v12945_v41  ;;  %7794 = vmatmul.msk.bf16.gmra.mxu3 %vm3234_vm2, %v7713_v37  ;;  %7764 = vmatmul.msk.bf16.gmra.mxu1 %vm3234_vm2, %v7713_v37  ;;  %vm5268_vm3 = vweird.f32 %v11962_v4 }
 0x7ea   : > { %v4722_v48 = vmul.f32 %v11945_v61, %v11945_v61  ;;  %vm12024_vm7 = vmor %vm5267_vm1, %vm5268_vm3 }
 0x7eb   : > { %v4723_v49 = vmul.f32 %v11941_v28, %v11941_v28 }
 0x7ed   : > { %6378 = vperm.xlu2 %8029, %v5788_v35  }
 0x7ef   : > { %4147 = vadd.xlane.f32.xlu1 %v4146_v58  ;;  %v4548_v39 = vpop.xlane.xlu2 %4547  ;;  %v5262_v58 = vmul.f32 %v11962_v4, %v11932_v15  ;;  %v4902_v15 = vld [vmem:[%s10661_s20 + $0x148] sm:$0xff] }
 0x7f0   : > { %v4662_v32 = vmul.f32 %v4548_v39, %v12945_v41  ;;  %v4552_v42 = vpop.xlane.xlu0 %4551  ;;  %v11973_v39 = vpop.f32.mrf.mxu2 }
 0x7f1   : > { %v4663_v45 = vmul.f32 %v4552_v42, %v12945_v41  ;;  %v5263_v30 = vmul.f32 %v11962_v4, %v5262_v58 }
 0x7f2   : > { %v4782_v6 = vsub.f32 %v4662_v32, %v4722_v48  ;;  %v11985_v48 = vpop.f32.mrf.mxu0  ;;  %v11987_v32 = vpop.f32.mrf.mxu1 }
 0x7f3   : > { %v4783_v19 = vsub.f32 %v4663_v45, %v4723_v49  ;;  %v11978_v49 = vmul.f32 %v11429_v57, %v12945_v41  ;;  %v5264_v43 = vmul.f32 0.5, %v5263_v30  ;;  %v13054_v45 = vld [vmem:[#allocation34_spill] sm:$0xff] }
 0x7f4   : > { %v4842_v35 = vmax.f32 %v4782_v6, 0.0 }
 0x7f5   : > { %v4843_v60 = vmax.f32 %v4783_v19, 0.0  ;;  %v4713_v42 = vmul.f32 %v11978_v49, %v11978_v49  ;;  %v8013_v19 = vld [vmem:[%s10298_s17 + $0x1b4] sm:$0xf0]  ;;  %v5265_v62 = vsub.f32 1.5, %v5264_v43 }
 0x7f6   : > { %v11968_v33 = vadd.f32 0.001, %v4842_v35  ;;  %v8012_v35 = vld [vmem:[%s10298_s17 + $0x1b4] sm:$0xf] }
 0x7f7   : > { %4567 = vadd.xlane.f32.xlu1 %v4566_v59  ;;  %v5944_v24 = vpop.permute.xlu2 %5943  ;;  %v11970_v16 = vadd.f32 0.001, %v4843_v60  ;;  %v7716_v59 = vld [vmem:[%s10298_s17 + $0x1b0] sm:$0xf]  ;;  %v4773_v60 = vsub.f32 %v4653_v51, %v4713_v42  ;;  %v7721_v5 = vor.u32 %v8012_v35, %v7718_v18  ;;  %v4711_v42 = vmul.f32 %v12000_v50, %v12000_v50 }
 0x7f8   : > { %8149 = vrsqrt.f32 %v11968_v33  ;;  %v6169_v57 = vmul.f32 %v5944_v24, %v10897_v12  ;;  %v6170_v6 = vmul.f32 %v5944_v24, %v13054_v45  ;;  %v7717_v22 = vor.u32 %v8013_v19, %v7716_v59  ;;  %v3772_v51 = vpop.f32.mrf.mxu2 }
 0x7f9   : > { %8151 = vrsqrt.f32 %v11970_v16  ;;  %7795 = vmatmul.msk.bf16.gmra.mxu3 %vm3234_vm2, %v7721_v5  ;;  %7765 = vmatmul.msk.bf16.gmra.mxu1 %vm3234_vm2, %v7721_v5  ;;  %vm5407_vm5 = vweird.f32 %v11970_v16  ;;  %vm5397_vm8 = vweird.f32 %v11968_v33 }
 0x7fa   : > { %3786 = vmatmul.bf16.gmra.mxu2 %v7717_v22  ;;  %3468 = vmatmul.bf16.gmra.mxu0 %v7717_v22  ;;  %v3931_v22 = vpop.f32.mrf.mxu3  ;;  %v3454_v19 = vpop.f32.mrf.mxu0 }
 0x7fb   : > { %v12029_v5 = vadd.f32 %v3931_v22, %v3772_v51  ;;  %v3613_v35 = vpop.f32.mrf.mxu1  ;;  %v4889_v22 = vld [vmem:[%s10661_s20 + $0xe0] sm:$0xff] }
 0x7fd   : > { %13057 = vst [vmem:[#allocation17_spill] sm:$0xff] %v12029_v5 }
 0x7fe   : > { %v8150_v37 = vpop.eup %8149 }
 0x7ff   : > { %v11996_v58 = vpop.eup %8151  ;;  %v5392_v30 = vmul.f32 %v8150_v37, %v11968_v33  ;;  %v6364_v34 = vpop.permute.xlu2 %6363  ;;  %vm5398_vm4 = vweird.f32 %v8150_v37  ;;  %v12039_v33 = vadd.f32 %v3613_v35, %v3454_v19  ;;  %v12065_v19 = vadd.f32 %v11981_v46, %v11973_v39 }
 0x800   : > { %v5402_v12 = vmul.f32 %v11996_v58, %v11970_v16  ;;  %v6589_v24 = vadd.f32 %v6364_v34, %v6169_v57  ;;  %v6590_v45 = vadd.f32 %v6364_v34, %v6170_v6  ;;  %v4651_v57 = vmul.f32 %v11349_v52, %v12945_v41  ;;  %vm5399_vm9 = vmor %vm5397_vm8, %vm5398_vm4 }
 0x801   : > { %v5393_v31 = vmul.f32 %v8150_v37, %v5392_v30  ;;  %v4833_v34 = vmax.f32 %v4773_v60, 0.0  ;;  %vm5408_vm6 = vweird.f32 %v11996_v58  ;;  %v5266_v16 = vmul.f32 %v11962_v4, %v5265_v62  ;;  %13060 = vst [vmem:[#allocation32_spill] sm:$0xff] %v12039_v33 }
 0x802   : > { %v5403_v2 = vmul.f32 %v11996_v58, %v5402_v12  ;;  %6709 = vst [vmem:[%s10867_s29 + $0x180] sm:$0xff] %v6589_v24  ;;  %v4771_v60 = vsub.f32 %v4651_v57, %v4711_v42  ;;  %vm12035_vm10 = vmor %vm5407_vm5, %vm5408_vm6  ;;  %v4153_v57 = vsel %vm1976_vm0, %v12029_v5, 0.0  ;;  %v12079_v39 = vadd.f32 %v11987_v32, %v11985_v48 }
 0x803   : > { %v5394_v6 = vmul.f32 0.5, %v5393_v31  ;;  %6710 = vst.msk [vmem:[%s10867_s29 + $0x188] sm:$0xff] %vm1976_vm0, %v6590_v45  ;;  %v5954_v18 = vpop.permute.xlu0 %5953  ;;  %v12031_v30 = vadd.f32 0.001, %v4833_v34  ;;  %v4154_v52 = vadd.f32 %v4153_v57, %v12039_v33 }
 0x804   : > { %v5404_v43 = vmul.f32 0.5, %v5403_v2  ;;  %v6173_v51 = vmul.f32 %v5954_v18, %v10979_v20  ;;  %v6174_v42 = vmul.f32 %v5954_v18, %v10971_v14  ;;  %v4831_v34 = vmax.f32 %v4771_v60, 0.0 }
 0x805   : > { %v5395_v59 = vsub.f32 1.5, %v5394_v6  ;;  %8153 = vrsqrt.f32 %v12031_v30  ;;  %vm5307_vm12 = vweird.f32 %v12031_v30 }
 0x806   : > { %v5405_v31 = vsub.f32 1.5, %v5404_v43  ;;  %v4903_v43 = vld [vmem:[%s10661_s20 + $0x150] sm:$0xff]  ;;  %v4951_v60 = vadd.f32 0.001, %v4831_v34 }
 0x807   : > { %v5396_v12 = vmul.f32 %v8150_v37, %v5395_v59 }
 0x808   : > { %v5406_v2 = vmul.f32 %v11996_v58, %v5405_v31  ;;  %8155 = vrsqrt.f32 %v4951_v60  ;;  %vm5287_vm14 = vweird.f32 %v4951_v60 }
 0x809   : > { %v5400_v45 = vsel %vm5399_vm9, %v8150_v37, %v5396_v12  ;;  %v5270_v37 = vsel %vm12024_vm7, %v11962_v4, %v5266_v16  ;;  %v4358_v4 = vmul.f32 %v12029_v5, %v12029_v5  ;;  %v4357_v16 = vmul.f32 %v12039_v33, %v12039_v33  ;;  %v13086_v5 = vld [vmem:[#allocation10_spill] sm:$0xff] }
 0x80a   : > { %v12046_v62 = vmul.f32 %v5400_v45, %v4902_v15  ;;  %v5410_v14 = vsel %vm12035_vm10, %v11996_v58, %v5406_v2  ;;  %v5609_v58 = vmul.f32 %v5270_v37, %v4889_v22  ;;  %v4149_v15 = vsel %vm1976_vm0, %v12065_v19, 0.0  ;;  %v5669_v45 = vld [vmem:[%s10671_s23 + $0xe0] sm:$0xff] }
 0x80b   : > { %v6374_v6 = vpop.permute.xlu0 %6373  ;;  %v12061_v31 = vmul.f32 %v5410_v14, %v4903_v43  ;;  %v8154_v46 = vpop.eup %8153  ;;  %v4573_v12 = vsel %vm1976_vm0, %v4358_v4, 0.0  ;;  %v4150_v32 = vadd.f32 %v4149_v15, %v12079_v39  ;;  %v4356_v2 = vmul.f32 %v12065_v19, %v12065_v19  ;;  %v13087_v33 = vld [vmem:[#allocation22_spill] sm:$0xff] }
 0x80c   : > { %v6593_v20 = vadd.f32 %v6374_v6, %v6173_v51  ;;  %v6594_v18 = vadd.f32 %v6374_v6, %v6174_v42  ;;  %v12059_v59 = vmul.f32 %v12046_v62, %v11945_v61  ;;  %v5302_v48 = vmul.f32 %v8154_v46, %v12031_v30 }
 0x80d   : > { %v12073_v35 = vmul.f32 %v12061_v31, %v11941_v28  ;;  %v5729_v28 = vmul.f32 %v5609_v58, %v11905_v56  ;;  %v4574_v51 = vadd.f32 %v4573_v12, %v4357_v16  ;;  %v4355_v6 = vmul.f32 %v12079_v39, %v12079_v39 }
 0x80e   : > { %6713 = vst [vmem:[%s10867_s29 + $0x1a0] sm:$0xff] %v6593_v20  ;;  %v5303_v34 = vmul.f32 %v8154_v46, %v5302_v48  ;;  %v4569_v37 = vsel %vm1976_vm0, %v4356_v2, 0.0  ;;  %v8156_v43 = vpop.eup %8155  ;;  %vm5308_vm11 = vweird.f32 %v8154_v46  ;;  %v4893_v48 = vld [vmem:[%s10661_s20 + $0x100] sm:$0xff] }
 0x80f   : > { %6714 = vst.msk [vmem:[%s10867_s29 + $0x1a8] sm:$0xff] %vm1976_vm0, %v6594_v18  ;;  %v4136_v61 = vpop.xlane.xlu1 %4135  ;;  %v5789_v42 = vsub.f32 %v5669_v45, %v5729_v28  ;;  %v4570_v18 = vadd.f32 %v4569_v37, %v4355_v6  ;;  %v5282_v4 = vmul.f32 %v8156_v43, %v4951_v60  ;;  %vm5309_vm13 = vmor %vm5307_vm12, %vm5308_vm11  ;;  %vm5288_vm15 = vweird.f32 %v8156_v43 }
 0x810   : > { %5963 = vperm.xlu1 %8028, %v5609_v58   ;;  %v12088_v24 = vmul.f32 %v4136_v61, %v12945_v41  ;;  %v5304_v20 = vmul.f32 0.5, %v5303_v34  ;;  %vm12107_vm4 = vmor %vm5287_vm14, %vm5288_vm15 }
 0x811   : > { %4155 = vadd.xlane.f32.xlu0 %v4154_v52  ;;  %v5283_v16 = vmul.f32 %v8156_v43, %v5282_v4 }
 0x812   : > { %v4724_v56 = vmul.f32 %v12088_v24, %v12088_v24  ;;  %v5305_v61 = vsub.f32 1.5, %v5304_v20  ;;  %v5673_v20 = vld [vmem:[%s10671_s23 + $0x100] sm:$0xff] }
 0x813   : > { %v5284_v28 = vmul.f32 0.5, %v5283_v16 }
 0x814   : > { %v5306_v15 = vmul.f32 %v8154_v46, %v5305_v61 }
 0x815   : > { %v5285_v2 = vsub.f32 1.5, %v5284_v28  ;;  %v3933_v28 = vpop.f32.mrf.mxu3 }
 0x816   : > { %4151 = vadd.xlane.f32.xlu2 %v4150_v32  ;;  %v5310_v32 = vsel %vm5309_vm13, %v8154_v46, %v5306_v15 }
 0x817   : > { %v4556_v57 = vpop.xlane.xlu1 %4555  ;;  %v5286_v34 = vmul.f32 %v8156_v43, %v5285_v2 }
 0x818   : > { %6383 = vperm.xlu1 %8028, %v5789_v42   ;;  %v4664_v22 = vmul.f32 %v4556_v57, %v12945_v41  ;;  %v12105_v57 = vmul.f32 %v11376_v36, %v12945_v41  ;;  %v4652_v36 = vmul.f32 %v11395_v40, %v12945_v41 }
 0x819   : > { %4575 = vadd.xlane.f32.xlu0 %v4574_v51 }
 0x81a   : > { %v4784_v14 = vsub.f32 %v4664_v22, %v4724_v56  ;;  %v5613_v56 = vmul.f32 %v5310_v32, %v4893_v48  ;;  %v4904_v22 = vld [vmem:[%s10661_s20 + $0x158] sm:$0xff] }
 0x81c   : > { %v4844_v52 = vmax.f32 %v4784_v14, 0.0  ;;  %v5733_v6 = vmul.f32 %v5613_v56, %v11978_v49  ;;  %v4712_v14 = vmul.f32 %v12105_v57, %v12105_v57  ;;  %v3774_v49 = vpop.f32.mrf.mxu2 }
 0x81d   : > { %v12129_v2 = vadd.f32 %v3933_v28, %v3774_v49 }
 0x81e   : > { %4571 = vadd.xlane.f32.xlu2 %v4570_v18  ;;  %v4964_v58 = vadd.f32 0.001, %v4844_v52  ;;  %v4891_v18 = vld [vmem:[%s10661_s20 + $0xf0] sm:$0xff]  ;;  %v5290_v52 = vsel %vm12107_vm4, %v8156_v43, %v5286_v34  ;;  %v5793_v61 = vsub.f32 %v5673_v20, %v5733_v6  ;;  %v4772_v16 = vsub.f32 %v4652_v36, %v4712_v14 }
 0x81f   : > { %v5611_v15 = vmul.f32 %v5290_v52, %v4891_v18  ;;  %13063 = vst [vmem:[#allocation31_spill] sm:$0xff] %v12129_v2  ;;  %v5671_v34 = vld [vmem:[%s10671_s23 + $0xf0] sm:$0xff]  ;;  %v4360_v36 = vmul.f32 %v12129_v2, %v12129_v2 }
 0x820   : > { %8157 = vrsqrt.f32 %v4964_v58  ;;  %vm5417_vm1 = vweird.f32 %v4964_v58 }
 0x826   : > { %v8158_v12 = vpop.eup %8157 }
 0x827   : > { %v5412_v45 = vmul.f32 %v8158_v12, %v4964_v58  ;;  %vm5418_vm3 = vweird.f32 %v8158_v12 }
 0x828   : > { %vm5419_vm5 = vmor %vm5417_vm1, %vm5418_vm3 }
 0x829   : > { %v5413_v51 = vmul.f32 %v8158_v12, %v5412_v45 }
 0x82b   : > { %v5414_v42 = vmul.f32 0.5, %v5413_v51  ;;  %v3615_v51 = vpop.f32.mrf.mxu1 }
 0x82d   : > { %v5415_v46 = vsub.f32 1.5, %v5414_v42  ;;  %5983 = vperm.xlu0 %8030, %v5613_v56   ;;  %v4832_v42 = vmax.f32 %v4772_v16, 0.0 }
 0x82f   : > { %v5949_v60 = vpop.permute.xlu1 %5948  ;;  %v5416_v37 = vmul.f32 %v8158_v12, %v5415_v46 }
 0x830   : > { %v6171_v40 = vmul.f32 %v5949_v60, %v10919_v27  ;;  %v6172_v43 = vmul.f32 %v5949_v60, %v10913_v21  ;;  %v4157_v27 = vsel %vm1976_vm0, %v12129_v2, 0.0  ;;  %v12143_v60 = vadd.f32 0.001, %v4832_v42  ;;  %v12165_v42 = vpop.f32.mrf.mxu3 }
 0x831   : > { %v5420_v4 = vsel %vm5419_vm5, %v8158_v12, %v5416_v37  ;;  %v3456_v12 = vpop.f32.mrf.mxu0 }
 0x832   : > { %v12121_v58 = vmul.f32 %v5420_v4, %v4904_v22  ;;  %v12134_v6 = vadd.f32 %v3615_v51, %v3456_v12  ;;  %8159 = vrsqrt.f32 %v12143_v60  ;;  %vm5297_vm7 = vweird.f32 %v12143_v60 }
 0x834   : > { %v12125_v45 = vmul.f32 %v12121_v58, %v12088_v24  ;;  %v5731_v24 = vmul.f32 %v5611_v15, %v12000_v50  ;;  %13064 = vst [vmem:[#allocation25_spill] sm:$0xff] %v12134_v6  ;;  %v4158_v50 = vadd.f32 %v4157_v27, %v12134_v6  ;;  %v7726_v27 = vld [vmem:[%s10298_s17 + $0x1c8] sm:$0xf0] }
 0x835   : > { %6403 = vperm.xlu0 %8030, %v5793_v61  }
 0x836   : > { %5973 = vperm.xlu2 %8029, %v5611_v15   ;;  %v4144_v48 = vpop.xlane.xlu0 %4143  ;;  %v5791_v22 = vsub.f32 %v5671_v34, %v5731_v24  ;;  %v4359_v15 = vmul.f32 %v12134_v6, %v12134_v6  ;;  %v8015_v24 = vld [vmem:[%s10298_s17 + $0x1c4] sm:$0xf0]  ;;  %v8014_v34 = vld [vmem:[%s10298_s17 + $0x1c4] sm:$0xf] }
 0x837   : > { %v6369_v32 = vpop.permute.xlu1 %6368  ;;  %v12139_v21 = vmul.f32 %v4144_v48, %v12945_v41  ;;  %v12161_v48 = vpop.f32.mrf.mxu2 }
 0x838   : > { %v6591_v56 = vadd.f32 %v6369_v32, %v6171_v40  ;;  %v6592_v30 = vadd.f32 %v6369_v32, %v6172_v43  ;;  %v4140_v46 = vpop.xlane.xlu2 %4139  ;;  %v4577_v40 = vsel %vm1976_vm0, %v4360_v36, 0.0  ;;  %v12163_v32 = vpop.eup %8159 }
 0x839   : > { %v12146_v37 = vmul.f32 %v4140_v46, %v12945_v41  ;;  %v4726_v20 = vmul.f32 %v12139_v21, %v12139_v21  ;;  %v4578_v51 = vadd.f32 %v4577_v40, %v4359_v15  ;;  %vm5298_vm10 = vweird.f32 %v12163_v32 }
 0x83a   : > { %6711 = vst [vmem:[%s10867_s29 + $0x190] sm:$0xff] %v6591_v56  ;;  %vm12204_vm14 = vmor %vm5297_vm7, %vm5298_vm10 }
 0x83b   : > { %6712 = vst.msk [vmem:[%s10867_s29 + $0x198] sm:$0xff] %vm1976_vm0, %v6592_v30  ;;  %v4725_v4 = vmul.f32 %v12146_v37, %v12146_v37  ;;  %v7724_v30 = vld [vmem:[%s10298_s17 + $0x1c0] sm:$0xf] }
 0x83c   : > { %v7725_v36 = vor.u32 %v8015_v24, %v7724_v30 }
 0x83e   : > { %6393 = vperm.xlu2 %8029, %v5791_v22   ;;  %v4564_v14 = vpop.xlane.xlu0 %4563  ;;  %v5292_v22 = vmul.f32 %v12163_v32, %v12143_v60  ;;  %3791 = vmatmul.bf16.gmra.mxu2 %v7725_v36 }
 0x83f   : > { %v4666_v18 = vmul.f32 %v4564_v14, %v12945_v41  ;;  %v12175_v14 = vpop.f32.mrf.mxu1  ;;  %3473 = vmatmul.bf16.gmra.mxu0 %v7725_v36 }
 0x840   : > { %v4560_v52 = vpop.xlane.xlu2 %4559 }
 0x841   : > { %v4665_v61 = vmul.f32 %v4560_v52, %v12945_v41  ;;  %v4786_v16 = vsub.f32 %v4666_v18, %v4726_v20  ;;  %v7729_v20 = vor.u32 %v8014_v34, %v7726_v27  ;;  %v5293_v52 = vmul.f32 %v12163_v32, %v5292_v22 }
 0x842   : > { %4159 = vadd.xlane.f32.xlu1 %v4158_v50  ;;  %v12173_v50 = vpop.f32.mrf.mxu0 }
 0x843   : > { %v4785_v49 = vsub.f32 %v4665_v61, %v4725_v4  ;;  %v4846_v28 = vmax.f32 %v4786_v16, 0.0  ;;  %7796 = vmatmul.msk.bf16.gmra.mxu3 %vm3234_vm2, %v7729_v20  ;;  %7766 = vmatmul.msk.bf16.gmra.mxu1 %vm3234_vm2, %v7729_v20  ;;  %v5294_v30 = vmul.f32 0.5, %v5293_v52 }
 0x845   : > { %v4845_v43 = vmax.f32 %v4785_v49, 0.0  ;;  %v4966_v12 = vadd.f32 0.001, %v4846_v28  ;;  %v3779_v49 = vpop.f32.mrf.mxu2 }
 0x847   : > { %v4965_v56 = vadd.f32 0.001, %v4845_v43  ;;  %8161 = vrsqrt.f32 %v4966_v12  ;;  %vm5437_vm9 = vweird.f32 %v4966_v12 }
 0x848   : > { %v5959_v46 = vpop.permute.xlu2 %5958 }
 0x849   : > { %8163 = vrsqrt.f32 %v4965_v56  ;;  %v6175_v16 = vmul.f32 %v5959_v46, %v11016_v25  ;;  %v6176_v15 = vmul.f32 %v5959_v46, %v11009_v23  ;;  %v3620_v46 = vpop.f32.mrf.mxu1  ;;  %vm5427_vm11 = vweird.f32 %v4965_v56 }
 0x84a   : > { %4579 = vadd.xlane.f32.xlu1 %v4578_v51  ;;  %v3938_v51 = vpop.f32.mrf.mxu3  ;;  %v3461_v23 = vpop.f32.mrf.mxu0 }
 0x84b   : > { %v12183_v20 = vadd.f32 %v3938_v51, %v3779_v49  ;;  %v12190_v49 = vadd.f32 %v3620_v46, %v3461_v23  ;;  %v4905_v51 = vld [vmem:[%s10661_s20 + $0x160] sm:$0xff]  ;;  %v4892_v23 = vld [vmem:[%s10661_s20 + $0xf8] sm:$0xff] }
 0x84d   : > { %v8162_v18 = vpop.eup %8161  ;;  %13065 = vst [vmem:[#allocation24_spill] sm:$0xff] %v12183_v20 }
 0x84e   : > { %v5432_v4 = vmul.f32 %v8162_v18, %v4966_v12  ;;  %vm5438_vm6 = vweird.f32 %v8162_v18  ;;  %13066 = vst [vmem:[#allocation34_spill] sm:$0xff] %v12190_v49 }
 0x84f   : > { %v8164_v61 = vpop.eup %8163  ;;  %vm5439_vm12 = vmor %vm5437_vm9, %vm5438_vm6 }
 0x850   : > { %v5422_v28 = vmul.f32 %v8164_v61, %v4965_v56  ;;  %v5433_v40 = vmul.f32 %v8162_v18, %v5432_v4  ;;  %v6379_v43 = vpop.permute.xlu2 %6378  ;;  %v5295_v4 = vsub.f32 1.5, %v5294_v30  ;;  %vm5428_vm8 = vweird.f32 %v8164_v61 }
 0x851   : > { %v5969_v24 = vpop.permute.xlu0 %5968  ;;  %v6595_v34 = vadd.f32 %v6379_v43, %v6175_v16  ;;  %v6596_v27 = vadd.f32 %v6379_v43, %v6176_v15  ;;  %v4906_v16 = vld [vmem:[%s10661_s20 + $0x168] sm:$0xff]  ;;  %vm5429_vm13 = vmor %vm5427_vm11, %vm5428_vm8 }
 0x852   : > { %v5423_v22 = vmul.f32 %v8164_v61, %v5422_v28  ;;  %v5434_v36 = vmul.f32 0.5, %v5433_v40  ;;  %v4165_v28 = vsel %vm1976_vm0, %v12183_v20, 0.0  ;;  %v6179_v40 = vmul.f32 %v5969_v24, %v11119_v26 }
 0x853   : > { %6715 = vst [vmem:[%s10867_s29 + $0x1b0] sm:$0xff] %v6595_v34  ;;  %v6180_v43 = vmul.f32 %v5969_v24, %v11110_v17  ;;  %v4166_v26 = vadd.f32 %v4165_v28, %v12190_v49  ;;  %v5672_v28 = vld [vmem:[%s10671_s23 + $0xf8] sm:$0xff] }
 0x854   : > { %v5424_v2 = vmul.f32 0.5, %v5423_v22  ;;  %v5435_v25 = vsub.f32 1.5, %v5434_v36  ;;  %6716 = vst.msk [vmem:[%s10867_s29 + $0x1b8] sm:$0xff] %vm1976_vm0, %v6596_v27  ;;  %v5296_v22 = vmul.f32 %v12163_v32, %v5295_v4 }
 0x856   : > { %v5425_v52 = vsub.f32 1.5, %v5424_v2  ;;  %v5436_v15 = vmul.f32 %v8162_v18, %v5435_v25  ;;  %v12217_v25 = vadd.f32 %v12165_v42, %v12161_v48  ;;  %v12234_v48 = vadd.f32 %v12175_v14, %v12173_v50 }
 0x857   : > { %v4363_v42 = vmul.f32 %v12190_v49, %v12190_v49 }
 0x858   : > { %v5426_v2 = vmul.f32 %v8164_v61, %v5425_v52  ;;  %v5440_v12 = vsel %vm5439_vm12, %v8162_v18, %v5436_v15  ;;  %v4362_v14 = vmul.f32 %v12217_v25, %v12217_v25 }
 0x859   : > { %v6389_v30 = vpop.permute.xlu0 %6388  ;;  %v12197_v34 = vmul.f32 %v5440_v12, %v4906_v16 }
 0x85a   : > { %v6599_v56 = vadd.f32 %v6389_v30, %v6179_v40  ;;  %v6600_v27 = vadd.f32 %v6389_v30, %v6180_v43  ;;  %v5430_v36 = vsel %vm5429_vm13, %v8164_v61, %v5426_v2  ;;  %v4364_v61 = vmul.f32 %v12183_v20, %v12183_v20 }
 0x85b   : > { %v12209_v18 = vmul.f32 %v5430_v36, %v4905_v51  ;;  %v12213_v24 = vmul.f32 %v12197_v34, %v12139_v21  ;;  %v5300_v21 = vsel %vm12204_vm14, %v12163_v32, %v5296_v22  ;;  %v4361_v40 = vmul.f32 %v12234_v48, %v12234_v48 }
 0x85c   : > { %6719 = vst [vmem:[%s10867_s29 + $0x1d0] sm:$0xff] %v6599_v56  ;;  %v4585_v46 = vsel %vm1976_vm0, %v4364_v61, 0.0  ;;  %v5612_v4 = vmul.f32 %v5300_v21, %v4892_v23  ;;  %v4581_v2 = vsel %vm1976_vm0, %v4362_v14, 0.0  ;;  %v5676_v23 = vld [vmem:[%s10671_s23 + $0x118] sm:$0xff] }
 0x85d   : > { %6720 = vst.msk [vmem:[%s10867_s29 + $0x1d8] sm:$0xff] %vm1976_vm0, %v6600_v27  ;;  %v12226_v60 = vmul.f32 %v12209_v18, %v12146_v37  ;;  %v4161_v37 = vsel %vm1976_vm0, %v12217_v25, 0.0  ;;  %v4586_v16 = vadd.f32 %v4585_v46, %v4363_v42  ;;  %v4582_v30 = vadd.f32 %v4581_v2, %v4361_v40 }
 0x85e   : > { %v4162_v15 = vadd.f32 %v4161_v37, %v12234_v48  ;;  %v5732_v32 = vmul.f32 %v5612_v4, %v12105_v57  ;;  %v5796_v42 = vsub.f32 %v5676_v23, %v11678_v13  ;;  %v4907_v37 = vld [vmem:[%s10661_s20 + $0x170] sm:$0xff] }
 0x85f   : > { %4167 = vadd.xlane.f32.xlu0 %v4166_v26 }
 0x860   : > { %v5792_v43 = vsub.f32 %v5672_v28, %v5732_v32 }
 0x862   : > { %v4148_v52 = vpop.xlane.xlu1 %4147 }
 0x863   : > { %5978 = vperm.xlu1 %8028, %v5612_v4   ;;  %v4247_v50 = vmul.f32 %v4148_v52, %v12945_v41 }
 0x865   : > { %v4727_v51 = vmul.f32 %v4247_v50, %v4247_v50  ;;  %v3782_v32 = vpop.f32.mrf.mxu2 }
 0x867   : > { %4587 = vadd.xlane.f32.xlu0 %v4586_v16  ;;  %4163 = vadd.xlane.f32.xlu2 %v4162_v15 }
 0x86a   : > { %v4568_v12 = vpop.xlane.xlu1 %4567 }
 0x86b   : > { %6398 = vperm.xlu1 %8028, %v5792_v43   ;;  %v4667_v57 = vmul.f32 %v4568_v12, %v12945_v41  ;;  %v5674_v12 = vld [vmem:[%s10671_s23 + $0x108] sm:$0xff] }
 0x86c   : > { %v3941_v14 = vpop.f32.mrf.mxu3 }
 0x86d   : > { %v4787_v56 = vsub.f32 %v4667_v57, %v4727_v51  ;;  %v3464_v51 = vpop.f32.mrf.mxu0  ;;  %v3623_v57 = vpop.f32.mrf.mxu1 }
 0x86f   : > { %4583 = vadd.xlane.f32.xlu2 %v4582_v30  ;;  %v4847_v27 = vmax.f32 %v4787_v56, 0.0 }
 0x871   : > { %v4967_v22 = vadd.f32 0.001, %v4847_v27  ;;  %v13070_v27 = vld [vmem:[#allocation9_spill] sm:$0xff] }
 0x873   : > { %8165 = vrsqrt.f32 %v4967_v22  ;;  %vm5447_vm15 = vweird.f32 %v4967_v22 }
 0x879   : > { %v8166_v36 = vpop.eup %8165 }
 0x87a   : > { %v5442_v17 = vmul.f32 %v8166_v36, %v4967_v22  ;;  %vm5448_vm1 = vweird.f32 %v8166_v36  ;;  %v12273_v22 = vadd.f32 %v3623_v57, %v3464_v51 }
 0x87b   : > { %5998 = vperm.xlu0 %8030, %v11661_v44   ;;  %vm5449_vm3 = vmor %vm5447_vm15, %vm5448_vm1 }
 0x87c   : > { %v5443_v26 = vmul.f32 %v8166_v36, %v5442_v17  ;;  %13071 = vst [vmem:[#allocation9_spill] sm:$0xff] %v12273_v22  ;;  %v7732_v17 = vld [vmem:[%s10298_s17 + $0x1d0] sm:$0xf]  ;;  %v4365_v57 = vmul.f32 %v12273_v22, %v12273_v22 }
 0x87e   : > { %v5444_v61 = vmul.f32 0.5, %v5443_v26  ;;  %v8017_v26 = vld [vmem:[%s10298_s17 + $0x1d4] sm:$0xf0] }
 0x880   : > { %v5445_v21 = vsub.f32 1.5, %v5444_v61 }
 0x882   : > { %v5964_v46 = vpop.permute.xlu1 %5963  ;;  %v5446_v4 = vmul.f32 %v8166_v36, %v5445_v21  ;;  %v7733_v21 = vor.u32 %v8017_v26, %v7732_v17 }
 0x883   : > { %6418 = vperm.xlu0 %8030, %v5796_v42   ;;  %v6177_v13 = vmul.f32 %v5964_v46, %v11048_v38  ;;  %v6178_v40 = vmul.f32 %v5964_v46, %v11044_v54  ;;  %v5794_v54 = vsub.f32 %v5674_v12, %v13070_v27  ;;  %v8016_v42 = vld [vmem:[%s10298_s17 + $0x1d4] sm:$0xf]  ;;  %v7734_v46 = vld [vmem:[%s10298_s17 + $0x1d8] sm:$0xf0]  ;;  %v3943_v12 = vpop.f32.mrf.mxu3 }
 0x884   : > { %v4156_v52 = vpop.xlane.xlu0 %4155  ;;  %v5450_v16 = vsel %vm5449_vm3, %v8166_v36, %v5446_v4  ;;  %v7737_v4 = vor.u32 %v8016_v42, %v7734_v46  ;;  %3796 = vmatmul.bf16.gmra.mxu2 %v7733_v21  ;;  %3478 = vmatmul.bf16.gmra.mxu0 %v7733_v21 }
 0x885   : > { %v12255_v15 = vmul.f32 %v5450_v16, %v4907_v37  ;;  %v12259_v44 = vmul.f32 %v4156_v52, %v12945_v41 }
 0x886   : > { %7797 = vmatmul.msk.bf16.gmra.mxu3 %vm3234_vm2, %v7737_v4  ;;  %7767 = vmatmul.msk.bf16.gmra.mxu1 %vm3234_vm2, %v7737_v4 }
 0x887   : > { %5988 = vperm.xlu2 %8029, %v11508_v55   ;;  %v12262_v28 = vmul.f32 %v12255_v15, %v4247_v50  ;;  %v12266_v55 = vadd.f32 %v3941_v14, %v3782_v32  ;;  %v4729_v50 = vmul.f32 %v12259_v44, %v12259_v44 }
 0x889   : > { %v4152_v43 = vpop.xlane.xlu2 %4151  ;;  %13069 = vst [vmem:[#allocation43_spill] sm:$0xff] %v12266_v55  ;;  %v4169_v23 = vsel %vm1976_vm0, %v12266_v55, 0.0 }
 0x88a   : > { %v6384_v2 = vpop.permute.xlu1 %6383  ;;  %v12279_v61 = vmul.f32 %v4152_v43, %v12945_v41  ;;  %v4170_v16 = vadd.f32 %v4169_v23, %v12273_v22 }
 0x88b   : > { %v6597_v30 = vadd.f32 %v6384_v2, %v6177_v13  ;;  %v6598_v56 = vadd.f32 %v6384_v2, %v6178_v40  ;;  %v4366_v13 = vmul.f32 %v12266_v55, %v12266_v55  ;;  %v12295_v2 = vpop.f32.mrf.mxu2  ;;  %v3946_v21 = vpop.f32.mrf.mxu3 }
 0x88c   : > { %v4576_v38 = vpop.xlane.xlu0 %4575  ;;  %v4728_v14 = vmul.f32 %v12279_v61, %v12279_v61 }
 0x88d   : > { %6717 = vst [vmem:[%s10867_s29 + $0x1c0] sm:$0xff] %v6597_v30  ;;  %v4669_v36 = vmul.f32 %v4576_v38, %v12945_v41  ;;  %v3625_v38 = vpop.f32.mrf.mxu1 }
 0x88e   : > { %6718 = vst.msk [vmem:[%s10867_s29 + $0x1c8] sm:$0xff] %vm1976_vm0, %v6598_v56  ;;  %v4589_v56 = vsel %vm1976_vm0, %v4366_v13, 0.0 }
 0x88f   : > { %6408 = vperm.xlu2 %8029, %v5794_v54   ;;  %v4789_v37 = vsub.f32 %v4669_v36, %v4729_v50  ;;  %v3466_v50 = vpop.f32.mrf.mxu0  ;;  %v4590_v36 = vadd.f32 %v4589_v56, %v4365_v57 }
 0x891   : > { %v4572_v52 = vpop.xlane.xlu2 %4571  ;;  %v4849_v32 = vmax.f32 %v4789_v37, 0.0  ;;  %v13072_v37 = vld [vmem:[#allocation36_spill] sm:$0xff] }
 0x892   : > { %v4668_v40 = vmul.f32 %v4572_v52, %v12945_v41  ;;  %v13073_v52 = vld [vmem:[#allocation35_spill] sm:$0xff] }
 0x893   : > { %v4969_v43 = vadd.f32 0.001, %v4849_v32  ;;  %v3787_v23 = vpop.f32.mrf.mxu2 }
 0x894   : > { %v4788_v51 = vsub.f32 %v4668_v40, %v4728_v14 }
 0x895   : > { %4171 = vadd.xlane.f32.xlu1 %v4170_v16  ;;  %8167 = vrsqrt.f32 %v4969_v43  ;;  %v3628_v57 = vpop.f32.mrf.mxu1  ;;  %vm5467_vm4 = vweird.f32 %v4969_v43 }
 0x896   : > { %v4848_v30 = vmax.f32 %v4788_v51, 0.0  ;;  %v12302_v51 = vadd.f32 %v3946_v21, %v3787_v23 }
 0x897   : > { %v3469_v32 = vpop.f32.mrf.mxu0 }
 0x898   : > { %v4968_v27 = vadd.f32 0.001, %v4848_v30  ;;  %13074 = vst [vmem:[#allocation36_spill] sm:$0xff] %v12302_v51  ;;  %v12305_v55 = vadd.f32 %v3628_v57, %v3469_v32 }
 0x899   : > { %v5974_v54 = vpop.permute.xlu2 %5973 }
 0x89a   : > { %8169 = vrsqrt.f32 %v4968_v27  ;;  %v6181_v4 = vmul.f32 %v5974_v54, %v13072_v37  ;;  %v6182_v16 = vmul.f32 %v5974_v54, %v13073_v52  ;;  %13075 = vst [vmem:[#allocation35_spill] sm:$0xff] %v12305_v55  ;;  %v4177_v54 = vsel %vm1976_vm0, %v12302_v51, 0.0  ;;  %v13076_v37 = vld [vmem:[#allocation40_spill] sm:$0xff]  ;;  %v13077_v52 = vld [vmem:[#allocation39_spill] sm:$0xff] }
 0x89b   : > { %v8168_v17 = vpop.eup %8167  ;;  %vm5457_vm5 = vweird.f32 %v4968_v27 }
 0x89c   : > { %v5462_v26 = vmul.f32 %v8168_v17, %v4969_v43  ;;  %vm5468_vm6 = vweird.f32 %v8168_v17 }
 0x89d   : > { %4591 = vadd.xlane.f32.xlu1 %v4590_v36  ;;  %vm5469_vm8 = vmor %vm5467_vm4, %vm5468_vm6 }
 0x89e   : > { %v5463_v13 = vmul.f32 %v8168_v17, %v5462_v26 }
 0x89f   : > { %v5984_v42 = vpop.permute.xlu0 %5983 }
 0x8a0   : > { %v8170_v46 = vpop.eup %8169  ;;  %v5464_v20 = vmul.f32 0.5, %v5463_v13  ;;  %v6185_v26 = vmul.f32 %v5984_v42, %v13076_v37  ;;  %v6186_v23 = vmul.f32 %v5984_v42, %v13077_v52  ;;  %v4369_v42 = vmul.f32 %v12305_v55, %v12305_v55 }
 0x8a1   : > { %v5452_v14 = vmul.f32 %v8170_v46, %v4968_v27  ;;  %v6394_v40 = vpop.permute.xlu2 %6393  ;;  %vm5458_vm2 = vweird.f32 %v8170_v46  ;;  %v12335_v52 = vadd.f32 %v3625_v38, %v3466_v50  ;;  %v5675_v38 = vld [vmem:[%s10671_s23 + $0x110] sm:$0xff] }
 0x8a2   : > { %v6601_v30 = vadd.f32 %v6394_v40, %v6181_v4  ;;  %v6602_v56 = vadd.f32 %v6394_v40, %v6182_v16  ;;  %v5465_v13 = vsub.f32 1.5, %v5464_v20  ;;  %v4908_v40 = vld [vmem:[%s10661_s20 + $0x178] sm:$0xff]  ;;  %vm5459_vm7 = vmor %vm5457_vm5, %vm5458_vm2 }
 0x8a3   : > { %v5453_v36 = vmul.f32 %v8170_v46, %v5452_v14  ;;  %v4178_v14 = vadd.f32 %v4177_v54, %v12305_v55  ;;  %v4909_v54 = vld [vmem:[%s10661_s20 + $0x180] sm:$0xff]  ;;  %v13085_v55 = vld [vmem:[#allocation41_spill] sm:$0xff] }
 0x8a4   : > { %6721 = vst [vmem:[%s10867_s29 + $0x1e0] sm:$0xff] %v6601_v30  ;;  %v4370_v30 = vmul.f32 %v12302_v51, %v12302_v51  ;;  %v5466_v20 = vmul.f32 %v8168_v17, %v5465_v13  ;;  %v13084_v51 = vld [vmem:[#allocation42_spill] sm:$0xff] }
 0x8a5   : > { %v5454_v22 = vmul.f32 0.5, %v5453_v36  ;;  %6722 = vst.msk [vmem:[%s10867_s29 + $0x1e8] sm:$0xff] %vm1976_vm0, %v6602_v56  ;;  %v12330_v36 = vadd.f32 %v3943_v12, %v12295_v2 }
 0x8a6   : > { %v4597_v27 = vsel %vm1976_vm0, %v4370_v30, 0.0 }
 0x8a7   : > { %v5455_v21 = vsub.f32 1.5, %v5454_v22  ;;  %v6404_v4 = vpop.permute.xlu0 %6403  ;;  %v4368_v12 = vmul.f32 %v12330_v36, %v12330_v36 }
 0x8a8   : > { %v6605_v16 = vadd.f32 %v6404_v4, %v6185_v26  ;;  %v6606_v32 = vadd.f32 %v6404_v4, %v6186_v23  ;;  %v4598_v26 = vadd.f32 %v4597_v27, %v4369_v42  ;;  %v13078_v4 = vld [vmem:[#allocation19_spill] sm:$0xff]  ;;  %v5679_v27 = vld [vmem:[%s10671_s23 + $0x130] sm:$0xff] }
 0x8a9   : > { %v5456_v57 = vmul.f32 %v8170_v46, %v5455_v21  ;;  %v4173_v21 = vsel %vm1976_vm0, %v12330_v36, 0.0 }
 0x8aa   : > { %6725 = vst [vmem:[%s10867_s29 + $0x200] sm:$0xff] %v6605_v16  ;;  %v4174_v2 = vadd.f32 %v4173_v21, %v12335_v52  ;;  %v13079_v16 = vld [vmem:[#allocation7_spill] sm:$0xff] }
 0x8ab   : > { %6726 = vst.msk [vmem:[%s10867_s29 + $0x208] sm:$0xff] %vm1976_vm0, %v6606_v32  ;;  %v5460_v22 = vsel %vm5459_vm7, %v8170_v46, %v5456_v57  ;;  %v5470_v46 = vsel %vm5469_vm8, %v8168_v17, %v5466_v20  ;;  %v4593_v17 = vsel %vm1976_vm0, %v4368_v12, 0.0  ;;  %v5795_v32 = vsub.f32 %v5675_v38, %v13079_v16  ;;  %v4910_v38 = vld [vmem:[%s10661_s20 + $0x188] sm:$0xff]  ;;  %v3789_v16 = vpop.f32.mrf.mxu2 }
 0x8ac   : > { %v12320_v43 = vmul.f32 %v5460_v22, %v4908_v40  ;;  %v12333_v37 = vmul.f32 %v5470_v46, %v4909_v54 }
 0x8ad   : > { %4179 = vadd.xlane.f32.xlu0 %v4178_v14 }
 0x8ae   : > { %v12327_v56 = vmul.f32 %v12320_v43, %v12279_v61  ;;  %v12339_v23 = vmul.f32 %v12333_v37, %v12259_v44  ;;  %v4367_v44 = vmul.f32 %v12335_v52, %v12335_v52 }
 0x8b0   : > { %v4594_v40 = vadd.f32 %v4593_v17, %v4367_v44 }
 0x8b5   : > { %4599 = vadd.xlane.f32.xlu0 %v4598_v26  ;;  %v4160_v61 = vpop.xlane.xlu1 %4159  ;;  %v5799_v26 = vsub.f32 %v5679_v27, %v11856_v10  ;;  %v3471_v27 = vpop.f32.mrf.mxu0 }
 0x8b6   : > { %5993 = vperm.xlu1 %8028, %v13078_v4   ;;  %v4250_v50 = vmul.f32 %v4160_v61, %v12945_v41 }
 0x8b8   : > { %4175 = vadd.xlane.f32.xlu2 %v4174_v2  ;;  %v4730_v14 = vmul.f32 %v4250_v50, %v4250_v50 }
 0x8bd   : > { %v4580_v13 = vpop.xlane.xlu1 %4579 }
 0x8be   : > { %6413 = vperm.xlu1 %8028, %v5795_v32   ;;  %v4670_v57 = vmul.f32 %v4580_v13, %v12945_v41  ;;  %v3948_v32 = vpop.f32.mrf.mxu3 }
 0x8c0   : > { %4595 = vadd.xlane.f32.xlu2 %v4594_v40  ;;  %v4790_v30 = vsub.f32 %v4670_v57, %v4730_v14  ;;  %v5677_v57 = vld [vmem:[%s10671_s23 + $0x120] sm:$0xff] }
 0x8c2   : > { %v4850_v22 = vmax.f32 %v4790_v30, 0.0 }
 0x8c4   : > { %v4970_v42 = vadd.f32 0.001, %v4850_v22  ;;  %v13080_v22 = vld [vmem:[#allocation38_spill] sm:$0xff] }
 0x8c6   : > { %8171 = vrsqrt.f32 %v4970_v42  ;;  %vm5477_vm9 = vweird.f32 %v4970_v42 }
 0x8c9   : > { %6013 = vperm.xlu0 %8030, %v11846_v8  }
 0x8cc   : > { %v8172_v20 = vpop.eup %8171 }
 0x8cd   : > { %v5472_v54 = vmul.f32 %v8172_v20, %v4970_v42  ;;  %vm5478_vm10 = vweird.f32 %v8172_v20 }
 0x8ce   : > { %vm5479_vm11 = vmor %vm5477_vm9, %vm5478_vm10 }
 0x8cf   : > { %v5473_v46 = vmul.f32 %v8172_v20, %v5472_v54 }
 0x8d1   : > { %v5474_v21 = vmul.f32 0.5, %v5473_v46  ;;  %6433 = vperm.xlu0 %8030, %v5799_v26   ;;  %v12373_v46 = vadd.f32 %v3948_v32, %v3789_v16  ;;  %v3630_v26 = vpop.f32.mrf.mxu1  ;;  %v12386_v32 = vpop.f32.mrf.mxu2 }
 0x8d2   : > { %v4168_v61 = vpop.xlane.xlu0 %4167 }
 0x8d3   : > { %v5475_v4 = vsub.f32 1.5, %v5474_v21  ;;  %v12358_v12 = vmul.f32 %v4168_v61, %v12945_v41  ;;  %13082 = vst [vmem:[#allocation40_spill] sm:$0xff] %v12373_v46  ;;  %v4181_v16 = vsel %vm1976_vm0, %v12373_v46, 0.0 }
 0x8d5   : > { %v5979_v2 = vpop.permute.xlu1 %5978  ;;  %v5476_v8 = vmul.f32 %v8172_v20, %v5475_v4  ;;  %v4732_v10 = vmul.f32 %v12358_v12, %v12358_v12 }
 0x8d6   : > { %v6183_v42 = vmul.f32 %v5979_v2, %v13080_v22 }
 0x8d7   : > { %v5480_v44 = vsel %vm5479_vm11, %v8172_v20, %v5476_v8 }
 0x8d8   : > { %6003 = vperm.xlu2 %8029, %v11702_v0   ;;  %v12362_v17 = vmul.f32 %v5480_v44, %v4910_v38  ;;  %v13081_v0 = vld [vmem:[#allocation37_spill] sm:$0xff]  ;;  %v5797_v38 = vsub.f32 %v5677_v57, %v11709_v3  ;;  %v12380_v44 = vadd.f32 %v3630_v26, %v3471_v27 }
 0x8d9   : > { %v6184_v20 = vmul.f32 %v5979_v2, %v13081_v0  ;;  %v12398_v0 = vpop.f32.mrf.mxu1 }
 0x8da   : > { %v4164_v14 = vpop.xlane.xlu2 %4163  ;;  %v4588_v13 = vpop.xlane.xlu0 %4587  ;;  %v12367_v40 = vmul.f32 %v12362_v17, %v4250_v50  ;;  %13083 = vst [vmem:[#allocation39_spill] sm:$0xff] %v12380_v44  ;;  %v4182_v57 = vadd.f32 %v4181_v16, %v12380_v44  ;;  %v4371_v27 = vmul.f32 %v12380_v44, %v12380_v44 }
 0x8db   : > { %v4672_v30 = vmul.f32 %v4588_v13, %v12945_v41  ;;  %v12377_v50 = vmul.f32 %v4164_v14, %v12945_v41  ;;  %v12388_v13 = vpop.f32.mrf.mxu3  ;;  %v3794_v16 = vpop.f32.mrf.mxu2 }
 0x8dd   : > { %v6399_v54 = vpop.permute.xlu1 %6398  ;;  %v4792_v21 = vsub.f32 %v4672_v30, %v4732_v10  ;;  %v4731_v3 = vmul.f32 %v12377_v50, %v12377_v50  ;;  %v4372_v30 = vmul.f32 %v12373_v46, %v12373_v46 }
 0x8de   : > { %v6603_v61 = vadd.f32 %v6399_v54, %v6183_v42  ;;  %v6604_v4 = vadd.f32 %v6399_v54, %v6184_v20  ;;  %v12396_v42 = vpop.f32.mrf.mxu0 }
 0x8df   : > { %v4852_v8 = vmax.f32 %v4792_v21, 0.0  ;;  %v4601_v21 = vsel %vm1976_vm0, %v4372_v30, 0.0 }
 0x8e0   : > { %6723 = vst [vmem:[%s10867_s29 + $0x1f0] sm:$0xff] %v6603_v61  ;;  %6423 = vperm.xlu2 %8029, %v5797_v38  }
 0x8e1   : > { %6724 = vst.msk [vmem:[%s10867_s29 + $0x1f8] sm:$0xff] %vm1976_vm0, %v6604_v4  ;;  %v4972_v2 = vadd.f32 0.001, %v4852_v8  ;;  %v4602_v8 = vadd.f32 %v4601_v21, %v4371_v27  ;;  %v3635_v44 = vpop.f32.mrf.mxu1  ;;  %v4912_v21 = vld [vmem:[%s10661_s20 + $0x198] sm:$0xff] }
 0x8e2   : > { %v4584_v10 = vpop.xlane.xlu2 %4583 }
 0x8e3   : > { %v4671_v14 = vmul.f32 %v4584_v10, %v12945_v41  ;;  %8173 = vrsqrt.f32 %v4972_v2  ;;  %v3953_v10 = vpop.f32.mrf.mxu3  ;;  %vm5497_vm13 = vweird.f32 %v4972_v2 }
 0x8e4   : > { %v12403_v46 = vadd.f32 %v3953_v10, %v3794_v16 }
 0x8e5   : > { %v4791_v22 = vsub.f32 %v4671_v14, %v4731_v3 }
 0x8e7   : > { %v4851_v20 = vmax.f32 %v4791_v22, 0.0 }
 0x8e8   : > { %4183 = vadd.xlane.f32.xlu1 %v4182_v57  ;;  %v3476_v57 = vpop.f32.mrf.mxu0 }
 0x8e9   : > { %v8174_v54 = vpop.eup %8173  ;;  %v4971_v26 = vadd.f32 0.001, %v4851_v20  ;;  %v12408_v10 = vadd.f32 %v3635_v44, %v3476_v57 }
 0x8ea   : > { %v5492_v61 = vmul.f32 %v8174_v54, %v4972_v2  ;;  %v5989_v4 = vpop.permute.xlu2 %5988  ;;  %vm5498_vm12 = vweird.f32 %v8174_v54 }
 0x8eb   : > { %8175 = vrsqrt.f32 %v4971_v26  ;;  %v6187_v30 = vmul.f32 %v5989_v4, %v13084_v51  ;;  %v6188_v49 = vmul.f32 %v5989_v4, %v13085_v55  ;;  %vm5499_vm14 = vmor %vm5497_vm13, %vm5498_vm12  ;;  %vm5487_vm1 = vweird.f32 %v4971_v26 }
 0x8ec   : > { %v5493_v38 = vmul.f32 %v8174_v54, %v5492_v61 }
 0x8ed   : > { %v5999_v3 = vpop.permute.xlu0 %5998 }
 0x8ee   : > { %v5494_v14 = vmul.f32 0.5, %v5493_v38  ;;  %v6191_v51 = vmul.f32 %v5999_v3, %v13086_v5  ;;  %v6192_v55 = vmul.f32 %v5999_v3, %v13087_v33  ;;  %v4376_v33 = vmul.f32 %v12403_v46, %v12403_v46 }
 0x8ef   : > { %v4375_v3 = vmul.f32 %v12408_v10, %v12408_v10 }
 0x8f0   : > { %v5495_v22 = vsub.f32 1.5, %v5494_v14  ;;  %4603 = vadd.xlane.f32.xlu1 %v4602_v8  ;;  %v4189_v8 = vsel %vm1976_vm0, %v12403_v46, 0.0 }
 0x8f1   : > { %v8176_v20 = vpop.eup %8175  ;;  %v4190_v57 = vadd.f32 %v4189_v8, %v12408_v10  ;;  %v12445_v8 = vadd.f32 %v12398_v0, %v12396_v42  ;;  %v5678_v42 = vld [vmem:[%s10671_s23 + $0x128] sm:$0xff] }
 0x8f2   : > { %v5482_v61 = vmul.f32 %v8176_v20, %v4971_v26  ;;  %v6409_v27 = vpop.permute.xlu2 %6408  ;;  %v5496_v6 = vmul.f32 %v8174_v54, %v5495_v22  ;;  %vm5488_vm15 = vweird.f32 %v8176_v20 }
 0x8f3   : > { %v6607_v38 = vadd.f32 %v6409_v27, %v6187_v30  ;;  %v6608_v16 = vadd.f32 %v6409_v27, %v6188_v49  ;;  %vm5489_vm3 = vmor %vm5487_vm1, %vm5488_vm15  ;;  %v4609_v27 = vsel %vm1976_vm0, %v4376_v33, 0.0 }
 0x8f4   : > { %v5483_v14 = vmul.f32 %v8176_v20, %v5482_v61  ;;  %v5500_v2 = vsel %vm5499_vm14, %v8174_v54, %v5496_v6  ;;  %v4911_v6 = vld [vmem:[%s10661_s20 + $0x190] sm:$0xff] }
 0x8f5   : > { %6727 = vst [vmem:[%s10867_s29 + $0x210] sm:$0xff] %v6607_v38  ;;  %v6419_v4 = vpop.permute.xlu0 %6418  ;;  %v12415_v22 = vmul.f32 %v5500_v2, %v4912_v21  ;;  %v12437_v38 = vadd.f32 %v12388_v13, %v12386_v32 }
 0x8f6   : > { %v5484_v30 = vmul.f32 0.5, %v5483_v14  ;;  %6728 = vst.msk [vmem:[%s10867_s29 + $0x218] sm:$0xff] %vm1976_vm0, %v6608_v16  ;;  %v6611_v49 = vadd.f32 %v6419_v4, %v6191_v51  ;;  %v6612_v44 = vadd.f32 %v6419_v4, %v6192_v55  ;;  %v4610_v16 = vadd.f32 %v4609_v27, %v4375_v3 }
 0x8f7   : > { %v12422_v61 = vmul.f32 %v12415_v22, %v12358_v12  ;;  %v4185_v14 = vsel %vm1976_vm0, %v12437_v38, 0.0  ;;  %v4374_v51 = vmul.f32 %v12437_v38, %v12437_v38  ;;  %v5798_v55 = vsub.f32 %v5678_v42, %v11749_v53 }
 0x8f8   : > { %v5485_v5 = vsub.f32 1.5, %v5484_v30  ;;  %6731 = vst [vmem:[%s10867_s29 + $0x230] sm:$0xff] %v6611_v49 }
 0x8f9   : > { %6732 = vst.msk [vmem:[%s10867_s29 + $0x238] sm:$0xff] %vm1976_vm0, %v6612_v44  ;;  %v4605_v0 = vsel %vm1976_vm0, %v4374_v51, 0.0 }
 0x8fa   : > { %v5486_v54 = vmul.f32 %v8176_v20, %v5485_v5  ;;  %v5682_v5 = vld [vmem:[%s10671_s23 + $0x148] sm:$0xff] }
 0x8fb   : > { %4191 = vadd.xlane.f32.xlu0 %v4190_v57  ;;  %v5802_v33 = vsub.f32 %v5682_v5, %v12059_v59  ;;  %v13089_v5 = vld [vmem:[#allocation26_spill] sm:$0xff] }
 0x8fc   : > { %v5490_v12 = vsel %vm5489_vm3, %v8176_v20, %v5486_v54  ;;  %v4186_v20 = vadd.f32 %v4185_v14, %v12445_v8 }
 0x8fd   : > { %v12433_v21 = vmul.f32 %v5490_v12, %v4911_v6 }
 0x8ff   : > { %v12441_v26 = vmul.f32 %v12433_v21, %v12377_v50  ;;  %v4373_v50 = vmul.f32 %v12445_v8, %v12445_v8 }
 0x901   : > { %v4606_v2 = vadd.f32 %v4605_v0, %v4373_v50  ;;  %v5685_v50 = vld [vmem:[%s10671_s23 + $0x160] sm:$0xff] }
 0x903   : > { %4611 = vadd.xlane.f32.xlu0 %v4610_v16 }
 0x908   : > { %v4172_v32 = vpop.xlane.xlu1 %4171 }
 0x909   : > { %6008 = vperm.xlu1 %8028, %v11745_v47   ;;  %4187 = vadd.xlane.f32.xlu2 %v4186_v20  ;;  %v4253_v13 = vmul.f32 %v4172_v32, %v12945_v41  ;;  %v4913_v20 = vld [vmem:[%s10661_s20 + $0x1a0] sm:$0xff] }
 0x90b   : > { %v4733_v4 = vmul.f32 %v4253_v13, %v4253_v13 }
 0x910   : > { %v4592_v30 = vpop.xlane.xlu1 %4591 }
 0x911   : > { %6428 = vperm.xlu1 %8028, %v5798_v55   ;;  %4607 = vadd.xlane.f32.xlu2 %v4606_v2  ;;  %v4673_v49 = vmul.f32 %v4592_v30, %v12945_v41  ;;  %v3797_v30 = vpop.f32.mrf.mxu2 }
 0x913   : > { %v4793_v47 = vsub.f32 %v4673_v49, %v4733_v4  ;;  %v5680_v4 = vld [vmem:[%s10671_s23 + $0x138] sm:$0xff]  ;;  %v3956_v49 = vpop.f32.mrf.mxu3 }
 0x915   : > { %v4853_v44 = vmax.f32 %v4793_v47, 0.0 }
 0x917   : > { %6028 = vperm.xlu0 %8030, %v12046_v62   ;;  %v4973_v57 = vadd.f32 0.001, %v4853_v44 }
 0x919   : > { %8177 = vrsqrt.f32 %v4973_v57  ;;  %vm5507_vm2 = vweird.f32 %v4973_v57 }
 0x91f   : > { %v8178_v6 = vpop.eup %8177  ;;  %6448 = vperm.xlu0 %8030, %v5802_v33  }
 0x920   : > { %v5502_v53 = vmul.f32 %v8178_v6, %v4973_v57  ;;  %v4180_v54 = vpop.xlane.xlu0 %4179  ;;  %vm5508_vm4 = vweird.f32 %v8178_v6  ;;  %v13088_v57 = vld [vmem:[#allocation28_spill] sm:$0xff] }
 0x921   : > { %v12464_v27 = vmul.f32 %v4180_v54, %v12945_v41  ;;  %vm5509_vm5 = vmor %vm5507_vm2, %vm5508_vm4 }
 0x922   : > { %v5503_v3 = vmul.f32 %v8178_v6, %v5502_v53  ;;  %v3479_v53 = vpop.f32.mrf.mxu0 }
 0x923   : > { %v4735_v59 = vmul.f32 %v12464_v27, %v12464_v27 }
 0x924   : > { %v5504_v12 = vmul.f32 0.5, %v5503_v3  ;;  %v12486_v3 = vadd.f32 %v3956_v49, %v3797_v30 }
 0x926   : > { %v5505_v62 = vsub.f32 1.5, %v5504_v12  ;;  %v3638_v12 = vpop.f32.mrf.mxu1 }
 0x927   : > { %6043 = vperm.xlu0 %8030, %v12209_v18   ;;  %v5805_v18 = vsub.f32 %v5685_v50, %v12226_v60 }
 0x928   : > { %v5994_v16 = vpop.permute.xlu1 %5993  ;;  %v4600_v14 = vpop.xlane.xlu0 %4599  ;;  %v5506_v51 = vmul.f32 %v8178_v6, %v5505_v62 }
 0x929   : > { %6018 = vperm.xlu2 %8029, %v11871_v63   ;;  %v4675_v32 = vmul.f32 %v4600_v14, %v12945_v41  ;;  %v6189_v63 = vmul.f32 %v5994_v16, %v13088_v57  ;;  %v6190_v33 = vmul.f32 %v5994_v16, %v13089_v5  ;;  %v12489_v16 = vadd.f32 %v3638_v12, %v3479_v53 }
 0x92a   : > { %v5510_v42 = vsel %vm5509_vm5, %v8178_v6, %v5506_v51  ;;  %v5800_v6 = vsub.f32 %v5680_v4, %v11882_v7  ;;  %v4193_v51 = vsel %vm1976_vm0, %v12486_v3, 0.0  ;;  %v5688_v4 = vld [vmem:[%s10671_s23 + $0x178] sm:$0xff] }
 0x92b   : > { %v4176_v0 = vpop.xlane.xlu2 %4175  ;;  %v4795_v55 = vsub.f32 %v4675_v32, %v4735_v59  ;;  %v12473_v2 = vmul.f32 %v5510_v42, %v4913_v20  ;;  %v4194_v50 = vadd.f32 %v4193_v51, %v12489_v16 }
 0x92c   : > { %v12484_v54 = vmul.f32 %v4176_v0, %v12945_v41  ;;  %v4378_v0 = vmul.f32 %v12486_v3, %v12486_v3 }
 0x92d   : > { %v12478_v47 = vmul.f32 %v12473_v2, %v4253_v13  ;;  %v4855_v44 = vmax.f32 %v4795_v55, 0.0 }
 0x92e   : > { %v4734_v7 = vmul.f32 %v12484_v54, %v12484_v54  ;;  %v4613_v57 = vsel %vm1976_vm0, %v4378_v0, 0.0 }
 0x92f   : > { %6463 = vperm.xlu0 %8030, %v5805_v18   ;;  %v4975_v59 = vadd.f32 0.001, %v4855_v44  ;;  %v4377_v18 = vmul.f32 %v12489_v16, %v12489_v16 }
 0x930   : > { %v6414_v60 = vpop.permute.xlu1 %6413 }
 0x931   : > { %v6609_v62 = vadd.f32 %v6414_v60, %v6189_v63  ;;  %v6610_v13 = vadd.f32 %v6414_v60, %v6190_v33  ;;  %6438 = vperm.xlu2 %8029, %v5800_v6   ;;  %8179 = vrsqrt.f32 %v4975_v59  ;;  %v4614_v5 = vadd.f32 %v4613_v57, %v4377_v18  ;;  %v13090_v6 = vld [vmem:[#allocation16_spill] sm:$0xff]  ;;  %v13091_v60 = vld [vmem:[#allocation3_spill] sm:$0xff] }
 0x932   : > { %vm5527_vm6 = vweird.f32 %v4975_v59 }
 0x933   : > { %6729 = vst [vmem:[%s10867_s29 + $0x220] sm:$0xff] %v6609_v62  ;;  %v4596_v14 = vpop.xlane.xlu2 %4595  ;;  %v13092_v62 = vld [vmem:[#allocation21_spill] sm:$0xff] }
 0x934   : > { %6730 = vst.msk [vmem:[%s10867_s29 + $0x228] sm:$0xff] %vm1976_vm0, %v6610_v13  ;;  %v4674_v20 = vmul.f32 %v4596_v14, %v12945_v41 }
 0x936   : > { %v4794_v32 = vsub.f32 %v4674_v20, %v4734_v7  ;;  %v13093_v20 = vld [vmem:[#allocation23_spill] sm:$0xff] }
 0x937   : > { %6058 = vperm.xlu0 %8030, %v12320_v43   ;;  %v8180_v44 = vpop.eup %8179  ;;  %v5808_v43 = vsub.f32 %v5688_v4, %v12327_v56 }
 0x938   : > { %v4854_v42 = vmax.f32 %v4794_v32, 0.0  ;;  %v5522_v63 = vmul.f32 %v8180_v44, %v4975_v59  ;;  %vm5528_vm7 = vweird.f32 %v8180_v44  ;;  %v3640_v59 = vpop.f32.mrf.mxu1 }
 0x939   : > { %vm12520_vm8 = vmor %vm5527_vm6, %vm5528_vm7 }
 0x93a   : > { %v4974_v55 = vadd.f32 0.001, %v4854_v42  ;;  %v5523_v14 = vmul.f32 %v8180_v44, %v5522_v63 }
 0x93b   : > { %v6014_v30 = vpop.permute.xlu0 %6013  ;;  %4195 = vadd.xlane.f32.xlu1 %v4194_v50  ;;  %v6004_v49 = vpop.permute.xlu2 %6003 }
 0x93c   : > { %8181 = vrsqrt.f32 %v4974_v55  ;;  %v6197_v53 = vmul.f32 %v6014_v30, %v13090_v6  ;;  %v6198_v12 = vmul.f32 %v6014_v30, %v13091_v60  ;;  %v6193_v13 = vmul.f32 %v6004_v49, %v13092_v62  ;;  %v3958_v60 = vpop.f32.mrf.mxu3 }
 0x93d   : > { %v6194_v51 = vmul.f32 %v6004_v49, %v13093_v20  ;;  %v5524_v30 = vmul.f32 0.5, %v5523_v14  ;;  %vm5517_vm10 = vweird.f32 %v4974_v55  ;;  %v4915_v14 = vld [vmem:[%s10661_s20 + $0x1b0] sm:$0xff] }
 0x93f   : > { %6478 = vperm.xlu0 %8030, %v5808_v43   ;;  %v5691_v43 = vld [vmem:[%s10671_s23 + $0x190] sm:$0xff]  ;;  %v5525_v63 = vsub.f32 1.5, %v5524_v30  ;;  %v5681_v30 = vld [vmem:[%s10671_s23 + $0x140] sm:$0xff] }
 0x942   : > { %v8182_v33 = vpop.eup %8181 }
 0x943   : > { %v5512_v7 = vmul.f32 %v8182_v33, %v4974_v55  ;;  %v6434_v32 = vpop.permute.xlu0 %6433  ;;  %4615 = vadd.xlane.f32.xlu1 %v4614_v5  ;;  %v6424_v56 = vpop.permute.xlu2 %6423  ;;  %v5811_v5 = vsub.f32 %v5691_v43, %v12441_v26  ;;  %vm5518_vm9 = vweird.f32 %v8182_v33 }
 0x944   : > { %v6617_v50 = vadd.f32 %v6434_v32, %v6197_v53  ;;  %v6618_v42 = vadd.f32 %v6434_v32, %v6198_v12  ;;  %v6613_v0 = vadd.f32 %v6424_v56, %v6193_v13  ;;  %v6614_v18 = vadd.f32 %v6424_v56, %v6194_v51  ;;  %v3799_v53 = vpop.f32.mrf.mxu2  ;;  %vm5519_vm11 = vmor %vm5517_vm10, %vm5518_vm9  ;;  %v3481_v13 = vpop.f32.mrf.mxu0 }
 0x945   : > { %v5513_v4 = vmul.f32 %v8182_v33, %v5512_v7  ;;  %v5526_v12 = vmul.f32 %v8180_v44, %v5525_v63  ;;  %v12524_v62 = vadd.f32 %v3958_v60, %v3799_v53  ;;  %v4914_v7 = vld [vmem:[%s10661_s20 + $0x1a8] sm:$0xff]  ;;  %v12532_v32 = vadd.f32 %v3640_v59, %v3481_v13 }
 0x946   : > { %6737 = vst [vmem:[%s10867_s29 + $0x260] sm:$0xff] %v6617_v50 }
 0x947   : > { %v5514_v57 = vmul.f32 0.5, %v5513_v4  ;;  %6738 = vst.msk [vmem:[%s10867_s29 + $0x268] sm:$0xff] %vm1976_vm0, %v6618_v42  ;;  %6073 = vperm.xlu0 %8030, %v12433_v21   ;;  %v5530_v26 = vsel %vm12520_vm8, %v8180_v44, %v5526_v12  ;;  %v4197_v50 = vsel %vm1976_vm0, %v12524_v62, 0.0  ;;  %v4380_v44 = vmul.f32 %v12524_v62, %v12524_v62 }
 0x948   : > { %6733 = vst [vmem:[%s10867_s29 + $0x240] sm:$0xff] %v6613_v0  ;;  %v12530_v51 = vmul.f32 %v5530_v26, %v4915_v14  ;;  %v4198_v42 = vadd.f32 %v4197_v50, %v12532_v32  ;;  %v5694_v0 = vld [vmem:[%s10671_s23 + $0x1a8] sm:$0xff]  ;;  %v4379_v4 = vmul.f32 %v12532_v32, %v12532_v32 }
 0x949   : > { %6734 = vst.msk [vmem:[%s10867_s29 + $0x248] sm:$0xff] %vm1976_vm0, %v6614_v18  ;;  %v5515_v49 = vsub.f32 1.5, %v5514_v57  ;;  %v4617_v18 = vsel %vm1976_vm0, %v4380_v44, 0.0 }
 0x94a   : > { %v12536_v55 = vmul.f32 %v12530_v51, %v12464_v27  ;;  %v4618_v57 = vadd.f32 %v4617_v18, %v4379_v4 }
 0x94b   : > { %v5516_v21 = vmul.f32 %v8182_v33, %v5515_v49  ;;  %v5801_v49 = vsub.f32 %v5681_v30, %v11921_v29 }
 0x94d   : > { %v5520_v20 = vsel %vm5519_vm11, %v8182_v33, %v5516_v21  ;;  %v5683_v21 = vld [vmem:[%s10671_s23 + $0x150] sm:$0xff] }
 0x94e   : > { %v5634_v56 = vmul.f32 %v5520_v20, %v4914_v7  ;;  %v5803_v13 = vsub.f32 %v5683_v21, %v12073_v35  ;;  %v13096_v7 = vld [vmem:[#allocation29_spill] sm:$0xff] }
 0x94f   : > { %6493 = vperm.xlu0 %8030, %v5811_v5  }
 0x950   : > { %v5754_v33 = vmul.f32 %v5634_v56, %v12484_v54  ;;  %v5684_v54 = vld [vmem:[%s10671_s23 + $0x158] sm:$0xff] }
 0x951   : > { %v5804_v63 = vsub.f32 %v5684_v54, %v12125_v45  ;;  %v5687_v45 = vld [vmem:[%s10671_s23 + $0x170] sm:$0xff] }
 0x952   : > { %v5814_v27 = vsub.f32 %v5694_v0, %v5754_v33 }
 0x957   : > { %6088 = vperm.xlu0 %8030, %v5634_v56   ;;  %v13097_v56 = vld [vmem:[#allocation27_spill] sm:$0xff] }
 0x95a   : > { %4199 = vadd.xlane.f32.xlu2 %v4198_v42 }
 0x95b   : > { %v4184_v43 = vpop.xlane.xlu1 %4183 }
 0x95c   : > { %6023 = vperm.xlu1 %8028, %v11915_v1   ;;  %v12555_v1 = vmul.f32 %v4184_v43, %v12945_v41  ;;  %v5690_v43 = vld [vmem:[%s10671_s23 + $0x188] sm:$0xff] }
 0x95e   : > { %v4736_v53 = vmul.f32 %v12555_v1, %v12555_v1 }
 0x95f   : > { %6508 = vperm.xlu0 %8030, %v5814_v27  }
 0x962   : > { %4619 = vadd.xlane.f32.xlu2 %v4618_v57 }
 0x963   : > { %v4604_v5 = vpop.xlane.xlu1 %4603 }
 0x964   : > { %6443 = vperm.xlu1 %8028, %v5801_v49   ;;  %v4676_v29 = vmul.f32 %v4604_v5, %v12945_v41  ;;  %v5686_v49 = vld [vmem:[%s10671_s23 + $0x168] sm:$0xff] }
 0x966   : > { %v4796_v12 = vsub.f32 %v4676_v29, %v4736_v53  ;;  %v5806_v53 = vsub.f32 %v5686_v49, %v12213_v24 }
 0x968   : > { %v4856_v26 = vmax.f32 %v4796_v12, 0.0  ;;  %v13098_v12 = vld [vmem:[#allocation33_spill] sm:$0xff] }
 0x96a   : > { %v12574_v4 = vadd.f32 0.001, %v4856_v26 }
 0x96c   : > { %6038 = vperm.xlu1 %8028, %v12121_v58   ;;  %8183 = vrsqrt.f32 %v12574_v4  ;;  %vm5537_vm15 = vweird.f32 %v12574_v4 }
 0x96e   : > { %v4192_v6 = vpop.xlane.xlu0 %4191 }
 0x972   : > { %v12584_v54 = vpop.eup %8183 }
 0x973   : > { %v5532_v21 = vmul.f32 %v12584_v54, %v12574_v4  ;;  %vm5538_vm1 = vweird.f32 %v12584_v54 }
 0x974   : > { %6458 = vperm.xlu1 %8028, %v5804_v63   ;;  %vm5539_vm3 = vmor %vm5537_vm15, %vm5538_vm1 }
 0x976   : > { %v4612_v14 = vpop.xlane.xlu0 %4611 }
 0x97a   : > { %6033 = vperm.xlu2 %8029, %v12061_v31  }
 0x97b   : > { %v6009_v60 = vpop.permute.xlu1 %6008 }
 0x97c   : > { %6053 = vperm.xlu1 %8028, %v12255_v15   ;;  %v4188_v58 = vpop.xlane.xlu2 %4187  ;;  %v6195_v20 = vmul.f32 %v6009_v60, %v13096_v7  ;;  %v6196_v31 = vmul.f32 %v6009_v60, %v13097_v56  ;;  %v5807_v15 = vsub.f32 %v5687_v45, %v12262_v28  ;;  %v5533_v56 = vmul.f32 %v12584_v54, %v5532_v21 }
 0x97d   : > { %v12566_v59 = vmul.f32 %v4188_v58, %v12945_v41 }
 0x97f   : > { %v4737_v33 = vmul.f32 %v12566_v59, %v12566_v59 }
 0x982   : > { %6453 = vperm.xlu2 %8029, %v5803_v13   ;;  %v13099_v13 = vld [vmem:[#allocation30_spill] sm:$0xff] }
 0x983   : > { %v6429_v50 = vpop.permute.xlu1 %6428 }
 0x984   : > { %v6615_v42 = vadd.f32 %v6429_v50, %v6195_v20  ;;  %v6616_v44 = vadd.f32 %v6429_v50, %v6196_v31  ;;  %6473 = vperm.xlu1 %8028, %v5807_v15   ;;  %v4608_v35 = vpop.xlane.xlu2 %4607 }
 0x985   : > { %v4677_v0 = vmul.f32 %v4608_v35, %v12945_v41 }
 0x986   : > { %6735 = vst [vmem:[%s10867_s29 + $0x250] sm:$0xff] %v6615_v42 }
 0x987   : > { %6736 = vst.msk [vmem:[%s10867_s29 + $0x258] sm:$0xff] %vm1976_vm0, %v6616_v44  ;;  %v4797_v27 = vsub.f32 %v4677_v0, %v4737_v33  ;;  %v5534_v44 = vmul.f32 0.5, %v5533_v56  ;;  %v4917_v33 = vld [vmem:[%s10661_s20 + $0x1c0] sm:$0xff] }
 0x989   : > { %v4857_v18 = vmax.f32 %v4797_v27, 0.0  ;;  %v6029_v28 = vpop.permute.xlu0 %6028  ;;  %v5689_v27 = vld [vmem:[%s10671_s23 + $0x180] sm:$0xff] }
 0x98a   : > { %6048 = vperm.xlu2 %8029, %v12197_v34   ;;  %v6203_v63 = vmul.f32 %v6029_v28, %v11688_v11  ;;  %v6204_v5 = vmul.f32 %v6029_v28, %v11673_v9  ;;  %v12595_v9 = vmul.f32 %v4192_v6, %v12945_v41  ;;  %v4678_v6 = vmul.f32 %v4612_v14, %v12945_v41 }
 0x98b   : > { %v4977_v30 = vadd.f32 0.001, %v4857_v18  ;;  %v5535_v14 = vsub.f32 1.5, %v5534_v44 }
 0x98c   : > { %6068 = vperm.xlu1 %8028, %v12362_v17   ;;  %v6019_v57 = vpop.permute.xlu2 %6018  ;;  %v5810_v17 = vsub.f32 %v5690_v43, %v12367_v40  ;;  %v4738_v31 = vmul.f32 %v12595_v9, %v12595_v9  ;;  %v13100_v43 = vld [vmem:[#allocation5_spill] sm:$0xff] }
 0x98d   : > { %8185 = vrsqrt.f32 %v4977_v30  ;;  %v6199_v45 = vmul.f32 %v6019_v57, %v13098_v12  ;;  %v6200_v11 = vmul.f32 %v6019_v57, %v13099_v13  ;;  %vm5547_vm13 = vweird.f32 %v4977_v30  ;;  %v5693_v57 = vld [vmem:[%s10671_s23 + $0x1a0] sm:$0xff]  ;;  %v4916_v12 = vld [vmem:[%s10661_s20 + $0x1b8] sm:$0xff] }
 0x98e   : > { %v4798_v35 = vsub.f32 %v4678_v6, %v4738_v31 }
 0x990   : > { %v4858_v49 = vmax.f32 %v4798_v35, 0.0 }
 0x991   : > { %v6449_v29 = vpop.permute.xlu0 %6448 }
 0x992   : > { %v6623_v60 = vadd.f32 %v6449_v29, %v6203_v63  ;;  %v6624_v34 = vadd.f32 %v6449_v29, %v6204_v5  ;;  %6468 = vperm.xlu2 %8029, %v5806_v53   ;;  %v13101_v5 = vld [vmem:[#allocation12_spill] sm:$0xff] }
 0x993   : > { %v8186_v58 = vpop.eup %8185 }
 0x994   : > { %v5542_v24 = vmul.f32 %v8186_v58, %v4977_v30  ;;  %6743 = vst [vmem:[%s10867_s29 + $0x290] sm:$0xff] %v6623_v60  ;;  %6488 = vperm.xlu1 %8028, %v5810_v17   ;;  %v6439_v26 = vpop.permute.xlu2 %6438  ;;  %vm5548_vm12 = vweird.f32 %v8186_v58  ;;  %v5809_v30 = vsub.f32 %v5689_v27, %v12339_v23  ;;  %v5813_v60 = vsub.f32 %v5693_v57, %v12478_v47  ;;  %v5697_v23 = vld [vmem:[%s10671_s23 + $0x1c0] sm:$0xff]  ;;  %v5695_v27 = vld [vmem:[%s10671_s23 + $0x1b0] sm:$0xff] }
 0x995   : > { %6744 = vst.msk [vmem:[%s10867_s29 + $0x298] sm:$0xff] %vm1976_vm0, %v6624_v34  ;;  %v6619_v7 = vadd.f32 %v6439_v26, %v6199_v45  ;;  %v6620_v40 = vadd.f32 %v6439_v26, %v6200_v11  ;;  %vm5549_vm14 = vmor %vm5547_vm13, %vm5548_vm12  ;;  %v5536_v17 = vmul.f32 %v12584_v54, %v5535_v14  ;;  %v5692_v45 = vld [vmem:[%s10671_s23 + $0x198] sm:$0xff] }
 0x996   : > { %v5543_v20 = vmul.f32 %v8186_v58, %v5542_v24  ;;  %v5696_v26 = vld [vmem:[%s10671_s23 + $0x1b8] sm:$0xff] }
 0x997   : > { %6739 = vst [vmem:[%s10867_s29 + $0x270] sm:$0xff] %v6619_v7  ;;  %v5540_v47 = vsel %vm5539_vm3, %v12584_v54, %v5536_v17  ;;  %v5812_v54 = vsub.f32 %v5692_v45, %v12422_v61 }
 0x998   : > { %v5544_v15 = vmul.f32 0.5, %v5543_v20  ;;  %6740 = vst.msk [vmem:[%s10867_s29 + $0x278] sm:$0xff] %vm1976_vm0, %v6620_v40 }
 0x999   : > { %v6044_v50 = vpop.permute.xlu0 %6043 }
 0x99a   : > { %v5545_v42 = vsub.f32 1.5, %v5544_v15  ;;  %6063 = vperm.xlu2 %8029, %v12333_v37   ;;  %v6209_v63 = vmul.f32 %v6044_v50, %v13100_v43  ;;  %v6210_v37 = vmul.f32 %v6044_v50, %v13101_v5  ;;  %v4918_v5 = vld [vmem:[%s10661_s20 + $0x1c8] sm:$0xff] }
 0x99c   : > { %6083 = vperm.xlu1 %8028, %v12473_v2   ;;  %v5546_v0 = vmul.f32 %v8186_v58, %v5545_v42 }
 0x99e   : > { %v5550_v18 = vsel %vm5549_vm14, %v8186_v58, %v5546_v0  ;;  %v4978_v58 = vadd.f32 0.001, %v4858_v49 }
 0x99f   : > { %v5637_v28 = vmul.f32 %v5550_v18, %v4917_v33 }
 0x9a0   : > { %8187 = vrsqrt.f32 %v4978_v58  ;;  %vm5557_vm2 = vweird.f32 %v4978_v58 }
 0x9a1   : > { %v6464_v53 = vpop.permute.xlu0 %6463  ;;  %6103 = vperm.xlu0 %8030, %v5637_v28   ;;  %v5757_v34 = vmul.f32 %v5637_v28, %v12566_v59  ;;  %v5636_v59 = vmul.f32 %v5540_v47, %v4916_v12  ;;  %v5815_v28 = vsub.f32 %v5695_v27, %v12536_v55  ;;  %v13106_v27 = vld [vmem:[#allocation14_spill] sm:$0xff] }
 0x9a2   : > { %v6629_v2 = vadd.f32 %v6464_v53, %v6209_v63  ;;  %v6630_v29 = vadd.f32 %v6464_v53, %v6210_v37  ;;  %6483 = vperm.xlu2 %8029, %v5809_v30  }
 0x9a3   : > { %v5817_v21 = vsub.f32 %v5697_v23, %v5757_v34  ;;  %v5756_v24 = vmul.f32 %v5636_v59, %v12555_v1  ;;  %v5698_v34 = vld [vmem:[%s10671_s23 + $0x1c8] sm:$0xff] }
 0x9a4   : > { %6749 = vst [vmem:[%s10867_s29 + $0x2c0] sm:$0xff] %v6629_v2  ;;  %6503 = vperm.xlu1 %8028, %v5813_v60  }
 0x9a5   : > { %6750 = vst.msk [vmem:[%s10867_s29 + $0x2c8] sm:$0xff] %vm1976_vm0, %v6630_v29  ;;  %v5816_v15 = vsub.f32 %v5696_v26, %v5756_v24  ;;  %v13102_v24 = vld [vmem:[#allocation13_spill] sm:$0xff] }
 0x9a6   : > { %v8188_v13 = vpop.eup %8187 }
 0x9a7   : > { %v5552_v20 = vmul.f32 %v8188_v13, %v4978_v58  ;;  %vm5558_vm4 = vweird.f32 %v8188_v13  ;;  %v4919_v58 = vld [vmem:[%s10661_s20 + $0x1d0] sm:$0xff] }
 0x9a8   : > { %vm5559_vm5 = vmor %vm5557_vm2, %vm5558_vm4 }
 0x9a9   : > { %v6059_v4 = vpop.permute.xlu0 %6058  ;;  %6523 = vperm.xlu0 %8030, %v5817_v21   ;;  %v5553_v1 = vmul.f32 %v8188_v13, %v5552_v20 }
 0x9aa   : > { %6078 = vperm.xlu2 %8029, %v12415_v22   ;;  %v6215_v7 = vmul.f32 %v6059_v4, %v12079_v39  ;;  %v6216_v40 = vmul.f32 %v6059_v4, %v12065_v19 }
 0x9ab   : > { %v5554_v50 = vmul.f32 0.5, %v5553_v1 }
 0x9ac   : > { %6098 = vperm.xlu1 %8028, %v5636_v59  }
 0x9ad   : > { %v5555_v33 = vsub.f32 1.5, %v5554_v50 }
 0x9ae   : > { %v4196_v11 = vpop.xlane.xlu1 %4195 }
 0x9af   : > { %v12634_v56 = vmul.f32 %v4196_v11, %v12945_v41  ;;  %v5556_v49 = vmul.f32 %v8188_v13, %v5555_v33 }
 0x9b1   : > { %v6479_v22 = vpop.permute.xlu0 %6478  ;;  %v4739_v39 = vmul.f32 %v12634_v56, %v12634_v56 }
 0x9b2   : > { %v6635_v31 = vadd.f32 %v6479_v22, %v6215_v7  ;;  %v6636_v6 = vadd.f32 %v6479_v22, %v6216_v40  ;;  %6498 = vperm.xlu2 %8029, %v5812_v54   ;;  %v13103_v7 = vld [vmem:[#allocation18_spill] sm:$0xff] }
 0x9b4   : > { %6755 = vst [vmem:[%s10867_s29 + $0x2f0] sm:$0xff] %v6635_v31  ;;  %6518 = vperm.xlu1 %8028, %v5816_v15   ;;  %v5699_v31 = vld [vmem:[%s10671_s23 + $0x1d0] sm:$0xff] }
 0x9b5   : > { %6756 = vst.msk [vmem:[%s10867_s29 + $0x2f8] sm:$0xff] %vm1976_vm0, %v6636_v6 }
 0x9b6   : > { %v4616_v19 = vpop.xlane.xlu1 %4615 }
 0x9b7   : > { %v4679_v61 = vmul.f32 %v4616_v19, %v12945_v41 }
 0x9b9   : > { %v4799_v42 = vsub.f32 %v4679_v61, %v4739_v39  ;;  %v6074_v44 = vpop.permute.xlu0 %6073 }
 0x9ba   : > { %6093 = vperm.xlu2 %8029, %v12530_v51   ;;  %v6221_v18 = vmul.f32 %v6074_v44, %v12234_v48  ;;  %v6222_v14 = vmul.f32 %v6074_v44, %v12217_v25  ;;  %v5560_v48 = vsel %vm5559_vm5, %v8188_v13, %v5556_v49  ;;  %v13104_v44 = vld [vmem:[#allocation2_spill] sm:$0xff] }
 0x9bb   : > { %v4859_v35 = vmax.f32 %v4799_v42, 0.0  ;;  %v5638_v30 = vmul.f32 %v5560_v48, %v4918_v5 }
 0x9bd   : > { %v4979_v0 = vadd.f32 0.001, %v4859_v35  ;;  %v5758_v29 = vmul.f32 %v5638_v30, %v12595_v9  ;;  %v13105_v35 = vld [vmem:[#allocation8_spill] sm:$0xff] }
 0x9bf   : > { %8189 = vrsqrt.f32 %v4979_v0  ;;  %vm5567_vm6 = vweird.f32 %v4979_v0  ;;  %v5818_v47 = vsub.f32 %v5698_v34, %v5758_v29  ;;  %v13108_v34 = vld [vmem:[#allocation6_spill] sm:$0xff] }
 0x9c1   : > { %v6494_v57 = vpop.permute.xlu0 %6493 }
 0x9c2   : > { %v6641_v43 = vadd.f32 %v6494_v57, %v6221_v18  ;;  %v6642_v51 = vadd.f32 %v6494_v57, %v6222_v14  ;;  %6513 = vperm.xlu2 %8029, %v5815_v28   ;;  %v13107_v14 = vld [vmem:[#allocation20_spill] sm:$0xff] }
 0x9c4   : > { %6761 = vst [vmem:[%s10867_s29 + $0x320] sm:$0xff] %v6641_v43 }
 0x9c5   : > { %v8190_v63 = vpop.eup %8189  ;;  %6762 = vst.msk [vmem:[%s10867_s29 + $0x328] sm:$0xff] %vm1976_vm0, %v6642_v51 }
 0x9c6   : > { %v5562_v37 = vmul.f32 %v8190_v63, %v4979_v0  ;;  %vm5568_vm7 = vweird.f32 %v8190_v63 }
 0x9c7   : > { %vm5569_vm8 = vmor %vm5567_vm6, %vm5568_vm7 }
 0x9c8   : > { %v5563_v25 = vmul.f32 %v8190_v63, %v5562_v37 }
 0x9c9   : > { %v6089_v55 = vpop.permute.xlu0 %6088 }
 0x9ca   : > { %v5564_v53 = vmul.f32 0.5, %v5563_v25  ;;  %6108 = vperm.xlu2 %8029, %v5638_v30   ;;  %v6227_v21 = vmul.f32 %v6089_v55, %v12335_v52  ;;  %v6228_v12 = vmul.f32 %v6089_v55, %v12330_v36  ;;  %v4920_v55 = vld [vmem:[%s10661_s20 + $0x1d8] sm:$0xff] }
 0x9cc   : > { %v5565_v2 = vsub.f32 1.5, %v5564_v53 }
 0x9cd   : > { %v4200_v60 = vpop.xlane.xlu2 %4199 }
 0x9ce   : > { %v6024_v17 = vpop.permute.xlu1 %6023  ;;  %v5566_v23 = vmul.f32 %v8190_v63, %v5565_v2  ;;  %v4260_v13 = vmul.f32 %v4200_v60, %v12945_v41 }
 0x9cf   : > { %v6201_v26 = vmul.f32 %v6024_v17, %v13102_v24  ;;  %v6202_v52 = vmul.f32 %v6024_v17, %v13103_v7 }
 0x9d0   : > { %v5570_v4 = vsel %vm5569_vm8, %v8190_v63, %v5566_v23  ;;  %v4740_v54 = vmul.f32 %v4260_v13, %v4260_v13 }
 0x9d1   : > { %v6509_v59 = vpop.permute.xlu0 %6508  ;;  %v5639_v45 = vmul.f32 %v5570_v4, %v4919_v58  ;;  %v13109_v58 = vld [vmem:[#allocation4_spill] sm:$0xff]  ;;  %v13111_v4 = vld [vmem:[#allocation15_spill] sm:$0xff] }
 0x9d2   : > { %v6647_v9 = vadd.f32 %v6509_v59, %v6227_v21  ;;  %v6648_v11 = vadd.f32 %v6509_v59, %v6228_v12  ;;  %6528 = vperm.xlu2 %8029, %v5818_v47   ;;  %v13110_v12 = vld [vmem:[#allocation11_spill] sm:$0xff] }
 0x9d3   : > { %6113 = vperm.xlu1 %8028, %v5639_v45   ;;  %v5759_v40 = vmul.f32 %v5639_v45, %v12634_v56 }
 0x9d4   : > { %6767 = vst [vmem:[%s10867_s29 + $0x350] sm:$0xff] %v6647_v9  ;;  %v5700_v9 = vld [vmem:[%s10671_s23 + $0x1d8] sm:$0xff] }
 0x9d5   : > { %6768 = vst.msk [vmem:[%s10867_s29 + $0x358] sm:$0xff] %vm1976_vm0, %v6648_v11  ;;  %v4620_v36 = vpop.xlane.xlu2 %4619  ;;  %v5819_v39 = vsub.f32 %v5699_v31, %v5759_v40 }
 0x9d6   : > { %v4680_v20 = vmul.f32 %v4620_v36, %v12945_v41  ;;  %v6444_v22 = vpop.permute.xlu1 %6443 }
 0x9d7   : > { %v6621_v6 = vadd.f32 %v6444_v22, %v6201_v26  ;;  %v6622_v15 = vadd.f32 %v6444_v22, %v6202_v52  ;;  %v13113_v22 = vld [vmem:[#allocation17_spill] sm:$0xff] }
 0x9d8   : > { %v4800_v1 = vsub.f32 %v4680_v20, %v4740_v54  ;;  %v13112_v54 = vld [vmem:[#allocation32_spill] sm:$0xff] }
 0x9d9   : > { %6741 = vst [vmem:[%s10867_s29 + $0x280] sm:$0xff] %v6621_v6  ;;  %v13114_v6 = vld [vmem:[#allocation25_spill] sm:$0xff] }
 0x9da   : > { %v4860_v19 = vmax.f32 %v4800_v1, 0.0  ;;  %6742 = vst.msk [vmem:[%s10867_s29 + $0x288] sm:$0xff] %vm1976_vm0, %v6622_v15  ;;  %v13115_v1 = vld [vmem:[#allocation31_spill] sm:$0xff] }
 0x9db   : > { %6533 = vperm.xlu1 %8028, %v5819_v39  }
 0x9dc   : > { %v4980_v61 = vadd.f32 0.001, %v4860_v19 }
 0x9dd   : > { %v6034_v50 = vpop.permute.xlu2 %6033 }
 0x9de   : > { %8191 = vrsqrt.f32 %v4980_v61  ;;  %v6039_v42 = vpop.permute.xlu1 %6038  ;;  %v6205_v41 = vmul.f32 %v6034_v50, %v13104_v44  ;;  %v6206_v33 = vmul.f32 %v6034_v50, %v13105_v35  ;;  %vm5577_vm10 = vweird.f32 %v4980_v61 }
 0x9df   : > { %v6207_v18 = vmul.f32 %v6039_v42, %v13106_v27  ;;  %v6208_v28 = vmul.f32 %v6039_v42, %v13107_v14 }
 0x9e4   : > { %v8192_v56 = vpop.eup %8191 }
 0x9e5   : > { %v5572_v0 = vmul.f32 %v8192_v56, %v4980_v61  ;;  %v6454_v57 = vpop.permute.xlu2 %6453  ;;  %vm5578_vm9 = vweird.f32 %v8192_v56 }
 0x9e6   : > { %v6625_v49 = vadd.f32 %v6454_v57, %v6205_v41  ;;  %v6626_v43 = vadd.f32 %v6454_v57, %v6206_v33  ;;  %v6459_v51 = vpop.permute.xlu1 %6458  ;;  %vm5579_vm11 = vmor %vm5577_vm10, %vm5578_vm9 }
 0x9e7   : > { %v5573_v63 = vmul.f32 %v8192_v56, %v5572_v0  ;;  %v6627_v5 = vadd.f32 %v6459_v51, %v6207_v18  ;;  %v6628_v48 = vadd.f32 %v6459_v51, %v6208_v28  ;;  %v13116_v0 = vld [vmem:[#allocation34_spill] sm:$0xff]  ;;  %v13117_v18 = vld [vmem:[#allocation24_spill] sm:$0xff]  ;;  %v13118_v28 = vld [vmem:[#allocation9_spill] sm:$0xff] }
 0x9e8   : > { %6745 = vst [vmem:[%s10867_s29 + $0x2a0] sm:$0xff] %v6625_v49  ;;  %v13119_v49 = vld [vmem:[#allocation43_spill] sm:$0xff] }
 0x9e9   : > { %v5574_v37 = vmul.f32 0.5, %v5573_v63  ;;  %6746 = vst.msk [vmem:[%s10867_s29 + $0x2a8] sm:$0xff] %vm1976_vm0, %v6626_v43 }
 0x9ea   : > { %6747 = vst [vmem:[%s10867_s29 + $0x2b0] sm:$0xff] %v6627_v5 }
 0x9eb   : > { %v5575_v25 = vsub.f32 1.5, %v5574_v37  ;;  %6748 = vst.msk [vmem:[%s10867_s29 + $0x2b8] sm:$0xff] %vm1976_vm0, %v6628_v48 }
 0x9ed   : > { %v6049_v30 = vpop.permute.xlu2 %6048  ;;  %v5576_v53 = vmul.f32 %v8192_v56, %v5575_v25 }
 0x9ee   : > { %v6054_v2 = vpop.permute.xlu1 %6053  ;;  %v6211_v17 = vmul.f32 %v6049_v30, %v13108_v34  ;;  %v6212_v23 = vmul.f32 %v6049_v30, %v13109_v58 }
 0x9ef   : > { %v5580_v29 = vsel %vm5579_vm11, %v8192_v56, %v5576_v53  ;;  %v6213_v47 = vmul.f32 %v6054_v2, %v13110_v12  ;;  %v6214_v59 = vmul.f32 %v6054_v2, %v13111_v4  ;;  %v13123_v12 = vld [vmem:[#allocation40_spill] sm:$0xff] }
 0x9f0   : > { %v5640_v60 = vmul.f32 %v5580_v29, %v4920_v55 }
 0x9f2   : > { %6118 = vperm.xlu0 %8030, %v5640_v60   ;;  %v5760_v21 = vmul.f32 %v5640_v60, %v4260_v13 }
 0x9f4   : > { %v5820_v36 = vsub.f32 %v5700_v9, %v5760_v21 }
 0x9f5   : > { %v6469_v45 = vpop.permute.xlu2 %6468 }
 0x9f6   : > { %v6631_v11 = vadd.f32 %v6469_v45, %v6211_v17  ;;  %v6632_v24 = vadd.f32 %v6469_v45, %v6212_v23  ;;  %v6474_v26 = vpop.permute.xlu1 %6473  ;;  %v13120_v17 = vld [vmem:[#allocation35_spill] sm:$0xff] }
 0x9f7   : > { %v6633_v7 = vadd.f32 %v6474_v26, %v6213_v47  ;;  %v6634_v52 = vadd.f32 %v6474_v26, %v6214_v59 }
 0x9f8   : > { %6751 = vst [vmem:[%s10867_s29 + $0x2d0] sm:$0xff] %v6631_v11 }
 0x9f9   : > { %6752 = vst.msk [vmem:[%s10867_s29 + $0x2d8] sm:$0xff] %vm1976_vm0, %v6632_v24 }
 0x9fa   : > { %6753 = vst [vmem:[%s10867_s29 + $0x2e0] sm:$0xff] %v6633_v7  ;;  %6538 = vperm.xlu0 %8030, %v5820_v36  }
 0x9fb   : > { %6754 = vst.msk [vmem:[%s10867_s29 + $0x2e8] sm:$0xff] %vm1976_vm0, %v6634_v52 }
 0x9fd   : > { %v6064_v13 = vpop.permute.xlu2 %6063 }
 0x9fe   : > { %v6069_v40 = vpop.permute.xlu1 %6068  ;;  %v6217_v20 = vmul.f32 %v6064_v13, %v13112_v54  ;;  %v6218_v31 = vmul.f32 %v6064_v13, %v13113_v22 }
 0x9ff   : > { %v6219_v15 = vmul.f32 %v6069_v40, %v13114_v6  ;;  %v6220_v39 = vmul.f32 %v6069_v40, %v13115_v1 }
 0xa05   : > { %v6484_v19 = vpop.permute.xlu2 %6483 }
 0xa06   : > { %v6637_v61 = vadd.f32 %v6484_v19, %v6217_v20  ;;  %v6638_v50 = vadd.f32 %v6484_v19, %v6218_v31  ;;  %v6489_v42 = vpop.permute.xlu1 %6488 }
 0xa07   : > { %v6639_v56 = vadd.f32 %v6489_v42, %v6219_v15  ;;  %v6640_v44 = vadd.f32 %v6489_v42, %v6220_v39 }
 0xa08   : > { %6757 = vst [vmem:[%s10867_s29 + $0x300] sm:$0xff] %v6637_v61 }
 0xa09   : > { %6758 = vst.msk [vmem:[%s10867_s29 + $0x308] sm:$0xff] %vm1976_vm0, %v6638_v50 }
 0xa0a   : > { %6759 = vst [vmem:[%s10867_s29 + $0x310] sm:$0xff] %v6639_v56 }
 0xa0b   : > { %6760 = vst.msk [vmem:[%s10867_s29 + $0x318] sm:$0xff] %vm1976_vm0, %v6640_v44 }
 0xa0d   : > { %v6079_v41 = vpop.permute.xlu2 %6078 }
 0xa0e   : > { %v6084_v35 = vpop.permute.xlu1 %6083  ;;  %v6223_v27 = vmul.f32 %v6079_v41, %v13116_v0  ;;  %v6224_v14 = vmul.f32 %v6079_v41, %v13117_v18 }
 0xa0f   : > { %v6225_v57 = vmul.f32 %v6084_v35, %v13118_v28  ;;  %v6226_v43 = vmul.f32 %v6084_v35, %v13119_v49 }
 0xa13   : > { %v6104_v33 = vpop.permute.xlu0 %6103 }
 0xa14   : > { %v6233_v30 = vmul.f32 %v6104_v33, %v12445_v8  ;;  %v6234_v55 = vmul.f32 %v6104_v33, %v12437_v38  ;;  %v13121_v8 = vld [vmem:[#allocation36_spill] sm:$0xff]  ;;  %v13122_v38 = vld [vmem:[#allocation39_spill] sm:$0xff] }
 0xa15   : > { %v6499_v51 = vpop.permute.xlu2 %6498 }
 0xa16   : > { %v6643_v63 = vadd.f32 %v6499_v51, %v6223_v27  ;;  %v6644_v5 = vadd.f32 %v6499_v51, %v6224_v14  ;;  %v6504_v48 = vpop.permute.xlu1 %6503 }
 0xa17   : > { %v6645_v37 = vadd.f32 %v6504_v48, %v6225_v57  ;;  %v6646_v25 = vadd.f32 %v6504_v48, %v6226_v43 }
 0xa18   : > { %6763 = vst [vmem:[%s10867_s29 + $0x330] sm:$0xff] %v6643_v63 }
 0xa19   : > { %6764 = vst.msk [vmem:[%s10867_s29 + $0x338] sm:$0xff] %vm1976_vm0, %v6644_v5 }
 0xa1a   : > { %6765 = vst [vmem:[%s10867_s29 + $0x340] sm:$0xff] %v6645_v37 }
 0xa1b   : > { %6766 = vst.msk [vmem:[%s10867_s29 + $0x348] sm:$0xff] %vm1976_vm0, %v6646_v25  ;;  %v6524_v53 = vpop.permute.xlu0 %6523 }
 0xa1c   : > { %v6653_v2 = vadd.f32 %v6524_v53, %v6233_v30  ;;  %v6654_v29 = vadd.f32 %v6524_v53, %v6234_v55 }
 0xa1d   : > { %v6094_v60 = vpop.permute.xlu2 %6093 }
 0xa1e   : > { %6773 = vst [vmem:[%s10867_s29 + $0x380] sm:$0xff] %v6653_v2  ;;  %v6099_v34 = vpop.permute.xlu1 %6098  ;;  %v6229_v58 = vmul.f32 %v6094_v60, %v13120_v17  ;;  %v6230_v23 = vmul.f32 %v6094_v60, %v13121_v8 }
 0xa1f   : > { %6774 = vst.msk [vmem:[%s10867_s29 + $0x388] sm:$0xff] %vm1976_vm0, %v6654_v29  ;;  %v6231_v21 = vmul.f32 %v6099_v34, %v13122_v38  ;;  %v6232_v47 = vmul.f32 %v6099_v34, %v13123_v12 }
 0xa25   : > { %v6514_v4 = vpop.permute.xlu2 %6513 }
 0xa26   : > { %v6649_v59 = vadd.f32 %v6514_v4, %v6229_v58  ;;  %v6650_v45 = vadd.f32 %v6514_v4, %v6230_v23  ;;  %v6519_v9 = vpop.permute.xlu1 %6518 }
 0xa27   : > { %v6651_v11 = vadd.f32 %v6519_v9, %v6231_v21  ;;  %v6652_v24 = vadd.f32 %v6519_v9, %v6232_v47 }
 0xa28   : > { %6769 = vst [vmem:[%s10867_s29 + $0x360] sm:$0xff] %v6649_v59 }
 0xa29   : > { %6770 = vst.msk [vmem:[%s10867_s29 + $0x368] sm:$0xff] %vm1976_vm0, %v6650_v45 }
 0xa2a   : > { %6771 = vst [vmem:[%s10867_s29 + $0x370] sm:$0xff] %v6651_v11 }
 0xa2b   : > { %6772 = vst.msk [vmem:[%s10867_s29 + $0x378] sm:$0xff] %vm1976_vm0, %v6652_v24 }
 0xa2d   : > { %v6109_v26 = vpop.permute.xlu2 %6108 }
 0xa2e   : > { %v6235_v7 = vmul.f32 %v6109_v26, %v12408_v10  ;;  %v6236_v52 = vmul.f32 %v6109_v26, %v12403_v46 }
 0xa35   : > { %v6529_v36 = vpop.permute.xlu2 %6528 }
 0xa36   : > { %v6655_v13 = vadd.f32 %v6529_v36, %v6235_v7  ;;  %v6656_v40 = vadd.f32 %v6529_v36, %v6236_v52 }
 0xa38   : > { %6775 = vst [vmem:[%s10867_s29 + $0x390] sm:$0xff] %v6655_v13 }
 0xa39   : > { %6776 = vst.msk [vmem:[%s10867_s29 + $0x398] sm:$0xff] %vm1976_vm0, %v6656_v40 }
 0xa45   : > { %v6114_v54 = vpop.permute.xlu1 %6113 }
 0xa46   : > { %v6237_v20 = vmul.f32 %v6114_v54, %v12489_v16  ;;  %v6238_v22 = vmul.f32 %v6114_v54, %v12486_v3 }
 0xa4d   : > { %v6534_v31 = vpop.permute.xlu1 %6533 }
 0xa4e   : > { %v6657_v6 = vadd.f32 %v6534_v31, %v6237_v20  ;;  %v6658_v15 = vadd.f32 %v6534_v31, %v6238_v22 }
 0xa50   : > { %6777 = vst [vmem:[%s10867_s29 + $0x3a0] sm:$0xff] %v6657_v6 }
 0xa51   : > { %6778 = vst.msk [vmem:[%s10867_s29 + $0x3a8] sm:$0xff] %vm1976_vm0, %v6658_v15 }
 0xa64   : > { %v6119_v46 = vpop.permute.xlu0 %6118 }
 0xa65   : > { %v6239_v10 = vmul.f32 %v6119_v46, %v12532_v32  ;;  %v6240_v1 = vmul.f32 %v6119_v46, %v12524_v62 }
 0xa6c   : > { %v6539_v39 = vpop.permute.xlu0 %6538 }
 0xa6d   : > { %v6659_v19 = vadd.f32 %v6539_v39, %v6239_v10  ;;  %v6660_v61 = vadd.f32 %v6539_v39, %v6240_v1 }
 0xa6f   : > { %6779 = vst [vmem:[%s10867_s29 + $0x3b0] sm:$0xff] %v6659_v19 }
 0xa70   : > { %6780 = vst.msk [vmem:[%s10867_s29 + $0x3b8] sm:$0xff] %vm1976_vm0, %v6660_v61 }
 0xa71 PF: > { %s17_s24 = sadd.s32 1, %s8199_s24  }
 0xa72   : > { %p14_p4 = scmp.ge.s32.totalorder %s17_s24, 4  }
 0xa74   :  { %16 = sbr.rel (!%p14_p4) target bundleno = 1 (0x1), region = 84 }

</bundles_post_ra>
